<compile_context>
chip_gen: v6e
topology: v6e:2x2x1
jax: 0.10.0
libtpu: 0.0.40
codegen_flags: <defaults>
</compile_context>

<pallas_src>
import functools

import jax
import jax.numpy as jnp
from jax.experimental import pallas as pl
from jax.experimental.pallas import tpu as pltpu

EPS = 1e-5          # nn.BatchNorm2d default eps
LEAKY_SLOPE = 0.01  # nn.LeakyReLU default negative_slope

# ------------------------- small runnable DIP config -------------------------
DEPTH = 2
IN_CH = 3
NU = [8, 16]
ND = NU
KU = [3, 3]
KD = KU
NS = [0, 4]
KS = [None, 1]

# ----------------------------- kernel tiling knobs ----------------------------
TM_MAX = 1024                      # rows (sublane axis) per tile; multiple of 8
LANE = 128                         # K and C are padded to multiples of the lane width
VMEM_LIMIT = 32 * 1024 * 1024      # explicit scoped-VMEM limit (safe on v5e/v6e/v7x)


def _round_up(v, m):
    return (v + m - 1) // m * m


def _tiles(m):
    tm = min(TM_MAX, _round_up(m, 8))
    mp = _round_up(m, tm)
    return tm, mp, mp // tm


def _mosaic_params():
    return pltpu.CompilerParams(dimension_semantics=("parallel",),
                                vmem_limit_bytes=VMEM_LIMIT)


# =============================== Pallas kernels ===============================
def _apply_act(y, act):
    if act == "leaky":
        return jnp.where(y >= 0, y, LEAKY_SLOPE * y)
    if act == "sigmoid":
        # numerically-stable sigmoid; the divide goes to the EUP via approx reciprocal
        z = jnp.exp(-jnp.abs(y))
        r = pl.reciprocal(1.0 + z, approx=True)
        s = jnp.where(y >= 0, r, z * r)
        return jnp.clip(s, 0.0, 1.0)   # guard approx-reciprocal overshoot
    return y


def _matmul_stats_kernel(x_ref, w_ref, b_ref, y_ref, stats_ref, *, m_real, tm):
    """Pass 1: y = x @ w + b (bf16 MXU, f32 acc) + masked per-tile BN partials."""
    y = jnp.dot(x_ref[...], w_ref[...], preferred_element_type=jnp.float32)
    y = y + b_ref[...]
    y_ref[...] = y
    # rows beyond the real M (padding rows) must not contribute to the statistics
    row = jax.lax.broadcasted_iota(jnp.int32, (tm, 1), 0) + pl.program_id(0) * tm
    mask = (row < m_real).astype(jnp.float32)
    ym = y * mask
    ssum = jnp.sum(ym, axis=0, keepdims=True)        # (1, Cp)
    ssq = jnp.sum(ym * y, axis=0, keepdims=True)     # (1, Cp)  sum(y^2) over valid rows
    rowid = jax.lax.broadcasted_iota(jnp.int32, (8, ssum.shape[1]), 0)
    stats = (jnp.where(rowid == 0, ssum, 0.0) +
             jnp.where(rowid == 1, ssq, 0.0))        # row0=sum, row1=sumsq, rest 0
    stats_ref[...] = stats[None]


def _matmul_act_kernel(x_ref, w_ref, b_ref, o_ref, *, act):
    """Fused matmul + bias + activation (used when no BatchNorm follows)."""
    y = jnp.dot(x_ref[...], w_ref[...], preferred_element_type=jnp.float32)
    o_ref[...] = _apply_act(y + b_ref[...], act)


def _affine_act_kernel(y_ref, sc_ref, sh_ref, o_ref, *, act):
    """Pass 2: BN affine (scale/shift precomputed from batch stats) + activation."""
    o_ref[...] = _apply_act(y_ref[...] * sc_ref[...] + sh_ref[...], act)


# ============================ pallas_call wrappers =============================
def _conv_matmul_pass(patches, w2d, bias, *, compute_stats, act="none"):
    """Tiled (M, K) @ (K, C) + bias with lane-padded K/C and bf16 MXU operands."""
    m, k = patches.shape
    k2, c = w2d.shape
    assert k == k2
    kp = _round_up(k, LANE)
    cp = _round_up(c, LANE)
    tm, mp, gm = _tiles(m)

    xp = jnp.pad(patches.astype(jnp.bfloat16), ((0, mp - m), (0, kp - k)))
    wp = jnp.pad(w2d.astype(jnp.bfloat16), ((0, kp - k), (0, cp - c)))
    bp = jnp.pad(bias.astype(jnp.float32).reshape(1, c), ((0, 0), (0, cp - c)))

    in_specs = [
        pl.BlockSpec((tm, kp), lambda i: (i, 0)),   # patches: pipelined over M tiles
        pl.BlockSpec((kp, cp), lambda i: (0, 0)),   # weight: resident across the grid
        pl.BlockSpec((1, cp), lambda i: (0, 0)),    # bias: resident
    ]
    flops = 2 * mp * kp * cp

    if compute_stats:
        kern = functools.partial(_matmul_stats_kernel, m_real=m, tm=tm)
        out_shape = (jax.ShapeDtypeStruct((mp, cp), jnp.float32),
                     jax.ShapeDtypeStruct((gm, 8, cp), jnp.float32))
        out_specs = (pl.BlockSpec((tm, cp), lambda i: (i, 0)),
                     pl.BlockSpec((1, 8, cp), lambda i: (i, 0, 0)))
        cost = pl.CostEstimate(
            flops=flops, transcendentals=0,
            bytes_accessed=2 * mp * kp + 2 * kp * cp + 4 * cp
                           + 4 * mp * cp + 4 * gm * 8 * cp)
        y, stats = pl.pallas_call(
            kern, out_shape=out_shape, grid=(gm,), in_specs=in_specs,
            out_specs=out_specs, compiler_params=_mosaic_params(),
            cost_estimate=cost)(xp, wp, bp)
        return y, stats, (m, c, cp)

    kern = functools.partial(_matmul_act_kernel, act=act)
    cost = pl.CostEstimate(
        flops=flops,
        transcendentals=mp * cp if act == "sigmoid" else 0,
        bytes_accessed=2 * mp * kp + 2 * kp * cp + 4 * cp + 4 * mp * cp)
    y = pl.pallas_call(
        kern, out_shape=jax.ShapeDtypeStruct((mp, cp), jnp.float32),
        grid=(gm,), in_specs=in_specs,
        out_specs=pl.BlockSpec((tm, cp), lambda i: (i, 0)),
        compiler_params=_mosaic_params(), cost_estimate=cost)(xp, wp, bp)
    return y, None, (m, c, cp)


def _affine_act_pass(y_pre, scale, shift, *, act):
    mp, cp = y_pre.shape
    tm = min(TM_MAX, mp)
    gm = mp // tm
    cost = pl.CostEstimate(flops=2 * mp * cp, transcendentals=0,
                           bytes_accessed=8 * mp * cp + 8 * cp)
    return pl.pallas_call(
        functools.partial(_affine_act_kernel, act=act),
        out_shape=jax.ShapeDtypeStruct((mp, cp), jnp.float32),
        grid=(gm,),
        in_specs=[pl.BlockSpec((tm, cp), lambda i: (i, 0)),
                  pl.BlockSpec((1, cp), lambda i: (0, 0)),
                  pl.BlockSpec((1, cp), lambda i: (0, 0))],
        out_specs=pl.BlockSpec((tm, cp), lambda i: (i, 0)),
        compiler_params=_mosaic_params(), cost_estimate=cost)(y_pre, scale, shift)


# ================================= JAX glue ==================================
def reflect_pad1(x):  # NHWC equivalent of nn.ReflectionPad2d(1)
    return jnp.pad(x, ((0, 0), (1, 1), (1, 1), (0, 0)), mode="reflect")


def im2col(x, kh, kw, stride):
    """NHWC -> (N*OH*OW, kh*kw*Cin) patches in bf16, tap-major / channel-minor."""
    # TODO(synk): the kh*kw tap expansion is still materialized in HBM (bf16 to halve
    # the traffic); folding the taps into the matmul kernel would need element-offset /
    # strided BlockSpecs, which is not done here.
    n, h, w, c = x.shape
    oh = (h - kh) // stride + 1
    ow = (w - kw) // stride + 1
    xb = x.astype(jnp.bfloat16)
    cols = []
    for i in range(kh):
        for j in range(kw):
            cols.append(xb[:, i:i + stride * oh:stride, j:j + stride * ow:stride, :])
    p = jnp.stack(cols, axis=3)                      # (N, OH, OW, kh*kw, C)
    return p.reshape(n * oh * ow, kh * kw * c), oh, ow


def _w2d(w):
    cout, cin, kh, kw = w.shape
    return jnp.transpose(w, (2, 3, 1, 0)).reshape(kh * kw * cin, cout)


def conv2d_bn_act(x, w, b, gamma, beta, *, stride=1, act="leaky"):
    """valid conv (PyTorch weight layout) + BatchNorm(batch stats) + activation, NHWC."""
    cout = w.shape[0]
    n = x.shape[0]
    patches, oh, ow = im2col(x, w.shape[2], w.shape[3], stride)
    y_pre, stats, (m, c, cp) = _conv_matmul_pass(patches, _w2d(w), b, compute_stats=True)
    ssum = jnp.sum(stats[:, 0, :], axis=0)
    ssq = jnp.sum(stats[:, 1, :], axis=0)
    mean = ssum / m
    var = jnp.maximum(ssq / m - mean * mean, 0.0)    # biased variance (training-mode BN)
    gp = jnp.pad(gamma.astype(jnp.float32), (0, cp - c))
    bpad = jnp.pad(beta.astype(jnp.float32), (0, cp - c))
    scale = gp * jax.lax.rsqrt(var + EPS)
    shift = bpad - mean * scale
    y = _affine_act_pass(y_pre, scale.reshape(1, cp), shift.reshape(1, cp), act=act)
    return y[:m, :cout].reshape(n, oh, ow, cout)


def conv2d_act(x, w, b, *, stride=1, act="none"):
    """valid conv + activation, no BatchNorm (final conv + sigmoid)."""
    cout = w.shape[0]
    n = x.shape[0]
    patches, oh, ow = im2col(x, w.shape[2], w.shape[3], stride)
    y, _, (m, _, _) = _conv_matmul_pass(patches, _w2d(w), b, compute_stats=False, act=act)
    return y[:m, :cout].reshape(n, oh, ow, cout)


def bilinear_up2(x):
    """F.interpolate(scale_factor=2, mode='bilinear', align_corners=False), NHWC."""
    # TODO(synk): gather-based bilinear resampling kept in plain JAX (not a matmul /
    # reduction hot path).
    n, h, w, c = x.shape

    def idx_lam(size):
        d = jnp.arange(2 * size, dtype=jnp.float32)
        s = jnp.maximum((d + 0.5) / 2.0 - 0.5, 0.0)
        i0 = jnp.minimum(jnp.floor(s).astype(jnp.int32), size - 1)
        i1 = jnp.minimum(i0 + 1, size - 1)
        lam = s - i0.astype(jnp.float32)
        return i0, i1, lam

    h0, h1, lh = idx_lam(h)
    w0, w1, lw = idx_lam(w)
    lh_ = lh[None, :, None, None]
    lw_ = lw[None, None, :, None]
    top = x[:, h0, :, :] * (1.0 - lh_) + x[:, h1, :, :] * lh_
    return top[:, :, w0, :] * (1.0 - lw_) + top[:, :, w1, :] * lw_


# ============================== DIP sub-modules ==============================
def downsample_fwd(x, p):
    x = reflect_pad1(x)
    x = conv2d_bn_act(x, p["w1"], p["b1"], p["g1"], p["be1"], stride=2, act="leaky")
    x = conv2d_bn_act(x, p["w2"], p["b2"], p["g2"], p["be2"], stride=1, act="leaky")
    return x


def skip_fwd(x, p):
    return conv2d_bn_act(x, p["w"], p["b"], p["g"], p["be"], stride=1, act="leaky")


def upsample_fwd(x, p):
    # Fold the leading BatchNorm (batch statistics) into conv1's weights/bias:
    # the per-channel affine commutes with reflection padding, so
    #   conv1(pad(BN(x))) == conv1'(pad(x)) with w1' = w1 * s[cin], b1' = b1 + sum(w1)·t
    mean = jnp.mean(x, axis=(0, 1, 2))
    var = jnp.var(x, axis=(0, 1, 2))                 # biased, matches training-mode BN
    s = p["g1"] * jax.lax.rsqrt(var + EPS)
    t = p["be1"] - mean * s
    w1f = p["w1"] * s[None, :, None, None]
    b1f = p["b1"] + jnp.einsum("oihw,i->o", p["w1"], t)
    x = reflect_pad1(x)
    x = conv2d_bn_act(x, w1f, b1f, p["g2"], p["be2"], stride=1, act="leaky")
    x = conv2d_bn_act(x, p["w2"], p["b2"], p["g3"], p["be3"], stride=1, act="leaky")
    return bilinear_up2(x)


@jax.jit
def dip_forward(params, x_nchw):
    x = jnp.transpose(x_nchw, (0, 2, 3, 1))          # NCHW -> NHWC (once)
    s = []
    nskip = 0
    for i in range(DEPTH):
        x = downsample_fwd(x, params["downs"][i])
        if KS[i] is not None:
            s.append(skip_fwd(x, params["skips"][nskip]))
            nskip += 1
    for i in range(DEPTH):
        lvl = DEPTH - i - 1
        if i == 0 and KS[lvl] is not None:
            x = upsample_fwd(s[-1], params["ups"][i])
        elif i != 0 and KS[lvl] is not None:
            x = upsample_fwd(jnp.concatenate([x, s[lvl]], axis=-1), params["ups"][i])
        elif i != 0 and KS[lvl] is None:
            x = upsample_fwd(x, params["ups"][i])
        # else: pass (same as PyTorch)
    x = conv2d_act(x, params["out_w"], params["out_b"], act="sigmoid")
    return jnp.transpose(x, (0, 3, 1, 2))            # back to NCHW


# =========================== deterministic parameters ===========================
def build_params(key):
    keys = iter(jax.random.split(key, 128))

    def conv_init(cout, cin, k):
        fan_in = cin * k * k
        w = jax.random.normal(next(keys), (cout, cin, k, k), jnp.float32) / jnp.sqrt(fan_in)
        b = 0.05 * jax.random.normal(next(keys), (cout,), jnp.float32)
        return w, b

    def bn_init(c):
        g = 1.0 + 0.1 * jax.random.normal(next(keys), (c,), jnp.float32)
        be = 0.1 * jax.random.normal(next(keys), (c,), jnp.float32)
        return g, be

    downs = []
    for i in range(DEPTH):
        cin = IN_CH if i == 0 else ND[i - 1]
        w1, b1 = conv_init(ND[i], cin, KD[i])
        g1, be1 = bn_init(ND[i])
        w2, b2 = conv_init(ND[i], ND[i], KD[i])
        g2, be2 = bn_init(ND[i])
        downs.append(dict(w1=w1, b1=b1, g1=g1, be1=be1,
                          w2=w2, b2=b2, g2=g2, be2=be2))

    skips = []
    for i in range(DEPTH):
        if KS[i] is not None:
            w, b = conv_init(NS[i], ND[i], KS[i])
            g, be = bn_init(NS[i])
            skips.append(dict(w=w, b=b, g=g, be=be))

    ups = []
    for i in range(DEPTH - 1, -1, -1):
        cin = NS[i] if i == DEPTH - 1 else NU[i + 1] + NS[i]
        g1, be1 = bn_init(cin)
        w1, b1 = conv_init(NU[i], cin, KU[i])
        g2, be2 = bn_init(NU[i])
        w2, b2 = conv_init(NU[i], NU[i], KU[i])
        g3, be3 = bn_init(NU[i])
        ups.append(dict(g1=g1, be1=be1, w1=w1, b1=b1, g2=g2, be2=be2,
                        w2=w2, b2=b2, g3=g3, be3=be3))

    out_w, out_b = conv_init(IN_CH, NU[0], 1)
    return dict(downs=downs, skips=skips, ups=ups, out_w=out_w, out_b=out_b)


# ==================================== main ====================================
if __name__ == "__main__":
    key = jax.random.PRNGKey(0)
    pkey, xkey = jax.random.split(key)
    params = build_params(pkey)

    # small input consistent with the module: NCHW, batch=2, 3 channels, 32x32
    x = jax.random.normal(xkey, (2, IN_CH, 32, 32), jnp.float32)

    y = dip_forward(params, x)
    y = jax.block_until_ready(y)

    assert y.shape == (2, IN_CH, 8, 8), y.shape
    assert bool(jnp.all(jnp.isfinite(y)))
    assert bool(jnp.all((y >= 0.0) & (y <= 1.0)))  # sigmoid output range
    print("KERNEL_OK")
</pallas_src>

<mosaic_0001>
module attributes {stable_mosaic.version = 11 : i64} {
  func.func @_matmul_stats_kernel(%arg0: i32, %arg1: memref<512x128xbf16, #tpu.memory_space<vmem>>, %arg2: memref<128x128xbf16, #tpu.memory_space<vmem>>, %arg3: memref<1x128xf32, #tpu.memory_space<vmem>>, %arg4: memref<512x128xf32, #tpu.memory_space<vmem>>, %arg5: memref<1x8x128xf32, #tpu.memory_space<vmem>>) attributes {dimension_semantics = [#tpu.dimension_semantics<parallel>], iteration_bounds = array<i64: 1>, scalar_prefetch = 0 : i64, scratch_operands = 0 : i64, tpu.core_type = #tpu.core_type<tc>, window_params = [{transform_indices = @transform_0, window_bounds = array<i64: 512, 128>}, {pipeline_mode = #tpu.pipeline_mode<synchronous>, transform_indices = @transform_1, window_bounds = array<i64: 128, 128>}, {pipeline_mode = #tpu.pipeline_mode<synchronous>, transform_indices = @transform_2, window_bounds = array<i64: 1, 128>}, {transform_indices = @transform_3, window_bounds = array<i64: 512, 128>}, {transform_indices = @transform_4, window_bounds = array<i64: 1, 8, 128>}]} {
    %c0 = arith.constant 0 : index
    %c0_0 = arith.constant 0 : index
    %0 = vector.load %arg1[%c0, %c0_0] : memref<512x128xbf16, #tpu.memory_space<vmem>>, vector<512x128xbf16>
    %c0_1 = arith.constant 0 : index
    %c0_2 = arith.constant 0 : index
    %1 = vector.load %arg2[%c0_1, %c0_2] : memref<128x128xbf16, #tpu.memory_space<vmem>>, vector<128x128xbf16>
    %cst = arith.constant dense<0.000000e+00> : vector<512x128xf32>
    %2 = tpu.matmul %0, %1, %cst {dimension_numbers = #tpu.dot_dimension_numbers<[1], [0], [0], [1], [0, 0, 1, 1], [], []>} : vector<512x128xbf16>, vector<128x128xbf16>, vector<512x128xf32> -> vector<512x128xf32>
    %c0_3 = arith.constant 0 : index
    %c0_4 = arith.constant 0 : index
    %3 = vector.load %arg3[%c0_3, %c0_4] : memref<1x128xf32, #tpu.memory_space<vmem>>, vector<1x128xf32>
    %4 = vector.broadcast %3 : vector<1x128xf32> to vector<512x128xf32>
    %5 = arith.addf %2, %4 : vector<512x128xf32>
    %c0_5 = arith.constant 0 : index
    %c0_6 = arith.constant 0 : index
    %6 = vector.load %arg4[%c0_5, %c0_6] : memref<512x128xf32, #tpu.memory_space<vmem>>, vector<512x128xf32>
    tpu.vector_store %arg4[%c0_5, %c0_6], %5 {strides = array<i32>} : memref<512x128xf32, #tpu.memory_space<vmem>>, vector<512x128xf32>,
    %7 = tpu.iota {dimensions = array<i32: 0>} : vector<512x1xi32>
    %c512_i32 = arith.constant 512 : i32
    %8 = arith.muli %arg0, %c512_i32 : i32
    %9 = vector.broadcast %8 : i32 to vector<512x1xi32>
    %10 = arith.addi %7, %9 : vector<512x1xi32>
    %c512_i32_7 = arith.constant 512 : i32
    %11 = vector.broadcast %c512_i32_7 : i32 to vector<512x1xi32>
    %12 = arith.cmpi slt, %10, %11 : vector<512x1xi32>
    %13 = arith.extui %12 : vector<512x1xi1> to vector<512x1xi32>
    %14 = arith.sitofp %13 : vector<512x1xi32> to vector<512x1xf32>
    %15 = vector.broadcast %14 : vector<512x1xf32> to vector<512x128xf32>
    %16 = arith.mulf %5, %15 : vector<512x128xf32>
    %cst_8 = arith.constant dense<0.000000e+00> : vector<128xf32>
    %17 = vector.multi_reduction <add>, %16, %cst_8 [0] : vector<512x128xf32> to vector<128xf32>
    %18 = vector.shape_cast %17 : vector<128xf32> to vector<1x128xf32>
    %19 = arith.mulf %16, %5 : vector<512x128xf32>
    %cst_9 = arith.constant dense<0.000000e+00> : vector<128xf32>
    %20 = vector.multi_reduction <add>, %19, %cst_9 [0] : vector<512x128xf32> to vector<128xf32>
    %21 = vector.shape_cast %20 : vector<128xf32> to vector<1x128xf32>
    %22 = tpu.iota {dimensions = array<i32: 0>} : vector<8x128xi32>
    %c0_i32 = arith.constant 0 : i32
    %23 = vector.broadcast %c0_i32 : i32 to vector<8x128xi32>
    %24 = arith.cmpi eq, %22, %23 : vector<8x128xi32>
    %cst_10 = arith.constant 0.000000e+00 : f32
    %25 = vector.shape_cast %18 : vector<1x128xf32> to vector<1x128xf32>
    %26 = vector.broadcast %25 : vector<1x128xf32> to vector<8x128xf32>
    %27 = vector.broadcast %cst_10 : f32 to vector<8x128xf32>
    %28 = arith.select %24, %26, %27 : vector<8x128xi1>, vector<8x128xf32>
    %c1_i32 = arith.constant 1 : i32
    %29 = vector.broadcast %c1_i32 : i32 to vector<8x128xi32>
    %30 = arith.cmpi eq, %22, %29 : vector<8x128xi32>
    %cst_11 = arith.constant 0.000000e+00 : f32
    %31 = vector.shape_cast %21 : vector<1x128xf32> to vector<1x128xf32>
    %32 = vector.broadcast %31 : vector<1x128xf32> to vector<8x128xf32>
    %33 = vector.broadcast %cst_11 : f32 to vector<8x128xf32>
    %34 = arith.select %30, %32, %33 : vector<8x128xi1>, vector<8x128xf32>
    %35 = arith.addf %28, %34 : vector<8x128xf32>
    %36 = vector.shape_cast %35 : vector<8x128xf32> to vector<1x8x128xf32>
    %c0_12 = arith.constant 0 : index
    %c0_13 = arith.constant 0 : index
    %c0_14 = arith.constant 0 : index
    %37 = vector.load %arg5[%c0_12, %c0_13, %c0_14] : memref<1x8x128xf32, #tpu.memory_space<vmem>>, vector<1x8x128xf32>
    tpu.vector_store %arg5[%c0_12, %c0_13, %c0_14], %36 {strides = array<i32>} : memref<1x8x128xf32, #tpu.memory_space<vmem>>, vector<1x8x128xf32>,
    return
  }
  func.func @transform_0(%arg0: i32) -> (i32, i32) {
    %c0_i32 = arith.constant 0 : i32
    %c0_i32_0 = arith.constant 0 : i32
    return %arg0, %c0_i32 : i32, i32
  }
  func.func @transform_1(%arg0: i32) -> (i32, i32) {
    %c0_i32 = arith.constant 0 : i32
    %c0_i32_0 = arith.constant 0 : i32
    %c0_i32_1 = arith.constant 0 : i32
    return %c0_i32, %c0_i32_0 : i32, i32
  }
  func.func @transform_2(%arg0: i32) -> (i32, i32) {
    %c0_i32 = arith.constant 0 : i32
    %c0_i32_0 = arith.constant 0 : i32
    %c0_i32_1 = arith.constant 0 : i32
    return %c0_i32, %c0_i32_0 : i32, i32
  }
  func.func @transform_3(%arg0: i32) -> (i32, i32) {
    %c0_i32 = arith.constant 0 : i32
    %c0_i32_0 = arith.constant 0 : i32
    return %arg0, %c0_i32 : i32, i32
  }
  func.func @transform_4(%arg0: i32) -> (i32, i32, i32) {
    %c0_i32 = arith.constant 0 : i32
    %c0_i32_0 = arith.constant 0 : i32
    %c0_i32_1 = arith.constant 0 : i32
    return %arg0, %c0_i32, %c0_i32_0 : i32, i32, i32
  }
}

module attributes {stable_mosaic.version = 11 : i64} {
  func.func @_affine_act_kernel(%arg0: i32, %arg1: memref<512x128xf32, #tpu.memory_space<vmem>>, %arg2: memref<1x128xf32, #tpu.memory_space<vmem>>, %arg3: memref<1x128xf32, #tpu.memory_space<vmem>>, %arg4: memref<512x128xf32, #tpu.memory_space<vmem>>) attributes {dimension_semantics = [#tpu.dimension_semantics<parallel>], iteration_bounds = array<i64: 1>, scalar_prefetch = 0 : i64, scratch_operands = 0 : i64, tpu.core_type = #tpu.core_type<tc>, window_params = [{transform_indices = @transform_0, window_bounds = array<i64: 512, 128>}, {pipeline_mode = #tpu.pipeline_mode<synchronous>, transform_indices = @transform_1, window_bounds = array<i64: 1, 128>}, {pipeline_mode = #tpu.pipeline_mode<synchronous>, transform_indices = @transform_2, window_bounds = array<i64: 1, 128>}, {transform_indices = @transform_3, window_bounds = array<i64: 512, 128>}]} {
    %c0 = arith.constant 0 : index
    %c0_0 = arith.constant 0 : index
    %0 = vector.load %arg1[%c0, %c0_0] : memref<512x128xf32, #tpu.memory_space<vmem>>, vector<512x128xf32>
    %c0_1 = arith.constant 0 : index
    %c0_2 = arith.constant 0 : index
    %1 = vector.load %arg2[%c0_1, %c0_2] : memref<1x128xf32, #tpu.memory_space<vmem>>, vector<1x128xf32>
    %2 = vector.broadcast %1 : vector<1x128xf32> to vector<512x128xf32>
    %3 = arith.mulf %0, %2 : vector<512x128xf32>
    %c0_3 = arith.constant 0 : index
    %c0_4 = arith.constant 0 : index
    %4 = vector.load %arg3[%c0_3, %c0_4] : memref<1x128xf32, #tpu.memory_space<vmem>>, vector<1x128xf32>
    %5 = vector.broadcast %4 : vector<1x128xf32> to vector<512x128xf32>
    %6 = arith.addf %3, %5 : vector<512x128xf32>
    %cst = arith.constant 0.000000e+00 : f32
    %7 = vector.broadcast %cst : f32 to vector<512x128xf32>
    %8 = arith.cmpf oge, %6, %7 : vector<512x128xf32>
    %cst_5 = arith.constant 0.00999999977 : f32
    %9 = vector.broadcast %cst_5 : f32 to vector<512x128xf32>
    %10 = arith.mulf %9, %6 : vector<512x128xf32>
    %11 = arith.select %8, %6, %10 : vector<512x128xi1>, vector<512x128xf32>
    %c0_6 = arith.constant 0 : index
    %c0_7 = arith.constant 0 : index
    %12 = vector.load %arg4[%c0_6, %c0_7] : memref<512x128xf32, #tpu.memory_space<vmem>>, vector<512x128xf32>
    tpu.vector_store %arg4[%c0_6, %c0_7], %11 {strides = array<i32>} : memref<512x128xf32, #tpu.memory_space<vmem>>, vector<512x128xf32>,
    return
  }
  func.func @transform_0(%arg0: i32) -> (i32, i32) {
    %c0_i32 = arith.constant 0 : i32
    %c0_i32_0 = arith.constant 0 : i32
    return %arg0, %c0_i32 : i32, i32
  }
  func.func @transform_1(%arg0: i32) -> (i32, i32) {
    %c0_i32 = arith.constant 0 : i32
    %c0_i32_0 = arith.constant 0 : i32
    %c0_i32_1 = arith.constant 0 : i32
    return %c0_i32, %c0_i32_0 : i32, i32
  }
  func.func @transform_2(%arg0: i32) -> (i32, i32) {
    %c0_i32 = arith.constant 0 : i32
    %c0_i32_0 = arith.constant 0 : i32
    %c0_i32_1 = arith.constant 0 : i32
    return %c0_i32, %c0_i32_0 : i32, i32
  }
  func.func @transform_3(%arg0: i32) -> (i32, i32) {
    %c0_i32 = arith.constant 0 : i32
    %c0_i32_0 = arith.constant 0 : i32
    return %arg0, %c0_i32 : i32, i32
  }
}

module attributes {stable_mosaic.version = 11 : i64} {
  func.func @_matmul_stats_kernel(%arg0: i32, %arg1: memref<392x128xbf16, #tpu.memory_space<vmem>>, %arg2: memref<128x128xbf16, #tpu.memory_space<vmem>>, %arg3: memref<1x128xf32, #tpu.memory_space<vmem>>, %arg4: memref<392x128xf32, #tpu.memory_space<vmem>>, %arg5: memref<1x8x128xf32, #tpu.memory_space<vmem>>) attributes {dimension_semantics = [#tpu.dimension_semantics<parallel>], iteration_bounds = array<i64: 1>, scalar_prefetch = 0 : i64, scratch_operands = 0 : i64, tpu.core_type = #tpu.core_type<tc>, window_params = [{transform_indices = @transform_0, window_bounds = array<i64: 392, 128>}, {pipeline_mode = #tpu.pipeline_mode<synchronous>, transform_indices = @transform_1, window_bounds = array<i64: 128, 128>}, {pipeline_mode = #tpu.pipeline_mode<synchronous>, transform_indices = @transform_2, window_bounds = array<i64: 1, 128>}, {transform_indices = @transform_3, window_bounds = array<i64: 392, 128>}, {transform_indices = @transform_4, window_bounds = array<i64: 1, 8, 128>}]} {
    %c0 = arith.constant 0 : index
    %c0_0 = arith.constant 0 : index
    %0 = vector.load %arg1[%c0, %c0_0] : memref<392x128xbf16, #tpu.memory_space<vmem>>, vector<392x128xbf16>
    %c0_1 = arith.constant 0 : index
    %c0_2 = arith.constant 0 : index
    %1 = vector.load %arg2[%c0_1, %c0_2] : memref<128x128xbf16, #tpu.memory_space<vmem>>, vector<128x128xbf16>
    %cst = arith.constant dense<0.000000e+00> : vector<392x128xf32>
    %2 = tpu.matmul %0, %1, %cst {dimension_numbers = #tpu.dot_dimension_numbers<[1], [0], [0], [1], [0, 0, 1, 1], [], []>} : vector<392x128xbf16>, vector<128x128xbf16>, vector<392x128xf32> -> vector<392x128xf32>
    %c0_3 = arith.constant 0 : index
    %c0_4 = arith.constant 0 : index
    %3 = vector.load %arg3[%c0_3, %c0_4] : memref<1x128xf32, #tpu.memory_space<vmem>>, vector<1x128xf32>
    %4 = vector.broadcast %3 : vector<1x128xf32> to vector<392x128xf32>
    %5 = arith.addf %2, %4 : vector<392x128xf32>
    %c0_5 = arith.constant 0 : index
    %c0_6 = arith.constant 0 : index
    %6 = vector.load %arg4[%c0_5, %c0_6] : memref<392x128xf32, #tpu.memory_space<vmem>>, vector<392x128xf32>
    tpu.vector_store %arg4[%c0_5, %c0_6], %5 {strides = array<i32>} : memref<392x128xf32, #tpu.memory_space<vmem>>, vector<392x128xf32>,
    %7 = tpu.iota {dimensions = array<i32: 0>} : vector<392x1xi32>
    %c392_i32 = arith.constant 392 : i32
    %8 = arith.muli %arg0, %c392_i32 : i32
    %9 = vector.broadcast %8 : i32 to vector<392x1xi32>
    %10 = arith.addi %7, %9 : vector<392x1xi32>
    %c392_i32_7 = arith.constant 392 : i32
    %11 = vector.broadcast %c392_i32_7 : i32 to vector<392x1xi32>
    %12 = arith.cmpi slt, %10, %11 : vector<392x1xi32>
    %13 = arith.extui %12 : vector<392x1xi1> to vector<392x1xi32>
    %14 = arith.sitofp %13 : vector<392x1xi32> to vector<392x1xf32>
    %15 = vector.broadcast %14 : vector<392x1xf32> to vector<392x128xf32>
    %16 = arith.mulf %5, %15 : vector<392x128xf32>
    %cst_8 = arith.constant dense<0.000000e+00> : vector<128xf32>
    %17 = vector.multi_reduction <add>, %16, %cst_8 [0] : vector<392x128xf32> to vector<128xf32>
    %18 = vector.shape_cast %17 : vector<128xf32> to vector<1x128xf32>
    %19 = arith.mulf %16, %5 : vector<392x128xf32>
    %cst_9 = arith.constant dense<0.000000e+00> : vector<128xf32>
    %20 = vector.multi_reduction <add>, %19, %cst_9 [0] : vector<392x128xf32> to vector<128xf32>
    %21 = vector.shape_cast %20 : vector<128xf32> to vector<1x128xf32>
    %22 = tpu.iota {dimensions = array<i32: 0>} : vector<8x128xi32>
    %c0_i32 = arith.constant 0 : i32
    %23 = vector.broadcast %c0_i32 : i32 to vector<8x128xi32>
    %24 = arith.cmpi eq, %22, %23 : vector<8x128xi32>
    %cst_10 = arith.constant 0.000000e+00 : f32
    %25 = vector.shape_cast %18 : vector<1x128xf32> to vector<1x128xf32>
    %26 = vector.broadcast %25 : vector<1x128xf32> to vector<8x128xf32>
    %27 = vector.broadcast %cst_10 : f32 to vector<8x128xf32>
    %28 = arith.select %24, %26, %27 : vector<8x128xi1>, vector<8x128xf32>
    %c1_i32 = arith.constant 1 : i32
    %29 = vector.broadcast %c1_i32 : i32 to vector<8x128xi32>
    %30 = arith.cmpi eq, %22, %29 : vector<8x128xi32>
    %cst_11 = arith.constant 0.000000e+00 : f32
    %31 = vector.shape_cast %21 : vector<1x128xf32> to vector<1x128xf32>
    %32 = vector.broadcast %31 : vector<1x128xf32> to vector<8x128xf32>
    %33 = vector.broadcast %cst_11 : f32 to vector<8x128xf32>
    %34 = arith.select %30, %32, %33 : vector<8x128xi1>, vector<8x128xf32>
    %35 = arith.addf %28, %34 : vector<8x128xf32>
    %36 = vector.shape_cast %35 : vector<8x128xf32> to vector<1x8x128xf32>
    %c0_12 = arith.constant 0 : index
    %c0_13 = arith.constant 0 : index
    %c0_14 = arith.constant 0 : index
    %37 = vector.load %arg5[%c0_12, %c0_13, %c0_14] : memref<1x8x128xf32, #tpu.memory_space<vmem>>, vector<1x8x128xf32>
    tpu.vector_store %arg5[%c0_12, %c0_13, %c0_14], %36 {strides = array<i32>} : memref<1x8x128xf32, #tpu.memory_space<vmem>>, vector<1x8x128xf32>,
    return
  }
  func.func @transform_0(%arg0: i32) -> (i32, i32) {
    %c0_i32 = arith.constant 0 : i32
    %c0_i32_0 = arith.constant 0 : i32
    return %arg0, %c0_i32 : i32, i32
  }
  func.func @transform_1(%arg0: i32) -> (i32, i32) {
    %c0_i32 = arith.constant 0 : i32
    %c0_i32_0 = arith.constant 0 : i32
    %c0_i32_1 = arith.constant 0 : i32
    return %c0_i32, %c0_i32_0 : i32, i32
  }
  func.func @transform_2(%arg0: i32) -> (i32, i32) {
    %c0_i32 = arith.constant 0 : i32
    %c0_i32_0 = arith.constant 0 : i32
    %c0_i32_1 = arith.constant 0 : i32
    return %c0_i32, %c0_i32_0 : i32, i32
  }
  func.func @transform_3(%arg0: i32) -> (i32, i32) {
    %c0_i32 = arith.constant 0 : i32
    %c0_i32_0 = arith.constant 0 : i32
    return %arg0, %c0_i32 : i32, i32
  }
  func.func @transform_4(%arg0: i32) -> (i32, i32, i32) {
    %c0_i32 = arith.constant 0 : i32
    %c0_i32_0 = arith.constant 0 : i32
    %c0_i32_1 = arith.constant 0 : i32
    return %arg0, %c0_i32, %c0_i32_0 : i32, i32, i32
  }
}

module attributes {stable_mosaic.version = 11 : i64} {
  func.func @_affine_act_kernel(%arg0: i32, %arg1: memref<392x128xf32, #tpu.memory_space<vmem>>, %arg2: memref<1x128xf32, #tpu.memory_space<vmem>>, %arg3: memref<1x128xf32, #tpu.memory_space<vmem>>, %arg4: memref<392x128xf32, #tpu.memory_space<vmem>>) attributes {dimension_semantics = [#tpu.dimension_semantics<parallel>], iteration_bounds = array<i64: 1>, scalar_prefetch = 0 : i64, scratch_operands = 0 : i64, tpu.core_type = #tpu.core_type<tc>, window_params = [{transform_indices = @transform_0, window_bounds = array<i64: 392, 128>}, {pipeline_mode = #tpu.pipeline_mode<synchronous>, transform_indices = @transform_1, window_bounds = array<i64: 1, 128>}, {pipeline_mode = #tpu.pipeline_mode<synchronous>, transform_indices = @transform_2, window_bounds = array<i64: 1, 128>}, {transform_indices = @transform_3, window_bounds = array<i64: 392, 128>}]} {
    %c0 = arith.constant 0 : index
    %c0_0 = arith.constant 0 : index
    %0 = vector.load %arg1[%c0, %c0_0] : memref<392x128xf32, #tpu.memory_space<vmem>>, vector<392x128xf32>
    %c0_1 = arith.constant 0 : index
    %c0_2 = arith.constant 0 : index
    %1 = vector.load %arg2[%c0_1, %c0_2] : memref<1x128xf32, #tpu.memory_space<vmem>>, vector<1x128xf32>
    %2 = vector.broadcast %1 : vector<1x128xf32> to vector<392x128xf32>
    %3 = arith.mulf %0, %2 : vector<392x128xf32>
    %c0_3 = arith.constant 0 : index
    %c0_4 = arith.constant 0 : index
    %4 = vector.load %arg3[%c0_3, %c0_4] : memref<1x128xf32, #tpu.memory_space<vmem>>, vector<1x128xf32>
    %5 = vector.broadcast %4 : vector<1x128xf32> to vector<392x128xf32>
    %6 = arith.addf %3, %5 : vector<392x128xf32>
    %cst = arith.constant 0.000000e+00 : f32
    %7 = vector.broadcast %cst : f32 to vector<392x128xf32>
    %8 = arith.cmpf oge, %6, %7 : vector<392x128xf32>
    %cst_5 = arith.constant 0.00999999977 : f32
    %9 = vector.broadcast %cst_5 : f32 to vector<392x128xf32>
    %10 = arith.mulf %9, %6 : vector<392x128xf32>
    %11 = arith.select %8, %6, %10 : vector<392x128xi1>, vector<392x128xf32>
    %c0_6 = arith.constant 0 : index
    %c0_7 = arith.constant 0 : index
    %12 = vector.load %arg4[%c0_6, %c0_7] : memref<392x128xf32, #tpu.memory_space<vmem>>, vector<392x128xf32>
    tpu.vector_store %arg4[%c0_6, %c0_7], %11 {strides = array<i32>} : memref<392x128xf32, #tpu.memory_space<vmem>>, vector<392x128xf32>,
    return
  }
  func.func @transform_0(%arg0: i32) -> (i32, i32) {
    %c0_i32 = arith.constant 0 : i32
    %c0_i32_0 = arith.constant 0 : i32
    return %arg0, %c0_i32 : i32, i32
  }
  func.func @transform_1(%arg0: i32) -> (i32, i32) {
    %c0_i32 = arith.constant 0 : i32
    %c0_i32_0 = arith.constant 0 : i32
    %c0_i32_1 = arith.constant 0 : i32
    return %c0_i32, %c0_i32_0 : i32, i32
  }
  func.func @transform_2(%arg0: i32) -> (i32, i32) {
    %c0_i32 = arith.constant 0 : i32
    %c0_i32_0 = arith.constant 0 : i32
    %c0_i32_1 = arith.constant 0 : i32
    return %c0_i32, %c0_i32_0 : i32, i32
  }
  func.func @transform_3(%arg0: i32) -> (i32, i32) {
    %c0_i32 = arith.constant 0 : i32
    %c0_i32_0 = arith.constant 0 : i32
    return %arg0, %c0_i32 : i32, i32
  }
}

module attributes {stable_mosaic.version = 11 : i64} {
  func.func @_affine_act_kernel(%arg0: i32, %arg1: memref<104x128xf32, #tpu.memory_space<vmem>>, %arg2: memref<1x128xf32, #tpu.memory_space<vmem>>, %arg3: memref<1x128xf32, #tpu.memory_space<vmem>>, %arg4: memref<104x128xf32, #tpu.memory_space<vmem>>) attributes {dimension_semantics = [#tpu.dimension_semantics<parallel>], iteration_bounds = array<i64: 1>, scalar_prefetch = 0 : i64, scratch_operands = 0 : i64, tpu.core_type = #tpu.core_type<tc>, window_params = [{transform_indices = @transform_0, window_bounds = array<i64: 104, 128>}, {pipeline_mode = #tpu.pipeline_mode<synchronous>, transform_indices = @transform_1, window_bounds = array<i64: 1, 128>}, {pipeline_mode = #tpu.pipeline_mode<synchronous>, transform_indices = @transform_2, window_bounds = array<i64: 1, 128>}, {transform_indices = @transform_3, window_bounds = array<i64: 104, 128>}]} {
    %c0 = arith.constant 0 : index
    %c0_0 = arith.constant 0 : index
    %0 = vector.load %arg1[%c0, %c0_0] : memref<104x128xf32, #tpu.memory_space<vmem>>, vector<104x128xf32>
    %c0_1 = arith.constant 0 : index
    %c0_2 = arith.constant 0 : index
    %1 = vector.load %arg2[%c0_1, %c0_2] : memref<1x128xf32, #tpu.memory_space<vmem>>, vector<1x128xf32>
    %2 = vector.broadcast %1 : vector<1x128xf32> to vector<104x128xf32>
    %3 = arith.mulf %0, %2 : vector<104x128xf32>
    %c0_3 = arith.constant 0 : index
    %c0_4 = arith.constant 0 : index
    %4 = vector.load %arg3[%c0_3, %c0_4] : memref<1x128xf32, #tpu.memory_space<vmem>>, vector<1x128xf32>
    %5 = vector.broadcast %4 : vector<1x128xf32> to vector<104x128xf32>
    %6 = arith.addf %3, %5 : vector<104x128xf32>
    %cst = arith.constant 0.000000e+00 : f32
    %7 = vector.broadcast %cst : f32 to vector<104x128xf32>
    %8 = arith.cmpf oge, %6, %7 : vector<104x128xf32>
    %cst_5 = arith.constant 0.00999999977 : f32
    %9 = vector.broadcast %cst_5 : f32 to vector<104x128xf32>
    %10 = arith.mulf %9, %6 : vector<104x128xf32>
    %11 = arith.select %8, %6, %10 : vector<104x128xi1>, vector<104x128xf32>
    %c0_6 = arith.constant 0 : index
    %c0_7 = arith.constant 0 : index
    %12 = vector.load %arg4[%c0_6, %c0_7] : memref<104x128xf32, #tpu.memory_space<vmem>>, vector<104x128xf32>
    tpu.vector_store %arg4[%c0_6, %c0_7], %11 {strides = array<i32>} : memref<104x128xf32, #tpu.memory_space<vmem>>, vector<104x128xf32>,
    return
  }
  func.func @transform_0(%arg0: i32) -> (i32, i32) {
    %c0_i32 = arith.constant 0 : i32
    %c0_i32_0 = arith.constant 0 : i32
    return %arg0, %c0_i32 : i32, i32
  }
  func.func @transform_1(%arg0: i32) -> (i32, i32) {
    %c0_i32 = arith.constant 0 : i32
    %c0_i32_0 = arith.constant 0 : i32
    %c0_i32_1 = arith.constant 0 : i32
    return %c0_i32, %c0_i32_0 : i32, i32
  }
  func.func @transform_2(%arg0: i32) -> (i32, i32) {
    %c0_i32 = arith.constant 0 : i32
    %c0_i32_0 = arith.constant 0 : i32
    %c0_i32_1 = arith.constant 0 : i32
    return %c0_i32, %c0_i32_0 : i32, i32
  }
  func.func @transform_3(%arg0: i32) -> (i32, i32) {
    %c0_i32 = arith.constant 0 : i32
    %c0_i32_0 = arith.constant 0 : i32
    return %arg0, %c0_i32 : i32, i32
  }
}

module attributes {stable_mosaic.version = 11 : i64} {
  func.func @_matmul_stats_kernel(%arg0: i32, %arg1: memref<104x128xbf16, #tpu.memory_space<vmem>>, %arg2: memref<128x128xbf16, #tpu.memory_space<vmem>>, %arg3: memref<1x128xf32, #tpu.memory_space<vmem>>, %arg4: memref<104x128xf32, #tpu.memory_space<vmem>>, %arg5: memref<1x8x128xf32, #tpu.memory_space<vmem>>) attributes {dimension_semantics = [#tpu.dimension_semantics<parallel>], iteration_bounds = array<i64: 1>, scalar_prefetch = 0 : i64, scratch_operands = 0 : i64, tpu.core_type = #tpu.core_type<tc>, window_params = [{transform_indices = @transform_0, window_bounds = array<i64: 104, 128>}, {pipeline_mode = #tpu.pipeline_mode<synchronous>, transform_indices = @transform_1, window_bounds = array<i64: 128, 128>}, {pipeline_mode = #tpu.pipeline_mode<synchronous>, transform_indices = @transform_2, window_bounds = array<i64: 1, 128>}, {transform_indices = @transform_3, window_bounds = array<i64: 104, 128>}, {transform_indices = @transform_4, window_bounds = array<i64: 1, 8, 128>}]} {
    %c0 = arith.constant 0 : index
    %c0_0 = arith.constant 0 : index
    %0 = vector.load %arg1[%c0, %c0_0] : memref<104x128xbf16, #tpu.memory_space<vmem>>, vector<104x128xbf16>
    %c0_1 = arith.constant 0 : index
    %c0_2 = arith.constant 0 : index
    %1 = vector.load %arg2[%c0_1, %c0_2] : memref<128x128xbf16, #tpu.memory_space<vmem>>, vector<128x128xbf16>
    %cst = arith.constant dense<0.000000e+00> : vector<104x128xf32>
    %2 = tpu.matmul %0, %1, %cst {dimension_numbers = #tpu.dot_dimension_numbers<[1], [0], [0], [1], [0, 0, 1, 1], [], []>} : vector<104x128xbf16>, vector<128x128xbf16>, vector<104x128xf32> -> vector<104x128xf32>
    %c0_3 = arith.constant 0 : index
    %c0_4 = arith.constant 0 : index
    %3 = vector.load %arg3[%c0_3, %c0_4] : memref<1x128xf32, #tpu.memory_space<vmem>>, vector<1x128xf32>
    %4 = vector.broadcast %3 : vector<1x128xf32> to vector<104x128xf32>
    %5 = arith.addf %2, %4 : vector<104x128xf32>
    %c0_5 = arith.constant 0 : index
    %c0_6 = arith.constant 0 : index
    %6 = vector.load %arg4[%c0_5, %c0_6] : memref<104x128xf32, #tpu.memory_space<vmem>>, vector<104x128xf32>
    tpu.vector_store %arg4[%c0_5, %c0_6], %5 {strides = array<i32>} : memref<104x128xf32, #tpu.memory_space<vmem>>, vector<104x128xf32>,
    %7 = tpu.iota {dimensions = array<i32: 0>} : vector<104x1xi32>
    %c104_i32 = arith.constant 104 : i32
    %8 = arith.muli %arg0, %c104_i32 : i32
    %9 = vector.broadcast %8 : i32 to vector<104x1xi32>
    %10 = arith.addi %7, %9 : vector<104x1xi32>
    %c98_i32 = arith.constant 98 : i32
    %11 = vector.broadcast %c98_i32 : i32 to vector<104x1xi32>
    %12 = arith.cmpi slt, %10, %11 : vector<104x1xi32>
    %13 = arith.extui %12 : vector<104x1xi1> to vector<104x1xi32>
    %14 = arith.sitofp %13 : vector<104x1xi32> to vector<104x1xf32>
    %15 = vector.broadcast %14 : vector<104x1xf32> to vector<104x128xf32>
    %16 = arith.mulf %5, %15 : vector<104x128xf32>
    %cst_7 = arith.constant dense<0.000000e+00> : vector<128xf32>
    %17 = vector.multi_reduction <add>, %16, %cst_7 [0] : vector<104x128xf32> to vector<128xf32>
    %18 = vector.shape_cast %17 : vector<128xf32> to vector<1x128xf32>
    %19 = arith.mulf %16, %5 : vector<104x128xf32>
    %cst_8 = arith.constant dense<0.000000e+00> : vector<128xf32>
    %20 = vector.multi_reduction <add>, %19, %cst_8 [0] : vector<104x128xf32> to vector<128xf32>
    %21 = vector.shape_cast %20 : vector<128xf32> to vector<1x128xf32>
    %22 = tpu.iota {dimensions = array<i32: 0>} : vector<8x128xi32>
    %c0_i32 = arith.constant 0 : i32
    %23 = vector.broadcast %c0_i32 : i32 to vector<8x128xi32>
    %24 = arith.cmpi eq, %22, %23 : vector<8x128xi32>
    %cst_9 = arith.constant 0.000000e+00 : f32
    %25 = vector.shape_cast %18 : vector<1x128xf32> to vector<1x128xf32>
    %26 = vector.broadcast %25 : vector<1x128xf32> to vector<8x128xf32>
    %27 = vector.broadcast %cst_9 : f32 to vector<8x128xf32>
    %28 = arith.select %24, %26, %27 : vector<8x128xi1>, vector<8x128xf32>
    %c1_i32 = arith.constant 1 : i32
    %29 = vector.broadcast %c1_i32 : i32 to vector<8x128xi32>
    %30 = arith.cmpi eq, %22, %29 : vector<8x128xi32>
    %cst_10 = arith.constant 0.000000e+00 : f32
    %31 = vector.shape_cast %21 : vector<1x128xf32> to vector<1x128xf32>
    %32 = vector.broadcast %31 : vector<1x128xf32> to vector<8x128xf32>
    %33 = vector.broadcast %cst_10 : f32 to vector<8x128xf32>
    %34 = arith.select %30, %32, %33 : vector<8x128xi1>, vector<8x128xf32>
    %35 = arith.addf %28, %34 : vector<8x128xf32>
    %36 = vector.shape_cast %35 : vector<8x128xf32> to vector<1x8x128xf32>
    %c0_11 = arith.constant 0 : index
    %c0_12 = arith.constant 0 : index
    %c0_13 = arith.constant 0 : index
    %37 = vector.load %arg5[%c0_11, %c0_12, %c0_13] : memref<1x8x128xf32, #tpu.memory_space<vmem>>, vector<1x8x128xf32>
    tpu.vector_store %arg5[%c0_11, %c0_12, %c0_13], %36 {strides = array<i32>} : memref<1x8x128xf32, #tpu.memory_space<vmem>>, vector<1x8x128xf32>,
    return
  }
  func.func @transform_0(%arg0: i32) -> (i32, i32) {
    %c0_i32 = arith.constant 0 : i32
    %c0_i32_0 = arith.constant 0 : i32
    return %arg0, %c0_i32 : i32, i32
  }
  func.func @transform_1(%arg0: i32) -> (i32, i32) {
    %c0_i32 = arith.constant 0 : i32
    %c0_i32_0 = arith.constant 0 : i32
    %c0_i32_1 = arith.constant 0 : i32
    return %c0_i32, %c0_i32_0 : i32, i32
  }
  func.func @transform_2(%arg0: i32) -> (i32, i32) {
    %c0_i32 = arith.constant 0 : i32
    %c0_i32_0 = arith.constant 0 : i32
    %c0_i32_1 = arith.constant 0 : i32
    return %c0_i32, %c0_i32_0 : i32, i32
  }
  func.func @transform_3(%arg0: i32) -> (i32, i32) {
    %c0_i32 = arith.constant 0 : i32
    %c0_i32_0 = arith.constant 0 : i32
    return %arg0, %c0_i32 : i32, i32
  }
  func.func @transform_4(%arg0: i32) -> (i32, i32, i32) {
    %c0_i32 = arith.constant 0 : i32
    %c0_i32_0 = arith.constant 0 : i32
    %c0_i32_1 = arith.constant 0 : i32
    return %arg0, %c0_i32, %c0_i32_0 : i32, i32, i32
  }
}

module attributes {stable_mosaic.version = 11 : i64} {
  func.func @_affine_act_kernel(%arg0: i32, %arg1: memref<56x128xf32, #tpu.memory_space<vmem>>, %arg2: memref<1x128xf32, #tpu.memory_space<vmem>>, %arg3: memref<1x128xf32, #tpu.memory_space<vmem>>, %arg4: memref<56x128xf32, #tpu.memory_space<vmem>>) attributes {dimension_semantics = [#tpu.dimension_semantics<parallel>], iteration_bounds = array<i64: 1>, scalar_prefetch = 0 : i64, scratch_operands = 0 : i64, tpu.core_type = #tpu.core_type<tc>, window_params = [{transform_indices = @transform_0, window_bounds = array<i64: 56, 128>}, {pipeline_mode = #tpu.pipeline_mode<synchronous>, transform_indices = @transform_1, window_bounds = array<i64: 1, 128>}, {pipeline_mode = #tpu.pipeline_mode<synchronous>, transform_indices = @transform_2, window_bounds = array<i64: 1, 128>}, {transform_indices = @transform_3, window_bounds = array<i64: 56, 128>}]} {
    %c0 = arith.constant 0 : index
    %c0_0 = arith.constant 0 : index
    %0 = vector.load %arg1[%c0, %c0_0] : memref<56x128xf32, #tpu.memory_space<vmem>>, vector<56x128xf32>
    %c0_1 = arith.constant 0 : index
    %c0_2 = arith.constant 0 : index
    %1 = vector.load %arg2[%c0_1, %c0_2] : memref<1x128xf32, #tpu.memory_space<vmem>>, vector<1x128xf32>
    %2 = vector.broadcast %1 : vector<1x128xf32> to vector<56x128xf32>
    %3 = arith.mulf %0, %2 : vector<56x128xf32>
    %c0_3 = arith.constant 0 : index
    %c0_4 = arith.constant 0 : index
    %4 = vector.load %arg3[%c0_3, %c0_4] : memref<1x128xf32, #tpu.memory_space<vmem>>, vector<1x128xf32>
    %5 = vector.broadcast %4 : vector<1x128xf32> to vector<56x128xf32>
    %6 = arith.addf %3, %5 : vector<56x128xf32>
    %cst = arith.constant 0.000000e+00 : f32
    %7 = vector.broadcast %cst : f32 to vector<56x128xf32>
    %8 = arith.cmpf oge, %6, %7 : vector<56x128xf32>
    %cst_5 = arith.constant 0.00999999977 : f32
    %9 = vector.broadcast %cst_5 : f32 to vector<56x128xf32>
    %10 = arith.mulf %9, %6 : vector<56x128xf32>
    %11 = arith.select %8, %6, %10 : vector<56x128xi1>, vector<56x128xf32>
    %c0_6 = arith.constant 0 : index
    %c0_7 = arith.constant 0 : index
    %12 = vector.load %arg4[%c0_6, %c0_7] : memref<56x128xf32, #tpu.memory_space<vmem>>, vector<56x128xf32>
    tpu.vector_store %arg4[%c0_6, %c0_7], %11 {strides = array<i32>} : memref<56x128xf32, #tpu.memory_space<vmem>>, vector<56x128xf32>,
    return
  }
  func.func @transform_0(%arg0: i32) -> (i32, i32) {
    %c0_i32 = arith.constant 0 : i32
    %c0_i32_0 = arith.constant 0 : i32
    return %arg0, %c0_i32 : i32, i32
  }
  func.func @transform_1(%arg0: i32) -> (i32, i32) {
    %c0_i32 = arith.constant 0 : i32
    %c0_i32_0 = arith.constant 0 : i32
    %c0_i32_1 = arith.constant 0 : i32
    return %c0_i32, %c0_i32_0 : i32, i32
  }
  func.func @transform_2(%arg0: i32) -> (i32, i32) {
    %c0_i32 = arith.constant 0 : i32
    %c0_i32_0 = arith.constant 0 : i32
    %c0_i32_1 = arith.constant 0 : i32
    return %c0_i32, %c0_i32_0 : i32, i32
  }
  func.func @transform_3(%arg0: i32) -> (i32, i32) {
    %c0_i32 = arith.constant 0 : i32
    %c0_i32_0 = arith.constant 0 : i32
    return %arg0, %c0_i32 : i32, i32
  }
}

module attributes {stable_mosaic.version = 11 : i64} {
  func.func @_matmul_stats_kernel(%arg0: i32, %arg1: memref<56x256xbf16, #tpu.memory_space<vmem>>, %arg2: memref<256x128xbf16, #tpu.memory_space<vmem>>, %arg3: memref<1x128xf32, #tpu.memory_space<vmem>>, %arg4: memref<56x128xf32, #tpu.memory_space<vmem>>, %arg5: memref<1x8x128xf32, #tpu.memory_space<vmem>>) attributes {dimension_semantics = [#tpu.dimension_semantics<parallel>], iteration_bounds = array<i64: 1>, scalar_prefetch = 0 : i64, scratch_operands = 0 : i64, tpu.core_type = #tpu.core_type<tc>, window_params = [{transform_indices = @transform_0, window_bounds = array<i64: 56, 256>}, {pipeline_mode = #tpu.pipeline_mode<synchronous>, transform_indices = @transform_1, window_bounds = array<i64: 256, 128>}, {pipeline_mode = #tpu.pipeline_mode<synchronous>, transform_indices = @transform_2, window_bounds = array<i64: 1, 128>}, {transform_indices = @transform_3, window_bounds = array<i64: 56, 128>}, {transform_indices = @transform_4, window_bounds = array<i64: 1, 8, 128>}]} {
    %c0 = arith.constant 0 : index
    %c0_0 = arith.constant 0 : index
    %0 = vector.load %arg1[%c0, %c0_0] : memref<56x256xbf16, #tpu.memory_space<vmem>>, vector<56x256xbf16>
    %c0_1 = arith.constant 0 : index
    %c0_2 = arith.constant 0 : index
    %1 = vector.load %arg2[%c0_1, %c0_2] : memref<256x128xbf16, #tpu.memory_space<vmem>>, vector<256x128xbf16>
    %cst = arith.constant dense<0.000000e+00> : vector<56x128xf32>
    %2 = tpu.matmul %0, %1, %cst {dimension_numbers = #tpu.dot_dimension_numbers<[1], [0], [0], [1], [0, 0, 1, 1], [], []>} : vector<56x256xbf16>, vector<256x128xbf16>, vector<56x128xf32> -> vector<56x128xf32>
    %c0_3 = arith.constant 0 : index
    %c0_4 = arith.constant 0 : index
    %3 = vector.load %arg3[%c0_3, %c0_4] : memref<1x128xf32, #tpu.memory_space<vmem>>, vector<1x128xf32>
    %4 = vector.broadcast %3 : vector<1x128xf32> to vector<56x128xf32>
    %5 = arith.addf %2, %4 : vector<56x128xf32>
    %c0_5 = arith.constant 0 : index
    %c0_6 = arith.constant 0 : index
    %6 = vector.load %arg4[%c0_5, %c0_6] : memref<56x128xf32, #tpu.memory_space<vmem>>, vector<56x128xf32>
    tpu.vector_store %arg4[%c0_5, %c0_6], %5 {strides = array<i32>} : memref<56x128xf32, #tpu.memory_space<vmem>>, vector<56x128xf32>,
    %7 = tpu.iota {dimensions = array<i32: 0>} : vector<56x1xi32>
    %c56_i32 = arith.constant 56 : i32
    %8 = arith.muli %arg0, %c56_i32 : i32
    %9 = vector.broadcast %8 : i32 to vector<56x1xi32>
    %10 = arith.addi %7, %9 : vector<56x1xi32>
    %c50_i32 = arith.constant 50 : i32
    %11 = vector.broadcast %c50_i32 : i32 to vector<56x1xi32>
    %12 = arith.cmpi slt, %10, %11 : vector<56x1xi32>
    %13 = arith.extui %12 : vector<56x1xi1> to vector<56x1xi32>
    %14 = arith.sitofp %13 : vector<56x1xi32> to vector<56x1xf32>
    %15 = vector.broadcast %14 : vector<56x1xf32> to vector<56x128xf32>
    %16 = arith.mulf %5, %15 : vector<56x128xf32>
    %cst_7 = arith.constant dense<0.000000e+00> : vector<128xf32>
    %17 = vector.multi_reduction <add>, %16, %cst_7 [0] : vector<56x128xf32> to vector<128xf32>
    %18 = vector.shape_cast %17 : vector<128xf32> to vector<1x128xf32>
    %19 = arith.mulf %16, %5 : vector<56x128xf32>
    %cst_8 = arith.constant dense<0.000000e+00> : vector<128xf32>
    %20 = vector.multi_reduction <add>, %19, %cst_8 [0] : vector<56x128xf32> to vector<128xf32>
    %21 = vector.shape_cast %20 : vector<128xf32> to vector<1x128xf32>
    %22 = tpu.iota {dimensions = array<i32: 0>} : vector<8x128xi32>
    %c0_i32 = arith.constant 0 : i32
    %23 = vector.broadcast %c0_i32 : i32 to vector<8x128xi32>
    %24 = arith.cmpi eq, %22, %23 : vector<8x128xi32>
    %cst_9 = arith.constant 0.000000e+00 : f32
    %25 = vector.shape_cast %18 : vector<1x128xf32> to vector<1x128xf32>
    %26 = vector.broadcast %25 : vector<1x128xf32> to vector<8x128xf32>
    %27 = vector.broadcast %cst_9 : f32 to vector<8x128xf32>
    %28 = arith.select %24, %26, %27 : vector<8x128xi1>, vector<8x128xf32>
    %c1_i32 = arith.constant 1 : i32
    %29 = vector.broadcast %c1_i32 : i32 to vector<8x128xi32>
    %30 = arith.cmpi eq, %22, %29 : vector<8x128xi32>
    %cst_10 = arith.constant 0.000000e+00 : f32
    %31 = vector.shape_cast %21 : vector<1x128xf32> to vector<1x128xf32>
    %32 = vector.broadcast %31 : vector<1x128xf32> to vector<8x128xf32>
    %33 = vector.broadcast %cst_10 : f32 to vector<8x128xf32>
    %34 = arith.select %30, %32, %33 : vector<8x128xi1>, vector<8x128xf32>
    %35 = arith.addf %28, %34 : vector<8x128xf32>
    %36 = vector.shape_cast %35 : vector<8x128xf32> to vector<1x8x128xf32>
    %c0_11 = arith.constant 0 : index
    %c0_12 = arith.constant 0 : index
    %c0_13 = arith.constant 0 : index
    %37 = vector.load %arg5[%c0_11, %c0_12, %c0_13] : memref<1x8x128xf32, #tpu.memory_space<vmem>>, vector<1x8x128xf32>
    tpu.vector_store %arg5[%c0_11, %c0_12, %c0_13], %36 {strides = array<i32>} : memref<1x8x128xf32, #tpu.memory_space<vmem>>, vector<1x8x128xf32>,
    return
  }
  func.func @transform_0(%arg0: i32) -> (i32, i32) {
    %c0_i32 = arith.constant 0 : i32
    %c0_i32_0 = arith.constant 0 : i32
    return %arg0, %c0_i32 : i32, i32
  }
  func.func @transform_1(%arg0: i32) -> (i32, i32) {
    %c0_i32 = arith.constant 0 : i32
    %c0_i32_0 = arith.constant 0 : i32
    %c0_i32_1 = arith.constant 0 : i32
    return %c0_i32, %c0_i32_0 : i32, i32
  }
  func.func @transform_2(%arg0: i32) -> (i32, i32) {
    %c0_i32 = arith.constant 0 : i32
    %c0_i32_0 = arith.constant 0 : i32
    %c0_i32_1 = arith.constant 0 : i32
    return %c0_i32, %c0_i32_0 : i32, i32
  }
  func.func @transform_3(%arg0: i32) -> (i32, i32) {
    %c0_i32 = arith.constant 0 : i32
    %c0_i32_0 = arith.constant 0 : i32
    return %arg0, %c0_i32 : i32, i32
  }
  func.func @transform_4(%arg0: i32) -> (i32, i32, i32) {
    %c0_i32 = arith.constant 0 : i32
    %c0_i32_0 = arith.constant 0 : i32
    %c0_i32_1 = arith.constant 0 : i32
    return %arg0, %c0_i32, %c0_i32_0 : i32, i32, i32
  }
}

module attributes {stable_mosaic.version = 11 : i64} {
  func.func @_matmul_stats_kernel(%arg0: i32, %arg1: memref<56x128xbf16, #tpu.memory_space<vmem>>, %arg2: memref<128x128xbf16, #tpu.memory_space<vmem>>, %arg3: memref<1x128xf32, #tpu.memory_space<vmem>>, %arg4: memref<56x128xf32, #tpu.memory_space<vmem>>, %arg5: memref<1x8x128xf32, #tpu.memory_space<vmem>>) attributes {dimension_semantics = [#tpu.dimension_semantics<parallel>], iteration_bounds = array<i64: 1>, scalar_prefetch = 0 : i64, scratch_operands = 0 : i64, tpu.core_type = #tpu.core_type<tc>, window_params = [{transform_indices = @transform_0, window_bounds = array<i64: 56, 128>}, {pipeline_mode = #tpu.pipeline_mode<synchronous>, transform_indices = @transform_1, window_bounds = array<i64: 128, 128>}, {pipeline_mode = #tpu.pipeline_mode<synchronous>, transform_indices = @transform_2, window_bounds = array<i64: 1, 128>}, {transform_indices = @transform_3, window_bounds = array<i64: 56, 128>}, {transform_indices = @transform_4, window_bounds = array<i64: 1, 8, 128>}]} {
    %c0 = arith.constant 0 : index
    %c0_0 = arith.constant 0 : index
    %0 = vector.load %arg1[%c0, %c0_0] : memref<56x128xbf16, #tpu.memory_space<vmem>>, vector<56x128xbf16>
    %c0_1 = arith.constant 0 : index
    %c0_2 = arith.constant 0 : index
    %1 = vector.load %arg2[%c0_1, %c0_2] : memref<128x128xbf16, #tpu.memory_space<vmem>>, vector<128x128xbf16>
    %cst = arith.constant dense<0.000000e+00> : vector<56x128xf32>
    %2 = tpu.matmul %0, %1, %cst {dimension_numbers = #tpu.dot_dimension_numbers<[1], [0], [0], [1], [0, 0, 1, 1], [], []>} : vector<56x128xbf16>, vector<128x128xbf16>, vector<56x128xf32> -> vector<56x128xf32>
    %c0_3 = arith.constant 0 : index
    %c0_4 = arith.constant 0 : index
    %3 = vector.load %arg3[%c0_3, %c0_4] : memref<1x128xf32, #tpu.memory_space<vmem>>, vector<1x128xf32>
    %4 = vector.broadcast %3 : vector<1x128xf32> to vector<56x128xf32>
    %5 = arith.addf %2, %4 : vector<56x128xf32>
    %c0_5 = arith.constant 0 : index
    %c0_6 = arith.constant 0 : index
    %6 = vector.load %arg4[%c0_5, %c0_6] : memref<56x128xf32, #tpu.memory_space<vmem>>, vector<56x128xf32>
    tpu.vector_store %arg4[%c0_5, %c0_6], %5 {strides = array<i32>} : memref<56x128xf32, #tpu.memory_space<vmem>>, vector<56x128xf32>,
    %7 = tpu.iota {dimensions = array<i32: 0>} : vector<56x1xi32>
    %c56_i32 = arith.constant 56 : i32
    %8 = arith.muli %arg0, %c56_i32 : i32
    %9 = vector.broadcast %8 : i32 to vector<56x1xi32>
    %10 = arith.addi %7, %9 : vector<56x1xi32>
    %c50_i32 = arith.constant 50 : i32
    %11 = vector.broadcast %c50_i32 : i32 to vector<56x1xi32>
    %12 = arith.cmpi slt, %10, %11 : vector<56x1xi32>
    %13 = arith.extui %12 : vector<56x1xi1> to vector<56x1xi32>
    %14 = arith.sitofp %13 : vector<56x1xi32> to vector<56x1xf32>
    %15 = vector.broadcast %14 : vector<56x1xf32> to vector<56x128xf32>
    %16 = arith.mulf %5, %15 : vector<56x128xf32>
    %cst_7 = arith.constant dense<0.000000e+00> : vector<128xf32>
    %17 = vector.multi_reduction <add>, %16, %cst_7 [0] : vector<56x128xf32> to vector<128xf32>
    %18 = vector.shape_cast %17 : vector<128xf32> to vector<1x128xf32>
    %19 = arith.mulf %16, %5 : vector<56x128xf32>
    %cst_8 = arith.constant dense<0.000000e+00> : vector<128xf32>
    %20 = vector.multi_reduction <add>, %19, %cst_8 [0] : vector<56x128xf32> to vector<128xf32>
    %21 = vector.shape_cast %20 : vector<128xf32> to vector<1x128xf32>
    %22 = tpu.iota {dimensions = array<i32: 0>} : vector<8x128xi32>
    %c0_i32 = arith.constant 0 : i32
    %23 = vector.broadcast %c0_i32 : i32 to vector<8x128xi32>
    %24 = arith.cmpi eq, %22, %23 : vector<8x128xi32>
    %cst_9 = arith.constant 0.000000e+00 : f32
    %25 = vector.shape_cast %18 : vector<1x128xf32> to vector<1x128xf32>
    %26 = vector.broadcast %25 : vector<1x128xf32> to vector<8x128xf32>
    %27 = vector.broadcast %cst_9 : f32 to vector<8x128xf32>
    %28 = arith.select %24, %26, %27 : vector<8x128xi1>, vector<8x128xf32>
    %c1_i32 = arith.constant 1 : i32
    %29 = vector.broadcast %c1_i32 : i32 to vector<8x128xi32>
    %30 = arith.cmpi eq, %22, %29 : vector<8x128xi32>
    %cst_10 = arith.constant 0.000000e+00 : f32
    %31 = vector.shape_cast %21 : vector<1x128xf32> to vector<1x128xf32>
    %32 = vector.broadcast %31 : vector<1x128xf32> to vector<8x128xf32>
    %33 = vector.broadcast %cst_10 : f32 to vector<8x128xf32>
    %34 = arith.select %30, %32, %33 : vector<8x128xi1>, vector<8x128xf32>
    %35 = arith.addf %28, %34 : vector<8x128xf32>
    %36 = vector.shape_cast %35 : vector<8x128xf32> to vector<1x8x128xf32>
    %c0_11 = arith.constant 0 : index
    %c0_12 = arith.constant 0 : index
    %c0_13 = arith.constant 0 : index
    %37 = vector.load %arg5[%c0_11, %c0_12, %c0_13] : memref<1x8x128xf32, #tpu.memory_space<vmem>>, vector<1x8x128xf32>
    tpu.vector_store %arg5[%c0_11, %c0_12, %c0_13], %36 {strides = array<i32>} : memref<1x8x128xf32, #tpu.memory_space<vmem>>, vector<1x8x128xf32>,
    return
  }
  func.func @transform_0(%arg0: i32) -> (i32, i32) {
    %c0_i32 = arith.constant 0 : i32
    %c0_i32_0 = arith.constant 0 : i32
    return %arg0, %c0_i32 : i32, i32
  }
  func.func @transform_1(%arg0: i32) -> (i32, i32) {
    %c0_i32 = arith.constant 0 : i32
    %c0_i32_0 = arith.constant 0 : i32
    %c0_i32_1 = arith.constant 0 : i32
    return %c0_i32, %c0_i32_0 : i32, i32
  }
  func.func @transform_2(%arg0: i32) -> (i32, i32) {
    %c0_i32 = arith.constant 0 : i32
    %c0_i32_0 = arith.constant 0 : i32
    %c0_i32_1 = arith.constant 0 : i32
    return %c0_i32, %c0_i32_0 : i32, i32
  }
  func.func @transform_3(%arg0: i32) -> (i32, i32) {
    %c0_i32 = arith.constant 0 : i32
    %c0_i32_0 = arith.constant 0 : i32
    return %arg0, %c0_i32 : i32, i32
  }
  func.func @transform_4(%arg0: i32) -> (i32, i32, i32) {
    %c0_i32 = arith.constant 0 : i32
    %c0_i32_0 = arith.constant 0 : i32
    %c0_i32_1 = arith.constant 0 : i32
    return %arg0, %c0_i32, %c0_i32_0 : i32, i32, i32
  }
}

module attributes {stable_mosaic.version = 11 : i64} {
  func.func @_affine_act_kernel(%arg0: i32, %arg1: memref<24x128xf32, #tpu.memory_space<vmem>>, %arg2: memref<1x128xf32, #tpu.memory_space<vmem>>, %arg3: memref<1x128xf32, #tpu.memory_space<vmem>>, %arg4: memref<24x128xf32, #tpu.memory_space<vmem>>) attributes {dimension_semantics = [#tpu.dimension_semantics<parallel>], iteration_bounds = array<i64: 1>, scalar_prefetch = 0 : i64, scratch_operands = 0 : i64, tpu.core_type = #tpu.core_type<tc>, window_params = [{transform_indices = @transform_0, window_bounds = array<i64: 24, 128>}, {pipeline_mode = #tpu.pipeline_mode<synchronous>, transform_indices = @transform_1, window_bounds = array<i64: 1, 128>}, {pipeline_mode = #tpu.pipeline_mode<synchronous>, transform_indices = @transform_2, window_bounds = array<i64: 1, 128>}, {transform_indices = @transform_3, window_bounds = array<i64: 24, 128>}]} {
    %c0 = arith.constant 0 : index
    %c0_0 = arith.constant 0 : index
    %0 = vector.load %arg1[%c0, %c0_0] : memref<24x128xf32, #tpu.memory_space<vmem>>, vector<24x128xf32>
    %c0_1 = arith.constant 0 : index
    %c0_2 = arith.constant 0 : index
    %1 = vector.load %arg2[%c0_1, %c0_2] : memref<1x128xf32, #tpu.memory_space<vmem>>, vector<1x128xf32>
    %2 = vector.broadcast %1 : vector<1x128xf32> to vector<24x128xf32>
    %3 = arith.mulf %0, %2 : vector<24x128xf32>
    %c0_3 = arith.constant 0 : index
    %c0_4 = arith.constant 0 : index
    %4 = vector.load %arg3[%c0_3, %c0_4] : memref<1x128xf32, #tpu.memory_space<vmem>>, vector<1x128xf32>
    %5 = vector.broadcast %4 : vector<1x128xf32> to vector<24x128xf32>
    %6 = arith.addf %3, %5 : vector<24x128xf32>
    %cst = arith.constant 0.000000e+00 : f32
    %7 = vector.broadcast %cst : f32 to vector<24x128xf32>
    %8 = arith.cmpf oge, %6, %7 : vector<24x128xf32>
    %cst_5 = arith.constant 0.00999999977 : f32
    %9 = vector.broadcast %cst_5 : f32 to vector<24x128xf32>
    %10 = arith.mulf %9, %6 : vector<24x128xf32>
    %11 = arith.select %8, %6, %10 : vector<24x128xi1>, vector<24x128xf32>
    %c0_6 = arith.constant 0 : index
    %c0_7 = arith.constant 0 : index
    %12 = vector.load %arg4[%c0_6, %c0_7] : memref<24x128xf32, #tpu.memory_space<vmem>>, vector<24x128xf32>
    tpu.vector_store %arg4[%c0_6, %c0_7], %11 {strides = array<i32>} : memref<24x128xf32, #tpu.memory_space<vmem>>, vector<24x128xf32>,
    return
  }
  func.func @transform_0(%arg0: i32) -> (i32, i32) {
    %c0_i32 = arith.constant 0 : i32
    %c0_i32_0 = arith.constant 0 : i32
    return %arg0, %c0_i32 : i32, i32
  }
  func.func @transform_1(%arg0: i32) -> (i32, i32) {
    %c0_i32 = arith.constant 0 : i32
    %c0_i32_0 = arith.constant 0 : i32
    %c0_i32_1 = arith.constant 0 : i32
    return %c0_i32, %c0_i32_0 : i32, i32
  }
  func.func @transform_2(%arg0: i32) -> (i32, i32) {
    %c0_i32 = arith.constant 0 : i32
    %c0_i32_0 = arith.constant 0 : i32
    %c0_i32_1 = arith.constant 0 : i32
    return %c0_i32, %c0_i32_0 : i32, i32
  }
  func.func @transform_3(%arg0: i32) -> (i32, i32) {
    %c0_i32 = arith.constant 0 : i32
    %c0_i32_0 = arith.constant 0 : i32
    return %arg0, %c0_i32 : i32, i32
  }
}

module attributes {stable_mosaic.version = 11 : i64} {
  func.func @_matmul_stats_kernel(%arg0: i32, %arg1: memref<24x256xbf16, #tpu.memory_space<vmem>>, %arg2: memref<256x128xbf16, #tpu.memory_space<vmem>>, %arg3: memref<1x128xf32, #tpu.memory_space<vmem>>, %arg4: memref<24x128xf32, #tpu.memory_space<vmem>>, %arg5: memref<1x8x128xf32, #tpu.memory_space<vmem>>) attributes {dimension_semantics = [#tpu.dimension_semantics<parallel>], iteration_bounds = array<i64: 1>, scalar_prefetch = 0 : i64, scratch_operands = 0 : i64, tpu.core_type = #tpu.core_type<tc>, window_params = [{transform_indices = @transform_0, window_bounds = array<i64: 24, 256>}, {pipeline_mode = #tpu.pipeline_mode<synchronous>, transform_indices = @transform_1, window_bounds = array<i64: 256, 128>}, {pipeline_mode = #tpu.pipeline_mode<synchronous>, transform_indices = @transform_2, window_bounds = array<i64: 1, 128>}, {transform_indices = @transform_3, window_bounds = array<i64: 24, 128>}, {transform_indices = @transform_4, window_bounds = array<i64: 1, 8, 128>}]} {
    %c0 = arith.constant 0 : index
    %c0_0 = arith.constant 0 : index
    %0 = vector.load %arg1[%c0, %c0_0] : memref<24x256xbf16, #tpu.memory_space<vmem>>, vector<24x256xbf16>
    %c0_1 = arith.constant 0 : index
    %c0_2 = arith.constant 0 : index
    %1 = vector.load %arg2[%c0_1, %c0_2] : memref<256x128xbf16, #tpu.memory_space<vmem>>, vector<256x128xbf16>
    %cst = arith.constant dense<0.000000e+00> : vector<24x128xf32>
    %2 = tpu.matmul %0, %1, %cst {dimension_numbers = #tpu.dot_dimension_numbers<[1], [0], [0], [1], [0, 0, 1, 1], [], []>} : vector<24x256xbf16>, vector<256x128xbf16>, vector<24x128xf32> -> vector<24x128xf32>
    %c0_3 = arith.constant 0 : index
    %c0_4 = arith.constant 0 : index
    %3 = vector.load %arg3[%c0_3, %c0_4] : memref<1x128xf32, #tpu.memory_space<vmem>>, vector<1x128xf32>
    %4 = vector.broadcast %3 : vector<1x128xf32> to vector<24x128xf32>
    %5 = arith.addf %2, %4 : vector<24x128xf32>
    %c0_5 = arith.constant 0 : index
    %c0_6 = arith.constant 0 : index
    %6 = vector.load %arg4[%c0_5, %c0_6] : memref<24x128xf32, #tpu.memory_space<vmem>>, vector<24x128xf32>
    tpu.vector_store %arg4[%c0_5, %c0_6], %5 {strides = array<i32>} : memref<24x128xf32, #tpu.memory_space<vmem>>, vector<24x128xf32>,
    %7 = tpu.iota {dimensions = array<i32: 0>} : vector<24x1xi32>
    %c24_i32 = arith.constant 24 : i32
    %8 = arith.muli %arg0, %c24_i32 : i32
    %9 = vector.broadcast %8 : i32 to vector<24x1xi32>
    %10 = arith.addi %7, %9 : vector<24x1xi32>
    %c18_i32 = arith.constant 18 : i32
    %11 = vector.broadcast %c18_i32 : i32 to vector<24x1xi32>
    %12 = arith.cmpi slt, %10, %11 : vector<24x1xi32>
    %13 = arith.extui %12 : vector<24x1xi1> to vector<24x1xi32>
    %14 = arith.sitofp %13 : vector<24x1xi32> to vector<24x1xf32>
    %15 = vector.broadcast %14 : vector<24x1xf32> to vector<24x128xf32>
    %16 = arith.mulf %5, %15 : vector<24x128xf32>
    %cst_7 = arith.constant dense<0.000000e+00> : vector<128xf32>
    %17 = vector.multi_reduction <add>, %16, %cst_7 [0] : vector<24x128xf32> to vector<128xf32>
    %18 = vector.shape_cast %17 : vector<128xf32> to vector<1x128xf32>
    %19 = arith.mulf %16, %5 : vector<24x128xf32>
    %cst_8 = arith.constant dense<0.000000e+00> : vector<128xf32>
    %20 = vector.multi_reduction <add>, %19, %cst_8 [0] : vector<24x128xf32> to vector<128xf32>
    %21 = vector.shape_cast %20 : vector<128xf32> to vector<1x128xf32>
    %22 = tpu.iota {dimensions = array<i32: 0>} : vector<8x128xi32>
    %c0_i32 = arith.constant 0 : i32
    %23 = vector.broadcast %c0_i32 : i32 to vector<8x128xi32>
    %24 = arith.cmpi eq, %22, %23 : vector<8x128xi32>
    %cst_9 = arith.constant 0.000000e+00 : f32
    %25 = vector.shape_cast %18 : vector<1x128xf32> to vector<1x128xf32>
    %26 = vector.broadcast %25 : vector<1x128xf32> to vector<8x128xf32>
    %27 = vector.broadcast %cst_9 : f32 to vector<8x128xf32>
    %28 = arith.select %24, %26, %27 : vector<8x128xi1>, vector<8x128xf32>
    %c1_i32 = arith.constant 1 : i32
    %29 = vector.broadcast %c1_i32 : i32 to vector<8x128xi32>
    %30 = arith.cmpi eq, %22, %29 : vector<8x128xi32>
    %cst_10 = arith.constant 0.000000e+00 : f32
    %31 = vector.shape_cast %21 : vector<1x128xf32> to vector<1x128xf32>
    %32 = vector.broadcast %31 : vector<1x128xf32> to vector<8x128xf32>
    %33 = vector.broadcast %cst_10 : f32 to vector<8x128xf32>
    %34 = arith.select %30, %32, %33 : vector<8x128xi1>, vector<8x128xf32>
    %35 = arith.addf %28, %34 : vector<8x128xf32>
    %36 = vector.shape_cast %35 : vector<8x128xf32> to vector<1x8x128xf32>
    %c0_11 = arith.constant 0 : index
    %c0_12 = arith.constant 0 : index
    %c0_13 = arith.constant 0 : index
    %37 = vector.load %arg5[%c0_11, %c0_12, %c0_13] : memref<1x8x128xf32, #tpu.memory_space<vmem>>, vector<1x8x128xf32>
    tpu.vector_store %arg5[%c0_11, %c0_12, %c0_13], %36 {strides = array<i32>} : memref<1x8x128xf32, #tpu.memory_space<vmem>>, vector<1x8x128xf32>,
    return
  }
  func.func @transform_0(%arg0: i32) -> (i32, i32) {
    %c0_i32 = arith.constant 0 : i32
    %c0_i32_0 = arith.constant 0 : i32
    return %arg0, %c0_i32 : i32, i32
  }
  func.func @transform_1(%arg0: i32) -> (i32, i32) {
    %c0_i32 = arith.constant 0 : i32
    %c0_i32_0 = arith.constant 0 : i32
    %c0_i32_1 = arith.constant 0 : i32
    return %c0_i32, %c0_i32_0 : i32, i32
  }
  func.func @transform_2(%arg0: i32) -> (i32, i32) {
    %c0_i32 = arith.constant 0 : i32
    %c0_i32_0 = arith.constant 0 : i32
    %c0_i32_1 = arith.constant 0 : i32
    return %c0_i32, %c0_i32_0 : i32, i32
  }
  func.func @transform_3(%arg0: i32) -> (i32, i32) {
    %c0_i32 = arith.constant 0 : i32
    %c0_i32_0 = arith.constant 0 : i32
    return %arg0, %c0_i32 : i32, i32
  }
  func.func @transform_4(%arg0: i32) -> (i32, i32, i32) {
    %c0_i32 = arith.constant 0 : i32
    %c0_i32_0 = arith.constant 0 : i32
    %c0_i32_1 = arith.constant 0 : i32
    return %arg0, %c0_i32, %c0_i32_0 : i32, i32, i32
  }
}

module attributes {stable_mosaic.version = 11 : i64} {
  func.func @_matmul_stats_kernel(%arg0: i32, %arg1: memref<72x256xbf16, #tpu.memory_space<vmem>>, %arg2: memref<256x128xbf16, #tpu.memory_space<vmem>>, %arg3: memref<1x128xf32, #tpu.memory_space<vmem>>, %arg4: memref<72x128xf32, #tpu.memory_space<vmem>>, %arg5: memref<1x8x128xf32, #tpu.memory_space<vmem>>) attributes {dimension_semantics = [#tpu.dimension_semantics<parallel>], iteration_bounds = array<i64: 1>, scalar_prefetch = 0 : i64, scratch_operands = 0 : i64, tpu.core_type = #tpu.core_type<tc>, window_params = [{transform_indices = @transform_0, window_bounds = array<i64: 72, 256>}, {pipeline_mode = #tpu.pipeline_mode<synchronous>, transform_indices = @transform_1, window_bounds = array<i64: 256, 128>}, {pipeline_mode = #tpu.pipeline_mode<synchronous>, transform_indices = @transform_2, window_bounds = array<i64: 1, 128>}, {transform_indices = @transform_3, window_bounds = array<i64: 72, 128>}, {transform_indices = @transform_4, window_bounds = array<i64: 1, 8, 128>}]} {
    %c0 = arith.constant 0 : index
    %c0_0 = arith.constant 0 : index
    %0 = vector.load %arg1[%c0, %c0_0] : memref<72x256xbf16, #tpu.memory_space<vmem>>, vector<72x256xbf16>
    %c0_1 = arith.constant 0 : index
    %c0_2 = arith.constant 0 : index
    %1 = vector.load %arg2[%c0_1, %c0_2] : memref<256x128xbf16, #tpu.memory_space<vmem>>, vector<256x128xbf16>
    %cst = arith.constant dense<0.000000e+00> : vector<72x128xf32>
    %2 = tpu.matmul %0, %1, %cst {dimension_numbers = #tpu.dot_dimension_numbers<[1], [0], [0], [1], [0, 0, 1, 1], [], []>} : vector<72x256xbf16>, vector<256x128xbf16>, vector<72x128xf32> -> vector<72x128xf32>
    %c0_3 = arith.constant 0 : index
    %c0_4 = arith.constant 0 : index
    %3 = vector.load %arg3[%c0_3, %c0_4] : memref<1x128xf32, #tpu.memory_space<vmem>>, vector<1x128xf32>
    %4 = vector.broadcast %3 : vector<1x128xf32> to vector<72x128xf32>
    %5 = arith.addf %2, %4 : vector<72x128xf32>
    %c0_5 = arith.constant 0 : index
    %c0_6 = arith.constant 0 : index
    %6 = vector.load %arg4[%c0_5, %c0_6] : memref<72x128xf32, #tpu.memory_space<vmem>>, vector<72x128xf32>
    tpu.vector_store %arg4[%c0_5, %c0_6], %5 {strides = array<i32>} : memref<72x128xf32, #tpu.memory_space<vmem>>, vector<72x128xf32>,
    %7 = tpu.iota {dimensions = array<i32: 0>} : vector<72x1xi32>
    %c72_i32 = arith.constant 72 : i32
    %8 = arith.muli %arg0, %c72_i32 : i32
    %9 = vector.broadcast %8 : i32 to vector<72x1xi32>
    %10 = arith.addi %7, %9 : vector<72x1xi32>
    %c72_i32_7 = arith.constant 72 : i32
    %11 = vector.broadcast %c72_i32_7 : i32 to vector<72x1xi32>
    %12 = arith.cmpi slt, %10, %11 : vector<72x1xi32>
    %13 = arith.extui %12 : vector<72x1xi1> to vector<72x1xi32>
    %14 = arith.sitofp %13 : vector<72x1xi32> to vector<72x1xf32>
    %15 = vector.broadcast %14 : vector<72x1xf32> to vector<72x128xf32>
    %16 = arith.mulf %5, %15 : vector<72x128xf32>
    %cst_8 = arith.constant dense<0.000000e+00> : vector<128xf32>
    %17 = vector.multi_reduction <add>, %16, %cst_8 [0] : vector<72x128xf32> to vector<128xf32>
    %18 = vector.shape_cast %17 : vector<128xf32> to vector<1x128xf32>
    %19 = arith.mulf %16, %5 : vector<72x128xf32>
    %cst_9 = arith.constant dense<0.000000e+00> : vector<128xf32>
    %20 = vector.multi_reduction <add>, %19, %cst_9 [0] : vector<72x128xf32> to vector<128xf32>
    %21 = vector.shape_cast %20 : vector<128xf32> to vector<1x128xf32>
    %22 = tpu.iota {dimensions = array<i32: 0>} : vector<8x128xi32>
    %c0_i32 = arith.constant 0 : i32
    %23 = vector.broadcast %c0_i32 : i32 to vector<8x128xi32>
    %24 = arith.cmpi eq, %22, %23 : vector<8x128xi32>
    %cst_10 = arith.constant 0.000000e+00 : f32
    %25 = vector.shape_cast %18 : vector<1x128xf32> to vector<1x128xf32>
    %26 = vector.broadcast %25 : vector<1x128xf32> to vector<8x128xf32>
    %27 = vector.broadcast %cst_10 : f32 to vector<8x128xf32>
    %28 = arith.select %24, %26, %27 : vector<8x128xi1>, vector<8x128xf32>
    %c1_i32 = arith.constant 1 : i32
    %29 = vector.broadcast %c1_i32 : i32 to vector<8x128xi32>
    %30 = arith.cmpi eq, %22, %29 : vector<8x128xi32>
    %cst_11 = arith.constant 0.000000e+00 : f32
    %31 = vector.shape_cast %21 : vector<1x128xf32> to vector<1x128xf32>
    %32 = vector.broadcast %31 : vector<1x128xf32> to vector<8x128xf32>
    %33 = vector.broadcast %cst_11 : f32 to vector<8x128xf32>
    %34 = arith.select %30, %32, %33 : vector<8x128xi1>, vector<8x128xf32>
    %35 = arith.addf %28, %34 : vector<8x128xf32>
    %36 = vector.shape_cast %35 : vector<8x128xf32> to vector<1x8x128xf32>
    %c0_12 = arith.constant 0 : index
    %c0_13 = arith.constant 0 : index
    %c0_14 = arith.constant 0 : index
    %37 = vector.load %arg5[%c0_12, %c0_13, %c0_14] : memref<1x8x128xf32, #tpu.memory_space<vmem>>, vector<1x8x128xf32>
    tpu.vector_store %arg5[%c0_12, %c0_13, %c0_14], %36 {strides = array<i32>} : memref<1x8x128xf32, #tpu.memory_space<vmem>>, vector<1x8x128xf32>,
    return
  }
  func.func @transform_0(%arg0: i32) -> (i32, i32) {
    %c0_i32 = arith.constant 0 : i32
    %c0_i32_0 = arith.constant 0 : i32
    return %arg0, %c0_i32 : i32, i32
  }
  func.func @transform_1(%arg0: i32) -> (i32, i32) {
    %c0_i32 = arith.constant 0 : i32
    %c0_i32_0 = arith.constant 0 : i32
    %c0_i32_1 = arith.constant 0 : i32
    return %c0_i32, %c0_i32_0 : i32, i32
  }
  func.func @transform_2(%arg0: i32) -> (i32, i32) {
    %c0_i32 = arith.constant 0 : i32
    %c0_i32_0 = arith.constant 0 : i32
    %c0_i32_1 = arith.constant 0 : i32
    return %c0_i32, %c0_i32_0 : i32, i32
  }
  func.func @transform_3(%arg0: i32) -> (i32, i32) {
    %c0_i32 = arith.constant 0 : i32
    %c0_i32_0 = arith.constant 0 : i32
    return %arg0, %c0_i32 : i32, i32
  }
  func.func @transform_4(%arg0: i32) -> (i32, i32, i32) {
    %c0_i32 = arith.constant 0 : i32
    %c0_i32_0 = arith.constant 0 : i32
    %c0_i32_1 = arith.constant 0 : i32
    return %arg0, %c0_i32, %c0_i32_0 : i32, i32, i32
  }
}

module attributes {stable_mosaic.version = 11 : i64} {
  func.func @_affine_act_kernel(%arg0: i32, %arg1: memref<72x128xf32, #tpu.memory_space<vmem>>, %arg2: memref<1x128xf32, #tpu.memory_space<vmem>>, %arg3: memref<1x128xf32, #tpu.memory_space<vmem>>, %arg4: memref<72x128xf32, #tpu.memory_space<vmem>>) attributes {dimension_semantics = [#tpu.dimension_semantics<parallel>], iteration_bounds = array<i64: 1>, scalar_prefetch = 0 : i64, scratch_operands = 0 : i64, tpu.core_type = #tpu.core_type<tc>, window_params = [{transform_indices = @transform_0, window_bounds = array<i64: 72, 128>}, {pipeline_mode = #tpu.pipeline_mode<synchronous>, transform_indices = @transform_1, window_bounds = array<i64: 1, 128>}, {pipeline_mode = #tpu.pipeline_mode<synchronous>, transform_indices = @transform_2, window_bounds = array<i64: 1, 128>}, {transform_indices = @transform_3, window_bounds = array<i64: 72, 128>}]} {
    %c0 = arith.constant 0 : index
    %c0_0 = arith.constant 0 : index
    %0 = vector.load %arg1[%c0, %c0_0] : memref<72x128xf32, #tpu.memory_space<vmem>>, vector<72x128xf32>
    %c0_1 = arith.constant 0 : index
    %c0_2 = arith.constant 0 : index
    %1 = vector.load %arg2[%c0_1, %c0_2] : memref<1x128xf32, #tpu.memory_space<vmem>>, vector<1x128xf32>
    %2 = vector.broadcast %1 : vector<1x128xf32> to vector<72x128xf32>
    %3 = arith.mulf %0, %2 : vector<72x128xf32>
    %c0_3 = arith.constant 0 : index
    %c0_4 = arith.constant 0 : index
    %4 = vector.load %arg3[%c0_3, %c0_4] : memref<1x128xf32, #tpu.memory_space<vmem>>, vector<1x128xf32>
    %5 = vector.broadcast %4 : vector<1x128xf32> to vector<72x128xf32>
    %6 = arith.addf %3, %5 : vector<72x128xf32>
    %cst = arith.constant 0.000000e+00 : f32
    %7 = vector.broadcast %cst : f32 to vector<72x128xf32>
    %8 = arith.cmpf oge, %6, %7 : vector<72x128xf32>
    %cst_5 = arith.constant 0.00999999977 : f32
    %9 = vector.broadcast %cst_5 : f32 to vector<72x128xf32>
    %10 = arith.mulf %9, %6 : vector<72x128xf32>
    %11 = arith.select %8, %6, %10 : vector<72x128xi1>, vector<72x128xf32>
    %c0_6 = arith.constant 0 : index
    %c0_7 = arith.constant 0 : index
    %12 = vector.load %arg4[%c0_6, %c0_7] : memref<72x128xf32, #tpu.memory_space<vmem>>, vector<72x128xf32>
    tpu.vector_store %arg4[%c0_6, %c0_7], %11 {strides = array<i32>} : memref<72x128xf32, #tpu.memory_space<vmem>>, vector<72x128xf32>,
    return
  }
  func.func @transform_0(%arg0: i32) -> (i32, i32) {
    %c0_i32 = arith.constant 0 : i32
    %c0_i32_0 = arith.constant 0 : i32
    return %arg0, %c0_i32 : i32, i32
  }
  func.func @transform_1(%arg0: i32) -> (i32, i32) {
    %c0_i32 = arith.constant 0 : i32
    %c0_i32_0 = arith.constant 0 : i32
    %c0_i32_1 = arith.constant 0 : i32
    return %c0_i32, %c0_i32_0 : i32, i32
  }
  func.func @transform_2(%arg0: i32) -> (i32, i32) {
    %c0_i32 = arith.constant 0 : i32
    %c0_i32_0 = arith.constant 0 : i32
    %c0_i32_1 = arith.constant 0 : i32
    return %c0_i32, %c0_i32_0 : i32, i32
  }
  func.func @transform_3(%arg0: i32) -> (i32, i32) {
    %c0_i32 = arith.constant 0 : i32
    %c0_i32_0 = arith.constant 0 : i32
    return %arg0, %c0_i32 : i32, i32
  }
}

module attributes {stable_mosaic.version = 11 : i64} {
  func.func @_affine_act_kernel(%arg0: i32, %arg1: memref<32x128xf32, #tpu.memory_space<vmem>>, %arg2: memref<1x128xf32, #tpu.memory_space<vmem>>, %arg3: memref<1x128xf32, #tpu.memory_space<vmem>>, %arg4: memref<32x128xf32, #tpu.memory_space<vmem>>) attributes {dimension_semantics = [#tpu.dimension_semantics<parallel>], iteration_bounds = array<i64: 1>, scalar_prefetch = 0 : i64, scratch_operands = 0 : i64, tpu.core_type = #tpu.core_type<tc>, window_params = [{transform_indices = @transform_0, window_bounds = array<i64: 32, 128>}, {pipeline_mode = #tpu.pipeline_mode<synchronous>, transform_indices = @transform_1, window_bounds = array<i64: 1, 128>}, {pipeline_mode = #tpu.pipeline_mode<synchronous>, transform_indices = @transform_2, window_bounds = array<i64: 1, 128>}, {transform_indices = @transform_3, window_bounds = array<i64: 32, 128>}]} {
    %c0 = arith.constant 0 : index
    %c0_0 = arith.constant 0 : index
    %0 = vector.load %arg1[%c0, %c0_0] : memref<32x128xf32, #tpu.memory_space<vmem>>, vector<32x128xf32>
    %c0_1 = arith.constant 0 : index
    %c0_2 = arith.constant 0 : index
    %1 = vector.load %arg2[%c0_1, %c0_2] : memref<1x128xf32, #tpu.memory_space<vmem>>, vector<1x128xf32>
    %2 = vector.broadcast %1 : vector<1x128xf32> to vector<32x128xf32>
    %3 = arith.mulf %0, %2 : vector<32x128xf32>
    %c0_3 = arith.constant 0 : index
    %c0_4 = arith.constant 0 : index
    %4 = vector.load %arg3[%c0_3, %c0_4] : memref<1x128xf32, #tpu.memory_space<vmem>>, vector<1x128xf32>
    %5 = vector.broadcast %4 : vector<1x128xf32> to vector<32x128xf32>
    %6 = arith.addf %3, %5 : vector<32x128xf32>
    %cst = arith.constant 0.000000e+00 : f32
    %7 = vector.broadcast %cst : f32 to vector<32x128xf32>
    %8 = arith.cmpf oge, %6, %7 : vector<32x128xf32>
    %cst_5 = arith.constant 0.00999999977 : f32
    %9 = vector.broadcast %cst_5 : f32 to vector<32x128xf32>
    %10 = arith.mulf %9, %6 : vector<32x128xf32>
    %11 = arith.select %8, %6, %10 : vector<32x128xi1>, vector<32x128xf32>
    %c0_6 = arith.constant 0 : index
    %c0_7 = arith.constant 0 : index
    %12 = vector.load %arg4[%c0_6, %c0_7] : memref<32x128xf32, #tpu.memory_space<vmem>>, vector<32x128xf32>
    tpu.vector_store %arg4[%c0_6, %c0_7], %11 {strides = array<i32>} : memref<32x128xf32, #tpu.memory_space<vmem>>, vector<32x128xf32>,
    return
  }
  func.func @transform_0(%arg0: i32) -> (i32, i32) {
    %c0_i32 = arith.constant 0 : i32
    %c0_i32_0 = arith.constant 0 : i32
    return %arg0, %c0_i32 : i32, i32
  }
  func.func @transform_1(%arg0: i32) -> (i32, i32) {
    %c0_i32 = arith.constant 0 : i32
    %c0_i32_0 = arith.constant 0 : i32
    %c0_i32_1 = arith.constant 0 : i32
    return %c0_i32, %c0_i32_0 : i32, i32
  }
  func.func @transform_2(%arg0: i32) -> (i32, i32) {
    %c0_i32 = arith.constant 0 : i32
    %c0_i32_0 = arith.constant 0 : i32
    %c0_i32_1 = arith.constant 0 : i32
    return %c0_i32, %c0_i32_0 : i32, i32
  }
  func.func @transform_3(%arg0: i32) -> (i32, i32) {
    %c0_i32 = arith.constant 0 : i32
    %c0_i32_0 = arith.constant 0 : i32
    return %arg0, %c0_i32 : i32, i32
  }
}

module attributes {stable_mosaic.version = 11 : i64} {
  func.func @_matmul_stats_kernel(%arg0: i32, %arg1: memref<32x128xbf16, #tpu.memory_space<vmem>>, %arg2: memref<128x128xbf16, #tpu.memory_space<vmem>>, %arg3: memref<1x128xf32, #tpu.memory_space<vmem>>, %arg4: memref<32x128xf32, #tpu.memory_space<vmem>>, %arg5: memref<1x8x128xf32, #tpu.memory_space<vmem>>) attributes {dimension_semantics = [#tpu.dimension_semantics<parallel>], iteration_bounds = array<i64: 1>, scalar_prefetch = 0 : i64, scratch_operands = 0 : i64, tpu.core_type = #tpu.core_type<tc>, window_params = [{transform_indices = @transform_0, window_bounds = array<i64: 32, 128>}, {pipeline_mode = #tpu.pipeline_mode<synchronous>, transform_indices = @transform_1, window_bounds = array<i64: 128, 128>}, {pipeline_mode = #tpu.pipeline_mode<synchronous>, transform_indices = @transform_2, window_bounds = array<i64: 1, 128>}, {transform_indices = @transform_3, window_bounds = array<i64: 32, 128>}, {transform_indices = @transform_4, window_bounds = array<i64: 1, 8, 128>}]} {
    %c0 = arith.constant 0 : index
    %c0_0 = arith.constant 0 : index
    %0 = vector.load %arg1[%c0, %c0_0] : memref<32x128xbf16, #tpu.memory_space<vmem>>, vector<32x128xbf16>
    %c0_1 = arith.constant 0 : index
    %c0_2 = arith.constant 0 : index
    %1 = vector.load %arg2[%c0_1, %c0_2] : memref<128x128xbf16, #tpu.memory_space<vmem>>, vector<128x128xbf16>
    %cst = arith.constant dense<0.000000e+00> : vector<32x128xf32>
    %2 = tpu.matmul %0, %1, %cst {dimension_numbers = #tpu.dot_dimension_numbers<[1], [0], [0], [1], [0, 0, 1, 1], [], []>} : vector<32x128xbf16>, vector<128x128xbf16>, vector<32x128xf32> -> vector<32x128xf32>
    %c0_3 = arith.constant 0 : index
    %c0_4 = arith.constant 0 : index
    %3 = vector.load %arg3[%c0_3, %c0_4] : memref<1x128xf32, #tpu.memory_space<vmem>>, vector<1x128xf32>
    %4 = vector.broadcast %3 : vector<1x128xf32> to vector<32x128xf32>
    %5 = arith.addf %2, %4 : vector<32x128xf32>
    %c0_5 = arith.constant 0 : index
    %c0_6 = arith.constant 0 : index
    %6 = vector.load %arg4[%c0_5, %c0_6] : memref<32x128xf32, #tpu.memory_space<vmem>>, vector<32x128xf32>
    tpu.vector_store %arg4[%c0_5, %c0_6], %5 {strides = array<i32>} : memref<32x128xf32, #tpu.memory_space<vmem>>, vector<32x128xf32>,
    %7 = tpu.iota {dimensions = array<i32: 0>} : vector<32x1xi32>
    %c32_i32 = arith.constant 32 : i32
    %8 = arith.muli %arg0, %c32_i32 : i32
    %9 = vector.broadcast %8 : i32 to vector<32x1xi32>
    %10 = arith.addi %7, %9 : vector<32x1xi32>
    %c32_i32_7 = arith.constant 32 : i32
    %11 = vector.broadcast %c32_i32_7 : i32 to vector<32x1xi32>
    %12 = arith.cmpi slt, %10, %11 : vector<32x1xi32>
    %13 = arith.extui %12 : vector<32x1xi1> to vector<32x1xi32>
    %14 = arith.sitofp %13 : vector<32x1xi32> to vector<32x1xf32>
    %15 = vector.broadcast %14 : vector<32x1xf32> to vector<32x128xf32>
    %16 = arith.mulf %5, %15 : vector<32x128xf32>
    %cst_8 = arith.constant dense<0.000000e+00> : vector<128xf32>
    %17 = vector.multi_reduction <add>, %16, %cst_8 [0] : vector<32x128xf32> to vector<128xf32>
    %18 = vector.shape_cast %17 : vector<128xf32> to vector<1x128xf32>
    %19 = arith.mulf %16, %5 : vector<32x128xf32>
    %cst_9 = arith.constant dense<0.000000e+00> : vector<128xf32>
    %20 = vector.multi_reduction <add>, %19, %cst_9 [0] : vector<32x128xf32> to vector<128xf32>
    %21 = vector.shape_cast %20 : vector<128xf32> to vector<1x128xf32>
    %22 = tpu.iota {dimensions = array<i32: 0>} : vector<8x128xi32>
    %c0_i32 = arith.constant 0 : i32
    %23 = vector.broadcast %c0_i32 : i32 to vector<8x128xi32>
    %24 = arith.cmpi eq, %22, %23 : vector<8x128xi32>
    %cst_10 = arith.constant 0.000000e+00 : f32
    %25 = vector.shape_cast %18 : vector<1x128xf32> to vector<1x128xf32>
    %26 = vector.broadcast %25 : vector<1x128xf32> to vector<8x128xf32>
    %27 = vector.broadcast %cst_10 : f32 to vector<8x128xf32>
    %28 = arith.select %24, %26, %27 : vector<8x128xi1>, vector<8x128xf32>
    %c1_i32 = arith.constant 1 : i32
    %29 = vector.broadcast %c1_i32 : i32 to vector<8x128xi32>
    %30 = arith.cmpi eq, %22, %29 : vector<8x128xi32>
    %cst_11 = arith.constant 0.000000e+00 : f32
    %31 = vector.shape_cast %21 : vector<1x128xf32> to vector<1x128xf32>
    %32 = vector.broadcast %31 : vector<1x128xf32> to vector<8x128xf32>
    %33 = vector.broadcast %cst_11 : f32 to vector<8x128xf32>
    %34 = arith.select %30, %32, %33 : vector<8x128xi1>, vector<8x128xf32>
    %35 = arith.addf %28, %34 : vector<8x128xf32>
    %36 = vector.shape_cast %35 : vector<8x128xf32> to vector<1x8x128xf32>
    %c0_12 = arith.constant 0 : index
    %c0_13 = arith.constant 0 : index
    %c0_14 = arith.constant 0 : index
    %37 = vector.load %arg5[%c0_12, %c0_13, %c0_14] : memref<1x8x128xf32, #tpu.memory_space<vmem>>, vector<1x8x128xf32>
    tpu.vector_store %arg5[%c0_12, %c0_13, %c0_14], %36 {strides = array<i32>} : memref<1x8x128xf32, #tpu.memory_space<vmem>>, vector<1x8x128xf32>,
    return
  }
  func.func @transform_0(%arg0: i32) -> (i32, i32) {
    %c0_i32 = arith.constant 0 : i32
    %c0_i32_0 = arith.constant 0 : i32
    return %arg0, %c0_i32 : i32, i32
  }
  func.func @transform_1(%arg0: i32) -> (i32, i32) {
    %c0_i32 = arith.constant 0 : i32
    %c0_i32_0 = arith.constant 0 : i32
    %c0_i32_1 = arith.constant 0 : i32
    return %c0_i32, %c0_i32_0 : i32, i32
  }
  func.func @transform_2(%arg0: i32) -> (i32, i32) {
    %c0_i32 = arith.constant 0 : i32
    %c0_i32_0 = arith.constant 0 : i32
    %c0_i32_1 = arith.constant 0 : i32
    return %c0_i32, %c0_i32_0 : i32, i32
  }
  func.func @transform_3(%arg0: i32) -> (i32, i32) {
    %c0_i32 = arith.constant 0 : i32
    %c0_i32_0 = arith.constant 0 : i32
    return %arg0, %c0_i32 : i32, i32
  }
  func.func @transform_4(%arg0: i32) -> (i32, i32, i32) {
    %c0_i32 = arith.constant 0 : i32
    %c0_i32_0 = arith.constant 0 : i32
    %c0_i32_1 = arith.constant 0 : i32
    return %arg0, %c0_i32, %c0_i32_0 : i32, i32, i32
  }
}

module attributes {stable_mosaic.version = 11 : i64} {
  func.func @_matmul_act_kernel(%arg0: i32, %arg1: memref<128x128xbf16, #tpu.memory_space<vmem>>, %arg2: memref<128x128xbf16, #tpu.memory_space<vmem>>, %arg3: memref<1x128xf32, #tpu.memory_space<vmem>>, %arg4: memref<128x128xf32, #tpu.memory_space<vmem>>) attributes {dimension_semantics = [#tpu.dimension_semantics<parallel>], iteration_bounds = array<i64: 1>, scalar_prefetch = 0 : i64, scratch_operands = 0 : i64, tpu.core_type = #tpu.core_type<tc>, window_params = [{transform_indices = @transform_0, window_bounds = array<i64: 128, 128>}, {pipeline_mode = #tpu.pipeline_mode<synchronous>, transform_indices = @transform_1, window_bounds = array<i64: 128, 128>}, {pipeline_mode = #tpu.pipeline_mode<synchronous>, transform_indices = @transform_2, window_bounds = array<i64: 1, 128>}, {transform_indices = @transform_3, window_bounds = array<i64: 128, 128>}]} {
    %c0 = arith.constant 0 : index
    %c0_0 = arith.constant 0 : index
    %0 = vector.load %arg1[%c0, %c0_0] : memref<128x128xbf16, #tpu.memory_space<vmem>>, vector<128x128xbf16>
    %c0_1 = arith.constant 0 : index
    %c0_2 = arith.constant 0 : index
    %1 = vector.load %arg2[%c0_1, %c0_2] : memref<128x128xbf16, #tpu.memory_space<vmem>>, vector<128x128xbf16>
    %cst = arith.constant dense<0.000000e+00> : vector<128x128xf32>
    %2 = tpu.matmul %0, %1, %cst {dimension_numbers = #tpu.dot_dimension_numbers<[1], [0], [0], [1], [0, 0, 1, 1], [], []>} : vector<128x128xbf16>, vector<128x128xbf16>, vector<128x128xf32> -> vector<128x128xf32>
    %c0_3 = arith.constant 0 : index
    %c0_4 = arith.constant 0 : index
    %3 = vector.load %arg3[%c0_3, %c0_4] : memref<1x128xf32, #tpu.memory_space<vmem>>, vector<1x128xf32>
    %4 = vector.broadcast %3 : vector<1x128xf32> to vector<128x128xf32>
    %5 = arith.addf %2, %4 : vector<128x128xf32>
    %6 = math.absf %5 : vector<128x128xf32>
    %cst_5 = arith.constant 0.000000e+00 : f32
    %7 = vector.broadcast %cst_5 : f32 to vector<128x128xf32>
    %8 = arith.subf %7, %6 : vector<128x128xf32>
    %9 = math.exp %8 : vector<128x128xf32>
    %cst_6 = arith.constant 1.000000e+00 : f32
    %10 = vector.broadcast %cst_6 : f32 to vector<128x128xf32>
    %11 = arith.addf %10, %9 : vector<128x128xf32>
    %12 = tpu.reciprocal %11 {approx = true} : vector<128x128xf32> -> vector<128x128xf32>
    %cst_7 = arith.constant 0.000000e+00 : f32
    %13 = vector.broadcast %cst_7 : f32 to vector<128x128xf32>
    %14 = arith.cmpf oge, %5, %13 : vector<128x128xf32>
    %15 = arith.mulf %9, %12 : vector<128x128xf32>
    %16 = arith.select %14, %12, %15 : vector<128x128xi1>, vector<128x128xf32>
    %cst_8 = arith.constant 0.000000e+00 : f32
    %cst_9 = arith.constant 1.000000e+00 : f32
    %17 = vector.broadcast %cst_8 : f32 to vector<128x128xf32>
    %18 = arith.maximumf %17, %16 : vector<128x128xf32>
    %19 = vector.broadcast %cst_9 : f32 to vector<128x128xf32>
    %20 = arith.minimumf %19, %18 : vector<128x128xf32>
    %c0_10 = arith.constant 0 : index
    %c0_11 = arith.constant 0 : index
    %21 = vector.load %arg4[%c0_10, %c0_11] : memref<128x128xf32, #tpu.memory_space<vmem>>, vector<128x128xf32>
    tpu.vector_store %arg4[%c0_10, %c0_11], %20 {strides = array<i32>} : memref<128x128xf32, #tpu.memory_space<vmem>>, vector<128x128xf32>,
    return
  }
  func.func @transform_0(%arg0: i32) -> (i32, i32) {
    %c0_i32 = arith.constant 0 : i32
    %c0_i32_0 = arith.constant 0 : i32
    return %arg0, %c0_i32 : i32, i32
  }
  func.func @transform_1(%arg0: i32) -> (i32, i32) {
    %c0_i32 = arith.constant 0 : i32
    %c0_i32_0 = arith.constant 0 : i32
    %c0_i32_1 = arith.constant 0 : i32
    return %c0_i32, %c0_i32_0 : i32, i32
  }
  func.func @transform_2(%arg0: i32) -> (i32, i32) {
    %c0_i32 = arith.constant 0 : i32
    %c0_i32_0 = arith.constant 0 : i32
    %c0_i32_1 = arith.constant 0 : i32
    return %c0_i32, %c0_i32_0 : i32, i32
  }
  func.func @transform_3(%arg0: i32) -> (i32, i32) {
    %c0_i32 = arith.constant 0 : i32
    %c0_i32_0 = arith.constant 0 : i32
    return %arg0, %c0_i32 : i32, i32
  }
}

</mosaic_0001>

<bundles_post_ra>
// kernel: dip_forward.20
= control target key start
LH: loop header
LB: loop body
LE: loop exit
PB: predicated region body
PF: predicated region fallthrough
CT: control target
= control target key end

     0   :  { %s1030_s0 = inlined_call_operand.vmem [shape: f32[512,128], index: 0, kind: input, shape index: {}]   ;;  %s1031_s1 = inlined_call_operand.vmem [shape: f32[1,128], index: 1, kind: input, shape index: {}]   ;;  %s1032_s2 = inlined_call_operand.vmem [shape: f32[1,128], index: 2, kind: input, shape index: {}]   ;;  %s1033_s3 = inlined_call_operand.vmem [shape: f32[512,128], index: 3, kind: output, shape index: {}]  }
   0x1   :  { %v14_v0 = vld [vmem:[%s1030_s0] sm:$0xff]  ;;  %v15_v4 = vld [vmem:[%s1030_s0 + $0x8] sm:$0xff]  ;;  %v16_v5 = vld [vmem:[%s1030_s0 + $0x10] sm:$0xff] }
   0x2   :  { %v508_v1 = vld [vmem:[%s1031_s1] ss:$0 sm:$0xff]  ;;  %v17_v6 = vld [vmem:[%s1030_s0 + $0x18] sm:$0xff]  ;;  %v19_v11 = vld [vmem:[%s1030_s0 + $0x28] sm:$0xff] }
   0x3   :  { %v513_v2 = vld [vmem:[%s1032_s2] ss:$0 sm:$0xff]  ;;  %v85_v3 = vmul.f32 %v508_v1, %v14_v0  ;;  %v86_v7 = vmul.f32 %v508_v1, %v15_v4  ;;  %v87_v8 = vmul.f32 %v508_v1, %v16_v5  ;;  %v88_v9 = vmul.f32 %v508_v1, %v17_v6  ;;  %v20_v12 = vld [vmem:[%s1030_s0 + $0x30] sm:$0xff]  ;;  %v21_v17 = vld [vmem:[%s1030_s0 + $0x38] sm:$0xff] }
   0x4   :  { %v18_v10 = vld [vmem:[%s1030_s0 + $0x20] sm:$0xff]  ;;  %v90_v15 = vmul.f32 %v508_v1, %v19_v11  ;;  %v91_v16 = vmul.f32 %v508_v1, %v20_v12  ;;  %v92_v21 = vmul.f32 %v508_v1, %v21_v17  ;;  %v23_v30 = vld [vmem:[%s1030_s0 + $0x48] sm:$0xff]  ;;  %v24_v31 = vld [vmem:[%s1030_s0 + $0x50] sm:$0xff] }
   0x5   :  { %v156_v13 = vadd.f32 %v513_v2, %v85_v3  ;;  %v89_v14 = vmul.f32 %v508_v1, %v18_v10  ;;  %v157_v18 = vadd.f32 %v513_v2, %v86_v7  ;;  %v158_v19 = vadd.f32 %v513_v2, %v87_v8  ;;  %v22_v25 = vld [vmem:[%s1030_s0 + $0x40] sm:$0xff]  ;;  %v25_v43 = vld [vmem:[%s1030_s0 + $0x58] sm:$0xff]  ;;  %v27_v45 = vld [vmem:[%s1030_s0 + $0x68] sm:$0xff] }
   0x6   :  { %v159_v20 = vadd.f32 %v513_v2, %v88_v9  ;;  %v161_v24 = vadd.f32 %v513_v2, %v90_v15  ;;  %v162_v37 = vadd.f32 %v513_v2, %v91_v16  ;;  %v163_v38 = vadd.f32 %v513_v2, %v92_v21  ;;  %v26_v44 = vld [vmem:[%s1030_s0 + $0x60] sm:$0xff]  ;;  %v28_v56 = vld [vmem:[%s1030_s0 + $0x70] sm:$0xff]  ;;  %v29_v4 = vld [vmem:[%s1030_s0 + $0x78] sm:$0xff] }
   0x7   :  { %vm220_vm0 = vcmp.ge.f32.partialorder %v156_v13, 0.0  ;;  %v284_v22 = vmul.f32 0.01, %v156_v13  ;;  %v160_v23 = vadd.f32 %v513_v2, %v89_v14  ;;  %vm221_vm1 = vcmp.ge.f32.partialorder %v157_v18, 0.0  ;;  %v30_v5 = vld [vmem:[%s1030_s0 + $0x80] sm:$0xff]  ;;  %v31_v9 = vld [vmem:[%s1030_s0 + $0x88] sm:$0xff] }
   0x8   :  { %v285_v26 = vmul.f32 0.01, %v157_v18  ;;  %vm222_vm2 = vcmp.ge.f32.partialorder %v158_v19, 0.0  ;;  %v286_v27 = vmul.f32 0.01, %v158_v19  ;;  %vm223_vm3 = vcmp.ge.f32.partialorder %v159_v20, 0.0 }
   0x9   :  { %v348_v28 = vsel %vm220_vm0, %v156_v13, %v284_v22  ;;  %v287_v29 = vmul.f32 0.01, %v159_v20  ;;  %vm224_vm4 = vcmp.ge.f32.partialorder %v160_v23, 0.0  ;;  %v288_v34 = vmul.f32 0.01, %v160_v23  ;;  %v32_v10 = vld [vmem:[%s1030_s0 + $0x90] sm:$0xff] }
   0xa   :  { %412 = vst [vmem:[%s1033_s3] sm:$0xff] %v348_v28  ;;  %v349_v32 = vsel %vm221_vm1, %v157_v18, %v285_v26  ;;  %v350_v33 = vsel %vm222_vm2, %v158_v19, %v286_v27  ;;  %vm225_vm5 = vcmp.ge.f32.partialorder %v161_v24, 0.0  ;;  %v289_v36 = vmul.f32 0.01, %v161_v24  ;;  %v33_v17 = vld [vmem:[%s1030_s0 + $0x98] sm:$0xff]  ;;  %v34_v18 = vld [vmem:[%s1030_s0 + $0xa0] sm:$0xff] }
   0xb   :  { %413 = vst [vmem:[%s1033_s3 + $0x8] sm:$0xff] %v349_v32  ;;  %414 = vst [vmem:[%s1033_s3 + $0x10] sm:$0xff] %v350_v33  ;;  %v351_v35 = vsel %vm223_vm3, %v159_v20, %v287_v29  ;;  %v352_v39 = vsel %vm224_vm4, %v160_v23, %v288_v34  ;;  %v93_v40 = vmul.f32 %v508_v1, %v22_v25  ;;  %vm226_vm6 = vcmp.ge.f32.partialorder %v162_v37, 0.0  ;;  %v35_v32 = vld [vmem:[%s1030_s0 + $0xa8] sm:$0xff]  ;;  %v36_v33 = vld [vmem:[%s1030_s0 + $0xb0] sm:$0xff] }
   0xc   :  { %415 = vst [vmem:[%s1033_s3 + $0x18] sm:$0xff] %v351_v35  ;;  %v94_v41 = vmul.f32 %v508_v1, %v23_v30  ;;  %v95_v42 = vmul.f32 %v508_v1, %v24_v31  ;;  %416 = vst [vmem:[%s1033_s3 + $0x20] sm:$0xff] %v352_v39  ;;  %v353_v46 = vsel %vm225_vm5, %v161_v24, %v289_v36  ;;  %v290_v47 = vmul.f32 0.01, %v162_v37 }
   0xd   :  { %vm227_vm7 = vcmp.ge.f32.partialorder %v163_v38, 0.0  ;;  %417 = vst [vmem:[%s1033_s3 + $0x28] sm:$0xff] %v353_v46  ;;  %v291_v48 = vmul.f32 0.01, %v163_v38  ;;  %v164_v49 = vadd.f32 %v513_v2, %v93_v40  ;;  %v96_v53 = vmul.f32 %v508_v1, %v25_v43  ;;  %v37_v40 = vld [vmem:[%s1030_s0 + $0xb8] sm:$0xff]  ;;  %v39_v46 = vld [vmem:[%s1030_s0 + $0xc8] sm:$0xff] }
   0xe   :  { %v165_v50 = vadd.f32 %v513_v2, %v94_v41  ;;  %v166_v51 = vadd.f32 %v513_v2, %v95_v42  ;;  %v354_v52 = vsel %vm226_vm6, %v162_v37, %v290_v47  ;;  %v97_v54 = vmul.f32 %v508_v1, %v26_v44  ;;  %v40_v47 = vld [vmem:[%s1030_s0 + $0xd0] sm:$0xff] }
   0xf   :  { %v98_v55 = vmul.f32 %v508_v1, %v27_v45  ;;  %418 = vst [vmem:[%s1033_s3 + $0x30] sm:$0xff] %v354_v52  ;;  %v355_v57 = vsel %vm227_vm7, %v163_v38, %v291_v48  ;;  %vm228_vm8 = vcmp.ge.f32.partialorder %v164_v49, 0.0  ;;  %v292_v58 = vmul.f32 0.01, %v164_v49  ;;  %v38_v45 = vld [vmem:[%s1030_s0 + $0xc0] sm:$0xff] }
  0x10   :  { %vm229_vm9 = vcmp.ge.f32.partialorder %v165_v50, 0.0  ;;  %419 = vst [vmem:[%s1033_s3 + $0x38] sm:$0xff] %v355_v57  ;;  %v293_v59 = vmul.f32 0.01, %v165_v50  ;;  %vm230_vm10 = vcmp.ge.f32.partialorder %v166_v51, 0.0  ;;  %v167_v61 = vadd.f32 %v513_v2, %v96_v53 }
  0x11   :  { %v294_v60 = vmul.f32 0.01, %v166_v51  ;;  %v356_v62 = vsel %vm228_vm8, %v164_v49, %v292_v58  ;;  %v168_v63 = vadd.f32 %v513_v2, %v97_v54  ;;  %v169_v0 = vadd.f32 %v513_v2, %v98_v55  ;;  %v41_v58 = vld [vmem:[%s1030_s0 + $0xd8] sm:$0xff] }
  0x12   :  { %v99_v3 = vmul.f32 %v508_v1, %v28_v56  ;;  %420 = vst [vmem:[%s1033_s3 + $0x40] sm:$0xff] %v356_v62  ;;  %v357_v6 = vsel %vm229_vm9, %v165_v50, %v293_v59  ;;  %vm231_vm11 = vcmp.ge.f32.partialorder %v167_v61, 0.0  ;;  %v295_v8 = vmul.f32 0.01, %v167_v61  ;;  %v42_v59 = vld [vmem:[%s1030_s0 + $0xe0] sm:$0xff] }
  0x13   :  { %v358_v7 = vsel %vm230_vm10, %v166_v51, %v294_v60  ;;  %421 = vst [vmem:[%s1033_s3 + $0x48] sm:$0xff] %v357_v6  ;;  %vm232_vm12 = vcmp.ge.f32.partialorder %v168_v63, 0.0  ;;  %v296_v11 = vmul.f32 0.01, %v168_v63  ;;  %vm233_vm13 = vcmp.ge.f32.partialorder %v169_v0, 0.0 }
  0x14   :  { %422 = vst [vmem:[%s1033_s3 + $0x50] sm:$0xff] %v358_v7  ;;  %v297_v12 = vmul.f32 0.01, %v169_v0  ;;  %v359_v13 = vsel %vm231_vm11, %v167_v61, %v295_v8  ;;  %v170_v14 = vadd.f32 %v513_v2, %v99_v3  ;;  %v100_v15 = vmul.f32 %v508_v1, %v29_v4 }
  0x15   :  { %v101_v16 = vmul.f32 %v508_v1, %v30_v5  ;;  %423 = vst [vmem:[%s1033_s3 + $0x58] sm:$0xff] %v359_v13  ;;  %v360_v19 = vsel %vm232_vm12, %v168_v63, %v296_v11  ;;  %v102_v21 = vmul.f32 %v508_v1, %v31_v9  ;;  %v103_v22 = vmul.f32 %v508_v1, %v32_v10  ;;  %v43_v10 = vld [vmem:[%s1030_s0 + $0xe8] sm:$0xff]  ;;  %v44_v11 = vld [vmem:[%s1030_s0 + $0xf0] sm:$0xff] }
  0x16   :  { %v361_v20 = vsel %vm233_vm13, %v169_v0, %v297_v12  ;;  %424 = vst [vmem:[%s1033_s3 + $0x60] sm:$0xff] %v360_v19  ;;  %vm234_vm14 = vcmp.ge.f32.partialorder %v170_v14, 0.0  ;;  %v298_v23 = vmul.f32 0.01, %v170_v14  ;;  %v171_v24 = vadd.f32 %v513_v2, %v100_v15 }
  0x17   :  { %425 = vst [vmem:[%s1033_s3 + $0x68] sm:$0xff] %v361_v20  ;;  %v172_v25 = vadd.f32 %v513_v2, %v101_v16  ;;  %v173_v26 = vadd.f32 %v513_v2, %v102_v21  ;;  %v174_v27 = vadd.f32 %v513_v2, %v103_v22  ;;  %v104_v28 = vmul.f32 %v508_v1, %v33_v17 }
  0x18   :  { %v105_v29 = vmul.f32 %v508_v1, %v34_v18  ;;  %v362_v30 = vsel %vm234_vm14, %v170_v14, %v298_v23  ;;  %vm235_vm15 = vcmp.ge.f32.partialorder %v171_v24, 0.0  ;;  %v299_v31 = vmul.f32 0.01, %v171_v24  ;;  %v45_v18 = vld [vmem:[%s1030_s0 + $0xf8] sm:$0xff]  ;;  %v46_v23 = vld [vmem:[%s1030_s0 + $0x100] sm:$0xff] }
  0x19   :  { %vm236_vm0 = vcmp.ge.f32.partialorder %v172_v25, 0.0  ;;  %426 = vst [vmem:[%s1033_s3 + $0x70] sm:$0xff] %v362_v30  ;;  %v300_v34 = vmul.f32 0.01, %v172_v25  ;;  %vm237_vm1 = vcmp.ge.f32.partialorder %v173_v26, 0.0  ;;  %vm238_vm2 = vcmp.ge.f32.partialorder %v174_v27, 0.0 }
  0x1a   :  { %v301_v35 = vmul.f32 0.01, %v173_v26  ;;  %v363_v36 = vsel %vm235_vm15, %v171_v24, %v299_v31  ;;  %v302_v37 = vmul.f32 0.01, %v174_v27  ;;  %v175_v38 = vadd.f32 %v513_v2, %v104_v28  ;;  %v47_v24 = vld [vmem:[%s1030_s0 + $0x108] sm:$0xff] }
  0x1b   :  { %v176_v39 = vadd.f32 %v513_v2, %v105_v29  ;;  %427 = vst [vmem:[%s1033_s3 + $0x78] sm:$0xff] %v363_v36  ;;  %v364_v41 = vsel %vm236_vm0, %v172_v25, %v300_v34  ;;  %v106_v43 = vmul.f32 %v508_v1, %v35_v32  ;;  %v107_v44 = vmul.f32 %v508_v1, %v36_v33  ;;  %v48_v25 = vld [vmem:[%s1030_s0 + $0x110] sm:$0xff]  ;;  %v49_v36 = vld [vmem:[%s1030_s0 + $0x118] sm:$0xff] }
  0x1c   :  { %v365_v42 = vsel %vm237_vm1, %v173_v26, %v301_v35  ;;  %428 = vst [vmem:[%s1033_s3 + $0x80] sm:$0xff] %v364_v41  ;;  %v366_v48 = vsel %vm238_vm2, %v174_v27, %v302_v37  ;;  %vm239_vm3 = vcmp.ge.f32.partialorder %v175_v38, 0.0  ;;  %v303_v49 = vmul.f32 0.01, %v175_v38  ;;  %v50_v37 = vld [vmem:[%s1030_s0 + $0x120] sm:$0xff] }
  0x1d   :  { %429 = vst [vmem:[%s1033_s3 + $0x88] sm:$0xff] %v365_v42  ;;  %vm240_vm4 = vcmp.ge.f32.partialorder %v176_v39, 0.0  ;;  %430 = vst [vmem:[%s1033_s3 + $0x90] sm:$0xff] %v366_v48  ;;  %v304_v50 = vmul.f32 0.01, %v176_v39  ;;  %v177_v51 = vadd.f32 %v513_v2, %v106_v43  ;;  %v178_v52 = vadd.f32 %v513_v2, %v107_v44 }
  0x1e   :  { %v108_v53 = vmul.f32 %v508_v1, %v37_v40  ;;  %v367_v54 = vsel %vm239_vm3, %v175_v38, %v303_v49  ;;  %v109_v55 = vmul.f32 %v508_v1, %v38_v45  ;;  %v110_v56 = vmul.f32 %v508_v1, %v39_v46 }
  0x1f   :  { %v111_v57 = vmul.f32 %v508_v1, %v40_v47  ;;  %431 = vst [vmem:[%s1033_s3 + $0x98] sm:$0xff] %v367_v54  ;;  %v368_v60 = vsel %vm240_vm4, %v176_v39, %v304_v50  ;;  %vm241_vm5 = vcmp.ge.f32.partialorder %v177_v51, 0.0  ;;  %v305_v61 = vmul.f32 0.01, %v177_v51  ;;  %v51_v50 = vld [vmem:[%s1030_s0 + $0x128] sm:$0xff] }
  0x20   :  { %vm242_vm6 = vcmp.ge.f32.partialorder %v178_v52, 0.0  ;;  %432 = vst [vmem:[%s1033_s3 + $0xa0] sm:$0xff] %v368_v60  ;;  %v306_v62 = vmul.f32 0.01, %v178_v52  ;;  %v179_v63 = vadd.f32 %v513_v2, %v108_v53  ;;  %v180_v0 = vadd.f32 %v513_v2, %v109_v55 }
  0x21   :  { %v181_v3 = vadd.f32 %v513_v2, %v110_v56  ;;  %v369_v4 = vsel %vm241_vm5, %v177_v51, %v305_v61  ;;  %v182_v5 = vadd.f32 %v513_v2, %v111_v57  ;;  %v112_v6 = vmul.f32 %v508_v1, %v41_v58  ;;  %v52_v51 = vld [vmem:[%s1030_s0 + $0x130] sm:$0xff]  ;;  %v53_v58 = vld [vmem:[%s1030_s0 + $0x138] sm:$0xff] }
  0x22   :  { %v113_v7 = vmul.f32 %v508_v1, %v42_v59  ;;  %433 = vst [vmem:[%s1033_s3 + $0xa8] sm:$0xff] %v369_v4  ;;  %v370_v8 = vsel %vm242_vm6, %v178_v52, %v306_v62  ;;  %vm243_vm7 = vcmp.ge.f32.partialorder %v179_v63, 0.0  ;;  %v307_v9 = vmul.f32 0.01, %v179_v63 }
  0x23   :  { %vm244_vm8 = vcmp.ge.f32.partialorder %v180_v0, 0.0  ;;  %434 = vst [vmem:[%s1033_s3 + $0xb0] sm:$0xff] %v370_v8  ;;  %v308_v12 = vmul.f32 0.01, %v180_v0  ;;  %vm245_vm9 = vcmp.ge.f32.partialorder %v181_v3, 0.0  ;;  %vm246_vm10 = vcmp.ge.f32.partialorder %v182_v5, 0.0 }
  0x24   :  { %v309_v13 = vmul.f32 0.01, %v181_v3  ;;  %v371_v14 = vsel %vm243_vm7, %v179_v63, %v307_v9  ;;  %v310_v15 = vmul.f32 0.01, %v182_v5  ;;  %v183_v16 = vadd.f32 %v513_v2, %v112_v6  ;;  %v54_v63 = vld [vmem:[%s1030_s0 + $0x140] sm:$0xff] }
  0x25   :  { %v184_v17 = vadd.f32 %v513_v2, %v113_v7  ;;  %435 = vst [vmem:[%s1033_s3 + $0xb8] sm:$0xff] %v371_v14  ;;  %v372_v19 = vsel %vm244_vm8, %v180_v0, %v308_v12  ;;  %v114_v21 = vmul.f32 %v508_v1, %v43_v10  ;;  %v115_v22 = vmul.f32 %v508_v1, %v44_v11  ;;  %v55_v0 = vld [vmem:[%s1030_s0 + $0x148] sm:$0xff]  ;;  %v57_v14 = vld [vmem:[%s1030_s0 + $0x158] sm:$0xff] }
  0x26   :  { %v373_v20 = vsel %vm245_vm9, %v181_v3, %v309_v13  ;;  %436 = vst [vmem:[%s1033_s3 + $0xc0] sm:$0xff] %v372_v19  ;;  %v374_v26 = vsel %vm246_vm10, %v182_v5, %v310_v15  ;;  %vm247_vm11 = vcmp.ge.f32.partialorder %v183_v16, 0.0  ;;  %v311_v27 = vmul.f32 0.01, %v183_v16  ;;  %v56_v3 = vld [vmem:[%s1030_s0 + $0x150] sm:$0xff]  ;;  %v58_v15 = vld [vmem:[%s1030_s0 + $0x160] sm:$0xff] }
  0x27   :  { %437 = vst [vmem:[%s1033_s3 + $0xc8] sm:$0xff] %v373_v20  ;;  %vm248_vm12 = vcmp.ge.f32.partialorder %v184_v17, 0.0  ;;  %438 = vst [vmem:[%s1033_s3 + $0xd0] sm:$0xff] %v374_v26  ;;  %v312_v28 = vmul.f32 0.01, %v184_v17  ;;  %v185_v29 = vadd.f32 %v513_v2, %v114_v21  ;;  %v186_v30 = vadd.f32 %v513_v2, %v115_v22 }
  0x28   :  { %v116_v31 = vmul.f32 %v508_v1, %v45_v18  ;;  %v375_v32 = vsel %vm247_vm11, %v183_v16, %v311_v27  ;;  %v117_v33 = vmul.f32 %v508_v1, %v46_v23  ;;  %v118_v34 = vmul.f32 %v508_v1, %v47_v24 }
  0x29   :  { %v119_v35 = vmul.f32 %v508_v1, %v48_v25  ;;  %439 = vst [vmem:[%s1033_s3 + $0xd8] sm:$0xff] %v375_v32  ;;  %v376_v38 = vsel %vm248_vm12, %v184_v17, %v312_v28  ;;  %vm249_vm13 = vcmp.ge.f32.partialorder %v185_v29, 0.0  ;;  %v313_v39 = vmul.f32 0.01, %v185_v29  ;;  %v59_v28 = vld [vmem:[%s1030_s0 + $0x168] sm:$0xff] }
  0x2a   :  { %vm250_vm14 = vcmp.ge.f32.partialorder %v186_v30, 0.0  ;;  %440 = vst [vmem:[%s1033_s3 + $0xe0] sm:$0xff] %v376_v38  ;;  %v314_v40 = vmul.f32 0.01, %v186_v30  ;;  %v187_v41 = vadd.f32 %v513_v2, %v116_v31  ;;  %v188_v42 = vadd.f32 %v513_v2, %v117_v33 }
  0x2b   :  { %v189_v43 = vadd.f32 %v513_v2, %v118_v34  ;;  %v377_v44 = vsel %vm249_vm13, %v185_v29, %v313_v39  ;;  %v190_v45 = vadd.f32 %v513_v2, %v119_v35  ;;  %v120_v46 = vmul.f32 %v508_v1, %v49_v36  ;;  %v60_v29 = vld [vmem:[%s1030_s0 + $0x170] sm:$0xff]  ;;  %v61_v36 = vld [vmem:[%s1030_s0 + $0x178] sm:$0xff] }
  0x2c   :  { %v121_v47 = vmul.f32 %v508_v1, %v50_v37  ;;  %441 = vst [vmem:[%s1033_s3 + $0xe8] sm:$0xff] %v377_v44  ;;  %v378_v48 = vsel %vm250_vm14, %v186_v30, %v314_v40  ;;  %vm251_vm15 = vcmp.ge.f32.partialorder %v187_v41, 0.0  ;;  %v315_v49 = vmul.f32 0.01, %v187_v41 }
  0x2d   :  { %vm252_vm0 = vcmp.ge.f32.partialorder %v188_v42, 0.0  ;;  %442 = vst [vmem:[%s1033_s3 + $0xf0] sm:$0xff] %v378_v48  ;;  %v316_v52 = vmul.f32 0.01, %v188_v42  ;;  %vm253_vm1 = vcmp.ge.f32.partialorder %v189_v43, 0.0  ;;  %vm254_vm2 = vcmp.ge.f32.partialorder %v190_v45, 0.0 }
  0x2e   :  { %v317_v53 = vmul.f32 0.01, %v189_v43  ;;  %v379_v54 = vsel %vm251_vm15, %v187_v41, %v315_v49  ;;  %v318_v55 = vmul.f32 0.01, %v190_v45  ;;  %v191_v56 = vadd.f32 %v513_v2, %v120_v46  ;;  %v62_v41 = vld [vmem:[%s1030_s0 + $0x180] sm:$0xff] }
  0x2f   :  { %v192_v57 = vadd.f32 %v513_v2, %v121_v47  ;;  %443 = vst [vmem:[%s1033_s3 + $0xf8] sm:$0xff] %v379_v54  ;;  %v380_v59 = vsel %vm252_vm0, %v188_v42, %v316_v52  ;;  %v122_v61 = vmul.f32 %v508_v1, %v51_v50  ;;  %v123_v62 = vmul.f32 %v508_v1, %v52_v51  ;;  %v63_v42 = vld [vmem:[%s1030_s0 + $0x188] sm:$0xff]  ;;  %v65_v54 = vld [vmem:[%s1030_s0 + $0x198] sm:$0xff] }
  0x30   :  { %v381_v60 = vsel %vm253_vm1, %v189_v43, %v317_v53  ;;  %444 = vst [vmem:[%s1033_s3 + $0x100] sm:$0xff] %v380_v59  ;;  %v382_v4 = vsel %vm254_vm2, %v190_v45, %v318_v55  ;;  %vm255_vm3 = vcmp.ge.f32.partialorder %v191_v56, 0.0  ;;  %v319_v5 = vmul.f32 0.01, %v191_v56  ;;  %v64_v43 = vld [vmem:[%s1030_s0 + $0x190] sm:$0xff]  ;;  %v66_v55 = vld [vmem:[%s1030_s0 + $0x1a0] sm:$0xff] }
  0x31   :  { %445 = vst [vmem:[%s1033_s3 + $0x108] sm:$0xff] %v381_v60  ;;  %vm256_vm4 = vcmp.ge.f32.partialorder %v192_v57, 0.0  ;;  %446 = vst [vmem:[%s1033_s3 + $0x110] sm:$0xff] %v382_v4  ;;  %v320_v6 = vmul.f32 0.01, %v192_v57  ;;  %v193_v7 = vadd.f32 %v513_v2, %v122_v61  ;;  %v194_v8 = vadd.f32 %v513_v2, %v123_v62 }
  0x32   :  { %v124_v9 = vmul.f32 %v508_v1, %v53_v58  ;;  %v383_v10 = vsel %vm255_vm3, %v191_v56, %v319_v5  ;;  %v125_v11 = vmul.f32 %v508_v1, %v54_v63  ;;  %v126_v12 = vmul.f32 %v508_v1, %v55_v0 }
  0x33   :  { %v127_v13 = vmul.f32 %v508_v1, %v56_v3  ;;  %447 = vst [vmem:[%s1033_s3 + $0x118] sm:$0xff] %v383_v10  ;;  %v384_v16 = vsel %vm256_vm4, %v192_v57, %v320_v6  ;;  %vm257_vm5 = vcmp.ge.f32.partialorder %v193_v7, 0.0  ;;  %v321_v17 = vmul.f32 0.01, %v193_v7  ;;  %v67_v6 = vld [vmem:[%s1030_s0 + $0x1a8] sm:$0xff] }
  0x34   :  { %vm258_vm6 = vcmp.ge.f32.partialorder %v194_v8, 0.0  ;;  %448 = vst [vmem:[%s1033_s3 + $0x120] sm:$0xff] %v384_v16  ;;  %v322_v18 = vmul.f32 0.01, %v194_v8  ;;  %v195_v19 = vadd.f32 %v513_v2, %v124_v9  ;;  %v196_v20 = vadd.f32 %v513_v2, %v125_v11 }
  0x35   :  { %v197_v21 = vadd.f32 %v513_v2, %v126_v12  ;;  %v385_v22 = vsel %vm257_vm5, %v193_v7, %v321_v17  ;;  %v198_v23 = vadd.f32 %v513_v2, %v127_v13  ;;  %v128_v24 = vmul.f32 %v508_v1, %v57_v14  ;;  %v68_v7 = vld [vmem:[%s1030_s0 + $0x1b0] sm:$0xff]  ;;  %v69_v14 = vld [vmem:[%s1030_s0 + $0x1b8] sm:$0xff] }
  0x36   :  { %v129_v25 = vmul.f32 %v508_v1, %v58_v15  ;;  %449 = vst [vmem:[%s1033_s3 + $0x128] sm:$0xff] %v385_v22  ;;  %v386_v26 = vsel %vm258_vm6, %v194_v8, %v322_v18  ;;  %vm259_vm7 = vcmp.ge.f32.partialorder %v195_v19, 0.0  ;;  %v323_v27 = vmul.f32 0.01, %v195_v19 }
  0x37   :  { %vm260_vm8 = vcmp.ge.f32.partialorder %v196_v20, 0.0  ;;  %450 = vst [vmem:[%s1033_s3 + $0x130] sm:$0xff] %v386_v26  ;;  %v324_v30 = vmul.f32 0.01, %v196_v20  ;;  %vm261_vm9 = vcmp.ge.f32.partialorder %v197_v21, 0.0  ;;  %vm262_vm10 = vcmp.ge.f32.partialorder %v198_v23, 0.0 }
  0x38   :  { %v325_v31 = vmul.f32 0.01, %v197_v21  ;;  %v387_v32 = vsel %vm259_vm7, %v195_v19, %v323_v27  ;;  %v326_v33 = vmul.f32 0.01, %v198_v23  ;;  %v199_v34 = vadd.f32 %v513_v2, %v128_v24  ;;  %v70_v19 = vld [vmem:[%s1030_s0 + $0x1c0] sm:$0xff] }
  0x39   :  { %v200_v35 = vadd.f32 %v513_v2, %v129_v25  ;;  %451 = vst [vmem:[%s1033_s3 + $0x138] sm:$0xff] %v387_v32  ;;  %v388_v37 = vsel %vm260_vm8, %v196_v20, %v324_v30  ;;  %v130_v39 = vmul.f32 %v508_v1, %v59_v28  ;;  %v131_v40 = vmul.f32 %v508_v1, %v60_v29  ;;  %v71_v20 = vld [vmem:[%s1030_s0 + $0x1c8] sm:$0xff]  ;;  %v73_v32 = vld [vmem:[%s1030_s0 + $0x1d8] sm:$0xff] }
  0x3a   :  { %v389_v38 = vsel %vm261_vm9, %v197_v21, %v325_v31  ;;  %452 = vst [vmem:[%s1033_s3 + $0x140] sm:$0xff] %v388_v37  ;;  %v390_v44 = vsel %vm262_vm10, %v198_v23, %v326_v33  ;;  %vm263_vm11 = vcmp.ge.f32.partialorder %v199_v34, 0.0  ;;  %v327_v45 = vmul.f32 0.01, %v199_v34  ;;  %v72_v21 = vld [vmem:[%s1030_s0 + $0x1d0] sm:$0xff]  ;;  %v74_v33 = vld [vmem:[%s1030_s0 + $0x1e0] sm:$0xff] }
  0x3b   :  { %453 = vst [vmem:[%s1033_s3 + $0x148] sm:$0xff] %v389_v38  ;;  %vm264_vm12 = vcmp.ge.f32.partialorder %v200_v35, 0.0  ;;  %454 = vst [vmem:[%s1033_s3 + $0x150] sm:$0xff] %v390_v44  ;;  %v328_v46 = vmul.f32 0.01, %v200_v35  ;;  %v201_v47 = vadd.f32 %v513_v2, %v130_v39  ;;  %v202_v48 = vadd.f32 %v513_v2, %v131_v40 }
  0x3c   :  { %v132_v49 = vmul.f32 %v508_v1, %v61_v36  ;;  %v391_v50 = vsel %vm263_vm11, %v199_v34, %v327_v45  ;;  %v133_v51 = vmul.f32 %v508_v1, %v62_v41  ;;  %v134_v52 = vmul.f32 %v508_v1, %v63_v42 }
  0x3d   :  { %v135_v53 = vmul.f32 %v508_v1, %v64_v43  ;;  %455 = vst [vmem:[%s1033_s3 + $0x158] sm:$0xff] %v391_v50  ;;  %v392_v56 = vsel %vm264_vm12, %v200_v35, %v328_v46  ;;  %vm265_vm13 = vcmp.ge.f32.partialorder %v201_v47, 0.0  ;;  %v329_v57 = vmul.f32 0.01, %v201_v47  ;;  %v75_v46 = vld [vmem:[%s1030_s0 + $0x1e8] sm:$0xff] }
  0x3e   :  { %vm266_vm14 = vcmp.ge.f32.partialorder %v202_v48, 0.0  ;;  %456 = vst [vmem:[%s1033_s3 + $0x160] sm:$0xff] %v392_v56  ;;  %v330_v58 = vmul.f32 0.01, %v202_v48  ;;  %v203_v59 = vadd.f32 %v513_v2, %v132_v49  ;;  %v204_v60 = vadd.f32 %v513_v2, %v133_v51 }
  0x3f   :  { %v205_v61 = vadd.f32 %v513_v2, %v134_v52  ;;  %v393_v62 = vsel %vm265_vm13, %v201_v47, %v329_v57  ;;  %v206_v63 = vadd.f32 %v513_v2, %v135_v53  ;;  %v136_v0 = vmul.f32 %v508_v1, %v65_v54  ;;  %v76_v47 = vld [vmem:[%s1030_s0 + $0x1f0] sm:$0xff]  ;;  %v77_v54 = vld [vmem:[%s1030_s0 + $0x1f8] sm:$0xff] }
  0x40   :  { %v137_v3 = vmul.f32 %v508_v1, %v66_v55  ;;  %457 = vst [vmem:[%s1033_s3 + $0x168] sm:$0xff] %v393_v62  ;;  %v394_v4 = vsel %vm266_vm14, %v202_v48, %v330_v58  ;;  %vm267_vm15 = vcmp.ge.f32.partialorder %v203_v59, 0.0  ;;  %v331_v5 = vmul.f32 0.01, %v203_v59 }
  0x41   :  { %vm268_vm0 = vcmp.ge.f32.partialorder %v204_v60, 0.0  ;;  %458 = vst [vmem:[%s1033_s3 + $0x170] sm:$0xff] %v394_v4  ;;  %v332_v8 = vmul.f32 0.01, %v204_v60  ;;  %vm269_vm1 = vcmp.ge.f32.partialorder %v205_v61, 0.0  ;;  %vm270_vm2 = vcmp.ge.f32.partialorder %v206_v63, 0.0 }
  0x42   :  { %v333_v9 = vmul.f32 0.01, %v205_v61  ;;  %v395_v10 = vsel %vm267_vm15, %v203_v59, %v331_v5  ;;  %v334_v11 = vmul.f32 0.01, %v206_v63  ;;  %v207_v12 = vadd.f32 %v513_v2, %v136_v0 }
  0x43   :  { %v208_v13 = vadd.f32 %v513_v2, %v137_v3  ;;  %459 = vst [vmem:[%s1033_s3 + $0x178] sm:$0xff] %v395_v10  ;;  %v396_v15 = vsel %vm268_vm0, %v204_v60, %v332_v8  ;;  %v138_v17 = vmul.f32 %v508_v1, %v67_v6  ;;  %v139_v18 = vmul.f32 %v508_v1, %v68_v7 }
  0x44   :  { %v397_v16 = vsel %vm269_vm1, %v205_v61, %v333_v9  ;;  %460 = vst [vmem:[%s1033_s3 + $0x180] sm:$0xff] %v396_v15  ;;  %v398_v22 = vsel %vm270_vm2, %v206_v63, %v334_v11  ;;  %vm271_vm3 = vcmp.ge.f32.partialorder %v207_v12, 0.0  ;;  %v335_v23 = vmul.f32 0.01, %v207_v12 }
  0x45   :  { %461 = vst [vmem:[%s1033_s3 + $0x188] sm:$0xff] %v397_v16  ;;  %vm272_vm4 = vcmp.ge.f32.partialorder %v208_v13, 0.0  ;;  %462 = vst [vmem:[%s1033_s3 + $0x190] sm:$0xff] %v398_v22  ;;  %v336_v24 = vmul.f32 0.01, %v208_v13  ;;  %v209_v25 = vadd.f32 %v513_v2, %v138_v17  ;;  %v210_v26 = vadd.f32 %v513_v2, %v139_v18 }
  0x46   :  { %v140_v27 = vmul.f32 %v508_v1, %v69_v14  ;;  %v399_v28 = vsel %vm271_vm3, %v207_v12, %v335_v23  ;;  %v141_v29 = vmul.f32 %v508_v1, %v70_v19  ;;  %v142_v30 = vmul.f32 %v508_v1, %v71_v20 }
  0x47   :  { %v143_v31 = vmul.f32 %v508_v1, %v72_v21  ;;  %463 = vst [vmem:[%s1033_s3 + $0x198] sm:$0xff] %v399_v28  ;;  %v400_v34 = vsel %vm272_vm4, %v208_v13, %v336_v24  ;;  %vm273_vm5 = vcmp.ge.f32.partialorder %v209_v25, 0.0  ;;  %v337_v35 = vmul.f32 0.01, %v209_v25 }
  0x48   :  { %vm274_vm6 = vcmp.ge.f32.partialorder %v210_v26, 0.0  ;;  %464 = vst [vmem:[%s1033_s3 + $0x1a0] sm:$0xff] %v400_v34  ;;  %v338_v36 = vmul.f32 0.01, %v210_v26  ;;  %v211_v37 = vadd.f32 %v513_v2, %v140_v27  ;;  %v212_v38 = vadd.f32 %v513_v2, %v141_v29 }
  0x49   :  { %v213_v39 = vadd.f32 %v513_v2, %v142_v30  ;;  %v401_v40 = vsel %vm273_vm5, %v209_v25, %v337_v35  ;;  %v214_v41 = vadd.f32 %v513_v2, %v143_v31  ;;  %v144_v42 = vmul.f32 %v508_v1, %v73_v32 }
  0x4a   :  { %v145_v43 = vmul.f32 %v508_v1, %v74_v33  ;;  %465 = vst [vmem:[%s1033_s3 + $0x1a8] sm:$0xff] %v401_v40  ;;  %v402_v44 = vsel %vm274_vm6, %v210_v26, %v338_v36  ;;  %vm275_vm7 = vcmp.ge.f32.partialorder %v211_v37, 0.0  ;;  %v339_v45 = vmul.f32 0.01, %v211_v37 }
  0x4b   :  { %vm276_vm8 = vcmp.ge.f32.partialorder %v212_v38, 0.0  ;;  %466 = vst [vmem:[%s1033_s3 + $0x1b0] sm:$0xff] %v402_v44  ;;  %v340_v48 = vmul.f32 0.01, %v212_v38  ;;  %vm277_vm9 = vcmp.ge.f32.partialorder %v213_v39, 0.0  ;;  %vm278_vm10 = vcmp.ge.f32.partialorder %v214_v41, 0.0 }
  0x4c   :  { %v341_v49 = vmul.f32 0.01, %v213_v39  ;;  %v403_v50 = vsel %vm275_vm7, %v211_v37, %v339_v45  ;;  %v342_v51 = vmul.f32 0.01, %v214_v41  ;;  %v215_v52 = vadd.f32 %v513_v2, %v144_v42 }
  0x4d   :  { %v216_v53 = vadd.f32 %v513_v2, %v145_v43  ;;  %467 = vst [vmem:[%s1033_s3 + $0x1b8] sm:$0xff] %v403_v50  ;;  %v404_v55 = vsel %vm276_vm8, %v212_v38, %v340_v48  ;;  %v146_v57 = vmul.f32 %v508_v1, %v75_v46  ;;  %v147_v58 = vmul.f32 %v508_v1, %v76_v47 }
  0x4e   :  { %v405_v56 = vsel %vm277_vm9, %v213_v39, %v341_v49  ;;  %468 = vst [vmem:[%s1033_s3 + $0x1c0] sm:$0xff] %v404_v55  ;;  %v406_v59 = vsel %vm278_vm10, %v214_v41, %v342_v51  ;;  %vm279_vm11 = vcmp.ge.f32.partialorder %v215_v52, 0.0  ;;  %v343_v60 = vmul.f32 0.01, %v215_v52 }
  0x4f   :  { %469 = vst [vmem:[%s1033_s3 + $0x1c8] sm:$0xff] %v405_v56  ;;  %vm280_vm12 = vcmp.ge.f32.partialorder %v216_v53, 0.0  ;;  %470 = vst [vmem:[%s1033_s3 + $0x1d0] sm:$0xff] %v406_v59  ;;  %v344_v61 = vmul.f32 0.01, %v216_v53  ;;  %v217_v62 = vadd.f32 %v513_v2, %v146_v57  ;;  %v218_v63 = vadd.f32 %v513_v2, %v147_v58 }
  0x50   :  { %v148_v0 = vmul.f32 %v508_v1, %v77_v54  ;;  %v407_v3 = vsel %vm279_vm11, %v215_v52, %v343_v60 }
  0x51   :  { %471 = vst [vmem:[%s1033_s3 + $0x1d8] sm:$0xff] %v407_v3  ;;  %v408_v4 = vsel %vm280_vm12, %v216_v53, %v344_v61  ;;  %vm281_vm13 = vcmp.ge.f32.partialorder %v217_v62, 0.0  ;;  %v345_v5 = vmul.f32 0.01, %v217_v62  ;;  %vm282_vm14 = vcmp.ge.f32.partialorder %v218_v63, 0.0 }
  0x52   :  { %472 = vst [vmem:[%s1033_s3 + $0x1e0] sm:$0xff] %v408_v4  ;;  %v346_v6 = vmul.f32 0.01, %v218_v63  ;;  %v219_v7 = vadd.f32 %v513_v2, %v148_v0 }
  0x53   :  { %v409_v8 = vsel %vm281_vm13, %v217_v62, %v345_v5 }
  0x54   :  { %473 = vst [vmem:[%s1033_s3 + $0x1e8] sm:$0xff] %v409_v8  ;;  %v410_v1 = vsel %vm282_vm14, %v218_v63, %v346_v6  ;;  %vm283_vm15 = vcmp.ge.f32.partialorder %v219_v7, 0.0  ;;  %v347_v9 = vmul.f32 0.01, %v219_v7 }
  0x55   :  { %474 = vst [vmem:[%s1033_s3 + $0x1f0] sm:$0xff] %v410_v1 }
  0x56   :  { %v411_v10 = vsel %vm283_vm15, %v219_v7, %v347_v9 }
  0x57   :  { %475 = vst [vmem:[%s1033_s3 + $0x1f8] sm:$0xff] %v411_v10 }

// kernel: dip_forward.19
= control target key start
LH: loop header
LB: loop body
LE: loop exit
PB: predicated region body
PF: predicated region fallthrough
CT: control target
= control target key end

     0   :  { %s2118_s1 = inlined_call_operand.vmem [shape: bf16[128,128], index: 1, kind: input, shape index: {}]   ;;  %s2119_s0 = inlined_call_operand.vmem [shape: bf16[512,128], index: 0, kind: input, shape index: {}]   ;;  %s2120_s2 = inlined_call_operand.vmem [shape: f32[1,128], index: 2, kind: input, shape index: {}]   ;;  %s2121_s3 = inlined_call_operand.vmem [shape: f32[512,128], index: 3, kind: output, shape index: {0}]   ;;  %s2122_s4 = inlined_call_operand.vmem [shape: f32[1,8,128], index: 4, kind: output, shape index: {1}]  }
   0x1   :  { %v1477_v0 = vld [vmem:[%s2118_s1 + $0x38] sm:$0xff]   ;;  %v1478_v1 = vld [vmem:[%s2118_s1 + $0x30] sm:$0xff]   ;;  %v1479_v2 = vld [vmem:[%s2118_s1 + $0x28] sm:$0xff]  }
   0x2   :  { %1381 = vmatprep.subr.bf16.mxu0 %v1477_v0  ;;  %1461 = vmatprep.subr.bf16.mxu1 %v1477_v0  ;;  %v1480_v3 = vld [vmem:[%s2118_s1 + $0x20] sm:$0xff]   ;;  %v1481_v5 = vld [vmem:[%s2118_s1 + $0x18] sm:$0xff]   ;;  %v1482_v6 = vld [vmem:[%s2118_s1 + $0x10] sm:$0xff]  }
   0x3   :  { %1382 = vmatpush3.bf16.msra.mxu0 %v1477_v0  ;;  %1469 = vmatpush3.bf16.msra.mxu1 %v1477_v0  ;;  %v1485_v4 = vld [vmem:[%s2119_s0] sm:$0xff]   ;;  %v1483_v7 = vld [vmem:[%s2118_s1 + $0x8] sm:$0xff]   ;;  %v1487_v11 = vld [vmem:[%s2119_s0 + $0x10] sm:$0xff]  }
   0x4   :  { %1383 = vmatprep.subr.bf16.mxu0 %v1478_v1  ;;  %1462 = vmatprep.subr.bf16.mxu1 %v1478_v1  ;;  %v1484_v8 = vld [vmem:[%s2118_s1] sm:$0xff]   ;;  %v1486_v10 = vld [vmem:[%s2119_s0 + $0x8] sm:$0xff]   ;;  %v1503_v13 = vld [vmem:[%s2119_s0 + $0x90] sm:$0xff]  }
   0x5   :  { %1397 = vmatprep.mubr.bf16.mxu0 %v1485_v4  ;;  %v1501_v9 = vld [vmem:[%s2119_s0 + $0x80] sm:$0xff]   ;;  %v1502_v12 = vld [vmem:[%s2119_s0 + $0x88] sm:$0xff]   ;;  %v1488_v14 = vld [vmem:[%s2119_s0 + $0x18] sm:$0xff]  }
   0x6   :  { %1429 = vmatprep.mubr.bf16.mxu1 %v1501_v9  ;;  %v1489_v15 = vld [vmem:[%s2119_s0 + $0x20] sm:$0xff]   ;;  %v1504_v16 = vld [vmem:[%s2119_s0 + $0x98] sm:$0xff]   ;;  %v1490_v18 = vld [vmem:[%s2119_s0 + $0x28] sm:$0xff]  }
   0x7   :  { %1384 = vmatpush3.bf16.msra.mxu0 %v1478_v1  ;;  %1470 = vmatpush3.bf16.msra.mxu1 %v1478_v1  ;;  %v1505_v17 = vld [vmem:[%s2119_s0 + $0xa0] sm:$0xff]   ;;  %v1506_v19 = vld [vmem:[%s2119_s0 + $0xa8] sm:$0xff]   ;;  %v1491_v20 = vld [vmem:[%s2119_s0 + $0x30] sm:$0xff]  }
   0x8   :  { %1385 = vmatprep.subr.bf16.mxu0 %v1479_v2  ;;  %1463 = vmatprep.subr.bf16.mxu1 %v1479_v2  ;;  %v1507_v21 = vld [vmem:[%s2119_s0 + $0xb0] sm:$0xff]   ;;  %v1492_v22 = vld [vmem:[%s2119_s0 + $0x38] sm:$0xff]   ;;  %v1493_v24 = vld [vmem:[%s2119_s0 + $0x40] sm:$0xff]  }
   0x9   :  { %v1508_v23 = vld [vmem:[%s2119_s0 + $0xb8] sm:$0xff]   ;;  %v1509_v25 = vld [vmem:[%s2119_s0 + $0xc0] sm:$0xff]   ;;  %v1494_v26 = vld [vmem:[%s2119_s0 + $0x48] sm:$0xff]  }
   0xa   :  { %v1510_v27 = vld [vmem:[%s2119_s0 + $0xc8] sm:$0xff]   ;;  %v1495_v28 = vld [vmem:[%s2119_s0 + $0x50] sm:$0xff]   ;;  %v1496_v30 = vld [vmem:[%s2119_s0 + $0x58] sm:$0xff]  }
   0xb   :  { %1386 = vmatpush3.bf16.msra.mxu0 %v1479_v2  ;;  %1471 = vmatpush3.bf16.msra.mxu1 %v1479_v2  ;;  %v1511_v29 = vld [vmem:[%s2119_s0 + $0xd0] sm:$0xff]   ;;  %v1512_v31 = vld [vmem:[%s2119_s0 + $0xd8] sm:$0xff]   ;;  %v1497_v32 = vld [vmem:[%s2119_s0 + $0x60] sm:$0xff]  }
   0xc   :  { %1387 = vmatprep.subr.bf16.mxu0 %v1480_v3  ;;  %1464 = vmatprep.subr.bf16.mxu1 %v1480_v3  ;;  %v1513_v33 = vld [vmem:[%s2119_s0 + $0xe0] sm:$0xff]   ;;  %v1498_v34 = vld [vmem:[%s2119_s0 + $0x68] sm:$0xff]   ;;  %v1499_v36 = vld [vmem:[%s2119_s0 + $0x70] sm:$0xff]  }
   0xd   :  { %v1514_v35 = vld [vmem:[%s2119_s0 + $0xe8] sm:$0xff]   ;;  %v1515_v37 = vld [vmem:[%s2119_s0 + $0xf0] sm:$0xff]   ;;  %v1500_v38 = vld [vmem:[%s2119_s0 + $0x78] sm:$0xff]  }
   0xe   :  { %v1516_v39 = vld [vmem:[%s2119_s0 + $0xf8] sm:$0xff]   ;;  %v1665_v40 = vld [vmem:[%s2120_s2] ss:$0 sm:$0xff] }
   0xf   :  { %1388 = vmatpush3.bf16.msra.mxu0 %v1480_v3  ;;  %1472 = vmatpush3.bf16.msra.mxu1 %v1480_v3 }
  0x10   :  { %1389 = vmatprep.subr.bf16.mxu0 %v1481_v5  ;;  %1465 = vmatprep.subr.bf16.mxu1 %v1481_v5 }
  0x13   :  { %1390 = vmatpush3.bf16.msra.mxu0 %v1481_v5  ;;  %1473 = vmatpush3.bf16.msra.mxu1 %v1481_v5 }
  0x14   :  { %1391 = vmatprep.subr.bf16.mxu0 %v1482_v6  ;;  %1466 = vmatprep.subr.bf16.mxu1 %v1482_v6 }
  0x17   :  { %1392 = vmatpush3.bf16.msra.mxu0 %v1482_v6  ;;  %1474 = vmatpush3.bf16.msra.mxu1 %v1482_v6 }
  0x18   :  { %1393 = vmatprep.subr.bf16.mxu0 %v1483_v7  ;;  %1467 = vmatprep.subr.bf16.mxu1 %v1483_v7 }
  0x1b   :  { %1394 = vmatpush3.bf16.msra.mxu0 %v1483_v7  ;;  %1475 = vmatpush3.bf16.msra.mxu1 %v1483_v7 }
  0x1c   :  { %1395 = vmatprep.subr.bf16.mxu0 %v1484_v8  ;;  %1468 = vmatprep.subr.bf16.mxu1 %v1484_v8 }
  0x1f   :  { %1396 = vmatpush3.bf16.msra.mxu0 %v1484_v8  ;;  %1476 = vmatpush3.bf16.msra.mxu1 %v1484_v8 }
  0x22   :  { %1398 = vmatmul.mubr.bf16.vlgmr.msra.gmra.mxu0 %v1486_v10  ;;  %1430 = vmatmul.mubr.bf16.vlgmr.msra.gmra.mxu1 %v1502_v12 }
  0x23   :  { %1401 = vmatprep.mubr.bf16.mxu0 %v1487_v11  ;;  %1433 = vmatprep.mubr.bf16.mxu1 %v1503_v13 }
  0x2a   :  { %1402 = vmatmul.mubr.bf16.gmra.mxu0 %v1488_v14  ;;  %1434 = vmatmul.mubr.bf16.gmra.mxu1 %v1504_v16 }
  0x2b   :  { %1405 = vmatprep.mubr.bf16.mxu0 %v1489_v15  ;;  %1437 = vmatprep.mubr.bf16.mxu1 %v1505_v17 }
  0x32   :  { %1406 = vmatmul.mubr.bf16.gmra.mxu0 %v1490_v18  ;;  %1438 = vmatmul.mubr.bf16.gmra.mxu1 %v1506_v19 }
  0x33   :  { %1409 = vmatprep.mubr.bf16.mxu0 %v1491_v20  ;;  %1441 = vmatprep.mubr.bf16.mxu1 %v1507_v21 }
  0x3a   :  { %1410 = vmatmul.mubr.bf16.gmra.mxu0 %v1492_v22  ;;  %1442 = vmatmul.mubr.bf16.gmra.mxu1 %v1508_v23 }
  0x3b   :  { %1413 = vmatprep.mubr.bf16.mxu0 %v1493_v24  ;;  %1445 = vmatprep.mubr.bf16.mxu1 %v1509_v25 }
  0x42   :  { %1414 = vmatmul.mubr.bf16.gmra.mxu0 %v1494_v26  ;;  %1446 = vmatmul.mubr.bf16.gmra.mxu1 %v1510_v27 }
  0x43   :  { %1417 = vmatprep.mubr.bf16.mxu0 %v1495_v28  ;;  %1449 = vmatprep.mubr.bf16.mxu1 %v1511_v29 }
  0x4a   :  { %1418 = vmatmul.mubr.bf16.gmra.mxu0 %v1496_v30  ;;  %1450 = vmatmul.mubr.bf16.gmra.mxu1 %v1512_v31 }
  0x4b   :  { %1421 = vmatprep.mubr.bf16.mxu0 %v1497_v32  ;;  %1453 = vmatprep.mubr.bf16.mxu1 %v1513_v33 }
  0x52   :  { %1422 = vmatmul.mubr.bf16.gmra.mxu0 %v1498_v34  ;;  %1454 = vmatmul.mubr.bf16.gmra.mxu1 %v1514_v35 }
  0x53   :  { %1425 = vmatprep.mubr.bf16.mxu0 %v1499_v36  ;;  %1457 = vmatprep.mubr.bf16.mxu1 %v1515_v37 }
  0x5a   :  { %1426 = vmatmul.mubr.bf16.gmra.mxu0 %v1500_v38  ;;  %1458 = vmatmul.mubr.bf16.gmra.mxu1 %v1516_v39 }
  0xe2   :  { %v1399_v41 = vpop.f32.mrf.mxu0  ;;  %v1431_v42 = vpop.f32.mrf.mxu1 }
  0xe3   :  { %v387_v43 = vadd.f32 %v1399_v41, %v1665_v40  ;;  %v1669_v44 = vadd.f32 %v1431_v42, %v1665_v40 }
  0xe4   :  { %v378_v45 = vpop.f32.mrf.mxu0  ;;  %v506_v46 = vpop.f32.mrf.mxu1 }
  0xe5   :  { %635 = vst [vmem:[%s2121_s3 + $0x10] sm:$0xff] %v387_v43  ;;  %v379_v47 = vadd.f32 %v1665_v40, %v378_v45  ;;  %667 = vst [vmem:[%s2121_s3 + $0x110] sm:$0xff] %v1669_v44  ;;  %v1680_v48 = vadd.f32 %v1665_v40, %v506_v46  ;;  %v1155_v2 = vmul.f32 %v387_v43, %v387_v43 }
  0xe6   :  { %v1400_v49 = vpop.f32.mrf.mxu0  ;;  %v1432_v50 = vpop.f32.mrf.mxu1 }
  0xe7   :  { %633 = vst [vmem:[%s2121_s3] sm:$0xff] %v379_v47  ;;  %v390_v51 = vadd.f32 %v1400_v49, %v1665_v40  ;;  %665 = vst [vmem:[%s2121_s3 + $0x100] sm:$0xff] %v1680_v48  ;;  %v1691_v52 = vadd.f32 %v1432_v50, %v1665_v40  ;;  %v1153_v59 = vmul.f32 %v379_v47, %v379_v47 }
  0xe8   :  { %v381_v53 = vpop.f32.mrf.mxu0  ;;  %v509_v54 = vpop.f32.mrf.mxu1 }
  0xe9   :  { %636 = vst [vmem:[%s2121_s3 + $0x18] sm:$0xff] %v390_v51  ;;  %v382_v55 = vadd.f32 %v1665_v40, %v381_v53  ;;  %668 = vst [vmem:[%s2121_s3 + $0x118] sm:$0xff] %v1691_v52  ;;  %v1702_v56 = vadd.f32 %v1665_v40, %v509_v54  ;;  %v1156_v9 = vmul.f32 %v390_v51, %v390_v51 }
  0xea   :  { %v1403_v57 = vpop.f32.mrf.mxu0  ;;  %v1435_v58 = vpop.f32.mrf.mxu1 }
  0xeb   :  { %634 = vst [vmem:[%s2121_s3 + $0x8] sm:$0xff] %v382_v55  ;;  %v1084_v60 = vadd.f32 %v382_v55, %v379_v47  ;;  %v1154_v61 = vmul.f32 %v382_v55, %v382_v55  ;;  %v403_v62 = vadd.f32 %v1403_v57, %v1665_v40  ;;  %666 = vst [vmem:[%s2121_s3 + $0x108] sm:$0xff] %v1702_v56 }
  0xec   :  { %v394_v63 = vpop.f32.mrf.mxu0  ;;  %v1713_v0 = vadd.f32 %v1435_v58, %v1665_v40  ;;  %v522_v1 = vpop.f32.mrf.mxu1 }
  0xed   :  { %v1085_v3 = vadd.f32 %v1084_v60, %v387_v43  ;;  %v1217_v4 = vadd.f32 %v1154_v61, %v1153_v59  ;;  %639 = vst [vmem:[%s2121_s3 + $0x30] sm:$0xff] %v403_v62  ;;  %v395_v5 = vadd.f32 %v1665_v40, %v394_v63  ;;  %v1724_v7 = vadd.f32 %v1665_v40, %v522_v1 }
  0xee   :  { %v1404_v6 = vpop.f32.mrf.mxu0  ;;  %671 = vst [vmem:[%s2121_s3 + $0x130] sm:$0xff] %v1713_v0  ;;  %v1436_v8 = vpop.f32.mrf.mxu1  ;;  %v1159_v30 = vmul.f32 %v403_v62, %v403_v62 }
  0xef   :  { %v1218_v10 = vadd.f32 %v1217_v4, %v1155_v2  ;;  %637 = vst [vmem:[%s2121_s3 + $0x20] sm:$0xff] %v395_v5  ;;  %v1086_v11 = vadd.f32 %v1085_v3, %v390_v51  ;;  %v406_v12 = vadd.f32 %v1404_v6, %v1665_v40  ;;  %669 = vst [vmem:[%s2121_s3 + $0x120] sm:$0xff] %v1724_v7 }
  0xf0   :  { %v397_v13 = vpop.f32.mrf.mxu0  ;;  %v1735_v14 = vadd.f32 %v1436_v8, %v1665_v40  ;;  %v525_v15 = vpop.f32.mrf.mxu1  ;;  %v1157_v17 = vmul.f32 %v395_v5, %v395_v5 }
  0xf1   :  { %v1087_v16 = vadd.f32 %v1086_v11, %v395_v5  ;;  %v1219_v18 = vadd.f32 %v1218_v10, %v1156_v9  ;;  %640 = vst [vmem:[%s2121_s3 + $0x38] sm:$0xff] %v406_v12  ;;  %v398_v19 = vadd.f32 %v1665_v40, %v397_v13  ;;  %v1746_v21 = vadd.f32 %v1665_v40, %v525_v15 }
  0xf2   :  { %v1407_v20 = vpop.f32.mrf.mxu0  ;;  %672 = vst [vmem:[%s2121_s3 + $0x138] sm:$0xff] %v1735_v14  ;;  %v1439_v22 = vpop.f32.mrf.mxu1  ;;  %v1160_v37 = vmul.f32 %v406_v12, %v406_v12 }
  0xf3   :  { %v1220_v23 = vadd.f32 %v1219_v18, %v1157_v17  ;;  %638 = vst [vmem:[%s2121_s3 + $0x28] sm:$0xff] %v398_v19  ;;  %v1088_v24 = vadd.f32 %v1087_v16, %v398_v19  ;;  %v1158_v25 = vmul.f32 %v398_v19, %v398_v19  ;;  %v419_v26 = vadd.f32 %v1407_v20, %v1665_v40 }
  0xf4   :  { %v410_v27 = vpop.f32.mrf.mxu0  ;;  %670 = vst [vmem:[%s2121_s3 + $0x128] sm:$0xff] %v1746_v21  ;;  %v1757_v28 = vadd.f32 %v1439_v22, %v1665_v40  ;;  %v538_v29 = vpop.f32.mrf.mxu1 }
  0xf5   :  { %v1089_v31 = vadd.f32 %v1088_v24, %v403_v62  ;;  %v1221_v32 = vadd.f32 %v1220_v23, %v1158_v25  ;;  %643 = vst [vmem:[%s2121_s3 + $0x50] sm:$0xff] %v419_v26  ;;  %v411_v33 = vadd.f32 %v1665_v40, %v410_v27  ;;  %v1768_v35 = vadd.f32 %v1665_v40, %v538_v29 }
  0xf6   :  { %v1408_v34 = vpop.f32.mrf.mxu0  ;;  %675 = vst [vmem:[%s2121_s3 + $0x150] sm:$0xff] %v1757_v28  ;;  %v1440_v36 = vpop.f32.mrf.mxu1  ;;  %v1163_v63 = vmul.f32 %v419_v26, %v419_v26 }
  0xf7   :  { %v1222_v38 = vadd.f32 %v1221_v32, %v1159_v30  ;;  %641 = vst [vmem:[%s2121_s3 + $0x40] sm:$0xff] %v411_v33  ;;  %v1090_v39 = vadd.f32 %v1089_v31, %v406_v12  ;;  %v422_v41 = vadd.f32 %v1408_v34, %v1665_v40  ;;  %673 = vst [vmem:[%s2121_s3 + $0x140] sm:$0xff] %v1768_v35 }
  0xf8   :  { %v413_v42 = vpop.f32.mrf.mxu0  ;;  %v1779_v43 = vadd.f32 %v1440_v36, %v1665_v40  ;;  %v541_v45 = vpop.f32.mrf.mxu1  ;;  %v1161_v47 = vmul.f32 %v411_v33, %v411_v33 }
  0xf9   :  { %v1091_v46 = vadd.f32 %v1090_v39, %v411_v33  ;;  %v1223_v49 = vadd.f32 %v1222_v38, %v1160_v37  ;;  %644 = vst [vmem:[%s2121_s3 + $0x58] sm:$0xff] %v422_v41  ;;  %v414_v50 = vadd.f32 %v1665_v40, %v413_v42  ;;  %v1790_v53 = vadd.f32 %v1665_v40, %v541_v45 }
  0xfa   :  { %v1411_v51 = vpop.f32.mrf.mxu0  ;;  %676 = vst [vmem:[%s2121_s3 + $0x158] sm:$0xff] %v1779_v43  ;;  %v1443_v54 = vpop.f32.mrf.mxu1  ;;  %v1164_v8 = vmul.f32 %v422_v41, %v422_v41 }
  0xfb   :  { %v1224_v55 = vadd.f32 %v1223_v49, %v1161_v47  ;;  %642 = vst [vmem:[%s2121_s3 + $0x48] sm:$0xff] %v414_v50  ;;  %v1092_v57 = vadd.f32 %v1091_v46, %v414_v50  ;;  %v1162_v58 = vmul.f32 %v414_v50, %v414_v50  ;;  %v435_v59 = vadd.f32 %v1411_v51, %v1665_v40 }
  0xfc   :  { %v426_v60 = vpop.f32.mrf.mxu0  ;;  %674 = vst [vmem:[%s2121_s3 + $0x148] sm:$0xff] %v1790_v53  ;;  %v1801_v61 = vadd.f32 %v1443_v54, %v1665_v40  ;;  %v554_v62 = vpop.f32.mrf.mxu1 }
  0xfd   :  { %v1093_v1 = vadd.f32 %v1092_v57, %v419_v26  ;;  %v1225_v2 = vadd.f32 %v1224_v55, %v1162_v58  ;;  %647 = vst [vmem:[%s2121_s3 + $0x70] sm:$0xff] %v435_v59  ;;  %v427_v3 = vadd.f32 %v1665_v40, %v426_v60  ;;  %v1812_v5 = vadd.f32 %v1665_v40, %v554_v62 }
  0xfe   :  { %v1412_v4 = vpop.f32.mrf.mxu0  ;;  %679 = vst [vmem:[%s2121_s3 + $0x170] sm:$0xff] %v1801_v61  ;;  %v1444_v6 = vpop.f32.mrf.mxu1  ;;  %v1167_v32 = vmul.f32 %v435_v59, %v435_v59 }
  0xff   :  { %v1226_v9 = vadd.f32 %v1225_v2, %v1163_v63  ;;  %645 = vst [vmem:[%s2121_s3 + $0x60] sm:$0xff] %v427_v3  ;;  %v1094_v10 = vadd.f32 %v1093_v1, %v422_v41  ;;  %v438_v11 = vadd.f32 %v1412_v4, %v1665_v40  ;;  %677 = vst [vmem:[%s2121_s3 + $0x160] sm:$0xff] %v1812_v5 }
 0x100   :  { %v429_v12 = vpop.f32.mrf.mxu0  ;;  %v1823_v13 = vadd.f32 %v1444_v6, %v1665_v40  ;;  %v557_v15 = vpop.f32.mrf.mxu1  ;;  %v1165_v17 = vmul.f32 %v427_v3, %v427_v3 }
 0x101   :  { %v1095_v16 = vadd.f32 %v1094_v10, %v427_v3  ;;  %v1227_v18 = vadd.f32 %v1226_v9, %v1164_v8  ;;  %648 = vst [vmem:[%s2121_s3 + $0x78] sm:$0xff] %v438_v11  ;;  %v430_v19 = vadd.f32 %v1665_v40, %v429_v12  ;;  %v1834_v22 = vadd.f32 %v1665_v40, %v557_v15 }
 0x102   :  { %v1415_v20 = vpop.f32.mrf.mxu0  ;;  %680 = vst [vmem:[%s2121_s3 + $0x178] sm:$0xff] %v1823_v13  ;;  %v1447_v23 = vpop.f32.mrf.mxu1  ;;  %v1168_v41 = vmul.f32 %v438_v11, %v438_v11 }
 0x103   :  { %v1228_v24 = vadd.f32 %v1227_v18, %v1165_v17  ;;  %646 = vst [vmem:[%s2121_s3 + $0x68] sm:$0xff] %v430_v19  ;;  %v1096_v25 = vadd.f32 %v1095_v16, %v430_v19  ;;  %v1166_v26 = vmul.f32 %v430_v19, %v430_v19  ;;  %v451_v27 = vadd.f32 %v1415_v20, %v1665_v40 }
 0x104   :  { %v442_v29 = vpop.f32.mrf.mxu0  ;;  %678 = vst [vmem:[%s2121_s3 + $0x168] sm:$0xff] %v1834_v22  ;;  %v1845_v30 = vadd.f32 %v1447_v23, %v1665_v40  ;;  %v570_v31 = vpop.f32.mrf.mxu1 }
 0x105   :  { %v1097_v33 = vadd.f32 %v1096_v25, %v435_v59  ;;  %v1229_v34 = vadd.f32 %v1228_v24, %v1166_v26  ;;  %651 = vst [vmem:[%s2121_s3 + $0x90] sm:$0xff] %v451_v27  ;;  %v443_v36 = vadd.f32 %v1665_v40, %v442_v29  ;;  %v1856_v38 = vadd.f32 %v1665_v40, %v570_v31 }
 0x106   :  { %v1416_v37 = vpop.f32.mrf.mxu0  ;;  %683 = vst [vmem:[%s2121_s3 + $0x190] sm:$0xff] %v1845_v30  ;;  %v1448_v39 = vpop.f32.mrf.mxu1  ;;  %v1171_v8 = vmul.f32 %v451_v27, %v451_v27 }
 0x107   :  { %v1230_v42 = vadd.f32 %v1229_v34, %v1167_v32  ;;  %649 = vst [vmem:[%s2121_s3 + $0x80] sm:$0xff] %v443_v36  ;;  %v1098_v45 = vadd.f32 %v1097_v33, %v438_v11  ;;  %v454_v46 = vadd.f32 %v1416_v37, %v1665_v40  ;;  %681 = vst [vmem:[%s2121_s3 + $0x180] sm:$0xff] %v1856_v38 }
 0x108   :  { %v445_v47 = vpop.f32.mrf.mxu0  ;;  %v1867_v49 = vadd.f32 %v1448_v39, %v1665_v40  ;;  %v573_v50 = vpop.f32.mrf.mxu1  ;;  %v1169_v54 = vmul.f32 %v443_v36, %v443_v36 }
 0x109   :  { %v1099_v51 = vadd.f32 %v1098_v45, %v443_v36  ;;  %v1231_v55 = vadd.f32 %v1230_v42, %v1168_v41  ;;  %652 = vst [vmem:[%s2121_s3 + $0x98] sm:$0xff] %v454_v46  ;;  %v446_v57 = vadd.f32 %v1665_v40, %v445_v47  ;;  %v1878_v59 = vadd.f32 %v1665_v40, %v573_v50 }
 0x10a   :  { %v1419_v58 = vpop.f32.mrf.mxu0  ;;  %684 = vst [vmem:[%s2121_s3 + $0x198] sm:$0xff] %v1867_v49  ;;  %v1451_v60 = vpop.f32.mrf.mxu1  ;;  %v1172_v17 = vmul.f32 %v454_v46, %v454_v46 }
 0x10b   :  { %v1232_v62 = vadd.f32 %v1231_v55, %v1169_v54  ;;  %650 = vst [vmem:[%s2121_s3 + $0x88] sm:$0xff] %v446_v57  ;;  %v1100_v63 = vadd.f32 %v1099_v51, %v446_v57  ;;  %v1170_v1 = vmul.f32 %v446_v57, %v446_v57  ;;  %v467_v2 = vadd.f32 %v1419_v58, %v1665_v40 }
 0x10c   :  { %v458_v3 = vpop.f32.mrf.mxu0  ;;  %682 = vst [vmem:[%s2121_s3 + $0x188] sm:$0xff] %v1878_v59  ;;  %v1889_v4 = vadd.f32 %v1451_v60, %v1665_v40  ;;  %v586_v6 = vpop.f32.mrf.mxu1 }
 0x10d   :  { %v1101_v9 = vadd.f32 %v1100_v63, %v451_v27  ;;  %v1233_v10 = vadd.f32 %v1232_v62, %v1170_v1  ;;  %655 = vst [vmem:[%s2121_s3 + $0xb0] sm:$0xff] %v467_v2  ;;  %v459_v11 = vadd.f32 %v1665_v40, %v458_v3  ;;  %v1900_v15 = vadd.f32 %v1665_v40, %v586_v6 }
 0x10e   :  { %v1420_v12 = vpop.f32.mrf.mxu0  ;;  %687 = vst [vmem:[%s2121_s3 + $0x1b0] sm:$0xff] %v1889_v4  ;;  %v1452_v16 = vpop.f32.mrf.mxu1  ;;  %v1175_v47 = vmul.f32 %v467_v2, %v467_v2 }
 0x10f   :  { %v1234_v18 = vadd.f32 %v1233_v10, %v1171_v8  ;;  %653 = vst [vmem:[%s2121_s3 + $0xa0] sm:$0xff] %v459_v11  ;;  %v1102_v19 = vadd.f32 %v1101_v9, %v454_v46  ;;  %v470_v20 = vadd.f32 %v1420_v12, %v1665_v40  ;;  %685 = vst [vmem:[%s2121_s3 + $0x1a0] sm:$0xff] %v1900_v15 }
 0x110   :  { %v461_v23 = vpop.f32.mrf.mxu0  ;;  %v1911_v24 = vadd.f32 %v1452_v16, %v1665_v40  ;;  %v589_v25 = vpop.f32.mrf.mxu1  ;;  %v1173_v27 = vmul.f32 %v459_v11, %v459_v11 }
 0x111   :  { %v1103_v26 = vadd.f32 %v1102_v19, %v459_v11  ;;  %v1235_v29 = vadd.f32 %v1234_v18, %v1172_v17  ;;  %656 = vst [vmem:[%s2121_s3 + $0xb8] sm:$0xff] %v470_v20  ;;  %v462_v31 = vadd.f32 %v1665_v40, %v461_v23  ;;  %v1922_v33 = vadd.f32 %v1665_v40, %v589_v25 }
 0x112   :  { %v1423_v32 = vpop.f32.mrf.mxu0  ;;  %688 = vst [vmem:[%s2121_s3 + $0x1b8] sm:$0xff] %v1911_v24  ;;  %v1455_v34 = vpop.f32.mrf.mxu1  ;;  %v1176_v60 = vmul.f32 %v470_v20, %v470_v20 }
 0x113   :  { %v1236_v36 = vadd.f32 %v1235_v29, %v1173_v27  ;;  %654 = vst [vmem:[%s2121_s3 + $0xa8] sm:$0xff] %v462_v31  ;;  %v1104_v37 = vadd.f32 %v1103_v26, %v462_v31  ;;  %v1174_v39 = vmul.f32 %v462_v31, %v462_v31  ;;  %v483_v41 = vadd.f32 %v1423_v32, %v1665_v40 }
 0x114   :  { %v474_v42 = vpop.f32.mrf.mxu0  ;;  %686 = vst [vmem:[%s2121_s3 + $0x1a8] sm:$0xff] %v1922_v33  ;;  %v1933_v45 = vadd.f32 %v1455_v34, %v1665_v40  ;;  %v602_v46 = vpop.f32.mrf.mxu1 }
 0x115   :  { %v1105_v50 = vadd.f32 %v1104_v37, %v467_v2  ;;  %v1237_v51 = vadd.f32 %v1236_v36, %v1174_v39  ;;  %659 = vst [vmem:[%s2121_s3 + $0xd0] sm:$0xff] %v483_v41  ;;  %v475_v54 = vadd.f32 %v1665_v40, %v474_v42  ;;  %v1944_v57 = vadd.f32 %v1665_v40, %v602_v46 }
 0x116   :  { %v1424_v55 = vpop.f32.mrf.mxu0  ;;  %691 = vst [vmem:[%s2121_s3 + $0x1d0] sm:$0xff] %v1933_v45  ;;  %v1456_v58 = vpop.f32.mrf.mxu1  ;;  %v1179_v29 = vmul.f32 %v483_v41, %v483_v41 }
 0x117   :  { %v1238_v62 = vadd.f32 %v1237_v51, %v1175_v47  ;;  %657 = vst [vmem:[%s2121_s3 + $0xc0] sm:$0xff] %v475_v54  ;;  %v1106_v63 = vadd.f32 %v1105_v50, %v470_v20  ;;  %v486_v1 = vadd.f32 %v1424_v55, %v1665_v40  ;;  %689 = vst [vmem:[%s2121_s3 + $0x1c0] sm:$0xff] %v1944_v57 }
 0x118   :  { %v477_v2 = vpop.f32.mrf.mxu0  ;;  %v1955_v3 = vadd.f32 %v1456_v58, %v1665_v40  ;;  %v605_v6 = vpop.f32.mrf.mxu1  ;;  %v1177_v9 = vmul.f32 %v475_v54, %v475_v54 }
 0x119   :  { %v1107_v8 = vadd.f32 %v1106_v63, %v475_v54  ;;  %v1239_v10 = vadd.f32 %v1238_v62, %v1176_v60  ;;  %660 = vst [vmem:[%s2121_s3 + $0xd8] sm:$0xff] %v486_v1  ;;  %v478_v11 = vadd.f32 %v1665_v40, %v477_v2  ;;  %v1966_v16 = vadd.f32 %v1665_v40, %v605_v6 }
 0x11a   :  { %v1427_v12 = vpop.f32.mrf.mxu0  ;;  %692 = vst [vmem:[%s2121_s3 + $0x1d8] sm:$0xff] %v1955_v3  ;;  %v1459_v17 = vpop.f32.mrf.mxu1  ;;  %v1180_v42 = vmul.f32 %v486_v1, %v486_v1 }
 0x11b   :  { %v1240_v18 = vadd.f32 %v1239_v10, %v1177_v9  ;;  %658 = vst [vmem:[%s2121_s3 + $0xc8] sm:$0xff] %v478_v11  ;;  %v1108_v19 = vadd.f32 %v1107_v8, %v478_v11  ;;  %v1178_v20 = vmul.f32 %v478_v11, %v478_v11  ;;  %v499_v23 = vadd.f32 %v1427_v12, %v1665_v40 }
 0x11c   :  { %v490_v25 = vpop.f32.mrf.mxu0  ;;  %690 = vst [vmem:[%s2121_s3 + $0x1c8] sm:$0xff] %v1966_v16  ;;  %v1977_v26 = vadd.f32 %v1459_v17, %v1665_v40  ;;  %v618_v27 = vpop.f32.mrf.mxu1 }
 0x11d   :  { %v1109_v31 = vadd.f32 %v1108_v19, %v483_v41  ;;  %v1241_v32 = vadd.f32 %v1240_v18, %v1178_v20  ;;  %663 = vst [vmem:[%s2121_s3 + $0xf0] sm:$0xff] %v499_v23  ;;  %v491_v34 = vadd.f32 %v1665_v40, %v490_v25  ;;  %v1988_v37 = vadd.f32 %v1665_v40, %v618_v27 }
 0x11e   :  { %v1428_v36 = vpop.f32.mrf.mxu0  ;;  %695 = vst [vmem:[%s2121_s3 + $0x1f0] sm:$0xff] %v1977_v26  ;;  %v1460_v39 = vpop.f32.mrf.mxu1  ;;  %v1183_v8 = vmul.f32 %v499_v23, %v499_v23  ;;  %v1186_v25 = vmul.f32 %v1702_v56, %v1702_v56 }
 0x11f   :  { %v1242_v46 = vadd.f32 %v1241_v32, %v1179_v29  ;;  %661 = vst [vmem:[%s2121_s3 + $0xe0] sm:$0xff] %v491_v34  ;;  %v1110_v41 = vadd.f32 %v1109_v31, %v486_v1  ;;  %v502_v47 = vadd.f32 %v1428_v36, %v1665_v40  ;;  %693 = vst [vmem:[%s2121_s3 + $0x1e0] sm:$0xff] %v1988_v37 }
 0x120   :  { %v493_v50 = vpop.f32.mrf.mxu0  ;;  %v1999_v51 = vadd.f32 %v1460_v39, %v1665_v40  ;;  %v621_v54 = vpop.f32.mrf.mxu1  ;;  %v1181_v58 = vmul.f32 %v491_v34, %v491_v34  ;;  %v1187_v29 = vmul.f32 %v1669_v44, %v1669_v44  ;;  %v1188_v32 = vmul.f32 %v1691_v52, %v1691_v52 }
 0x121   :  { %v1111_v55 = vadd.f32 %v1110_v41, %v491_v34  ;;  %v1243_v60 = vadd.f32 %v1242_v46, %v1180_v42  ;;  %664 = vst [vmem:[%s2121_s3 + $0xf8] sm:$0xff] %v502_v47  ;;  %v494_v62 = vadd.f32 %v1665_v40, %v493_v50  ;;  %v2010_v63 = vadd.f32 %v1665_v40, %v621_v54 }
 0x122   :  { %696 = vst [vmem:[%s2121_s3 + $0x1f8] sm:$0xff] %v1999_v51  ;;  %v1184_v11 = vmul.f32 %v502_v47, %v502_v47  ;;  %v1185_v40 = vmul.f32 %v1680_v48, %v1680_v48  ;;  %v1189_v39 = vmul.f32 %v1724_v7, %v1724_v7  ;;  %v1190_v41 = vmul.f32 %v1746_v21, %v1746_v21 }
 0x123   :  { %v1244_v1 = vadd.f32 %v1243_v60, %v1181_v58  ;;  %662 = vst [vmem:[%s2121_s3 + $0xe8] sm:$0xff] %v494_v62  ;;  %v1112_v2 = vadd.f32 %v1111_v55, %v494_v62  ;;  %v1182_v6 = vmul.f32 %v494_v62, %v494_v62  ;;  %694 = vst [vmem:[%s2121_s3 + $0x1e8] sm:$0xff] %v2010_v63 }
 0x124   :  { %v1193_v58 = vmul.f32 %v1768_v35, %v1768_v35 }
 0x125   :  { %v1113_v9 = vadd.f32 %v1112_v2, %v499_v23  ;;  %v1245_v10 = vadd.f32 %v1244_v1, %v1182_v6  ;;  %v1194_v1 = vmul.f32 %v1790_v53, %v1790_v53 }
 0x127   :  { %v1246_v12 = vadd.f32 %v1245_v10, %v1183_v8  ;;  %v1114_v17 = vadd.f32 %v1113_v9, %v502_v47  ;;  %v1197_v10 = vmul.f32 %v1812_v5, %v1812_v5 }
 0x129   :  { %v1115_v18 = vadd.f32 %v1114_v17, %v1680_v48  ;;  %v1247_v19 = vadd.f32 %v1246_v12, %v1184_v11  ;;  %v1198_v17 = vmul.f32 %v1834_v22, %v1834_v22 }
 0x12b   :  { %v1116_v20 = vadd.f32 %v1115_v18, %v1702_v56  ;;  %v1248_v27 = vadd.f32 %v1247_v19, %v1185_v40 }
 0x12d   :  { %v1117_v23 = vadd.f32 %v1116_v20, %v1669_v44  ;;  %v1249_v31 = vadd.f32 %v1248_v27, %v1186_v25  ;;  %v1191_v44 = vmul.f32 %v1713_v0, %v1713_v0  ;;  %v1201_v25 = vmul.f32 %v1856_v38, %v1856_v38 }
 0x12f   :  { %v1250_v34 = vadd.f32 %v1249_v31, %v1187_v29  ;;  %v1118_v36 = vadd.f32 %v1117_v23, %v1691_v52  ;;  %v1192_v52 = vmul.f32 %v1735_v14, %v1735_v14  ;;  %v1202_v23 = vmul.f32 %v1878_v59, %v1878_v59 }
 0x131   :  { %v1119_v48 = vadd.f32 %v1118_v36, %v1724_v7  ;;  %v1251_v42 = vadd.f32 %v1250_v34, %v1188_v32 }
 0x133   :  { %v1252_v56 = vadd.f32 %v1251_v42, %v1189_v39  ;;  %v1120_v46 = vadd.f32 %v1119_v48, %v1746_v21  ;;  %v1205_v48 = vmul.f32 %v1900_v15, %v1900_v15 }
 0x135   :  { %v1121_v47 = vadd.f32 %v1120_v46, %v1713_v0  ;;  %v1253_v50 = vadd.f32 %v1252_v56, %v1190_v41  ;;  %v1195_v0 = vmul.f32 %v1757_v28, %v1757_v28  ;;  %v1206_v56 = vmul.f32 %v1922_v33, %v1922_v33 }
 0x137   :  { %v1254_v54 = vadd.f32 %v1253_v50, %v1191_v44  ;;  %v1122_v55 = vadd.f32 %v1121_v47, %v1735_v14  ;;  %v1196_v14 = vmul.f32 %v1779_v43, %v1779_v43  ;;  %v1209_v50 = vmul.f32 %v1944_v57, %v1944_v57 }
 0x139   :  { %v1123_v7 = vadd.f32 %v1122_v55, %v1768_v35  ;;  %v1255_v60 = vadd.f32 %v1254_v54, %v1192_v52  ;;  %v1210_v55 = vmul.f32 %v1966_v16, %v1966_v16 }
 0x13b   :  { %v1256_v62 = vadd.f32 %v1255_v60, %v1193_v58  ;;  %v1124_v21 = vadd.f32 %v1123_v7, %v1790_v53 }
 0x13d   :  { %v1125_v2 = vadd.f32 %v1124_v21, %v1757_v28  ;;  %v1257_v6 = vadd.f32 %v1256_v62, %v1194_v1  ;;  %v1199_v28 = vmul.f32 %v1801_v61, %v1801_v61  ;;  %v1213_v21 = vmul.f32 %v1988_v37, %v1988_v37 }
 0x13f   :  { %v1258_v8 = vadd.f32 %v1257_v6, %v1195_v0  ;;  %v1126_v9 = vadd.f32 %v1125_v2, %v1779_v43  ;;  %v1200_v43 = vmul.f32 %v1823_v13, %v1823_v13  ;;  %v1214_v2 = vmul.f32 %v2010_v63, %v2010_v63 }
 0x141   :  { %v1127_v35 = vadd.f32 %v1126_v9, %v1812_v5  ;;  %v1259_v11 = vadd.f32 %v1258_v8, %v1196_v14 }
 0x143   :  { %v1260_v12 = vadd.f32 %v1259_v11, %v1197_v10  ;;  %v1128_v53 = vadd.f32 %v1127_v35, %v1834_v22 }
 0x145   :  { %v1129_v40 = vadd.f32 %v1128_v53, %v1801_v61  ;;  %v1261_v18 = vadd.f32 %v1260_v12, %v1198_v17  ;;  %v1203_v61 = vmul.f32 %v1845_v30, %v1845_v30  ;;  %v697_v12 = vlaneseq }
 0x147   :  { %v1262_v19 = vadd.f32 %v1261_v18, %v1199_v28  ;;  %v1130_v20 = vadd.f32 %v1129_v40, %v1823_v13  ;;  %v1204_v13 = vmul.f32 %v1867_v49, %v1867_v49  ;;  %v698_v40 = vshrl.u32 %v697_v12, 7 }
 0x149   :  { %v1131_v5 = vadd.f32 %v1130_v20, %v1856_v38  ;;  %v1263_v27 = vadd.f32 %v1262_v19, %v1200_v43  ;;  %vm1286_vm0 = vcmp.eq.s32.totalorder %v698_v40, 0  ;;  %vm1288_vm1 = vcmp.eq.s32.totalorder %v698_v40, 1 }
 0x14b   :  { %v1264_v29 = vadd.f32 %v1263_v27, %v1201_v25  ;;  %v1132_v22 = vadd.f32 %v1131_v5, %v1878_v59 }
 0x14d   :  { %v1133_v31 = vadd.f32 %v1132_v22, %v1845_v30  ;;  %v1265_v32 = vadd.f32 %v1264_v29, %v1202_v23  ;;  %v1207_v30 = vmul.f32 %v1889_v4, %v1889_v4 }
 0x14f   :  { %v1266_v34 = vadd.f32 %v1265_v32, %v1203_v61  ;;  %v1134_v36 = vadd.f32 %v1133_v31, %v1867_v49  ;;  %v1208_v49 = vmul.f32 %v1911_v24, %v1911_v24 }
 0x151   :  { %v1135_v38 = vadd.f32 %v1134_v36, %v1900_v15  ;;  %v1267_v39 = vadd.f32 %v1266_v34, %v1204_v13 }
 0x153   :  { %v1268_v42 = vadd.f32 %v1267_v39, %v1205_v48  ;;  %v1136_v59 = vadd.f32 %v1135_v38, %v1922_v33 }
 0x155   :  { %v1137_v46 = vadd.f32 %v1136_v59, %v1889_v4  ;;  %v1269_v41 = vadd.f32 %v1268_v42, %v1206_v56  ;;  %v1211_v4 = vmul.f32 %v1933_v45, %v1933_v45 }
 0x157   :  { %v1270_v44 = vadd.f32 %v1269_v41, %v1207_v30  ;;  %v1138_v47 = vadd.f32 %v1137_v46, %v1911_v24  ;;  %v1212_v24 = vmul.f32 %v1955_v3, %v1955_v3 }
 0x159   :  { %v1139_v15 = vadd.f32 %v1138_v47, %v1944_v57  ;;  %v1271_v52 = vadd.f32 %v1270_v44, %v1208_v49 }
 0x15b   :  { %v1272_v54 = vadd.f32 %v1271_v52, %v1209_v50  ;;  %v1140_v33 = vadd.f32 %v1139_v15, %v1966_v16 }
 0x15d   :  { %v1141_v7 = vadd.f32 %v1140_v33, %v1933_v45  ;;  %v1273_v58 = vadd.f32 %v1272_v54, %v1210_v55  ;;  %v1215_v45 = vmul.f32 %v1977_v26, %v1977_v26 }
 0x15f   :  { %v1274_v60 = vadd.f32 %v1273_v58, %v1211_v4  ;;  %v1142_v62 = vadd.f32 %v1141_v7, %v1955_v3  ;;  %v1216_v3 = vmul.f32 %v1999_v51, %v1999_v51 }
 0x161   :  { %v1143_v57 = vadd.f32 %v1142_v62, %v1988_v37  ;;  %v1275_v1 = vadd.f32 %v1274_v60, %v1212_v24 }
 0x163   :  { %v1276_v0 = vadd.f32 %v1275_v1, %v1213_v21  ;;  %v1144_v16 = vadd.f32 %v1143_v57, %v2010_v63 }
 0x165   :  { %v1145_v6 = vadd.f32 %v1144_v16, %v1977_v26  ;;  %v1277_v14 = vadd.f32 %v1276_v0, %v1214_v2 }
 0x167   :  { %v1146_v8 = vadd.f32 %v1145_v6, %v1999_v51  ;;  %v1278_v9 = vadd.f32 %v1277_v14, %v1215_v45 }
 0x169   :  { %v1147_v37 = vrot.slane %v1146_v8, 4  ;;  %v1279_v35 = vadd.f32 %v1278_v9, %v1216_v3 }
 0x16b   :  { %v1148_v10 = vadd.f32 %v1147_v37, %v1146_v8  ;;  %v1280_v11 = vrot.slane %v1279_v35, 4 }
 0x16d   :  { %v1149_v53 = vrot.slane %v1148_v10, 2  ;;  %v1281_v17 = vadd.f32 %v1280_v11, %v1279_v35 }
 0x16f   :  { %v1150_v63 = vadd.f32 %v1149_v53, %v1148_v10  ;;  %v1282_v28 = vrot.slane %v1281_v17, 2 }
 0x171   :  { %v1151_v18 = vrot.slane %v1150_v63, 1  ;;  %v1283_v43 = vadd.f32 %v1282_v28, %v1281_v17 }
 0x173   :  { %v1152_v26 = vadd.f32 %v1151_v18, %v1150_v63  ;;  %v1284_v19 = vrot.slane %v1283_v43, 1 }
 0x175   :  { %v1285_v20 = vadd.f32 %v1284_v19, %v1283_v43  ;;  %v1287_v5 = vsel %vm1286_vm0, %v1152_v26, 0.0 }
 0x177   :  { %v1289_v51 = vsel %vm1288_vm1, %v1285_v20, 0.0 }
 0x178   :  { %v1290_v25 = vadd.f32 %v1289_v51, %v1287_v5 }
 0x17a   :  { %1291 = vst [vmem:[%s2122_s4] sm:$0xff] %v1290_v25 }

// kernel: dip_forward.22
= control target key start
LH: loop header
LB: loop body
LE: loop exit
PB: predicated region body
PF: predicated region fallthrough
CT: control target
= control target key end

     0   :  { %s803_s0 = inlined_call_operand.vmem [shape: f32[392,128], index: 0, kind: input, shape index: {}]   ;;  %s804_s1 = inlined_call_operand.vmem [shape: f32[1,128], index: 1, kind: input, shape index: {}]   ;;  %s805_s2 = inlined_call_operand.vmem [shape: f32[1,128], index: 2, kind: input, shape index: {}]   ;;  %s806_s3 = inlined_call_operand.vmem [shape: f32[392,128], index: 3, kind: output, shape index: {}]  }
   0x1   :  { %v14_v0 = vld [vmem:[%s803_s0] sm:$0xff]  ;;  %v15_v4 = vld [vmem:[%s803_s0 + $0x8] sm:$0xff]  ;;  %v16_v5 = vld [vmem:[%s803_s0 + $0x10] sm:$0xff] }
   0x2   :  { %v403_v1 = vld [vmem:[%s804_s1] ss:$0 sm:$0xff]  ;;  %v17_v6 = vld [vmem:[%s803_s0 + $0x18] sm:$0xff]  ;;  %v19_v11 = vld [vmem:[%s803_s0 + $0x28] sm:$0xff] }
   0x3   :  { %v408_v2 = vld [vmem:[%s805_s2] ss:$0 sm:$0xff]  ;;  %v70_v3 = vmul.f32 %v403_v1, %v14_v0  ;;  %v71_v7 = vmul.f32 %v403_v1, %v15_v4  ;;  %v72_v8 = vmul.f32 %v403_v1, %v16_v5  ;;  %v73_v9 = vmul.f32 %v403_v1, %v17_v6  ;;  %v20_v12 = vld [vmem:[%s803_s0 + $0x30] sm:$0xff]  ;;  %v21_v17 = vld [vmem:[%s803_s0 + $0x38] sm:$0xff] }
   0x4   :  { %v18_v10 = vld [vmem:[%s803_s0 + $0x20] sm:$0xff]  ;;  %v75_v15 = vmul.f32 %v403_v1, %v19_v11  ;;  %v76_v16 = vmul.f32 %v403_v1, %v20_v12  ;;  %v77_v21 = vmul.f32 %v403_v1, %v21_v17  ;;  %v23_v30 = vld [vmem:[%s803_s0 + $0x48] sm:$0xff]  ;;  %v24_v31 = vld [vmem:[%s803_s0 + $0x50] sm:$0xff] }
   0x5   :  { %v126_v13 = vadd.f32 %v408_v2, %v70_v3  ;;  %v74_v14 = vmul.f32 %v403_v1, %v18_v10  ;;  %v127_v18 = vadd.f32 %v408_v2, %v71_v7  ;;  %v128_v19 = vadd.f32 %v408_v2, %v72_v8  ;;  %v22_v25 = vld [vmem:[%s803_s0 + $0x40] sm:$0xff]  ;;  %v25_v43 = vld [vmem:[%s803_s0 + $0x58] sm:$0xff]  ;;  %v27_v45 = vld [vmem:[%s803_s0 + $0x68] sm:$0xff] }
   0x6   :  { %v129_v20 = vadd.f32 %v408_v2, %v73_v9  ;;  %v131_v24 = vadd.f32 %v408_v2, %v75_v15  ;;  %v132_v37 = vadd.f32 %v408_v2, %v76_v16  ;;  %v133_v38 = vadd.f32 %v408_v2, %v77_v21  ;;  %v26_v44 = vld [vmem:[%s803_s0 + $0x60] sm:$0xff]  ;;  %v28_v56 = vld [vmem:[%s803_s0 + $0x70] sm:$0xff]  ;;  %v29_v4 = vld [vmem:[%s803_s0 + $0x78] sm:$0xff] }
   0x7   :  { %vm175_vm0 = vcmp.ge.f32.partialorder %v126_v13, 0.0  ;;  %v224_v22 = vmul.f32 0.01, %v126_v13  ;;  %v130_v23 = vadd.f32 %v408_v2, %v74_v14  ;;  %vm176_vm1 = vcmp.ge.f32.partialorder %v127_v18, 0.0  ;;  %v30_v5 = vld [vmem:[%s803_s0 + $0x80] sm:$0xff]  ;;  %v31_v9 = vld [vmem:[%s803_s0 + $0x88] sm:$0xff] }
   0x8   :  { %v225_v26 = vmul.f32 0.01, %v127_v18  ;;  %vm177_vm2 = vcmp.ge.f32.partialorder %v128_v19, 0.0  ;;  %v226_v27 = vmul.f32 0.01, %v128_v19  ;;  %vm178_vm3 = vcmp.ge.f32.partialorder %v129_v20, 0.0 }
   0x9   :  { %v273_v28 = vsel %vm175_vm0, %v126_v13, %v224_v22  ;;  %v227_v29 = vmul.f32 0.01, %v129_v20  ;;  %vm179_vm4 = vcmp.ge.f32.partialorder %v130_v23, 0.0  ;;  %v228_v34 = vmul.f32 0.01, %v130_v23  ;;  %v32_v10 = vld [vmem:[%s803_s0 + $0x90] sm:$0xff] }
   0xa   :  { %322 = vst [vmem:[%s806_s3] sm:$0xff] %v273_v28  ;;  %v274_v32 = vsel %vm176_vm1, %v127_v18, %v225_v26  ;;  %v275_v33 = vsel %vm177_vm2, %v128_v19, %v226_v27  ;;  %vm180_vm5 = vcmp.ge.f32.partialorder %v131_v24, 0.0  ;;  %v229_v36 = vmul.f32 0.01, %v131_v24  ;;  %v33_v17 = vld [vmem:[%s803_s0 + $0x98] sm:$0xff]  ;;  %v34_v18 = vld [vmem:[%s803_s0 + $0xa0] sm:$0xff] }
   0xb   :  { %323 = vst [vmem:[%s806_s3 + $0x8] sm:$0xff] %v274_v32  ;;  %324 = vst [vmem:[%s806_s3 + $0x10] sm:$0xff] %v275_v33  ;;  %v276_v35 = vsel %vm178_vm3, %v129_v20, %v227_v29  ;;  %v277_v39 = vsel %vm179_vm4, %v130_v23, %v228_v34  ;;  %v78_v40 = vmul.f32 %v403_v1, %v22_v25  ;;  %vm181_vm6 = vcmp.ge.f32.partialorder %v132_v37, 0.0  ;;  %v35_v32 = vld [vmem:[%s803_s0 + $0xa8] sm:$0xff]  ;;  %v36_v33 = vld [vmem:[%s803_s0 + $0xb0] sm:$0xff] }
   0xc   :  { %325 = vst [vmem:[%s806_s3 + $0x18] sm:$0xff] %v276_v35  ;;  %v79_v41 = vmul.f32 %v403_v1, %v23_v30  ;;  %v80_v42 = vmul.f32 %v403_v1, %v24_v31  ;;  %326 = vst [vmem:[%s806_s3 + $0x20] sm:$0xff] %v277_v39  ;;  %v278_v46 = vsel %vm180_vm5, %v131_v24, %v229_v36  ;;  %v230_v47 = vmul.f32 0.01, %v132_v37 }
   0xd   :  { %vm182_vm7 = vcmp.ge.f32.partialorder %v133_v38, 0.0  ;;  %327 = vst [vmem:[%s806_s3 + $0x28] sm:$0xff] %v278_v46  ;;  %v231_v48 = vmul.f32 0.01, %v133_v38  ;;  %v134_v49 = vadd.f32 %v408_v2, %v78_v40  ;;  %v81_v53 = vmul.f32 %v403_v1, %v25_v43  ;;  %v37_v40 = vld [vmem:[%s803_s0 + $0xb8] sm:$0xff]  ;;  %v39_v46 = vld [vmem:[%s803_s0 + $0xc8] sm:$0xff] }
   0xe   :  { %v135_v50 = vadd.f32 %v408_v2, %v79_v41  ;;  %v136_v51 = vadd.f32 %v408_v2, %v80_v42  ;;  %v279_v52 = vsel %vm181_vm6, %v132_v37, %v230_v47  ;;  %v82_v54 = vmul.f32 %v403_v1, %v26_v44  ;;  %v40_v47 = vld [vmem:[%s803_s0 + $0xd0] sm:$0xff] }
   0xf   :  { %v83_v55 = vmul.f32 %v403_v1, %v27_v45  ;;  %328 = vst [vmem:[%s806_s3 + $0x30] sm:$0xff] %v279_v52  ;;  %v280_v57 = vsel %vm182_vm7, %v133_v38, %v231_v48  ;;  %vm183_vm8 = vcmp.ge.f32.partialorder %v134_v49, 0.0  ;;  %v232_v58 = vmul.f32 0.01, %v134_v49  ;;  %v38_v45 = vld [vmem:[%s803_s0 + $0xc0] sm:$0xff] }
  0x10   :  { %vm184_vm9 = vcmp.ge.f32.partialorder %v135_v50, 0.0  ;;  %329 = vst [vmem:[%s806_s3 + $0x38] sm:$0xff] %v280_v57  ;;  %v233_v59 = vmul.f32 0.01, %v135_v50  ;;  %vm185_vm10 = vcmp.ge.f32.partialorder %v136_v51, 0.0  ;;  %v137_v61 = vadd.f32 %v408_v2, %v81_v53 }
  0x11   :  { %v234_v60 = vmul.f32 0.01, %v136_v51  ;;  %v281_v62 = vsel %vm183_vm8, %v134_v49, %v232_v58  ;;  %v138_v63 = vadd.f32 %v408_v2, %v82_v54  ;;  %v139_v0 = vadd.f32 %v408_v2, %v83_v55  ;;  %v41_v58 = vld [vmem:[%s803_s0 + $0xd8] sm:$0xff] }
  0x12   :  { %v84_v3 = vmul.f32 %v403_v1, %v28_v56  ;;  %330 = vst [vmem:[%s806_s3 + $0x40] sm:$0xff] %v281_v62  ;;  %v282_v6 = vsel %vm184_vm9, %v135_v50, %v233_v59  ;;  %vm186_vm11 = vcmp.ge.f32.partialorder %v137_v61, 0.0  ;;  %v235_v8 = vmul.f32 0.01, %v137_v61  ;;  %v42_v59 = vld [vmem:[%s803_s0 + $0xe0] sm:$0xff] }
  0x13   :  { %v283_v7 = vsel %vm185_vm10, %v136_v51, %v234_v60  ;;  %331 = vst [vmem:[%s806_s3 + $0x48] sm:$0xff] %v282_v6  ;;  %vm187_vm12 = vcmp.ge.f32.partialorder %v138_v63, 0.0  ;;  %v236_v11 = vmul.f32 0.01, %v138_v63  ;;  %vm188_vm13 = vcmp.ge.f32.partialorder %v139_v0, 0.0 }
  0x14   :  { %332 = vst [vmem:[%s806_s3 + $0x50] sm:$0xff] %v283_v7  ;;  %v237_v12 = vmul.f32 0.01, %v139_v0  ;;  %v284_v13 = vsel %vm186_vm11, %v137_v61, %v235_v8  ;;  %v140_v14 = vadd.f32 %v408_v2, %v84_v3  ;;  %v85_v15 = vmul.f32 %v403_v1, %v29_v4 }
  0x15   :  { %v86_v16 = vmul.f32 %v403_v1, %v30_v5  ;;  %333 = vst [vmem:[%s806_s3 + $0x58] sm:$0xff] %v284_v13  ;;  %v285_v19 = vsel %vm187_vm12, %v138_v63, %v236_v11  ;;  %v87_v21 = vmul.f32 %v403_v1, %v31_v9  ;;  %v88_v22 = vmul.f32 %v403_v1, %v32_v10  ;;  %v43_v10 = vld [vmem:[%s803_s0 + $0xe8] sm:$0xff]  ;;  %v44_v11 = vld [vmem:[%s803_s0 + $0xf0] sm:$0xff] }
  0x16   :  { %v286_v20 = vsel %vm188_vm13, %v139_v0, %v237_v12  ;;  %334 = vst [vmem:[%s806_s3 + $0x60] sm:$0xff] %v285_v19  ;;  %vm189_vm14 = vcmp.ge.f32.partialorder %v140_v14, 0.0  ;;  %v238_v23 = vmul.f32 0.01, %v140_v14  ;;  %v141_v24 = vadd.f32 %v408_v2, %v85_v15 }
  0x17   :  { %335 = vst [vmem:[%s806_s3 + $0x68] sm:$0xff] %v286_v20  ;;  %v142_v25 = vadd.f32 %v408_v2, %v86_v16  ;;  %v143_v26 = vadd.f32 %v408_v2, %v87_v21  ;;  %v144_v27 = vadd.f32 %v408_v2, %v88_v22  ;;  %v89_v28 = vmul.f32 %v403_v1, %v33_v17 }
  0x18   :  { %v90_v29 = vmul.f32 %v403_v1, %v34_v18  ;;  %v287_v30 = vsel %vm189_vm14, %v140_v14, %v238_v23  ;;  %vm190_vm15 = vcmp.ge.f32.partialorder %v141_v24, 0.0  ;;  %v239_v31 = vmul.f32 0.01, %v141_v24  ;;  %v45_v18 = vld [vmem:[%s803_s0 + $0xf8] sm:$0xff]  ;;  %v46_v23 = vld [vmem:[%s803_s0 + $0x100] sm:$0xff] }
  0x19   :  { %vm191_vm0 = vcmp.ge.f32.partialorder %v142_v25, 0.0  ;;  %336 = vst [vmem:[%s806_s3 + $0x70] sm:$0xff] %v287_v30  ;;  %v240_v34 = vmul.f32 0.01, %v142_v25  ;;  %vm192_vm1 = vcmp.ge.f32.partialorder %v143_v26, 0.0  ;;  %vm193_vm2 = vcmp.ge.f32.partialorder %v144_v27, 0.0 }
  0x1a   :  { %v241_v35 = vmul.f32 0.01, %v143_v26  ;;  %v288_v36 = vsel %vm190_vm15, %v141_v24, %v239_v31  ;;  %v242_v37 = vmul.f32 0.01, %v144_v27  ;;  %v145_v38 = vadd.f32 %v408_v2, %v89_v28  ;;  %v47_v24 = vld [vmem:[%s803_s0 + $0x108] sm:$0xff] }
  0x1b   :  { %v146_v39 = vadd.f32 %v408_v2, %v90_v29  ;;  %337 = vst [vmem:[%s806_s3 + $0x78] sm:$0xff] %v288_v36  ;;  %v289_v41 = vsel %vm191_vm0, %v142_v25, %v240_v34  ;;  %v91_v43 = vmul.f32 %v403_v1, %v35_v32  ;;  %v92_v44 = vmul.f32 %v403_v1, %v36_v33  ;;  %v48_v25 = vld [vmem:[%s803_s0 + $0x110] sm:$0xff]  ;;  %v49_v36 = vld [vmem:[%s803_s0 + $0x118] sm:$0xff] }
  0x1c   :  { %v290_v42 = vsel %vm192_vm1, %v143_v26, %v241_v35  ;;  %338 = vst [vmem:[%s806_s3 + $0x80] sm:$0xff] %v289_v41  ;;  %v291_v48 = vsel %vm193_vm2, %v144_v27, %v242_v37  ;;  %vm194_vm3 = vcmp.ge.f32.partialorder %v145_v38, 0.0  ;;  %v243_v49 = vmul.f32 0.01, %v145_v38  ;;  %v50_v37 = vld [vmem:[%s803_s0 + $0x120] sm:$0xff] }
  0x1d   :  { %339 = vst [vmem:[%s806_s3 + $0x88] sm:$0xff] %v290_v42  ;;  %vm195_vm4 = vcmp.ge.f32.partialorder %v146_v39, 0.0  ;;  %340 = vst [vmem:[%s806_s3 + $0x90] sm:$0xff] %v291_v48  ;;  %v244_v50 = vmul.f32 0.01, %v146_v39  ;;  %v147_v51 = vadd.f32 %v408_v2, %v91_v43  ;;  %v148_v52 = vadd.f32 %v408_v2, %v92_v44 }
  0x1e   :  { %v93_v53 = vmul.f32 %v403_v1, %v37_v40  ;;  %v292_v54 = vsel %vm194_vm3, %v145_v38, %v243_v49  ;;  %v94_v55 = vmul.f32 %v403_v1, %v38_v45  ;;  %v95_v56 = vmul.f32 %v403_v1, %v39_v46 }
  0x1f   :  { %v96_v57 = vmul.f32 %v403_v1, %v40_v47  ;;  %341 = vst [vmem:[%s806_s3 + $0x98] sm:$0xff] %v292_v54  ;;  %v293_v60 = vsel %vm195_vm4, %v146_v39, %v244_v50  ;;  %vm196_vm5 = vcmp.ge.f32.partialorder %v147_v51, 0.0  ;;  %v245_v61 = vmul.f32 0.01, %v147_v51  ;;  %v51_v50 = vld [vmem:[%s803_s0 + $0x128] sm:$0xff] }
  0x20   :  { %vm197_vm6 = vcmp.ge.f32.partialorder %v148_v52, 0.0  ;;  %342 = vst [vmem:[%s806_s3 + $0xa0] sm:$0xff] %v293_v60  ;;  %v246_v62 = vmul.f32 0.01, %v148_v52  ;;  %v149_v63 = vadd.f32 %v408_v2, %v93_v53  ;;  %v150_v0 = vadd.f32 %v408_v2, %v94_v55 }
  0x21   :  { %v151_v3 = vadd.f32 %v408_v2, %v95_v56  ;;  %v294_v4 = vsel %vm196_vm5, %v147_v51, %v245_v61  ;;  %v152_v5 = vadd.f32 %v408_v2, %v96_v57  ;;  %v97_v6 = vmul.f32 %v403_v1, %v41_v58  ;;  %v52_v51 = vld [vmem:[%s803_s0 + $0x130] sm:$0xff]  ;;  %v53_v58 = vld [vmem:[%s803_s0 + $0x138] sm:$0xff] }
  0x22   :  { %v98_v7 = vmul.f32 %v403_v1, %v42_v59  ;;  %343 = vst [vmem:[%s806_s3 + $0xa8] sm:$0xff] %v294_v4  ;;  %v295_v8 = vsel %vm197_vm6, %v148_v52, %v246_v62  ;;  %vm198_vm7 = vcmp.ge.f32.partialorder %v149_v63, 0.0  ;;  %v247_v9 = vmul.f32 0.01, %v149_v63 }
  0x23   :  { %vm199_vm8 = vcmp.ge.f32.partialorder %v150_v0, 0.0  ;;  %344 = vst [vmem:[%s806_s3 + $0xb0] sm:$0xff] %v295_v8  ;;  %v248_v12 = vmul.f32 0.01, %v150_v0  ;;  %vm200_vm9 = vcmp.ge.f32.partialorder %v151_v3, 0.0  ;;  %vm201_vm10 = vcmp.ge.f32.partialorder %v152_v5, 0.0 }
  0x24   :  { %v249_v13 = vmul.f32 0.01, %v151_v3  ;;  %v296_v14 = vsel %vm198_vm7, %v149_v63, %v247_v9  ;;  %v250_v15 = vmul.f32 0.01, %v152_v5  ;;  %v153_v16 = vadd.f32 %v408_v2, %v97_v6  ;;  %v54_v63 = vld [vmem:[%s803_s0 + $0x140] sm:$0xff] }
  0x25   :  { %v154_v17 = vadd.f32 %v408_v2, %v98_v7  ;;  %345 = vst [vmem:[%s806_s3 + $0xb8] sm:$0xff] %v296_v14  ;;  %v297_v19 = vsel %vm199_vm8, %v150_v0, %v248_v12  ;;  %v99_v21 = vmul.f32 %v403_v1, %v43_v10  ;;  %v100_v22 = vmul.f32 %v403_v1, %v44_v11  ;;  %v55_v0 = vld [vmem:[%s803_s0 + $0x148] sm:$0xff]  ;;  %v57_v14 = vld [vmem:[%s803_s0 + $0x158] sm:$0xff] }
  0x26   :  { %v298_v20 = vsel %vm200_vm9, %v151_v3, %v249_v13  ;;  %346 = vst [vmem:[%s806_s3 + $0xc0] sm:$0xff] %v297_v19  ;;  %v299_v26 = vsel %vm201_vm10, %v152_v5, %v250_v15  ;;  %vm202_vm11 = vcmp.ge.f32.partialorder %v153_v16, 0.0  ;;  %v251_v27 = vmul.f32 0.01, %v153_v16  ;;  %v56_v3 = vld [vmem:[%s803_s0 + $0x150] sm:$0xff]  ;;  %v58_v15 = vld [vmem:[%s803_s0 + $0x160] sm:$0xff] }
  0x27   :  { %347 = vst [vmem:[%s806_s3 + $0xc8] sm:$0xff] %v298_v20  ;;  %vm203_vm12 = vcmp.ge.f32.partialorder %v154_v17, 0.0  ;;  %348 = vst [vmem:[%s806_s3 + $0xd0] sm:$0xff] %v299_v26  ;;  %v252_v28 = vmul.f32 0.01, %v154_v17  ;;  %v155_v29 = vadd.f32 %v408_v2, %v99_v21  ;;  %v156_v30 = vadd.f32 %v408_v2, %v100_v22 }
  0x28   :  { %v101_v31 = vmul.f32 %v403_v1, %v45_v18  ;;  %v300_v32 = vsel %vm202_vm11, %v153_v16, %v251_v27  ;;  %v102_v33 = vmul.f32 %v403_v1, %v46_v23  ;;  %v103_v34 = vmul.f32 %v403_v1, %v47_v24 }
  0x29   :  { %v104_v35 = vmul.f32 %v403_v1, %v48_v25  ;;  %349 = vst [vmem:[%s806_s3 + $0xd8] sm:$0xff] %v300_v32  ;;  %v301_v38 = vsel %vm203_vm12, %v154_v17, %v252_v28  ;;  %vm204_vm13 = vcmp.ge.f32.partialorder %v155_v29, 0.0  ;;  %v253_v39 = vmul.f32 0.01, %v155_v29  ;;  %v59_v28 = vld [vmem:[%s803_s0 + $0x168] sm:$0xff] }
  0x2a   :  { %vm205_vm14 = vcmp.ge.f32.partialorder %v156_v30, 0.0  ;;  %350 = vst [vmem:[%s806_s3 + $0xe0] sm:$0xff] %v301_v38  ;;  %v254_v40 = vmul.f32 0.01, %v156_v30  ;;  %v157_v41 = vadd.f32 %v408_v2, %v101_v31  ;;  %v158_v42 = vadd.f32 %v408_v2, %v102_v33 }
  0x2b   :  { %v159_v43 = vadd.f32 %v408_v2, %v103_v34  ;;  %v302_v44 = vsel %vm204_vm13, %v155_v29, %v253_v39  ;;  %v160_v45 = vadd.f32 %v408_v2, %v104_v35  ;;  %v105_v46 = vmul.f32 %v403_v1, %v49_v36  ;;  %v60_v29 = vld [vmem:[%s803_s0 + $0x170] sm:$0xff]  ;;  %v61_v36 = vld [vmem:[%s803_s0 + $0x178] sm:$0xff] }
  0x2c   :  { %v106_v47 = vmul.f32 %v403_v1, %v50_v37  ;;  %351 = vst [vmem:[%s806_s3 + $0xe8] sm:$0xff] %v302_v44  ;;  %v303_v48 = vsel %vm205_vm14, %v156_v30, %v254_v40  ;;  %vm206_vm15 = vcmp.ge.f32.partialorder %v157_v41, 0.0  ;;  %v255_v49 = vmul.f32 0.01, %v157_v41 }
  0x2d   :  { %vm207_vm0 = vcmp.ge.f32.partialorder %v158_v42, 0.0  ;;  %352 = vst [vmem:[%s806_s3 + $0xf0] sm:$0xff] %v303_v48  ;;  %v256_v52 = vmul.f32 0.01, %v158_v42  ;;  %vm208_vm1 = vcmp.ge.f32.partialorder %v159_v43, 0.0  ;;  %vm209_vm2 = vcmp.ge.f32.partialorder %v160_v45, 0.0 }
  0x2e   :  { %v257_v53 = vmul.f32 0.01, %v159_v43  ;;  %v304_v54 = vsel %vm206_vm15, %v157_v41, %v255_v49  ;;  %v258_v55 = vmul.f32 0.01, %v160_v45  ;;  %v161_v56 = vadd.f32 %v408_v2, %v105_v46  ;;  %v62_v41 = vld [vmem:[%s803_s0 + $0x180] sm:$0xff] }
  0x2f   :  { %v162_v57 = vadd.f32 %v408_v2, %v106_v47  ;;  %353 = vst [vmem:[%s806_s3 + $0xf8] sm:$0xff] %v304_v54  ;;  %v305_v59 = vsel %vm207_vm0, %v158_v42, %v256_v52  ;;  %v107_v61 = vmul.f32 %v403_v1, %v51_v50  ;;  %v108_v62 = vmul.f32 %v403_v1, %v52_v51 }
  0x30   :  { %v306_v60 = vsel %vm208_vm1, %v159_v43, %v257_v53  ;;  %354 = vst [vmem:[%s806_s3 + $0x100] sm:$0xff] %v305_v59  ;;  %v307_v4 = vsel %vm209_vm2, %v160_v45, %v258_v55  ;;  %vm210_vm3 = vcmp.ge.f32.partialorder %v161_v56, 0.0  ;;  %v259_v5 = vmul.f32 0.01, %v161_v56 }
  0x31   :  { %355 = vst [vmem:[%s806_s3 + $0x108] sm:$0xff] %v306_v60  ;;  %vm211_vm4 = vcmp.ge.f32.partialorder %v162_v57, 0.0  ;;  %356 = vst [vmem:[%s806_s3 + $0x110] sm:$0xff] %v307_v4  ;;  %v260_v6 = vmul.f32 0.01, %v162_v57  ;;  %v163_v7 = vadd.f32 %v408_v2, %v107_v61  ;;  %v164_v8 = vadd.f32 %v408_v2, %v108_v62 }
  0x32   :  { %v109_v9 = vmul.f32 %v403_v1, %v53_v58  ;;  %v308_v10 = vsel %vm210_vm3, %v161_v56, %v259_v5  ;;  %v110_v11 = vmul.f32 %v403_v1, %v54_v63  ;;  %v111_v12 = vmul.f32 %v403_v1, %v55_v0 }
  0x33   :  { %v112_v13 = vmul.f32 %v403_v1, %v56_v3  ;;  %357 = vst [vmem:[%s806_s3 + $0x118] sm:$0xff] %v308_v10  ;;  %v309_v16 = vsel %vm211_vm4, %v162_v57, %v260_v6  ;;  %vm212_vm5 = vcmp.ge.f32.partialorder %v163_v7, 0.0  ;;  %v261_v17 = vmul.f32 0.01, %v163_v7 }
  0x34   :  { %vm213_vm6 = vcmp.ge.f32.partialorder %v164_v8, 0.0  ;;  %358 = vst [vmem:[%s806_s3 + $0x120] sm:$0xff] %v309_v16  ;;  %v262_v18 = vmul.f32 0.01, %v164_v8  ;;  %v165_v19 = vadd.f32 %v408_v2, %v109_v9  ;;  %v166_v20 = vadd.f32 %v408_v2, %v110_v11 }
  0x35   :  { %v167_v21 = vadd.f32 %v408_v2, %v111_v12  ;;  %v310_v22 = vsel %vm212_vm5, %v163_v7, %v261_v17  ;;  %v168_v23 = vadd.f32 %v408_v2, %v112_v13  ;;  %v113_v24 = vmul.f32 %v403_v1, %v57_v14 }
  0x36   :  { %v114_v25 = vmul.f32 %v403_v1, %v58_v15  ;;  %359 = vst [vmem:[%s806_s3 + $0x128] sm:$0xff] %v310_v22  ;;  %v311_v26 = vsel %vm213_vm6, %v164_v8, %v262_v18  ;;  %vm214_vm7 = vcmp.ge.f32.partialorder %v165_v19, 0.0  ;;  %v263_v27 = vmul.f32 0.01, %v165_v19 }
  0x37   :  { %vm215_vm8 = vcmp.ge.f32.partialorder %v166_v20, 0.0  ;;  %360 = vst [vmem:[%s806_s3 + $0x130] sm:$0xff] %v311_v26  ;;  %v264_v30 = vmul.f32 0.01, %v166_v20  ;;  %vm216_vm9 = vcmp.ge.f32.partialorder %v167_v21, 0.0  ;;  %vm217_vm10 = vcmp.ge.f32.partialorder %v168_v23, 0.0 }
  0x38   :  { %v265_v31 = vmul.f32 0.01, %v167_v21  ;;  %v312_v32 = vsel %vm214_vm7, %v165_v19, %v263_v27  ;;  %v266_v33 = vmul.f32 0.01, %v168_v23  ;;  %v169_v34 = vadd.f32 %v408_v2, %v113_v24 }
  0x39   :  { %v170_v35 = vadd.f32 %v408_v2, %v114_v25  ;;  %361 = vst [vmem:[%s806_s3 + $0x138] sm:$0xff] %v312_v32  ;;  %v313_v37 = vsel %vm215_vm8, %v166_v20, %v264_v30  ;;  %v115_v39 = vmul.f32 %v403_v1, %v59_v28  ;;  %v116_v40 = vmul.f32 %v403_v1, %v60_v29 }
  0x3a   :  { %v314_v38 = vsel %vm216_vm9, %v167_v21, %v265_v31  ;;  %362 = vst [vmem:[%s806_s3 + $0x140] sm:$0xff] %v313_v37  ;;  %v315_v42 = vsel %vm217_vm10, %v168_v23, %v266_v33  ;;  %vm218_vm11 = vcmp.ge.f32.partialorder %v169_v34, 0.0  ;;  %v267_v43 = vmul.f32 0.01, %v169_v34 }
  0x3b   :  { %363 = vst [vmem:[%s806_s3 + $0x148] sm:$0xff] %v314_v38  ;;  %vm219_vm12 = vcmp.ge.f32.partialorder %v170_v35, 0.0  ;;  %364 = vst [vmem:[%s806_s3 + $0x150] sm:$0xff] %v315_v42  ;;  %v268_v44 = vmul.f32 0.01, %v170_v35  ;;  %v171_v45 = vadd.f32 %v408_v2, %v115_v39  ;;  %v172_v46 = vadd.f32 %v408_v2, %v116_v40 }
  0x3c   :  { %v117_v47 = vmul.f32 %v403_v1, %v61_v36  ;;  %v316_v48 = vsel %vm218_vm11, %v169_v34, %v267_v43  ;;  %v118_v49 = vmul.f32 %v403_v1, %v62_v41 }
  0x3d   :  { %365 = vst [vmem:[%s806_s3 + $0x158] sm:$0xff] %v316_v48  ;;  %v317_v50 = vsel %vm219_vm12, %v170_v35, %v268_v44  ;;  %vm220_vm13 = vcmp.ge.f32.partialorder %v171_v45, 0.0  ;;  %v269_v51 = vmul.f32 0.01, %v171_v45  ;;  %vm221_vm14 = vcmp.ge.f32.partialorder %v172_v46, 0.0 }
  0x3e   :  { %366 = vst [vmem:[%s806_s3 + $0x160] sm:$0xff] %v317_v50  ;;  %v270_v52 = vmul.f32 0.01, %v172_v46  ;;  %v173_v53 = vadd.f32 %v408_v2, %v117_v47  ;;  %v174_v54 = vadd.f32 %v408_v2, %v118_v49 }
  0x3f   :  { %v318_v55 = vsel %vm220_vm13, %v171_v45, %v269_v51 }
  0x40   :  { %367 = vst [vmem:[%s806_s3 + $0x168] sm:$0xff] %v318_v55  ;;  %v319_v1 = vsel %vm221_vm14, %v172_v46, %v270_v52  ;;  %vm222_vm15 = vcmp.ge.f32.partialorder %v173_v53, 0.0  ;;  %v271_v56 = vmul.f32 0.01, %v173_v53  ;;  %vm223_vm0 = vcmp.ge.f32.partialorder %v174_v54, 0.0 }
  0x41   :  { %368 = vst [vmem:[%s806_s3 + $0x170] sm:$0xff] %v319_v1  ;;  %v272_v57 = vmul.f32 0.01, %v174_v54 }
  0x42   :  { %v320_v58 = vsel %vm222_vm15, %v173_v53, %v271_v56 }
  0x43   :  { %369 = vst [vmem:[%s806_s3 + $0x178] sm:$0xff] %v320_v58  ;;  %v321_v2 = vsel %vm223_vm0, %v174_v54, %v272_v57 }
  0x44   :  { %370 = vst [vmem:[%s806_s3 + $0x180] sm:$0xff] %v321_v2 }

// kernel: dip_forward.21
= control target key start
LH: loop header
LB: loop body
LE: loop exit
PB: predicated region body
PF: predicated region fallthrough
CT: control target
= control target key end

     0   :  { %v1268_v0 = vmov 0.0   ;;  %vm1269_vm0 = vmmov 0   ;;  %s1904_s1 = inlined_call_operand.vmem [shape: bf16[128,128], index: 1, kind: input, shape index: {}]   ;;  %s1905_s0 = inlined_call_operand.vmem [shape: bf16[392,128], index: 0, kind: input, shape index: {}]   ;;  %s1906_s2 = inlined_call_operand.vmem [shape: f32[1,128], index: 2, kind: input, shape index: {}]   ;;  %s1907_s3 = inlined_call_operand.vmem [shape: f32[392,128], index: 3, kind: output, shape index: {0}]   ;;  %s1908_s4 = inlined_call_operand.vmem [shape: f32[1,8,128], index: 4, kind: output, shape index: {1}]  }
   0x1   :  { %1101 = vmatprep.subr.bf16.mxu0 %v1268_v0  ;;  %v1235_v1 = vld [vmem:[%s1904_s1 + $0x38] sm:$0xff]   ;;  %1117 = vmatprep.mubr.msk.bf16.mxu0 %vm1269_vm0, %v1268_v0  ;;  %v1236_v2 = vld [vmem:[%s1904_s1 + $0x30] sm:$0xff]   ;;  %v1237_v3 = vld [vmem:[%s1904_s1 + $0x28] sm:$0xff]  }
   0x2   :  { %1217 = vmatprep.subr.bf16.mxu1 %v1268_v0  ;;  %1169 = vmatprep.mubr.msk.bf16.mxu1 %vm1269_vm0, %v1268_v0  ;;  %v1238_v4 = vld [vmem:[%s1904_s1 + $0x20] sm:$0xff]   ;;  %v1239_v5 = vld [vmem:[%s1904_s1 + $0x18] sm:$0xff]   ;;  %v1240_v6 = vld [vmem:[%s1904_s1 + $0x10] sm:$0xff]  }
   0x3   :  { %1102 = vmatpush3.bf16.msra.mxu0 %v1235_v1  ;;  %1225 = vmatpush3.bf16.msra.mxu1 %v1235_v1  ;;  %v1241_v7 = vld [vmem:[%s1904_s1 + $0x8] sm:$0xff]   ;;  %v1242_v8 = vld [vmem:[%s1904_s1] sm:$0xff]   ;;  %v1252_v12 = vld [vmem:[%s1905_s0 + $0x70] sm:$0xff]  }
   0x4   :  { %1103 = vmatprep.subr.bf16.mxu0 %v1268_v0  ;;  %1218 = vmatprep.subr.bf16.mxu1 %v1268_v0  ;;  %v1243_v9 = vld [vmem:[%s1905_s0] sm:$0xff]   ;;  %v1250_v10 = vld [vmem:[%s1905_s0 + $0x68] sm:$0xff]   ;;  %v1245_v13 = vld [vmem:[%s1905_s0 + $0x10] sm:$0xff]  }
   0x5   :  { %v1244_v11 = vld [vmem:[%s1905_s0 + $0x8] sm:$0xff]   ;;  %v1254_v14 = vld [vmem:[%s1905_s0 + $0x78] sm:$0xff]   ;;  %v1256_v16 = vld [vmem:[%s1905_s0 + $0x80] sm:$0xff]  }
   0x6   :  { %v1246_v15 = vld [vmem:[%s1905_s0 + $0x18] sm:$0xff]   ;;  %v1247_v17 = vld [vmem:[%s1905_s0 + $0x20] sm:$0xff]   ;;  %v1258_v18 = vld [vmem:[%s1905_s0 + $0x88] sm:$0xff]  }
   0x7   :  { %1104 = vmatpush3.bf16.msra.mxu0 %v1236_v2  ;;  %1226 = vmatpush3.bf16.msra.mxu1 %v1236_v2  ;;  %v1248_v19 = vld [vmem:[%s1905_s0 + $0x28] sm:$0xff]   ;;  %v1260_v20 = vld [vmem:[%s1905_s0 + $0x90] sm:$0xff]   ;;  %v1262_v22 = vld [vmem:[%s1905_s0 + $0x98] sm:$0xff]  }
   0x8   :  { %1105 = vmatprep.subr.bf16.mxu0 %v1268_v0  ;;  %1219 = vmatprep.subr.bf16.mxu1 %v1268_v0  ;;  %v1249_v21 = vld [vmem:[%s1905_s0 + $0x30] sm:$0xff]   ;;  %v1251_v23 = vld [vmem:[%s1905_s0 + $0x38] sm:$0xff]   ;;  %v1263_v24 = vld [vmem:[%s1905_s0 + $0xa0] sm:$0xff]  }
   0x9   :  { %v1253_v25 = vld [vmem:[%s1905_s0 + $0x40] sm:$0xff]   ;;  %v1264_v26 = vld [vmem:[%s1905_s0 + $0xa8] sm:$0xff]   ;;  %v1265_v28 = vld [vmem:[%s1905_s0 + $0xb0] sm:$0xff]  }
   0xa   :  { %v1255_v27 = vld [vmem:[%s1905_s0 + $0x48] sm:$0xff]   ;;  %v1257_v29 = vld [vmem:[%s1905_s0 + $0x50] sm:$0xff]   ;;  %v1266_v30 = vld [vmem:[%s1905_s0 + $0xb8] sm:$0xff]  }
   0xb   :  { %1106 = vmatpush3.bf16.msra.mxu0 %v1237_v3  ;;  %1227 = vmatpush3.bf16.msra.mxu1 %v1237_v3  ;;  %v1259_v31 = vld [vmem:[%s1905_s0 + $0x58] sm:$0xff]   ;;  %v1267_v32 = vld [vmem:[%s1905_s0 + $0xc0] ss:$0 sps:$4 sm:$0xff]  }
   0xc   :  { %1107 = vmatprep.subr.bf16.mxu0 %v1268_v0  ;;  %1220 = vmatprep.subr.bf16.mxu1 %v1268_v0  ;;  %v1261_v33 = vld [vmem:[%s1905_s0 + $0x60] sm:$0xff]  }
   0xd   :  { %v1463_v34 = vld [vmem:[%s1906_s2] ss:$0 sm:$0xff] }
   0xf   :  { %1108 = vmatpush3.bf16.msra.mxu0 %v1238_v4  ;;  %1228 = vmatpush3.bf16.msra.mxu1 %v1238_v4 }
  0x10   :  { %1109 = vmatprep.subr.bf16.mxu0 %v1268_v0  ;;  %1221 = vmatprep.subr.bf16.mxu1 %v1268_v0 }
  0x13   :  { %1110 = vmatpush3.bf16.msra.mxu0 %v1239_v5  ;;  %1229 = vmatpush3.bf16.msra.mxu1 %v1239_v5 }
  0x14   :  { %1111 = vmatprep.subr.bf16.mxu0 %v1268_v0  ;;  %1222 = vmatprep.subr.bf16.mxu1 %v1268_v0 }
  0x17   :  { %1112 = vmatpush3.bf16.msra.mxu0 %v1240_v6  ;;  %1230 = vmatpush3.bf16.msra.mxu1 %v1240_v6 }
  0x18   :  { %1113 = vmatprep.subr.bf16.mxu0 %v1268_v0  ;;  %1223 = vmatprep.subr.bf16.mxu1 %v1268_v0 }
  0x1b   :  { %1114 = vmatpush3.bf16.msra.mxu0 %v1241_v7  ;;  %1231 = vmatpush3.bf16.msra.mxu1 %v1241_v7 }
  0x1c   :  { %1115 = vmatprep.subr.bf16.mxu0 %v1268_v0  ;;  %1224 = vmatprep.subr.bf16.mxu1 %v1268_v0 }
  0x1f   :  { %1116 = vmatpush3.bf16.msra.mxu0 %v1242_v8  ;;  %1232 = vmatpush3.bf16.msra.mxu1 %v1242_v8 }
  0x22   :  { %1118 = vmatmul.mubr.bf16.vlgmr.msra.gmra.mxu0 %v1243_v9  ;;  %1170 = vmatmul.mubr.bf16.vlgmr.msra.gmra.mxu1 %v1250_v10 }
  0x23   :  { %1121 = vmatprep.mubr.msk.bf16.mxu0 %vm1269_vm0, %v1268_v0  ;;  %1173 = vmatprep.mubr.msk.bf16.mxu1 %vm1269_vm0, %v1268_v0 }
  0x2a   :  { %1122 = vmatmul.mubr.bf16.gmra.mxu0 %v1244_v11  ;;  %1174 = vmatmul.mubr.bf16.gmra.mxu1 %v1252_v12 }
  0x2b   :  { %1125 = vmatprep.mubr.msk.bf16.mxu0 %vm1269_vm0, %v1268_v0  ;;  %1177 = vmatprep.mubr.msk.bf16.mxu1 %vm1269_vm0, %v1268_v0 }
  0x32   :  { %1126 = vmatmul.mubr.bf16.gmra.mxu0 %v1245_v13  ;;  %1178 = vmatmul.mubr.bf16.gmra.mxu1 %v1254_v14 }
  0x33   :  { %1129 = vmatprep.mubr.msk.bf16.mxu0 %vm1269_vm0, %v1268_v0  ;;  %1181 = vmatprep.mubr.msk.bf16.mxu1 %vm1269_vm0, %v1268_v0 }
  0x3a   :  { %1130 = vmatmul.mubr.bf16.gmra.mxu0 %v1246_v15  ;;  %1182 = vmatmul.mubr.bf16.gmra.mxu1 %v1256_v16 }
  0x3b   :  { %1133 = vmatprep.mubr.msk.bf16.mxu0 %vm1269_vm0, %v1268_v0  ;;  %1185 = vmatprep.mubr.msk.bf16.mxu1 %vm1269_vm0, %v1268_v0 }
  0x42   :  { %1134 = vmatmul.mubr.bf16.gmra.mxu0 %v1247_v17  ;;  %1186 = vmatmul.mubr.bf16.gmra.mxu1 %v1258_v18 }
  0x43   :  { %1137 = vmatprep.mubr.msk.bf16.mxu0 %vm1269_vm0, %v1268_v0  ;;  %1189 = vmatprep.mubr.msk.bf16.mxu1 %vm1269_vm0, %v1268_v0 }
  0x4a   :  { %1138 = vmatmul.mubr.bf16.gmra.mxu0 %v1248_v19  ;;  %1190 = vmatmul.mubr.bf16.gmra.mxu1 %v1260_v20 }
  0x4b   :  { %1141 = vmatprep.mubr.msk.bf16.mxu0 %vm1269_vm0, %v1268_v0  ;;  %1193 = vmatprep.mubr.msk.bf16.mxu1 %vm1269_vm0, %v1268_v0 }
  0x52   :  { %1142 = vmatmul.mubr.bf16.gmra.mxu0 %v1249_v21  ;;  %1194 = vmatmul.mubr.bf16.gmra.mxu1 %v1262_v22 }
  0x53   :  { %1145 = vmatprep.mubr.msk.bf16.mxu0 %vm1269_vm0, %v1268_v0  ;;  %1197 = vmatprep.mubr.msk.bf16.mxu1 %vm1269_vm0, %v1268_v0 }
  0x5a   :  { %1146 = vmatmul.mubr.bf16.gmra.mxu0 %v1251_v23  ;;  %1198 = vmatmul.mubr.bf16.gmra.mxu1 %v1263_v24 }
  0x5b   :  { %1149 = vmatprep.mubr.msk.bf16.mxu0 %vm1269_vm0, %v1268_v0  ;;  %1201 = vmatprep.mubr.msk.bf16.mxu1 %vm1269_vm0, %v1268_v0 }
  0x62   :  { %1150 = vmatmul.mubr.bf16.gmra.mxu0 %v1253_v25  ;;  %1202 = vmatmul.mubr.bf16.gmra.mxu1 %v1264_v26 }
  0x63   :  { %1153 = vmatprep.mubr.msk.bf16.mxu0 %vm1269_vm0, %v1268_v0  ;;  %1205 = vmatprep.mubr.msk.bf16.mxu1 %vm1269_vm0, %v1268_v0 }
  0x6a   :  { %1154 = vmatmul.mubr.bf16.gmra.mxu0 %v1255_v27  ;;  %1206 = vmatmul.mubr.bf16.gmra.mxu1 %v1265_v28 }
  0x6b   :  { %1157 = vmatprep.mubr.msk.bf16.mxu0 %vm1269_vm0, %v1268_v0  ;;  %1209 = vmatprep.mubr.msk.bf16.mxu1 %vm1269_vm0, %v1268_v0 }
  0x72   :  { %1158 = vmatmul.mubr.bf16.gmra.mxu0 %v1257_v29  ;;  %1210 = vmatmul.mubr.bf16.gmra.mxu1 %v1266_v30 }
  0x73   :  { %1161 = vmatprep.mubr.msk.bf16.mxu0 %vm1269_vm0, %v1268_v0  ;;  %1213 = vmatprep.mubr.msk.bf16.mxu1 %vm1269_vm0, %v1268_v0 }
  0x7a   :  { %1162 = vmatmul.mubr.bf16.gmra.mxu0 %v1259_v31  ;;  %1214 = vmatmul.mubr.bf16.gmra.mxu1 %v1267_v32 }
  0x7b   :  { %1165 = vmatprep.mubr.msk.bf16.mxu0 %vm1269_vm0, %v1268_v0 }
  0x82   :  { %1166 = vmatmul.mubr.bf16.gmra.mxu0 %v1261_v33 }
  0xe2   :  { %v319_v35 = vpop.f32.mrf.mxu0  ;;  %v423_v36 = vpop.f32.mrf.mxu1 }
  0xe3   :  { %v1466_v37 = vadd.f32 %v1463_v34, %v319_v35  ;;  %v1469_v38 = vadd.f32 %v1463_v34, %v423_v36 }
  0xe4   :  { %v1119_v39 = vpop.f32.mrf.mxu0  ;;  %v1171_v40 = vpop.f32.mrf.mxu1 }
  0xe5   :  { %517 = vst [vmem:[%s1907_s3] sm:$0xff] %v1466_v37  ;;  %543 = vst [vmem:[%s1907_s3 + $0xd0] sm:$0xff] %v1469_v38 }
  0xe6   :  { %v322_v41 = vpop.f32.mrf.mxu0  ;;  %v426_v42 = vpop.f32.mrf.mxu1 }
  0xe7   :  { %v1480_v43 = vadd.f32 %v1463_v34, %v322_v41  ;;  %v1483_v44 = vadd.f32 %v1463_v34, %v426_v42 }
  0xe8   :  { %v1120_v45 = vpop.f32.mrf.mxu0  ;;  %v1172_v46 = vpop.f32.mrf.mxu1 }
  0xe9   :  { %518 = vst [vmem:[%s1907_s3 + $0x8] sm:$0xff] %v1480_v43  ;;  %544 = vst [vmem:[%s1907_s3 + $0xd8] sm:$0xff] %v1483_v44 }
  0xea   :  { %v327_v47 = vpop.f32.mrf.mxu0  ;;  %v431_v48 = vpop.f32.mrf.mxu1 }
  0xeb   :  { %v1494_v49 = vadd.f32 %v1463_v34, %v327_v47  ;;  %v1497_v50 = vadd.f32 %v1463_v34, %v431_v48 }
  0xec   :  { %v1123_v51 = vpop.f32.mrf.mxu0  ;;  %v1175_v52 = vpop.f32.mrf.mxu1 }
  0xed   :  { %519 = vst [vmem:[%s1907_s3 + $0x10] sm:$0xff] %v1494_v49  ;;  %545 = vst [vmem:[%s1907_s3 + $0xe0] sm:$0xff] %v1497_v50 }
  0xee   :  { %v330_v53 = vpop.f32.mrf.mxu0  ;;  %v434_v54 = vpop.f32.mrf.mxu1 }
  0xef   :  { %v1508_v55 = vadd.f32 %v1463_v34, %v330_v53  ;;  %v1511_v56 = vadd.f32 %v1463_v34, %v434_v54 }
  0xf0   :  { %v1124_v57 = vpop.f32.mrf.mxu0  ;;  %v1176_v58 = vpop.f32.mrf.mxu1 }
  0xf1   :  { %520 = vst [vmem:[%s1907_s3 + $0x18] sm:$0xff] %v1508_v55  ;;  %546 = vst [vmem:[%s1907_s3 + $0xe8] sm:$0xff] %v1511_v56  ;;  %v918_v58 = vmul.f32 %v1480_v43, %v1480_v43 }
  0xf2   :  { %v335_v59 = vpop.f32.mrf.mxu0  ;;  %v439_v60 = vpop.f32.mrf.mxu1 }
  0xf3   :  { %v1522_v61 = vadd.f32 %v1463_v34, %v335_v59  ;;  %v1525_v62 = vadd.f32 %v1463_v34, %v439_v60 }
  0xf4   :  { %v1127_v63 = vpop.f32.mrf.mxu0  ;;  %v1179_v0 = vpop.f32.mrf.mxu1 }
  0xf5   :  { %521 = vst [vmem:[%s1907_s3 + $0x20] sm:$0xff] %v1522_v61  ;;  %547 = vst [vmem:[%s1907_s3 + $0xf0] sm:$0xff] %v1525_v62 }
  0xf6   :  { %v338_v1 = vpop.f32.mrf.mxu0  ;;  %v442_v2 = vpop.f32.mrf.mxu1 }
  0xf7   :  { %v1536_v3 = vadd.f32 %v1463_v34, %v338_v1  ;;  %v1539_v4 = vadd.f32 %v1463_v34, %v442_v2  ;;  %v917_v1 = vmul.f32 %v1466_v37, %v1466_v37  ;;  %v919_v2 = vmul.f32 %v1494_v49, %v1494_v49 }
  0xf8   :  { %v1128_v5 = vpop.f32.mrf.mxu0  ;;  %v1180_v6 = vpop.f32.mrf.mxu1 }
  0xf9   :  { %522 = vst [vmem:[%s1907_s3 + $0x28] sm:$0xff] %v1536_v3  ;;  %548 = vst [vmem:[%s1907_s3 + $0xf8] sm:$0xff] %v1539_v4 }
  0xfa   :  { %v343_v7 = vpop.f32.mrf.mxu0  ;;  %v447_v8 = vpop.f32.mrf.mxu1 }
  0xfb   :  { %v1550_v9 = vadd.f32 %v1463_v34, %v343_v7  ;;  %v1553_v10 = vadd.f32 %v1463_v34, %v447_v8  ;;  %v863_v7 = vadd.f32 %v1480_v43, %v1466_v37  ;;  %v966_v8 = vadd.f32 %v918_v58, %v917_v1 }
  0xfc   :  { %v1131_v11 = vpop.f32.mrf.mxu0  ;;  %v1183_v12 = vpop.f32.mrf.mxu1 }
  0xfd   :  { %523 = vst [vmem:[%s1907_s3 + $0x30] sm:$0xff] %v1550_v9  ;;  %549 = vst [vmem:[%s1907_s3 + $0x100] sm:$0xff] %v1553_v10  ;;  %v920_v11 = vmul.f32 %v1508_v55, %v1508_v55 }
  0xfe   :  { %v346_v13 = vpop.f32.mrf.mxu0  ;;  %v450_v14 = vpop.f32.mrf.mxu1 }
  0xff   :  { %v1564_v15 = vadd.f32 %v1463_v34, %v346_v13  ;;  %v1567_v16 = vadd.f32 %v1463_v34, %v450_v14  ;;  %v864_v14 = vadd.f32 %v863_v7, %v1494_v49 }
 0x100   :  { %v1132_v17 = vpop.f32.mrf.mxu0  ;;  %v1184_v18 = vpop.f32.mrf.mxu1 }
 0x101   :  { %524 = vst [vmem:[%s1907_s3 + $0x38] sm:$0xff] %v1564_v15  ;;  %550 = vst [vmem:[%s1907_s3 + $0x108] sm:$0xff] %v1567_v16  ;;  %v967_v17 = vadd.f32 %v966_v8, %v919_v2  ;;  %v921_v18 = vmul.f32 %v1522_v61, %v1522_v61 }
 0x102   :  { %v351_v19 = vpop.f32.mrf.mxu0  ;;  %v455_v20 = vpop.f32.mrf.mxu1 }
 0x103   :  { %v1578_v21 = vadd.f32 %v1463_v34, %v351_v19  ;;  %v1581_v22 = vadd.f32 %v1463_v34, %v455_v20  ;;  %v968_v49 = vadd.f32 %v967_v17, %v920_v11 }
 0x104   :  { %v1135_v23 = vpop.f32.mrf.mxu0  ;;  %v1187_v24 = vpop.f32.mrf.mxu1 }
 0x105   :  { %525 = vst [vmem:[%s1907_s3 + $0x40] sm:$0xff] %v1578_v21  ;;  %551 = vst [vmem:[%s1907_s3 + $0x110] sm:$0xff] %v1581_v22  ;;  %v865_v23 = vadd.f32 %v864_v14, %v1508_v55  ;;  %v922_v24 = vmul.f32 %v1536_v3, %v1536_v3 }
 0x106   :  { %v354_v25 = vpop.f32.mrf.mxu0  ;;  %v458_v26 = vpop.f32.mrf.mxu1 }
 0x107   :  { %v1592_v27 = vadd.f32 %v1463_v34, %v354_v25  ;;  %v1595_v28 = vadd.f32 %v1463_v34, %v458_v26 }
 0x108   :  { %v1136_v29 = vpop.f32.mrf.mxu0  ;;  %v1188_v30 = vpop.f32.mrf.mxu1 }
 0x109   :  { %526 = vst [vmem:[%s1907_s3 + $0x48] sm:$0xff] %v1592_v27  ;;  %552 = vst [vmem:[%s1907_s3 + $0x118] sm:$0xff] %v1595_v28  ;;  %v866_v29 = vadd.f32 %v865_v23, %v1522_v61  ;;  %v926_v1 = vmul.f32 %v1592_v27, %v1592_v27 }
 0x10a   :  { %v359_v31 = vpop.f32.mrf.mxu0  ;;  %v463_v32 = vpop.f32.mrf.mxu1 }
 0x10b   :  { %v1606_v33 = vadd.f32 %v1463_v34, %v359_v31  ;;  %v1609_v35 = vadd.f32 %v1463_v34, %v463_v32  ;;  %v969_v31 = vadd.f32 %v968_v49, %v921_v18  ;;  %v923_v32 = vmul.f32 %v1550_v9, %v1550_v9 }
 0x10c   :  { %v1139_v36 = vpop.f32.mrf.mxu0  ;;  %v1191_v39 = vpop.f32.mrf.mxu1 }
 0x10d   :  { %527 = vst [vmem:[%s1907_s3 + $0x50] sm:$0xff] %v1606_v33  ;;  %553 = vst [vmem:[%s1907_s3 + $0x120] sm:$0xff] %v1609_v35  ;;  %v970_v61 = vadd.f32 %v969_v31, %v922_v24  ;;  %v927_v11 = vmul.f32 %v1606_v33, %v1606_v33 }
 0x10e   :  { %v362_v40 = vpop.f32.mrf.mxu0  ;;  %v466_v41 = vpop.f32.mrf.mxu1 }
 0x10f   :  { %v1620_v42 = vadd.f32 %v1463_v34, %v362_v40  ;;  %v1623_v45 = vadd.f32 %v1463_v34, %v466_v41  ;;  %v867_v40 = vadd.f32 %v866_v29, %v1536_v3  ;;  %v924_v41 = vmul.f32 %v1564_v15, %v1564_v15 }
 0x110   :  { %v1140_v46 = vpop.f32.mrf.mxu0  ;;  %v1192_v47 = vpop.f32.mrf.mxu1 }
 0x111   :  { %528 = vst [vmem:[%s1907_s3 + $0x58] sm:$0xff] %v1620_v42  ;;  %554 = vst [vmem:[%s1907_s3 + $0x128] sm:$0xff] %v1623_v45  ;;  %v928_v17 = vmul.f32 %v1620_v42, %v1620_v42 }
 0x112   :  { %v367_v48 = vpop.f32.mrf.mxu0  ;;  %v471_v51 = vpop.f32.mrf.mxu1 }
 0x113   :  { %v1634_v52 = vadd.f32 %v1463_v34, %v367_v48  ;;  %v1637_v53 = vadd.f32 %v1463_v34, %v471_v51  ;;  %v868_v48 = vadd.f32 %v867_v40, %v1550_v9 }
 0x114   :  { %v1143_v54 = vpop.f32.mrf.mxu0  ;;  %v1195_v57 = vpop.f32.mrf.mxu1 }
 0x115   :  { %529 = vst [vmem:[%s1907_s3 + $0x60] sm:$0xff] %v1634_v52  ;;  %555 = vst [vmem:[%s1907_s3 + $0x130] sm:$0xff] %v1637_v53  ;;  %v971_v54 = vadd.f32 %v970_v61, %v923_v32  ;;  %v925_v57 = vmul.f32 %v1578_v21, %v1578_v21  ;;  %v929_v24 = vmul.f32 %v1634_v52, %v1634_v52 }
 0x116   :  { %v370_v59 = vpop.f32.mrf.mxu0  ;;  %v474_v60 = vpop.f32.mrf.mxu1 }
 0x117   :  { %v1650_v63 = vadd.f32 %v1463_v34, %v370_v59  ;;  %v1653_v0 = vadd.f32 %v1463_v34, %v474_v60  ;;  %v869_v60 = vadd.f32 %v868_v48, %v1564_v15  ;;  %v972_v9 = vadd.f32 %v971_v54, %v924_v41 }
 0x118   :  { %v1144_v5 = vpop.f32.mrf.mxu0  ;;  %v1196_v6 = vpop.f32.mrf.mxu1 }
 0x119   :  { %530 = vst [vmem:[%s1907_s3 + $0x68] sm:$0xff] %v1650_v63  ;;  %556 = vst [vmem:[%s1907_s3 + $0x138] sm:$0xff] %v1653_v0  ;;  %v870_v6 = vadd.f32 %v869_v60, %v1578_v21  ;;  %v973_v8 = vadd.f32 %v972_v9, %v925_v57  ;;  %v930_v31 = vmul.f32 %v1650_v63, %v1650_v63 }
 0x11a   :  { %v375_v12 = vpop.f32.mrf.mxu0  ;;  %v479_v13 = vpop.f32.mrf.mxu1 }
 0x11b   :  { %v1673_v37 = vadd.f32 %v1463_v34, %v375_v12  ;;  %v1676_v43 = vadd.f32 %v1463_v34, %v479_v13  ;;  %v871_v14 = vadd.f32 %v870_v6, %v1592_v27  ;;  %v974_v21 = vadd.f32 %v973_v8, %v926_v1 }
 0x11c   :  { %v1147_v19 = vpop.f32.mrf.mxu0  ;;  %v1199_v20 = vpop.f32.mrf.mxu1 }
 0x11d   :  { %531 = vst [vmem:[%s1907_s3 + $0x70] sm:$0xff] %v1673_v37  ;;  %557 = vst [vmem:[%s1907_s3 + $0x140] sm:$0xff] %v1676_v43  ;;  %v872_v20 = vadd.f32 %v871_v14, %v1606_v33  ;;  %v975_v49 = vadd.f32 %v974_v21, %v927_v11  ;;  %v931_v41 = vmul.f32 %v1673_v37, %v1673_v37 }
 0x11e   :  { %v378_v25 = vpop.f32.mrf.mxu0  ;;  %v482_v26 = vpop.f32.mrf.mxu1 }
 0x11f   :  { %v1693_v55 = vadd.f32 %v1463_v34, %v378_v25  ;;  %v1696_v30 = vadd.f32 %v1463_v34, %v482_v26  ;;  %v873_v29 = vadd.f32 %v872_v20, %v1620_v42  ;;  %v976_v33 = vadd.f32 %v975_v49, %v928_v17 }
 0x120   :  { %v1148_v36 = vpop.f32.mrf.mxu0  ;;  %v1200_v39 = vpop.f32.mrf.mxu1 }
 0x121   :  { %532 = vst [vmem:[%s1907_s3 + $0x78] sm:$0xff] %v1693_v55  ;;  %558 = vst [vmem:[%s1907_s3 + $0x148] sm:$0xff] %v1696_v30  ;;  %v874_v39 = vadd.f32 %v873_v29, %v1634_v52  ;;  %v977_v61 = vadd.f32 %v976_v33, %v929_v24  ;;  %v932_v54 = vmul.f32 %v1693_v55, %v1693_v55 }
 0x122   :  { %v383_v46 = vpop.f32.mrf.mxu0  ;;  %v487_v47 = vpop.f32.mrf.mxu1 }
 0x123   :  { %v1713_v3 = vadd.f32 %v1463_v34, %v383_v46  ;;  %v1716_v51 = vadd.f32 %v1463_v34, %v487_v47  ;;  %v875_v48 = vadd.f32 %v874_v39, %v1650_v63  ;;  %v978_v52 = vadd.f32 %v977_v61, %v930_v31 }
 0x124   :  { %v1151_v58 = vpop.f32.mrf.mxu0  ;;  %v1203_v59 = vpop.f32.mrf.mxu1 }
 0x125   :  { %533 = vst [vmem:[%s1907_s3 + $0x80] sm:$0xff] %v1713_v3  ;;  %559 = vst [vmem:[%s1907_s3 + $0x150] sm:$0xff] %v1716_v51  ;;  %v876_v59 = vadd.f32 %v875_v48, %v1673_v37  ;;  %v979_v9 = vadd.f32 %v978_v52, %v931_v41  ;;  %v933_v1 = vmul.f32 %v1713_v3, %v1713_v3 }
 0x126   :  { %v386_v2 = vpop.f32.mrf.mxu0  ;;  %v490_v5 = vpop.f32.mrf.mxu1 }
 0x127   :  { %v387_v15 = vadd.f32 %v1463_v34, %v386_v2  ;;  %v1734_v7 = vadd.f32 %v1463_v34, %v490_v5  ;;  %v877_v6 = vadd.f32 %v876_v59, %v1693_v55  ;;  %v980_v37 = vadd.f32 %v979_v9, %v932_v54 }
 0x128   :  { %v1152_v12 = vpop.f32.mrf.mxu0  ;;  %v1204_v13 = vpop.f32.mrf.mxu1 }
 0x129   :  { %534 = vst [vmem:[%s1907_s3 + $0x88] sm:$0xff] %v387_v15  ;;  %560 = vst [vmem:[%s1907_s3 + $0x158] sm:$0xff] %v1734_v7  ;;  %v934_v8 = vmul.f32 %v387_v15, %v387_v15  ;;  %v878_v13 = vadd.f32 %v877_v6, %v1713_v3  ;;  %v981_v55 = vadd.f32 %v980_v37, %v933_v1 }
 0x12a   :  { %v391_v18 = vpop.f32.mrf.mxu0  ;;  %v495_v19 = vpop.f32.mrf.mxu1 }
 0x12b   :  { %v392_v23 = vadd.f32 %v1463_v34, %v391_v18  ;;  %v1751_v27 = vadd.f32 %v1463_v34, %v495_v19  ;;  %v879_v19 = vadd.f32 %v878_v13, %v387_v15  ;;  %v982_v3 = vadd.f32 %v981_v55, %v934_v8 }
 0x12c   :  { %v1155_v25 = vpop.f32.mrf.mxu0  ;;  %v1207_v26 = vpop.f32.mrf.mxu1 }
 0x12d   :  { %535 = vst [vmem:[%s1907_s3 + $0x90] sm:$0xff] %v392_v23  ;;  %561 = vst [vmem:[%s1907_s3 + $0x160] sm:$0xff] %v1751_v27  ;;  %v935_v20 = vmul.f32 %v392_v23, %v392_v23  ;;  %v880_v25 = vadd.f32 %v879_v19, %v392_v23 }
 0x12e   :  { %v394_v32 = vpop.f32.mrf.mxu0  ;;  %v498_v36 = vpop.f32.mrf.mxu1 }
 0x12f   :  { %v395_v40 = vadd.f32 %v1463_v34, %v394_v32  ;;  %v1768_v42 = vadd.f32 %v1463_v34, %v498_v36  ;;  %v983_v32 = vadd.f32 %v982_v3, %v935_v20  ;;  %v943_v20 = vmul.f32 %v1469_v38, %v1469_v38 }
 0x130   :  { %v1156_v46 = vpop.f32.mrf.mxu0  ;;  %v1208_v47 = vpop.f32.mrf.mxu1 }
 0x131   :  { %536 = vst [vmem:[%s1907_s3 + $0x98] sm:$0xff] %v395_v40  ;;  %562 = vst [vmem:[%s1907_s3 + $0x168] sm:$0xff] %v1768_v42  ;;  %v936_v26 = vmul.f32 %v395_v40, %v395_v40  ;;  %v881_v36 = vadd.f32 %v880_v25, %v395_v40 }
 0x132   :  { %v399_v57 = vpop.f32.mrf.mxu0  ;;  %v503_v58 = vpop.f32.mrf.mxu1 }
 0x133   :  { %v400_v60 = vadd.f32 %v1463_v34, %v399_v57  ;;  %v1785_v63 = vadd.f32 %v1463_v34, %v503_v58  ;;  %v984_v41 = vadd.f32 %v983_v32, %v936_v26  ;;  %v945_v26 = vmul.f32 %v1497_v50, %v1497_v50 }
 0x134   :  { %v1159_v2 = vpop.f32.mrf.mxu0  ;;  %v1211_v5 = vpop.f32.mrf.mxu1 }
 0x135   :  { %537 = vst [vmem:[%s1907_s3 + $0xa0] sm:$0xff] %v400_v60  ;;  %563 = vst [vmem:[%s1907_s3 + $0x170] sm:$0xff] %v1785_v63  ;;  %v937_v39 = vmul.f32 %v400_v60, %v400_v60  ;;  %v882_v46 = vadd.f32 %v881_v36, %v400_v60 }
 0x136   :  { %v402_v11 = vpop.f32.mrf.mxu0  ;;  %v506_v12 = vpop.f32.mrf.mxu1 }
 0x137   :  { %v403_v14 = vadd.f32 %v1463_v34, %v402_v11  ;;  %v1800_v21 = vadd.f32 %v1463_v34, %v506_v12  ;;  %v985_v40 = vadd.f32 %v984_v41, %v937_v39 }
 0x138   :  { %v1160_v17 = vpop.f32.mrf.mxu0  ;;  %v1212_v18 = vpop.f32.mrf.mxu1 }
 0x139   :  { %538 = vst [vmem:[%s1907_s3 + $0xa8] sm:$0xff] %v403_v14  ;;  %564 = vst [vmem:[%s1907_s3 + $0x178] sm:$0xff] %v1800_v21  ;;  %v938_v47 = vmul.f32 %v403_v14, %v403_v14  ;;  %v883_v57 = vadd.f32 %v882_v46, %v403_v14 }
 0x13a   :  { %v407_v49 = vpop.f32.mrf.mxu0  ;;  %v511_v24 = vpop.f32.mrf.mxu1 }
 0x13b   :  { %v408_v29 = vadd.f32 %v1463_v34, %v407_v49  ;;  %v1811_v33 = vadd.f32 %v1463_v34, %v511_v24  ;;  %v986_v9 = vadd.f32 %v985_v40, %v938_v47  ;;  %v944_v24 = vmul.f32 %v1483_v44, %v1483_v44 }
 0x13c   :  { %v1163_v15 = vpop.f32.mrf.mxu0  ;;  %v1215_v31 = vpop.f32.mrf.mxu1 }
 0x13d   :  { %539 = vst [vmem:[%s1907_s3 + $0xb0] sm:$0xff] %v408_v29  ;;  %565 = vst [vmem:[%s1907_s3 + $0x180] sm:$0xff] %v1811_v33  ;;  %v939_v58 = vmul.f32 %v408_v29, %v408_v29  ;;  %v884_v1 = vadd.f32 %v883_v57, %v408_v29  ;;  %v946_v31 = vmul.f32 %v1511_v56, %v1511_v56 }
 0x13e   :  { %v410_v23 = vpop.f32.mrf.mxu0  ;;  %v514_v61 = vpop.f32.mrf.mxu1 }
 0x13f   :  { %v411_v48 = vadd.f32 %v1463_v34, %v410_v23  ;;  %v987_v60 = vadd.f32 %v986_v9, %v939_v58 }
 0x140   :  { %v1164_v52 = vpop.f32.mrf.mxu0  ;;  %v1216_v54 = vpop.f32.mrf.mxu1 }
 0x141   :  { %540 = vst [vmem:[%s1907_s3 + $0xb8] sm:$0xff] %v411_v48  ;;  %v940_v2 = vmul.f32 %v411_v48, %v411_v48  ;;  %v885_v37 = vadd.f32 %v884_v1, %v411_v48 }
 0x142   :  { %v415_v59 = vpop.f32.mrf.mxu0 }
 0x143   :  { %v416_v5 = vadd.f32 %v1463_v34, %v415_v59  ;;  %v988_v12 = vadd.f32 %v987_v60, %v940_v2 }
 0x144   :  { %v1167_v6 = vpop.f32.mrf.mxu0 }
 0x145   :  { %541 = vst [vmem:[%s1907_s3 + $0xc0] sm:$0xff] %v416_v5  ;;  %v941_v8 = vmul.f32 %v416_v5, %v416_v5  ;;  %v886_v13 = vadd.f32 %v885_v37, %v416_v5  ;;  %v955_v5 = vmul.f32 %v1637_v53, %v1637_v53  ;;  %v956_v37 = vmul.f32 %v1653_v0, %v1653_v0 }
 0x146   :  { %v418_v11 = vpop.f32.mrf.mxu0 }
 0x147   :  { %v419_v14 = vadd.f32 %v1463_v34, %v418_v11  ;;  %v989_v17 = vadd.f32 %v988_v12, %v941_v8  ;;  %v957_v11 = vmul.f32 %v1676_v43, %v1676_v43 }
 0x148   :  { %v1168_v55 = vpop.f32.mrf.mxu0 }
 0x149   :  { %542 = vst [vmem:[%s1907_s3 + $0xc8] sm:$0xff] %v419_v14  ;;  %v887_v18 = vadd.f32 %v886_v13, %v419_v14  ;;  %v942_v19 = vmul.f32 %v419_v14, %v419_v14  ;;  %v958_v13 = vmul.f32 %v1696_v30, %v1696_v30  ;;  %v959_v55 = vmul.f32 %v1716_v51, %v1716_v51 }
 0x14b   :  { %v888_v3 = vadd.f32 %v887_v18, %v1469_v38  ;;  %v990_v49 = vadd.f32 %v989_v17, %v942_v19  ;;  %v947_v38 = vmul.f32 %v1525_v62, %v1525_v62  ;;  %v960_v18 = vmul.f32 %v1734_v7, %v1734_v7 }
 0x14d   :  { %v889_v25 = vadd.f32 %v888_v3, %v1483_v44  ;;  %v991_v34 = vadd.f32 %v990_v49, %v943_v20  ;;  %v948_v44 = vmul.f32 %v1539_v4, %v1539_v4  ;;  %v961_v20 = vmul.f32 %v1751_v27, %v1751_v27 }
 0x14e   :  { %v962_v49 = vmul.f32 %v1768_v42, %v1768_v42 }
 0x14f   :  { %v890_v29 = vadd.f32 %v889_v25, %v1497_v50  ;;  %v992_v15 = vadd.f32 %v991_v34, %v944_v24  ;;  %v949_v50 = vmul.f32 %v1553_v10, %v1553_v10  ;;  %v963_v25 = vmul.f32 %v1785_v63, %v1785_v63 }
 0x151   :  { %v891_v32 = vadd.f32 %v890_v29, %v1511_v56  ;;  %v993_v36 = vadd.f32 %v992_v15, %v945_v26  ;;  %v950_v56 = vmul.f32 %v1567_v16, %v1567_v16  ;;  %v964_v26 = vmul.f32 %v1800_v21, %v1800_v21 }
 0x153   :  { %v892_v39 = vadd.f32 %v891_v32, %v1525_v62  ;;  %v994_v23 = vadd.f32 %v993_v36, %v946_v31  ;;  %v951_v62 = vmul.f32 %v1581_v22, %v1581_v22 }
 0x155   :  { %v893_v61 = vadd.f32 %v892_v39, %v1539_v4  ;;  %v995_v41 = vadd.f32 %v994_v23, %v947_v38  ;;  %v952_v4 = vmul.f32 %v1595_v28, %v1595_v28  ;;  %v566_v38 = vlaneseq }
 0x157   :  { %v996_v46 = vadd.f32 %v995_v41, %v948_v44  ;;  %v894_v47 = vadd.f32 %v893_v61, %v1553_v10  ;;  %v953_v10 = vmul.f32 %v1609_v35, %v1609_v35  ;;  %v567_v61 = vshrl.u32 %v566_v38, 7 }
 0x159   :  { %v895_v48 = vadd.f32 %v894_v47, %v1567_v16  ;;  %v997_v52 = vadd.f32 %v996_v46, %v949_v50  ;;  %v954_v16 = vmul.f32 %v1623_v45, %v1623_v45  ;;  %vm1020_vm1 = vcmp.eq.s32.totalorder %v567_v61, 0 }
 0x15a   :  { %vm1022_vm2 = vcmp.eq.s32.totalorder %v567_v61, 1 }
 0x15b   :  { %v896_v54 = vadd.f32 %v895_v48, %v1581_v22  ;;  %v998_v40 = vadd.f32 %v997_v52, %v950_v56 }
 0x15d   :  { %v897_v57 = vadd.f32 %v896_v54, %v1595_v28  ;;  %v999_v58 = vadd.f32 %v998_v40, %v951_v62 }
 0x15f   :  { %v898_v59 = vadd.f32 %v897_v57, %v1609_v35  ;;  %v1000_v9 = vadd.f32 %v999_v58, %v952_v4 }
 0x161   :  { %v899_v1 = vadd.f32 %v898_v59, %v1623_v45  ;;  %v1001_v2 = vadd.f32 %v1000_v9, %v953_v10 }
 0x163   :  { %v900_v22 = vadd.f32 %v899_v1, %v1637_v53  ;;  %v1002_v6 = vadd.f32 %v1001_v2, %v954_v16 }
 0x165   :  { %v1003_v28 = vadd.f32 %v1002_v6, %v955_v5  ;;  %v901_v60 = vadd.f32 %v900_v22, %v1653_v0 }
 0x167   :  { %v1004_v35 = vadd.f32 %v1003_v28, %v956_v37  ;;  %v902_v8 = vadd.f32 %v901_v60, %v1676_v43 }
 0x169   :  { %v1005_v45 = vadd.f32 %v1004_v35, %v957_v11  ;;  %v903_v12 = vadd.f32 %v902_v8, %v1696_v30 }
 0x16b   :  { %v1006_v53 = vadd.f32 %v1005_v45, %v958_v13  ;;  %v904_v14 = vadd.f32 %v903_v12, %v1716_v51 }
 0x16d   :  { %v1007_v17 = vadd.f32 %v1006_v53, %v959_v55  ;;  %v905_v0 = vadd.f32 %v904_v14, %v1734_v7 }
 0x16f   :  { %v1008_v19 = vadd.f32 %v1007_v17, %v960_v18  ;;  %v906_v43 = vadd.f32 %v905_v0, %v1751_v27  ;;  %v965_v27 = vmul.f32 %v1811_v33, %v1811_v33 }
 0x171   :  { %v1009_v3 = vadd.f32 %v1008_v19, %v961_v20  ;;  %v907_v30 = vadd.f32 %v906_v43, %v1768_v42 }
 0x173   :  { %v1010_v24 = vadd.f32 %v1009_v3, %v962_v49  ;;  %v908_v51 = vadd.f32 %v907_v30, %v1785_v63 }
 0x175   :  { %v1011_v34 = vadd.f32 %v1010_v24, %v963_v25  ;;  %v909_v7 = vadd.f32 %v908_v51, %v1800_v21 }
 0x177   :  { %v1012_v29 = vadd.f32 %v1011_v34, %v964_v26  ;;  %v910_v15 = vadd.f32 %v909_v7, %v1811_v33 }
 0x179   :  { %v911_v31 = vrot.slane %v910_v15, 4  ;;  %v1013_v42 = vadd.f32 %v1012_v29, %v965_v27 }
 0x17b   :  { %v912_v32 = vadd.f32 %v911_v31, %v910_v15  ;;  %v1014_v36 = vrot.slane %v1013_v42, 4 }
 0x17d   :  { %v913_v39 = vrot.slane %v912_v32, 2  ;;  %v1015_v23 = vadd.f32 %v1014_v36, %v1013_v42 }
 0x17f   :  { %v914_v63 = vadd.f32 %v913_v39, %v912_v32  ;;  %v1016_v44 = vrot.slane %v1015_v23, 2 }
 0x181   :  { %v915_v41 = vrot.slane %v914_v63, 1  ;;  %v1017_v50 = vadd.f32 %v1016_v44, %v1015_v23 }
 0x183   :  { %v916_v46 = vadd.f32 %v915_v41, %v914_v63  ;;  %v1018_v21 = vrot.slane %v1017_v50, 1 }
 0x185   :  { %v1019_v47 = vadd.f32 %v1018_v21, %v1017_v50  ;;  %v1021_v56 = vsel %vm1020_vm1, %v916_v46, 0.0 }
 0x187   :  { %v1023_v48 = vsel %vm1022_vm2, %v1019_v47, 0.0 }
 0x188   :  { %v1024_v33 = vadd.f32 %v1023_v48, %v1021_v56 }
 0x18a   :  { %1025 = vst [vmem:[%s1908_s4] sm:$0xff] %v1024_v33 }

// kernel: dip_forward.24
= control target key start
LH: loop header
LB: loop body
LE: loop exit
PB: predicated region body
PF: predicated region fallthrough
CT: control target
= control target key end

     0   :  { %s259_s0 = inlined_call_operand.vmem [shape: f32[104,128], index: 0, kind: input, shape index: {}]   ;;  %s260_s1 = inlined_call_operand.vmem [shape: f32[1,128], index: 1, kind: input, shape index: {}]   ;;  %s261_s2 = inlined_call_operand.vmem [shape: f32[1,128], index: 2, kind: input, shape index: {}]   ;;  %s262_s3 = inlined_call_operand.vmem [shape: f32[104,128], index: 3, kind: output, shape index: {}]  }
   0x1   :  { %v14_v0 = vld [vmem:[%s259_s0] sm:$0xff]  ;;  %v15_v4 = vld [vmem:[%s259_s0 + $0x8] sm:$0xff]  ;;  %v16_v5 = vld [vmem:[%s259_s0 + $0x10] sm:$0xff] }
   0x2   :  { %v151_v1 = vld [vmem:[%s260_s1] ss:$0 sm:$0xff]  ;;  %v17_v6 = vld [vmem:[%s259_s0 + $0x18] sm:$0xff]  ;;  %v19_v11 = vld [vmem:[%s259_s0 + $0x28] sm:$0xff] }
   0x3   :  { %v156_v2 = vld [vmem:[%s261_s2] ss:$0 sm:$0xff]  ;;  %v34_v3 = vmul.f32 %v151_v1, %v14_v0  ;;  %v35_v7 = vmul.f32 %v151_v1, %v15_v4  ;;  %v36_v8 = vmul.f32 %v151_v1, %v16_v5  ;;  %v37_v9 = vmul.f32 %v151_v1, %v17_v6  ;;  %v20_v12 = vld [vmem:[%s259_s0 + $0x30] sm:$0xff]  ;;  %v21_v17 = vld [vmem:[%s259_s0 + $0x38] sm:$0xff] }
   0x4   :  { %v18_v10 = vld [vmem:[%s259_s0 + $0x20] sm:$0xff]  ;;  %v39_v15 = vmul.f32 %v151_v1, %v19_v11  ;;  %v40_v16 = vmul.f32 %v151_v1, %v20_v12  ;;  %v41_v21 = vmul.f32 %v151_v1, %v21_v17  ;;  %v23_v30 = vld [vmem:[%s259_s0 + $0x48] sm:$0xff]  ;;  %v24_v31 = vld [vmem:[%s259_s0 + $0x50] sm:$0xff] }
   0x5   :  { %v54_v13 = vadd.f32 %v156_v2, %v34_v3  ;;  %v38_v14 = vmul.f32 %v151_v1, %v18_v10  ;;  %v55_v18 = vadd.f32 %v156_v2, %v35_v7  ;;  %v56_v19 = vadd.f32 %v156_v2, %v36_v8  ;;  %v22_v25 = vld [vmem:[%s259_s0 + $0x40] sm:$0xff]  ;;  %v25_v43 = vld [vmem:[%s259_s0 + $0x58] sm:$0xff] }
   0x6   :  { %v57_v20 = vadd.f32 %v156_v2, %v37_v9  ;;  %v59_v24 = vadd.f32 %v156_v2, %v39_v15  ;;  %v60_v37 = vadd.f32 %v156_v2, %v40_v16  ;;  %v61_v38 = vadd.f32 %v156_v2, %v41_v21  ;;  %v26_v44 = vld [vmem:[%s259_s0 + $0x60] sm:$0xff] }
   0x7   :  { %vm67_vm0 = vcmp.ge.f32.partialorder %v54_v13, 0.0  ;;  %v80_v22 = vmul.f32 0.01, %v54_v13  ;;  %v58_v23 = vadd.f32 %v156_v2, %v38_v14  ;;  %vm68_vm1 = vcmp.ge.f32.partialorder %v55_v18, 0.0 }
   0x8   :  { %v81_v26 = vmul.f32 0.01, %v55_v18  ;;  %vm69_vm2 = vcmp.ge.f32.partialorder %v56_v19, 0.0  ;;  %v82_v27 = vmul.f32 0.01, %v56_v19  ;;  %vm70_vm3 = vcmp.ge.f32.partialorder %v57_v20, 0.0 }
   0x9   :  { %v93_v28 = vsel %vm67_vm0, %v54_v13, %v80_v22  ;;  %v83_v29 = vmul.f32 0.01, %v57_v20  ;;  %vm71_vm4 = vcmp.ge.f32.partialorder %v58_v23, 0.0  ;;  %v84_v34 = vmul.f32 0.01, %v58_v23 }
   0xa   :  { %106 = vst [vmem:[%s262_s3] sm:$0xff] %v93_v28  ;;  %v94_v32 = vsel %vm68_vm1, %v55_v18, %v81_v26  ;;  %v95_v33 = vsel %vm69_vm2, %v56_v19, %v82_v27  ;;  %vm72_vm5 = vcmp.ge.f32.partialorder %v59_v24, 0.0  ;;  %v85_v36 = vmul.f32 0.01, %v59_v24 }
   0xb   :  { %107 = vst [vmem:[%s262_s3 + $0x8] sm:$0xff] %v94_v32  ;;  %108 = vst [vmem:[%s262_s3 + $0x10] sm:$0xff] %v95_v33  ;;  %v96_v35 = vsel %vm70_vm3, %v57_v20, %v83_v29  ;;  %v97_v39 = vsel %vm71_vm4, %v58_v23, %v84_v34  ;;  %v42_v40 = vmul.f32 %v151_v1, %v22_v25  ;;  %vm73_vm6 = vcmp.ge.f32.partialorder %v60_v37, 0.0 }
   0xc   :  { %109 = vst [vmem:[%s262_s3 + $0x18] sm:$0xff] %v96_v35  ;;  %v43_v41 = vmul.f32 %v151_v1, %v23_v30  ;;  %v44_v42 = vmul.f32 %v151_v1, %v24_v31  ;;  %110 = vst [vmem:[%s262_s3 + $0x20] sm:$0xff] %v97_v39  ;;  %v98_v45 = vsel %vm72_vm5, %v59_v24, %v85_v36  ;;  %v86_v46 = vmul.f32 0.01, %v60_v37 }
   0xd   :  { %vm74_vm7 = vcmp.ge.f32.partialorder %v61_v38, 0.0  ;;  %111 = vst [vmem:[%s262_s3 + $0x28] sm:$0xff] %v98_v45  ;;  %v87_v47 = vmul.f32 0.01, %v61_v38  ;;  %v62_v48 = vadd.f32 %v156_v2, %v42_v40  ;;  %v45_v52 = vmul.f32 %v151_v1, %v25_v43 }
   0xe   :  { %v63_v49 = vadd.f32 %v156_v2, %v43_v41  ;;  %v64_v50 = vadd.f32 %v156_v2, %v44_v42  ;;  %v99_v51 = vsel %vm73_vm6, %v60_v37, %v86_v46  ;;  %v46_v53 = vmul.f32 %v151_v1, %v26_v44 }
   0xf   :  { %112 = vst [vmem:[%s262_s3 + $0x30] sm:$0xff] %v99_v51  ;;  %v100_v54 = vsel %vm74_vm7, %v61_v38, %v87_v47  ;;  %vm75_vm8 = vcmp.ge.f32.partialorder %v62_v48, 0.0  ;;  %v88_v55 = vmul.f32 0.01, %v62_v48  ;;  %v65_v58 = vadd.f32 %v156_v2, %v45_v52 }
  0x10   :  { %vm76_vm9 = vcmp.ge.f32.partialorder %v63_v49, 0.0  ;;  %113 = vst [vmem:[%s262_s3 + $0x38] sm:$0xff] %v100_v54  ;;  %v89_v56 = vmul.f32 0.01, %v63_v49  ;;  %vm77_vm10 = vcmp.ge.f32.partialorder %v64_v50, 0.0  ;;  %v66_v60 = vadd.f32 %v156_v2, %v46_v53 }
  0x11   :  { %v90_v57 = vmul.f32 0.01, %v64_v50  ;;  %v101_v59 = vsel %vm75_vm8, %v62_v48, %v88_v55  ;;  %vm78_vm11 = vcmp.ge.f32.partialorder %v65_v58, 0.0  ;;  %v91_v63 = vmul.f32 0.01, %v65_v58 }
  0x12   :  { %114 = vst [vmem:[%s262_s3 + $0x40] sm:$0xff] %v101_v59  ;;  %v102_v61 = vsel %vm76_vm9, %v63_v49, %v89_v56  ;;  %vm79_vm12 = vcmp.ge.f32.partialorder %v66_v60, 0.0  ;;  %v92_v0 = vmul.f32 0.01, %v66_v60 }
  0x13   :  { %v103_v62 = vsel %vm77_vm10, %v64_v50, %v90_v57  ;;  %115 = vst [vmem:[%s262_s3 + $0x48] sm:$0xff] %v102_v61  ;;  %v104_v1 = vsel %vm78_vm11, %v65_v58, %v91_v63 }
  0x14   :  { %116 = vst [vmem:[%s262_s3 + $0x50] sm:$0xff] %v103_v62  ;;  %117 = vst [vmem:[%s262_s3 + $0x58] sm:$0xff] %v104_v1  ;;  %v105_v2 = vsel %vm79_vm12, %v66_v60, %v92_v0 }
  0x15   :  { %118 = vst [vmem:[%s262_s3 + $0x60] sm:$0xff] %v105_v2 }

// kernel: dip_forward.23
= control target key start
LH: loop header
LB: loop body
LE: loop exit
PB: predicated region body
PF: predicated region fallthrough
CT: control target
= control target key end

     0   :  { %v495_v0 = vmov 0.0   ;;  %vm496_vm0 = vmmov 0   ;;  %v242_v51 = vlaneseq  ;;  %s682_s1 = inlined_call_operand.vmem [shape: bf16[128,128], index: 1, kind: input, shape index: {}]   ;;  %s683_s0 = inlined_call_operand.vmem [shape: bf16[104,128], index: 0, kind: input, shape index: {}]   ;;  %s684_s2 = inlined_call_operand.vmem [shape: f32[1,128], index: 2, kind: input, shape index: {}]   ;;  %s685_s3 = inlined_call_operand.vmem [shape: f32[104,128], index: 3, kind: output, shape index: {0}]   ;;  %s686_s4 = inlined_call_operand.vmem [shape: f32[1,8,128], index: 4, kind: output, shape index: {1}]  }
   0x1   :  { %418 = vmatprep.subr.bf16.mxu0 %v495_v0  ;;  %v480_v1 = vld [vmem:[%s682_s1 + $0x38] sm:$0xff]   ;;  %462 = vmatprep.subr.bf16.mxu1 %v495_v0  ;;  %v481_v2 = vld [vmem:[%s682_s1 + $0x30] sm:$0xff]   ;;  %v482_v3 = vld [vmem:[%s682_s1 + $0x28] sm:$0xff]  }
   0x2   :  { %434 = vmatprep.mubr.msk.bf16.mxu0 %vm496_vm0, %v495_v0  ;;  %450 = vmatprep.mubr.msk.bf16.mxu1 %vm496_vm0, %v495_v0  ;;  %v483_v4 = vld [vmem:[%s682_s1 + $0x20] sm:$0xff]   ;;  %v484_v5 = vld [vmem:[%s682_s1 + $0x18] sm:$0xff]   ;;  %v485_v6 = vld [vmem:[%s682_s1 + $0x10] sm:$0xff]   ;;  %v243_v63 = vshrl.u32 %v242_v51, 7 }
   0x3   :  { %419 = vmatpush3.bf16.msra.mxu0 %v480_v1  ;;  %470 = vmatpush3.bf16.msra.mxu1 %v480_v1  ;;  %v486_v7 = vld [vmem:[%s682_s1 + $0x8] sm:$0xff]   ;;  %v487_v8 = vld [vmem:[%s682_s1] sm:$0xff]   ;;  %v491_v13 = vld [vmem:[%s683_s0 + $0x10] sm:$0xff]  }
   0x4   :  { %420 = vmatprep.subr.bf16.mxu0 %v495_v0  ;;  %463 = vmatprep.subr.bf16.mxu1 %v495_v0  ;;  %v488_v9 = vld [vmem:[%s683_s0] sm:$0xff]   ;;  %v489_v11 = vld [vmem:[%s683_s0 + $0x8] sm:$0xff]   ;;  %v494_v14 = vld [vmem:[%s683_s0 + $0x30] ss:$0 sps:$4 sm:$0xff]   ;;  %vm372_vm2 = vcmp.eq.s32.totalorder %v243_v63, 0  ;;  %vm374_vm3 = vcmp.eq.s32.totalorder %v243_v63, 1 }
   0x5   :  { %v490_v10 = vld [vmem:[%s683_s0 + $0x20] sm:$0xff]   ;;  %v492_v12 = vld [vmem:[%s683_s0 + $0x28] sm:$0xff]   ;;  %v493_v15 = vld [vmem:[%s683_s0 + $0x18] sm:$0xff]  }
   0x6   :  { %v600_v16 = vld [vmem:[%s684_s2] ss:$0 sm:$0xff] }
   0x7   :  { %421 = vmatpush3.bf16.msra.mxu0 %v481_v2  ;;  %471 = vmatpush3.bf16.msra.mxu1 %v481_v2 }
   0x8   :  { %422 = vmatprep.subr.bf16.mxu0 %v495_v0  ;;  %464 = vmatprep.subr.bf16.mxu1 %v495_v0 }
   0xb   :  { %423 = vmatpush3.bf16.msra.mxu0 %v482_v3  ;;  %472 = vmatpush3.bf16.msra.mxu1 %v482_v3 }
   0xc   :  { %424 = vmatprep.subr.bf16.mxu0 %v495_v0  ;;  %465 = vmatprep.subr.bf16.mxu1 %v495_v0 }
   0xf   :  { %425 = vmatpush3.bf16.msra.mxu0 %v483_v4  ;;  %473 = vmatpush3.bf16.msra.mxu1 %v483_v4 }
  0x10   :  { %426 = vmatprep.subr.bf16.mxu0 %v495_v0  ;;  %466 = vmatprep.subr.bf16.mxu1 %v495_v0 }
  0x13   :  { %427 = vmatpush3.bf16.msra.mxu0 %v484_v5  ;;  %474 = vmatpush3.bf16.msra.mxu1 %v484_v5 }
  0x14   :  { %428 = vmatprep.subr.bf16.mxu0 %v495_v0  ;;  %467 = vmatprep.subr.bf16.mxu1 %v495_v0 }
  0x17   :  { %429 = vmatpush3.bf16.msra.mxu0 %v485_v6  ;;  %475 = vmatpush3.bf16.msra.mxu1 %v485_v6 }
  0x18   :  { %430 = vmatprep.subr.bf16.mxu0 %v495_v0  ;;  %468 = vmatprep.subr.bf16.mxu1 %v495_v0 }
  0x1b   :  { %431 = vmatpush3.bf16.msra.mxu0 %v486_v7  ;;  %476 = vmatpush3.bf16.msra.mxu1 %v486_v7 }
  0x1c   :  { %432 = vmatprep.subr.bf16.mxu0 %v495_v0  ;;  %469 = vmatprep.subr.bf16.mxu1 %v495_v0 }
  0x1f   :  { %433 = vmatpush3.bf16.msra.mxu0 %v487_v8  ;;  %477 = vmatpush3.bf16.msra.mxu1 %v487_v8 }
  0x22   :  { %435 = vmatmul.mubr.bf16.vlgmr.msra.gmra.mxu0 %v488_v9  ;;  %451 = vmatmul.mubr.bf16.vlgmr.msra.gmra.mxu1 %v490_v10  ;;  %v255_v10 = vadd.s32 96, %v243_v63 }
  0x23   :  { %438 = vmatprep.mubr.msk.bf16.mxu0 %vm496_vm0, %v495_v0  ;;  %454 = vmatprep.mubr.msk.bf16.mxu1 %vm496_vm0, %v495_v0 }
  0x24   :  { %vm283_vm1 = vcmp.lt.s32.totalorder %v255_v10, 98 }
  0x2a   :  { %439 = vmatmul.mubr.bf16.gmra.mxu0 %v489_v11  ;;  %455 = vmatmul.mubr.bf16.gmra.mxu1 %v492_v12 }
  0x2b   :  { %442 = vmatprep.mubr.msk.bf16.mxu0 %vm496_vm0, %v495_v0  ;;  %458 = vmatprep.mubr.msk.bf16.mxu1 %vm496_vm0, %v495_v0 }
  0x32   :  { %443 = vmatmul.mubr.bf16.gmra.mxu0 %v491_v13  ;;  %459 = vmatmul.mubr.bf16.gmra.mxu1 %v494_v14 }
  0x33   :  { %446 = vmatprep.mubr.msk.bf16.mxu0 %vm496_vm0, %v495_v0 }
  0x3a   :  { %447 = vmatmul.mubr.bf16.gmra.mxu0 %v493_v15 }
  0xe2   :  { %v175_v17 = vpop.f32.mrf.mxu0  ;;  %v207_v18 = vpop.f32.mrf.mxu1 }
  0xe3   :  { %v176_v19 = vadd.f32 %v600_v16, %v175_v17  ;;  %v604_v20 = vadd.f32 %v600_v16, %v207_v18 }
  0xe4   :  { %v436_v21 = vpop.f32.mrf.mxu0  ;;  %v452_v22 = vpop.f32.mrf.mxu1 }
  0xe5   :  { %229 = vst [vmem:[%s685_s3] sm:$0xff] %v176_v19  ;;  %237 = vst [vmem:[%s685_s3 + $0x40] sm:$0xff] %v604_v20  ;;  %v341_v48 = vmul.f32 %v176_v19, %v176_v19  ;;  %v349_v21 = vmul.f32 %v604_v20, %v604_v20 }
  0xe6   :  { %v178_v23 = vpop.f32.mrf.mxu0  ;;  %v210_v24 = vpop.f32.mrf.mxu1 }
  0xe7   :  { %v179_v25 = vadd.f32 %v600_v16, %v178_v23  ;;  %v615_v26 = vadd.f32 %v600_v16, %v210_v24  ;;  %v402_v24 = vsel %vm283_vm1, 1.0, %v495_v0 }
  0xe8   :  { %v437_v27 = vpop.f32.mrf.mxu0  ;;  %v453_v28 = vpop.f32.mrf.mxu1 }
  0xe9   :  { %230 = vst [vmem:[%s685_s3 + $0x8] sm:$0xff] %v179_v25  ;;  %238 = vst [vmem:[%s685_s3 + $0x48] sm:$0xff] %v615_v26  ;;  %v342_v43 = vmul.f32 %v179_v25, %v179_v25  ;;  %v323_v49 = vadd.f32 %v179_v25, %v176_v19 }
  0xea   :  { %v183_v29 = vpop.f32.mrf.mxu0  ;;  %v215_v30 = vpop.f32.mrf.mxu1 }
  0xeb   :  { %v184_v31 = vadd.f32 %v600_v16, %v183_v29  ;;  %v626_v32 = vadd.f32 %v600_v16, %v215_v30  ;;  %v354_v54 = vadd.f32 %v342_v43, %v341_v48 }
  0xec   :  { %v440_v33 = vpop.f32.mrf.mxu0  ;;  %v456_v34 = vpop.f32.mrf.mxu1 }
  0xed   :  { %231 = vst [vmem:[%s685_s3 + $0x10] sm:$0xff] %v184_v31  ;;  %239 = vst [vmem:[%s685_s3 + $0x50] sm:$0xff] %v626_v32  ;;  %v343_v50 = vmul.f32 %v184_v31, %v184_v31  ;;  %v324_v55 = vadd.f32 %v323_v49, %v184_v31  ;;  %v351_v28 = vmul.f32 %v626_v32, %v626_v32 }
  0xee   :  { %v186_v35 = vpop.f32.mrf.mxu0  ;;  %v218_v36 = vpop.f32.mrf.mxu1 }
  0xef   :  { %v187_v37 = vadd.f32 %v600_v16, %v186_v35  ;;  %v637_v38 = vadd.f32 %v600_v16, %v218_v36  ;;  %v355_v60 = vadd.f32 %v354_v54, %v343_v50 }
  0xf0   :  { %v441_v39 = vpop.f32.mrf.mxu0  ;;  %v457_v40 = vpop.f32.mrf.mxu1 }
  0xf1   :  { %232 = vst [vmem:[%s685_s3 + $0x18] sm:$0xff] %v187_v37  ;;  %240 = vst [vmem:[%s685_s3 + $0x58] sm:$0xff] %v637_v38  ;;  %v344_v56 = vmul.f32 %v187_v37, %v187_v37  ;;  %v325_v61 = vadd.f32 %v324_v55, %v187_v37  ;;  %v352_v33 = vmul.f32 %v637_v38, %v637_v38 }
  0xf2   :  { %v191_v41 = vpop.f32.mrf.mxu0  ;;  %v223_v42 = vpop.f32.mrf.mxu1 }
  0xf3   :  { %v192_v44 = vadd.f32 %v600_v16, %v191_v41  ;;  %v224_v45 = vadd.f32 %v600_v16, %v223_v42  ;;  %v356_v2 = vadd.f32 %v355_v60, %v344_v56 }
  0xf4   :  { %v444_v46 = vpop.f32.mrf.mxu0  ;;  %v460_v47 = vpop.f32.mrf.mxu1 }
  0xf5   :  { %233 = vst [vmem:[%s685_s3 + $0x20] sm:$0xff] %v192_v44  ;;  %241 = vst [vmem:[%s685_s3 + $0x60] sm:$0xff] %v224_v45  ;;  %v345_v62 = vmul.f32 %v192_v44, %v192_v44  ;;  %v326_v3 = vadd.f32 %v325_v61, %v192_v44  ;;  %v322_v30 = vmul.f32 %v402_v24, %v224_v45 }
  0xf6   :  { %v194_v52 = vpop.f32.mrf.mxu0  ;;  %v226_v53 = vpop.f32.mrf.mxu1 }
  0xf7   :  { %v195_v57 = vadd.f32 %v600_v16, %v194_v52  ;;  %v357_v7 = vadd.f32 %v356_v2, %v345_v62  ;;  %v353_v35 = vmul.f32 %v322_v30, %v224_v45 }
  0xf8   :  { %v445_v58 = vpop.f32.mrf.mxu0  ;;  %v461_v59 = vpop.f32.mrf.mxu1 }
  0xf9   :  { %234 = vst [vmem:[%s685_s3 + $0x28] sm:$0xff] %v195_v57  ;;  %v346_v4 = vmul.f32 %v195_v57, %v195_v57  ;;  %v327_v8 = vadd.f32 %v326_v3, %v195_v57 }
  0xfa   :  { %v199_v1 = vpop.f32.mrf.mxu0 }
  0xfb   :  { %v200_v5 = vadd.f32 %v600_v16, %v199_v1  ;;  %v358_v12 = vadd.f32 %v357_v7, %v346_v4 }
  0xfc   :  { %v448_v6 = vpop.f32.mrf.mxu0 }
  0xfd   :  { %235 = vst [vmem:[%s685_s3 + $0x30] sm:$0xff] %v200_v5  ;;  %v347_v9 = vmul.f32 %v200_v5, %v200_v5  ;;  %v328_v13 = vadd.f32 %v327_v8, %v200_v5 }
  0xfe   :  { %v202_v11 = vpop.f32.mrf.mxu0 }
  0xff   :  { %v203_v14 = vadd.f32 %v600_v16, %v202_v11  ;;  %v359_v17 = vadd.f32 %v358_v12, %v347_v9  ;;  %v350_v16 = vmul.f32 %v615_v26, %v615_v26 }
 0x100   :  { %v449_v15 = vpop.f32.mrf.mxu0 }
 0x101   :  { %236 = vst [vmem:[%s685_s3 + $0x38] sm:$0xff] %v203_v14  ;;  %v329_v18 = vadd.f32 %v328_v13, %v203_v14  ;;  %v348_v19 = vmul.f32 %v203_v14, %v203_v14 }
 0x103   :  { %v330_v22 = vadd.f32 %v329_v18, %v604_v20  ;;  %v360_v23 = vadd.f32 %v359_v17, %v348_v19 }
 0x105   :  { %v331_v25 = vadd.f32 %v330_v22, %v615_v26  ;;  %v361_v27 = vadd.f32 %v360_v23, %v349_v21 }
 0x107   :  { %v362_v29 = vadd.f32 %v361_v27, %v350_v16  ;;  %v332_v31 = vadd.f32 %v331_v25, %v626_v32 }
 0x109   :  { %v333_v20 = vadd.f32 %v332_v31, %v637_v38  ;;  %v363_v34 = vadd.f32 %v362_v29, %v351_v28 }
 0x10b   :  { %v334_v0 = vadd.f32 %v333_v20, %v322_v30  ;;  %v364_v36 = vadd.f32 %v363_v34, %v352_v33 }
 0x10d   :  { %v335_v37 = vrot.slane %v334_v0, 4  ;;  %v365_v39 = vadd.f32 %v364_v36, %v353_v35 }
 0x10f   :  { %v336_v26 = vadd.f32 %v335_v37, %v334_v0  ;;  %v366_v40 = vrot.slane %v365_v39, 4 }
 0x111   :  { %v337_v41 = vrot.slane %v336_v26, 2  ;;  %v367_v42 = vadd.f32 %v366_v40, %v365_v39 }
 0x113   :  { %v338_v43 = vadd.f32 %v337_v41, %v336_v26  ;;  %v368_v44 = vrot.slane %v367_v42, 2 }
 0x115   :  { %v339_v46 = vrot.slane %v338_v43, 1  ;;  %v369_v47 = vadd.f32 %v368_v44, %v367_v42 }
 0x117   :  { %v340_v32 = vadd.f32 %v339_v46, %v338_v43  ;;  %v370_v48 = vrot.slane %v369_v47, 1 }
 0x119   :  { %v371_v49 = vadd.f32 %v370_v48, %v369_v47  ;;  %v373_v38 = vsel %vm372_vm2, %v340_v32, 0.0 }
 0x11b   :  { %v375_v50 = vsel %vm374_vm3, %v371_v49, 0.0 }
 0x11c   :  { %v376_v51 = vadd.f32 %v375_v50, %v373_v38 }
 0x11e   :  { %377 = vst [vmem:[%s686_s4] sm:$0xff] %v376_v51 }

// kernel: dip_forward.26
= control target key start
LH: loop header
LB: loop body
LE: loop exit
PB: predicated region body
PF: predicated region fallthrough
CT: control target
= control target key end

     0   :  { %s151_s0 = inlined_call_operand.vmem [shape: f32[56,128], index: 0, kind: input, shape index: {}]   ;;  %s152_s1 = inlined_call_operand.vmem [shape: f32[1,128], index: 1, kind: input, shape index: {}]   ;;  %s153_s2 = inlined_call_operand.vmem [shape: f32[1,128], index: 2, kind: input, shape index: {}]   ;;  %s154_s3 = inlined_call_operand.vmem [shape: f32[56,128], index: 3, kind: output, shape index: {}]  }
   0x1   :  { %v14_v0 = vld [vmem:[%s151_s0] sm:$0xff]  ;;  %v15_v4 = vld [vmem:[%s151_s0 + $0x8] sm:$0xff]  ;;  %v16_v5 = vld [vmem:[%s151_s0 + $0x10] sm:$0xff] }
   0x2   :  { %v81_v1 = vld [vmem:[%s152_s1] ss:$0 sm:$0xff]  ;;  %v17_v6 = vld [vmem:[%s151_s0 + $0x18] sm:$0xff]  ;;  %v19_v11 = vld [vmem:[%s151_s0 + $0x28] sm:$0xff] }
   0x3   :  { %v82_v2 = vld [vmem:[%s153_s2] ss:$0 sm:$0xff]  ;;  %v28_v3 = vmul.f32 %v81_v1, %v14_v0  ;;  %v29_v7 = vmul.f32 %v81_v1, %v15_v4  ;;  %v30_v8 = vmul.f32 %v81_v1, %v16_v5  ;;  %v31_v9 = vmul.f32 %v81_v1, %v17_v6  ;;  %v20_v12 = vld [vmem:[%s151_s0 + $0x30] sm:$0xff] }
   0x4   :  { %v18_v10 = vld [vmem:[%s151_s0 + $0x20] sm:$0xff]  ;;  %v33_v15 = vmul.f32 %v81_v1, %v19_v11  ;;  %v34_v19 = vmul.f32 %v81_v1, %v20_v12 }
   0x5   :  { %v42_v13 = vadd.f32 %v82_v2, %v28_v3  ;;  %v32_v14 = vmul.f32 %v81_v1, %v18_v10  ;;  %v43_v16 = vadd.f32 %v82_v2, %v29_v7  ;;  %v44_v17 = vadd.f32 %v82_v2, %v30_v8 }
   0x6   :  { %v45_v18 = vadd.f32 %v82_v2, %v31_v9  ;;  %v47_v22 = vadd.f32 %v82_v2, %v33_v15  ;;  %v48_v32 = vadd.f32 %v82_v2, %v34_v19 }
   0x7   :  { %vm49_vm0 = vcmp.ge.f32.partialorder %v42_v13, 0.0  ;;  %v56_v20 = vmul.f32 0.01, %v42_v13  ;;  %v46_v21 = vadd.f32 %v82_v2, %v32_v14  ;;  %vm50_vm1 = vcmp.ge.f32.partialorder %v43_v16, 0.0 }
   0x8   :  { %v57_v23 = vmul.f32 0.01, %v43_v16  ;;  %vm51_vm2 = vcmp.ge.f32.partialorder %v44_v17, 0.0  ;;  %v58_v24 = vmul.f32 0.01, %v44_v17  ;;  %vm52_vm3 = vcmp.ge.f32.partialorder %v45_v18, 0.0 }
   0x9   :  { %v63_v25 = vsel %vm49_vm0, %v42_v13, %v56_v20  ;;  %v59_v26 = vmul.f32 0.01, %v45_v18  ;;  %vm53_vm4 = vcmp.ge.f32.partialorder %v46_v21, 0.0  ;;  %v60_v29 = vmul.f32 0.01, %v46_v21 }
   0xa   :  { %70 = vst [vmem:[%s154_s3] sm:$0xff] %v63_v25  ;;  %v64_v27 = vsel %vm50_vm1, %v43_v16, %v57_v23  ;;  %v65_v28 = vsel %vm51_vm2, %v44_v17, %v58_v24  ;;  %vm54_vm5 = vcmp.ge.f32.partialorder %v47_v22, 0.0  ;;  %v61_v31 = vmul.f32 0.01, %v47_v22 }
   0xb   :  { %71 = vst [vmem:[%s154_s3 + $0x8] sm:$0xff] %v64_v27  ;;  %72 = vst [vmem:[%s154_s3 + $0x10] sm:$0xff] %v65_v28  ;;  %v66_v30 = vsel %vm52_vm3, %v45_v18, %v59_v26  ;;  %v67_v33 = vsel %vm53_vm4, %v46_v21, %v60_v29  ;;  %vm55_vm6 = vcmp.ge.f32.partialorder %v48_v32, 0.0  ;;  %v62_v35 = vmul.f32 0.01, %v48_v32 }
   0xc   :  { %73 = vst [vmem:[%s154_s3 + $0x18] sm:$0xff] %v66_v30  ;;  %74 = vst [vmem:[%s154_s3 + $0x20] sm:$0xff] %v67_v33  ;;  %v68_v34 = vsel %vm54_vm5, %v47_v22, %v61_v31 }
   0xd   :  { %75 = vst [vmem:[%s154_s3 + $0x28] sm:$0xff] %v68_v34  ;;  %v69_v36 = vsel %vm55_vm6, %v48_v32, %v62_v35 }
   0xe   :  { %76 = vst [vmem:[%s154_s3 + $0x30] sm:$0xff] %v69_v36 }

// kernel: dip_forward.25
= control target key start
LH: loop header
LB: loop body
LE: loop exit
PB: predicated region body
PF: predicated region fallthrough
CT: control target
= control target key end

     0   :  { %v267_v30 = vlaneseq  ;;  %s594_s1 = inlined_call_operand.vmem [shape: bf16[256,128], index: 1, kind: input, shape index: {}]   ;;  %s595_s0 = inlined_call_operand.vmem [shape: bf16[56,256], index: 0, kind: input, shape index: {}]   ;;  %s596_s2 = inlined_call_operand.vmem [shape: f32[1,128], index: 2, kind: input, shape index: {}]   ;;  %s597_s3 = inlined_call_operand.vmem [shape: f32[56,128], index: 3, kind: output, shape index: {0}]   ;;  %s598_s4 = inlined_call_operand.vmem [shape: f32[1,8,128], index: 4, kind: output, shape index: {1}]  }
   0x1   :  { %v440_v0 = vld [vmem:[%s594_s1 + $0x78] sm:$0xff]   ;;  %v442_v2 = vld [vmem:[%s594_s1 + $0x70] sm:$0xff]   ;;  %v444_v4 = vld [vmem:[%s594_s1 + $0x68] sm:$0xff]  }
   0x2   :  { %v441_v1 = vld [vmem:[%s594_s1 + $0x38] sm:$0xff]   ;;  %383 = vmatprep.subr.bf16.mxu0 %v440_v0  ;;  %423 = vmatprep.subr.bf16.mxu1 %v440_v0  ;;  %v443_v3 = vld [vmem:[%s594_s1 + $0x30] sm:$0xff]   ;;  %v445_v5 = vld [vmem:[%s594_s1 + $0x28] sm:$0xff]   ;;  %v565_v39 = vshrl.u32 %v267_v30, 7 }
   0x3   :  { %384 = vmatpush3.bf16.msra.mxu0 %v441_v1  ;;  %431 = vmatpush3.bf16.msra.mxu1 %v441_v1  ;;  %v446_v6 = vld [vmem:[%s594_s1 + $0x60] sm:$0xff]   ;;  %v448_v8 = vld [vmem:[%s594_s1 + $0x58] sm:$0xff]   ;;  %v450_v10 = vld [vmem:[%s594_s1 + $0x50] sm:$0xff]   ;;  %v467_v1 = vmov 0.0  }
   0x4   :  { %385 = vmatprep.subr.bf16.mxu0 %v442_v2  ;;  %424 = vmatprep.subr.bf16.mxu1 %v442_v2  ;;  %v447_v7 = vld [vmem:[%s594_s1 + $0x20] sm:$0xff]   ;;  %v449_v9 = vld [vmem:[%s594_s1 + $0x18] sm:$0xff]   ;;  %v451_v13 = vld [vmem:[%s594_s1 + $0x10] sm:$0xff]   ;;  %v274_v48 = vadd.s32 48, %v565_v39  ;;  %vm343_vm1 = vcmp.eq.s32.totalorder %v565_v39, 0  ;;  %vm345_vm2 = vcmp.eq.s32.totalorder %v565_v39, 1 }
   0x5   :  { %v458_v11 = vld [vmem:[%s595_s0 + $0x4] ss:$8 sps:$4 sm:$0xff]   ;;  %v23_v18 = vld [vmem:[%s595_s0 + $0x30] sm:$0xff]  ;;  %v456_v19 = vld [vmem:[%s595_s0] ss:$8 sps:$4 sm:$0xff]  }
   0x6   :  { %v461_v12 = vld [vmem:[%s595_s0 + $0x24] ss:$8 sps:$4 sm:$0xff]   ;;  %228 = vmatprep.mubr.bf16.mxu0 %v458_v11  ;;  %v459_v20 = vld [vmem:[%s595_s0 + $0x20] ss:$8 sps:$4 sm:$0xff]   ;;  %v462_v21 = vld [vmem:[%s595_s0 + $0x14] ss:$8 sps:$4 sm:$0xff]   ;;  %v365_v22 = vcombine.high %v23_v18, %v23_v18  ;;  %v364_v24 = vcombine.low %v23_v18, %v23_v18 }
   0x7   :  { %386 = vmatpush3.bf16.msra.mxu0 %v443_v3  ;;  %432 = vmatpush3.bf16.msra.mxu1 %v443_v3  ;;  %v452_v14 = vld [vmem:[%s594_s1 + $0x48] sm:$0xff]   ;;  %v454_v16 = vld [vmem:[%s594_s1 + $0x40] sm:$0xff]   ;;  %v464_v23 = vld [vmem:[%s595_s0 + $0x10] ss:$8 sps:$4 sm:$0xff]   ;;  %vm290_vm0 = vcmp.lt.s32.totalorder %v274_v48, 50 }
   0x8   :  { %387 = vmatprep.subr.bf16.mxu0 %v444_v4  ;;  %425 = vmatprep.subr.bf16.mxu1 %v444_v4  ;;  %v453_v15 = vld [vmem:[%s594_s1 + $0x8] sm:$0xff]   ;;  %v455_v17 = vld [vmem:[%s594_s1] sm:$0xff]   ;;  %v382_v2 = vsel %vm290_vm0, 1.0, %v467_v1 }
   0x9   :  { %244 = vmatprep.mubr.bf16.mxu1 %v461_v12  ;;  %v357_v27 = vld [vmem:[%s596_s2] ss:$0 sm:$0xff] }
   0xb   :  { %388 = vmatpush3.bf16.msra.mxu0 %v445_v5  ;;  %433 = vmatpush3.bf16.msra.mxu1 %v445_v5 }
   0xc   :  { %389 = vmatprep.subr.bf16.mxu0 %v446_v6  ;;  %426 = vmatprep.subr.bf16.mxu1 %v446_v6 }
   0xf   :  { %390 = vmatpush3.bf16.msra.mxu0 %v447_v7  ;;  %434 = vmatpush3.bf16.msra.mxu1 %v447_v7 }
  0x10   :  { %391 = vmatprep.subr.bf16.mxu0 %v448_v8  ;;  %427 = vmatprep.subr.bf16.mxu1 %v448_v8 }
  0x13   :  { %392 = vmatpush3.bf16.msra.mxu0 %v449_v9  ;;  %435 = vmatpush3.bf16.msra.mxu1 %v449_v9 }
  0x14   :  { %393 = vmatprep.subr.bf16.mxu0 %v450_v10  ;;  %428 = vmatprep.subr.bf16.mxu1 %v450_v10 }
  0x17   :  { %394 = vmatpush3.bf16.msra.mxu0 %v451_v13  ;;  %436 = vmatpush3.bf16.msra.mxu1 %v451_v13 }
  0x18   :  { %395 = vmatprep.subr.bf16.mxu0 %v452_v14  ;;  %429 = vmatprep.subr.bf16.mxu1 %v452_v14 }
  0x1b   :  { %396 = vmatpush3.bf16.msra.mxu0 %v453_v15  ;;  %437 = vmatpush3.bf16.msra.mxu1 %v453_v15 }
  0x1c   :  { %397 = vmatprep.subr.bf16.mxu0 %v454_v16  ;;  %430 = vmatprep.subr.bf16.mxu1 %v454_v16 }
  0x1f   :  { %398 = vmatpush3.bf16.msra.mxu0 %v455_v17  ;;  %438 = vmatpush3.bf16.msra.mxu1 %v455_v17 }
  0x22   :  { %229 = vmatmul.mubr.bf16.vlgmr.msra.gmra.mxu0 %v456_v19  ;;  %245 = vmatmul.mubr.bf16.vlgmr.msra.gmra.mxu1 %v459_v20 }
  0x23   :  { %236 = vmatprep.mubr.bf16.mxu0 %v462_v21  ;;  %252 = vmatprep.mubr.bf16.mxu1 %v365_v22 }
  0x2a   :  { %237 = vmatmul.mubr.bf16.gmra.mxu0 %v464_v23  ;;  %253 = vmatmul.mubr.bf16.gmra.mxu1 %v364_v24 }
  0xe2   :  { %v399_v25 = vpop.f32.mrf.mxu0  ;;  %v411_v26 = vpop.f32.mrf.mxu1 }
  0xe4   :  { %v400_v28 = vpop.f32.mrf.mxu0  ;;  %v412_v29 = vpop.f32.mrf.mxu1 }
  0xe5   :  { %v401_v31 = vadd.f32 %v400_v28, %v399_v25  ;;  %v413_v32 = vadd.f32 %v412_v29, %v411_v26 }
  0xe6   :  { %v402_v33 = vpop.f32.mrf.mxu0  ;;  %v414_v34 = vpop.f32.mrf.mxu1 }
  0xe7   :  { %v231_v35 = vadd.f32 %v401_v31, %v357_v27  ;;  %v247_v36 = vadd.f32 %v413_v32, %v357_v27 }
  0xe8   :  { %v403_v37 = vpop.f32.mrf.mxu0  ;;  %v415_v38 = vpop.f32.mrf.mxu1 }
  0xe9   :  { %260 = vst [vmem:[%s597_s3] sm:$0xff] %v231_v35  ;;  %264 = vst [vmem:[%s597_s3 + $0x20] sm:$0xff] %v247_v36  ;;  %v404_v40 = vadd.f32 %v403_v37, %v402_v33  ;;  %v416_v41 = vadd.f32 %v415_v38, %v414_v34  ;;  %v324_v58 = vmul.f32 %v231_v35, %v231_v35 }
  0xea   :  { %v405_v42 = vpop.f32.mrf.mxu0  ;;  %v417_v43 = vpop.f32.mrf.mxu1  ;;  %v328_v6 = vmul.f32 %v247_v36, %v247_v36 }
  0xeb   :  { %v234_v44 = vadd.f32 %v404_v40, %v357_v27  ;;  %v250_v45 = vadd.f32 %v416_v41, %v357_v27 }
  0xec   :  { %v406_v46 = vpop.f32.mrf.mxu0  ;;  %v418_v47 = vpop.f32.mrf.mxu1 }
  0xed   :  { %261 = vst [vmem:[%s597_s3 + $0x8] sm:$0xff] %v234_v44  ;;  %265 = vst [vmem:[%s597_s3 + $0x28] sm:$0xff] %v250_v45  ;;  %v407_v49 = vadd.f32 %v406_v46, %v405_v42  ;;  %v419_v51 = vadd.f32 %v418_v47, %v417_v43  ;;  %v325_v53 = vmul.f32 %v234_v44, %v234_v44 }
  0xee   :  { %v408_v50 = vpop.f32.mrf.mxu0  ;;  %v420_v52 = vpop.f32.mrf.mxu1  ;;  %v312_v59 = vadd.f32 %v234_v44, %v231_v35  ;;  %v329_v10 = vmul.f32 %v250_v45, %v250_v45 }
  0xef   :  { %v239_v54 = vadd.f32 %v407_v49, %v357_v27  ;;  %v255_v55 = vadd.f32 %v419_v51, %v357_v27  ;;  %v331_v62 = vadd.f32 %v325_v53, %v324_v58 }
  0xf0   :  { %v409_v56 = vpop.f32.mrf.mxu0  ;;  %v421_v57 = vpop.f32.mrf.mxu1 }
  0xf1   :  { %262 = vst [vmem:[%s597_s3 + $0x10] sm:$0xff] %v239_v54  ;;  %v326_v60 = vmul.f32 %v239_v54, %v239_v54  ;;  %v410_v61 = vadd.f32 %v409_v56, %v408_v50  ;;  %266 = vst [vmem:[%s597_s3 + $0x30] sm:$0xff] %v255_v55  ;;  %v313_v63 = vadd.f32 %v312_v59, %v239_v54 }
  0xf2   :  { %v311_v7 = vmul.f32 %v382_v2, %v255_v55 }
  0xf3   :  { %v242_v0 = vadd.f32 %v410_v61, %v357_v27  ;;  %v332_v3 = vadd.f32 %v331_v62, %v326_v60 }
  0xf4   :  { %v330_v13 = vmul.f32 %v311_v7, %v255_v55 }
  0xf5   :  { %263 = vst [vmem:[%s597_s3 + $0x18] sm:$0xff] %v242_v0  ;;  %v314_v4 = vadd.f32 %v313_v63, %v242_v0  ;;  %v327_v5 = vmul.f32 %v242_v0, %v242_v0 }
  0xf7   :  { %v315_v8 = vadd.f32 %v314_v4, %v247_v36  ;;  %v333_v9 = vadd.f32 %v332_v3, %v327_v5 }
  0xf9   :  { %v316_v11 = vadd.f32 %v315_v8, %v250_v45  ;;  %v334_v12 = vadd.f32 %v333_v9, %v328_v6 }
  0xfb   :  { %v317_v14 = vadd.f32 %v316_v11, %v311_v7  ;;  %v335_v15 = vadd.f32 %v334_v12, %v329_v10 }
  0xfd   :  { %v318_v16 = vrot.slane %v317_v14, 4  ;;  %v336_v17 = vadd.f32 %v335_v15, %v330_v13 }
  0xff   :  { %v319_v18 = vadd.f32 %v318_v16, %v317_v14  ;;  %v337_v19 = vrot.slane %v336_v17, 4 }
 0x101   :  { %v320_v20 = vrot.slane %v319_v18, 2  ;;  %v338_v21 = vadd.f32 %v337_v19, %v336_v17 }
 0x103   :  { %v321_v22 = vadd.f32 %v320_v20, %v319_v18  ;;  %v339_v23 = vrot.slane %v338_v21, 2 }
 0x105   :  { %v322_v24 = vrot.slane %v321_v22, 1  ;;  %v340_v25 = vadd.f32 %v339_v23, %v338_v21 }
 0x107   :  { %v323_v26 = vadd.f32 %v322_v24, %v321_v22  ;;  %v341_v27 = vrot.slane %v340_v25, 1 }
 0x109   :  { %v342_v28 = vadd.f32 %v341_v27, %v340_v25  ;;  %v344_v29 = vsel %vm343_vm1, %v323_v26, 0.0 }
 0x10b   :  { %v346_v30 = vsel %vm345_vm2, %v342_v28, 0.0 }
 0x10c   :  { %v347_v31 = vadd.f32 %v346_v30, %v344_v29 }
 0x10e   :  { %348 = vst [vmem:[%s598_s4] sm:$0xff] %v347_v31 }

// kernel: dip_forward.27
= control target key start
LH: loop header
LB: loop body
LE: loop exit
PB: predicated region body
PF: predicated region fallthrough
CT: control target
= control target key end

     0   :  { %v188_v12 = vlaneseq  ;;  %v357_v37 = vmov 0.0   ;;  %s446_s1 = inlined_call_operand.vmem [shape: bf16[128,128], index: 1, kind: input, shape index: {}]   ;;  %s447_s0 = inlined_call_operand.vmem [shape: bf16[56,128], index: 0, kind: input, shape index: {}]   ;;  %s448_s2 = inlined_call_operand.vmem [shape: f32[1,128], index: 2, kind: input, shape index: {}]   ;;  %s449_s3 = inlined_call_operand.vmem [shape: f32[56,128], index: 3, kind: output, shape index: {0}]   ;;  %s450_s4 = inlined_call_operand.vmem [shape: f32[1,8,128], index: 4, kind: output, shape index: {1}]  }
   0x1   :  { %v345_v0 = vld [vmem:[%s446_s1 + $0x38] sm:$0xff]   ;;  %v346_v1 = vld [vmem:[%s446_s1 + $0x30] sm:$0xff]   ;;  %v347_v2 = vld [vmem:[%s446_s1 + $0x28] sm:$0xff]  }
   0x2   :  { %304 = vmatprep.subr.bf16.mxu0 %v345_v0  ;;  %328 = vmatprep.subr.bf16.mxu1 %v345_v0  ;;  %v348_v3 = vld [vmem:[%s446_s1 + $0x20] sm:$0xff]   ;;  %v355_v5 = vld [vmem:[%s447_s0 + $0x10] sm:$0xff]   ;;  %v349_v6 = vld [vmem:[%s446_s1 + $0x18] sm:$0xff]   ;;  %v189_v18 = vshrl.u32 %v188_v12, 7 }
   0x3   :  { %305 = vmatpush3.bf16.msra.mxu0 %v345_v0  ;;  %336 = vmatpush3.bf16.msra.mxu1 %v345_v0  ;;  %v353_v4 = vld [vmem:[%s447_s0] sm:$0xff]   ;;  %v350_v7 = vld [vmem:[%s446_s1 + $0x10] sm:$0xff]   ;;  %v351_v8 = vld [vmem:[%s446_s1 + $0x8] sm:$0xff]  }
   0x4   :  { %306 = vmatprep.subr.bf16.mxu0 %v346_v1  ;;  %329 = vmatprep.subr.bf16.mxu1 %v346_v1  ;;  %v352_v9 = vld [vmem:[%s446_s1] sm:$0xff]   ;;  %v354_v10 = vld [vmem:[%s447_s0 + $0x8] sm:$0xff]   ;;  %v356_v11 = vld [vmem:[%s447_s0 + $0x18] ss:$0 sps:$4 sm:$0xff]   ;;  %v195_v25 = vadd.s32 48, %v189_v18  ;;  %vm266_vm1 = vcmp.eq.s32.totalorder %v189_v18, 1 }
   0x5   :  { %320 = vmatprep.mubr.bf16.mxu0 %v353_v4  ;;  %324 = vmatprep.mubr.bf16.mxu1 %v355_v5  ;;  %v278_v13 = vld [vmem:[%s448_s2] ss:$0 sm:$0xff]  ;;  %vm264_vm2 = vcmp.eq.s32.totalorder %v189_v18, 0 }
   0x6   :  { %vm211_vm0 = vcmp.lt.s32.totalorder %v195_v25, 50 }
   0x7   :  { %307 = vmatpush3.bf16.msra.mxu0 %v346_v1  ;;  %337 = vmatpush3.bf16.msra.mxu1 %v346_v1  ;;  %v291_v38 = vsel %vm211_vm0, 1.0, %v357_v37 }
   0x8   :  { %308 = vmatprep.subr.bf16.mxu0 %v347_v2  ;;  %330 = vmatprep.subr.bf16.mxu1 %v347_v2 }
   0xb   :  { %309 = vmatpush3.bf16.msra.mxu0 %v347_v2  ;;  %338 = vmatpush3.bf16.msra.mxu1 %v347_v2 }
   0xc   :  { %310 = vmatprep.subr.bf16.mxu0 %v348_v3  ;;  %331 = vmatprep.subr.bf16.mxu1 %v348_v3 }
   0xf   :  { %311 = vmatpush3.bf16.msra.mxu0 %v348_v3  ;;  %339 = vmatpush3.bf16.msra.mxu1 %v348_v3 }
  0x10   :  { %312 = vmatprep.subr.bf16.mxu0 %v349_v6  ;;  %332 = vmatprep.subr.bf16.mxu1 %v349_v6 }
  0x13   :  { %313 = vmatpush3.bf16.msra.mxu0 %v349_v6  ;;  %340 = vmatpush3.bf16.msra.mxu1 %v349_v6 }
  0x14   :  { %314 = vmatprep.subr.bf16.mxu0 %v350_v7  ;;  %333 = vmatprep.subr.bf16.mxu1 %v350_v7 }
  0x17   :  { %315 = vmatpush3.bf16.msra.mxu0 %v350_v7  ;;  %341 = vmatpush3.bf16.msra.mxu1 %v350_v7 }
  0x18   :  { %316 = vmatprep.subr.bf16.mxu0 %v351_v8  ;;  %334 = vmatprep.subr.bf16.mxu1 %v351_v8 }
  0x1b   :  { %317 = vmatpush3.bf16.msra.mxu0 %v351_v8  ;;  %342 = vmatpush3.bf16.msra.mxu1 %v351_v8 }
  0x1c   :  { %318 = vmatprep.subr.bf16.mxu0 %v352_v9  ;;  %335 = vmatprep.subr.bf16.mxu1 %v352_v9 }
  0x1f   :  { %319 = vmatpush3.bf16.msra.mxu0 %v352_v9  ;;  %343 = vmatpush3.bf16.msra.mxu1 %v352_v9 }
  0x22   :  { %321 = vmatmul.mubr.bf16.vlgmr.msra.gmra.mxu0 %v354_v10  ;;  %325 = vmatmul.mubr.bf16.vlgmr.msra.gmra.mxu1 %v356_v11 }
  0xe2   :  { %v322_v14 = vpop.f32.mrf.mxu0  ;;  %v326_v15 = vpop.f32.mrf.mxu1 }
  0xe3   :  { %v160_v16 = vadd.f32 %v322_v14, %v278_v13  ;;  %v176_v17 = vadd.f32 %v326_v15, %v278_v13 }
  0xe4   :  { %v151_v19 = vpop.f32.mrf.mxu0  ;;  %v167_v20 = vpop.f32.mrf.mxu1 }
  0xe5   :  { %183 = vst [vmem:[%s449_s3 + $0x10] sm:$0xff] %v160_v16  ;;  %v152_v21 = vadd.f32 %v278_v13, %v151_v19  ;;  %187 = vst [vmem:[%s449_s3 + $0x30] sm:$0xff] %v176_v17  ;;  %v168_v22 = vadd.f32 %v278_v13, %v167_v20  ;;  %v247_v34 = vmul.f32 %v160_v16, %v160_v16 }
  0xe6   :  { %v323_v23 = vpop.f32.mrf.mxu0  ;;  %v327_v24 = vpop.f32.mrf.mxu1  ;;  %v232_v42 = vmul.f32 %v291_v38, %v176_v17 }
  0xe7   :  { %181 = vst [vmem:[%s449_s3] sm:$0xff] %v152_v21  ;;  %v163_v26 = vadd.f32 %v323_v23, %v278_v13  ;;  %185 = vst [vmem:[%s449_s3 + $0x20] sm:$0xff] %v168_v22  ;;  %v245_v31 = vmul.f32 %v152_v21, %v152_v21  ;;  %v249_v43 = vmul.f32 %v168_v22, %v168_v22 }
  0xe8   :  { %v154_v27 = vpop.f32.mrf.mxu0  ;;  %v170_v28 = vpop.f32.mrf.mxu1  ;;  %v251_v49 = vmul.f32 %v232_v42, %v176_v17 }
  0xe9   :  { %184 = vst [vmem:[%s449_s3 + $0x18] sm:$0xff] %v163_v26  ;;  %v155_v29 = vadd.f32 %v278_v13, %v154_v27  ;;  %v171_v30 = vadd.f32 %v278_v13, %v170_v28  ;;  %v248_v39 = vmul.f32 %v163_v26, %v163_v26 }
  0xeb   :  { %182 = vst [vmem:[%s449_s3 + $0x8] sm:$0xff] %v155_v29  ;;  %v233_v32 = vadd.f32 %v155_v29, %v152_v21  ;;  %v246_v33 = vmul.f32 %v155_v29, %v155_v29  ;;  %186 = vst [vmem:[%s449_s3 + $0x28] sm:$0xff] %v171_v30  ;;  %v250_v47 = vmul.f32 %v171_v30, %v171_v30 }
  0xed   :  { %v234_v35 = vadd.f32 %v233_v32, %v160_v16  ;;  %v252_v36 = vadd.f32 %v246_v33, %v245_v31 }
  0xef   :  { %v253_v40 = vadd.f32 %v252_v36, %v247_v34  ;;  %v235_v41 = vadd.f32 %v234_v35, %v163_v26 }
  0xf1   :  { %v236_v44 = vadd.f32 %v235_v41, %v168_v22  ;;  %v254_v45 = vadd.f32 %v253_v40, %v248_v39 }
  0xf3   :  { %v237_v46 = vadd.f32 %v236_v44, %v171_v30  ;;  %v255_v48 = vadd.f32 %v254_v45, %v249_v43 }
  0xf5   :  { %v238_v50 = vadd.f32 %v237_v46, %v232_v42  ;;  %v256_v51 = vadd.f32 %v255_v48, %v250_v47 }
  0xf7   :  { %v239_v52 = vrot.slane %v238_v50, 4  ;;  %v257_v53 = vadd.f32 %v256_v51, %v251_v49 }
  0xf9   :  { %v240_v54 = vadd.f32 %v239_v52, %v238_v50  ;;  %v258_v55 = vrot.slane %v257_v53, 4 }
  0xfb   :  { %v241_v56 = vrot.slane %v240_v54, 2  ;;  %v259_v57 = vadd.f32 %v258_v55, %v257_v53 }
  0xfd   :  { %v242_v58 = vadd.f32 %v241_v56, %v240_v54  ;;  %v260_v59 = vrot.slane %v259_v57, 2 }
  0xff   :  { %v243_v60 = vrot.slane %v242_v58, 1  ;;  %v261_v61 = vadd.f32 %v260_v59, %v259_v57 }
 0x101   :  { %v244_v62 = vadd.f32 %v243_v60, %v242_v58  ;;  %v262_v63 = vrot.slane %v261_v61, 1 }
 0x103   :  { %v263_v0 = vadd.f32 %v262_v63, %v261_v61  ;;  %v265_v1 = vsel %vm264_vm2, %v244_v62, 0.0 }
 0x105   :  { %v267_v2 = vsel %vm266_vm1, %v263_v0, 0.0 }
 0x106   :  { %v268_v3 = vadd.f32 %v267_v2, %v265_v1 }
 0x108   :  { %269 = vst [vmem:[%s450_s4] sm:$0xff] %v268_v3 }

// kernel: dip_forward.32
= control target key start
LH: loop header
LB: loop body
LE: loop exit
PB: predicated region body
PF: predicated region fallthrough
CT: control target
= control target key end

     0   :  { %s99_s0 = inlined_call_operand.vmem [shape: f32[24,128], index: 0, kind: input, shape index: {}]   ;;  %s100_s1 = inlined_call_operand.vmem [shape: f32[1,128], index: 1, kind: input, shape index: {}]   ;;  %s101_s2 = inlined_call_operand.vmem [shape: f32[1,128], index: 2, kind: input, shape index: {}]   ;;  %s102_s3 = inlined_call_operand.vmem [shape: f32[24,128], index: 3, kind: output, shape index: {}]  }
   0x1   :  { %v14_v0 = vld [vmem:[%s99_s0] sm:$0xff]  ;;  %v15_v4 = vld [vmem:[%s99_s0 + $0x8] sm:$0xff]  ;;  %v16_v5 = vld [vmem:[%s99_s0 + $0x10] sm:$0xff] }
   0x2   :  { %v53_v1 = vld [vmem:[%s100_s1] ss:$0 sm:$0xff] }
   0x3   :  { %v54_v2 = vld [vmem:[%s101_s2] ss:$0 sm:$0xff]  ;;  %v24_v3 = vmul.f32 %v53_v1, %v14_v0  ;;  %v25_v6 = vmul.f32 %v53_v1, %v15_v4  ;;  %v26_v7 = vmul.f32 %v53_v1, %v16_v5 }
   0x5   :  { %v34_v8 = vadd.f32 %v54_v2, %v24_v3  ;;  %v35_v9 = vadd.f32 %v54_v2, %v25_v6  ;;  %v36_v10 = vadd.f32 %v54_v2, %v26_v7 }
   0x7   :  { %vm37_vm0 = vcmp.ge.f32.partialorder %v34_v8, 0.0  ;;  %v40_v11 = vmul.f32 0.01, %v34_v8  ;;  %vm38_vm1 = vcmp.ge.f32.partialorder %v35_v9, 0.0  ;;  %v41_v12 = vmul.f32 0.01, %v35_v9 }
   0x8   :  { %vm39_vm2 = vcmp.ge.f32.partialorder %v36_v10, 0.0  ;;  %v42_v13 = vmul.f32 0.01, %v36_v10 }
   0x9   :  { %v43_v14 = vsel %vm37_vm0, %v34_v8, %v40_v11  ;;  %v44_v15 = vsel %vm38_vm1, %v35_v9, %v41_v12 }
   0xa   :  { %46 = vst [vmem:[%s102_s3] sm:$0xff] %v43_v14  ;;  %v45_v16 = vsel %vm39_vm2, %v36_v10, %v42_v13  ;;  %47 = vst [vmem:[%s102_s3 + $0x8] sm:$0xff] %v44_v15 }
   0xb   :  { %48 = vst [vmem:[%s102_s3 + $0x10] sm:$0xff] %v45_v16 }

// kernel: dip_forward.31
= control target key start
LH: loop header
LB: loop body
LE: loop exit
PB: predicated region body
PF: predicated region fallthrough
CT: control target
= control target key end

     0   :  { %v223_v21 = vlaneseq  ;;  %v365_v35 = vmov 0.0   ;;  %s463_s1 = inlined_call_operand.vmem [shape: bf16[256,128], index: 1, kind: input, shape index: {}]   ;;  %s464_s0 = inlined_call_operand.vmem [shape: bf16[24,256], index: 0, kind: input, shape index: {}]   ;;  %s465_s2 = inlined_call_operand.vmem [shape: f32[1,128], index: 2, kind: input, shape index: {}]   ;;  %s466_s3 = inlined_call_operand.vmem [shape: f32[24,128], index: 3, kind: output, shape index: {0}]   ;;  %s467_s4 = inlined_call_operand.vmem [shape: f32[1,8,128], index: 4, kind: output, shape index: {1}]  }
   0x1   :  { %v344_v0 = vld [vmem:[%s463_s1 + $0x78] sm:$0xff]   ;;  %v346_v2 = vld [vmem:[%s463_s1 + $0x70] sm:$0xff]   ;;  %v348_v4 = vld [vmem:[%s463_s1 + $0x68] sm:$0xff]  }
   0x2   :  { %v345_v1 = vld [vmem:[%s463_s1 + $0x38] sm:$0xff]   ;;  %299 = vmatprep.subr.bf16.mxu0 %v344_v0  ;;  %327 = vmatprep.subr.bf16.mxu1 %v344_v0  ;;  %v347_v3 = vld [vmem:[%s463_s1 + $0x30] sm:$0xff]   ;;  %v349_v5 = vld [vmem:[%s463_s1 + $0x28] sm:$0xff]   ;;  %v224_v22 = vshrl.u32 %v223_v21, 7 }
   0x3   :  { %300 = vmatpush3.bf16.msra.mxu0 %v345_v1  ;;  %335 = vmatpush3.bf16.msra.mxu1 %v345_v1  ;;  %v350_v6 = vld [vmem:[%s463_s1 + $0x60] sm:$0xff]   ;;  %v352_v8 = vld [vmem:[%s463_s1 + $0x58] sm:$0xff]   ;;  %v354_v10 = vld [vmem:[%s463_s1 + $0x50] sm:$0xff]  }
   0x4   :  { %301 = vmatprep.subr.bf16.mxu0 %v346_v2  ;;  %328 = vmatprep.subr.bf16.mxu1 %v346_v2  ;;  %v351_v7 = vld [vmem:[%s463_s1 + $0x20] sm:$0xff]   ;;  %v353_v9 = vld [vmem:[%s463_s1 + $0x18] sm:$0xff]   ;;  %v19_v12 = vld [vmem:[%s464_s0 + $0x10] sm:$0xff]  ;;  %v226_v23 = vadd.s32 16, %v224_v22  ;;  %vm265_vm1 = vcmp.eq.s32.totalorder %v224_v22, 1  ;;  %vm263_vm2 = vcmp.eq.s32.totalorder %v224_v22, 0 }
   0x5   :  { %v362_v11 = vld [vmem:[%s464_s0 + $0x4] ss:$8 sps:$4 sm:$0xff]   ;;  %v281_v13 = vcombine.high %v19_v12, %v19_v12  ;;  %v355_v14 = vld [vmem:[%s463_s1 + $0x10] sm:$0xff]   ;;  %v360_v19 = vld [vmem:[%s464_s0] ss:$8 sps:$4 sm:$0xff]   ;;  %v280_v20 = vcombine.low %v19_v12, %v19_v12 }
   0x6   :  { %v356_v15 = vld [vmem:[%s463_s1 + $0x48] sm:$0xff]   ;;  %204 = vmatprep.mubr.bf16.mxu0 %v362_v11  ;;  %v358_v17 = vld [vmem:[%s463_s1 + $0x40] sm:$0xff]   ;;  %vm234_vm0 = vcmp.lt.s32.totalorder %v226_v23, 18 }
   0x7   :  { %302 = vmatpush3.bf16.msra.mxu0 %v347_v3  ;;  %336 = vmatpush3.bf16.msra.mxu1 %v347_v3  ;;  %v357_v16 = vld [vmem:[%s463_s1 + $0x8] sm:$0xff]   ;;  %v359_v18 = vld [vmem:[%s463_s1] sm:$0xff]   ;;  %v298_v36 = vsel %vm234_vm0, 1.0, %v365_v35 }
   0x8   :  { %303 = vmatprep.subr.bf16.mxu0 %v348_v4  ;;  %329 = vmatprep.subr.bf16.mxu1 %v348_v4  ;;  %v277_v26 = vld [vmem:[%s465_s2] ss:$0 sm:$0xff] }
   0x9   :  { %212 = vmatprep.mubr.bf16.mxu1 %v281_v13 }
   0xb   :  { %304 = vmatpush3.bf16.msra.mxu0 %v349_v5  ;;  %337 = vmatpush3.bf16.msra.mxu1 %v349_v5 }
   0xc   :  { %305 = vmatprep.subr.bf16.mxu0 %v350_v6  ;;  %330 = vmatprep.subr.bf16.mxu1 %v350_v6 }
   0xf   :  { %306 = vmatpush3.bf16.msra.mxu0 %v351_v7  ;;  %338 = vmatpush3.bf16.msra.mxu1 %v351_v7 }
  0x10   :  { %307 = vmatprep.subr.bf16.mxu0 %v352_v8  ;;  %331 = vmatprep.subr.bf16.mxu1 %v352_v8 }
  0x13   :  { %308 = vmatpush3.bf16.msra.mxu0 %v353_v9  ;;  %339 = vmatpush3.bf16.msra.mxu1 %v353_v9 }
  0x14   :  { %309 = vmatprep.subr.bf16.mxu0 %v354_v10  ;;  %332 = vmatprep.subr.bf16.mxu1 %v354_v10 }
  0x17   :  { %310 = vmatpush3.bf16.msra.mxu0 %v355_v14  ;;  %340 = vmatpush3.bf16.msra.mxu1 %v355_v14 }
  0x18   :  { %311 = vmatprep.subr.bf16.mxu0 %v356_v15  ;;  %333 = vmatprep.subr.bf16.mxu1 %v356_v15 }
  0x1b   :  { %312 = vmatpush3.bf16.msra.mxu0 %v357_v16  ;;  %341 = vmatpush3.bf16.msra.mxu1 %v357_v16 }
  0x1c   :  { %313 = vmatprep.subr.bf16.mxu0 %v358_v17  ;;  %334 = vmatprep.subr.bf16.mxu1 %v358_v17 }
  0x1f   :  { %314 = vmatpush3.bf16.msra.mxu0 %v359_v18  ;;  %342 = vmatpush3.bf16.msra.mxu1 %v359_v18 }
  0x22   :  { %205 = vmatmul.mubr.bf16.vlgmr.msra.gmra.mxu0 %v360_v19  ;;  %213 = vmatmul.mubr.bf16.vlgmr.msra.gmra.mxu1 %v280_v20 }
  0xe2   :  { %v315_v24 = vpop.f32.mrf.mxu0  ;;  %v321_v25 = vpop.f32.mrf.mxu1 }
  0xe4   :  { %v316_v27 = vpop.f32.mrf.mxu0  ;;  %v322_v28 = vpop.f32.mrf.mxu1 }
  0xe5   :  { %v317_v29 = vadd.f32 %v316_v27, %v315_v24  ;;  %v323_v30 = vadd.f32 %v322_v28, %v321_v25 }
  0xe6   :  { %v318_v31 = vpop.f32.mrf.mxu0  ;;  %v324_v32 = vpop.f32.mrf.mxu1 }
  0xe7   :  { %v207_v33 = vadd.f32 %v317_v29, %v277_v26  ;;  %v215_v34 = vadd.f32 %v323_v30, %v277_v26 }
  0xe8   :  { %v319_v37 = vpop.f32.mrf.mxu0  ;;  %v325_v38 = vpop.f32.mrf.mxu1 }
  0xe9   :  { %220 = vst [vmem:[%s466_s3] sm:$0xff] %v207_v33  ;;  %222 = vst [vmem:[%s466_s3 + $0x10] sm:$0xff] %v215_v34  ;;  %v320_v39 = vadd.f32 %v319_v37, %v318_v31  ;;  %v243_v40 = vmul.f32 %v298_v36, %v215_v34  ;;  %v252_v42 = vmul.f32 %v207_v33, %v207_v33 }
  0xeb   :  { %v210_v41 = vadd.f32 %v320_v39, %v277_v26  ;;  %v254_v45 = vmul.f32 %v243_v40, %v215_v34 }
  0xed   :  { %221 = vst [vmem:[%s466_s3 + $0x8] sm:$0xff] %v210_v41  ;;  %v244_v43 = vadd.f32 %v210_v41, %v207_v33  ;;  %v253_v44 = vmul.f32 %v210_v41, %v210_v41 }
  0xef   :  { %v245_v46 = vadd.f32 %v244_v43, %v243_v40  ;;  %v255_v47 = vadd.f32 %v253_v44, %v252_v42 }
  0xf1   :  { %v246_v48 = vrot.slane %v245_v46, 4  ;;  %v256_v49 = vadd.f32 %v255_v47, %v254_v45 }
  0xf3   :  { %v247_v50 = vadd.f32 %v246_v48, %v245_v46  ;;  %v257_v51 = vrot.slane %v256_v49, 4 }
  0xf5   :  { %v248_v52 = vrot.slane %v247_v50, 2  ;;  %v258_v53 = vadd.f32 %v257_v51, %v256_v49 }
  0xf7   :  { %v249_v54 = vadd.f32 %v248_v52, %v247_v50  ;;  %v259_v55 = vrot.slane %v258_v53, 2 }
  0xf9   :  { %v250_v56 = vrot.slane %v249_v54, 1  ;;  %v260_v57 = vadd.f32 %v259_v55, %v258_v53 }
  0xfb   :  { %v251_v58 = vadd.f32 %v250_v56, %v249_v54  ;;  %v261_v59 = vrot.slane %v260_v57, 1 }
  0xfd   :  { %v262_v60 = vadd.f32 %v261_v59, %v260_v57  ;;  %v264_v61 = vsel %vm263_vm2, %v251_v58, 0.0 }
  0xff   :  { %v266_v62 = vsel %vm265_vm1, %v262_v60, 0.0 }
 0x100   :  { %v267_v63 = vadd.f32 %v266_v62, %v264_v61 }
 0x102   :  { %268 = vst [vmem:[%s467_s4] sm:$0xff] %v267_v63 }

// kernel: dip_forward.33
= control target key start
LH: loop header
LB: loop body
LE: loop exit
PB: predicated region body
PF: predicated region fallthrough
CT: control target
= control target key end

     0   :  { %s649_s1 = inlined_call_operand.vmem [shape: bf16[256,128], index: 1, kind: input, shape index: {}]   ;;  %s650_s0 = inlined_call_operand.vmem [shape: bf16[72,256], index: 0, kind: input, shape index: {}]   ;;  %s651_s2 = inlined_call_operand.vmem [shape: f32[1,128], index: 2, kind: input, shape index: {}]   ;;  %s652_s3 = inlined_call_operand.vmem [shape: f32[72,128], index: 3, kind: output, shape index: {0}]   ;;  %s653_s4 = inlined_call_operand.vmem [shape: f32[1,8,128], index: 4, kind: output, shape index: {1}]  }
   0x1   :  { %v486_v0 = vld [vmem:[%s649_s1 + $0x78] sm:$0xff]   ;;  %v488_v2 = vld [vmem:[%s649_s1 + $0x70] sm:$0xff]   ;;  %v490_v4 = vld [vmem:[%s649_s1 + $0x68] sm:$0xff]  }
   0x2   :  { %v487_v1 = vld [vmem:[%s649_s1 + $0x38] sm:$0xff]   ;;  %424 = vmatprep.subr.bf16.mxu0 %v486_v0  ;;  %470 = vmatprep.subr.bf16.mxu1 %v486_v0  ;;  %v489_v3 = vld [vmem:[%s649_s1 + $0x30] sm:$0xff]   ;;  %v491_v5 = vld [vmem:[%s649_s1 + $0x28] sm:$0xff]  }
   0x3   :  { %425 = vmatpush3.bf16.msra.mxu0 %v487_v1  ;;  %478 = vmatpush3.bf16.msra.mxu1 %v487_v1  ;;  %v492_v6 = vld [vmem:[%s649_s1 + $0x60] sm:$0xff]   ;;  %v494_v8 = vld [vmem:[%s649_s1 + $0x58] sm:$0xff]   ;;  %v496_v10 = vld [vmem:[%s649_s1 + $0x50] sm:$0xff]  }
   0x4   :  { %426 = vmatprep.subr.bf16.mxu0 %v488_v2  ;;  %471 = vmatprep.subr.bf16.mxu1 %v488_v2  ;;  %v493_v7 = vld [vmem:[%s649_s1 + $0x20] sm:$0xff]   ;;  %v495_v9 = vld [vmem:[%s649_s1 + $0x18] sm:$0xff]   ;;  %v497_v12 = vld [vmem:[%s649_s1 + $0x10] sm:$0xff]  }
   0x5   :  { %v504_v11 = vld [vmem:[%s650_s0 + $0x4] ss:$8 sps:$4 sm:$0xff]   ;;  %v510_v13 = vld [vmem:[%s650_s0 + $0x34] ss:$8 sps:$4 sm:$0xff]   ;;  %v502_v19 = vld [vmem:[%s650_s0] ss:$8 sps:$4 sm:$0xff]  }
   0x6   :  { %v498_v14 = vld [vmem:[%s649_s1 + $0x48] sm:$0xff]   ;;  %240 = vmatprep.mubr.bf16.mxu0 %v504_v11  ;;  %264 = vmatprep.mubr.bf16.mxu1 %v510_v13  ;;  %v500_v16 = vld [vmem:[%s649_s1 + $0x40] sm:$0xff]   ;;  %v508_v20 = vld [vmem:[%s650_s0 + $0x30] ss:$8 sps:$4 sm:$0xff]  }
   0x7   :  { %427 = vmatpush3.bf16.msra.mxu0 %v489_v3  ;;  %479 = vmatpush3.bf16.msra.mxu1 %v489_v3  ;;  %v499_v15 = vld [vmem:[%s649_s1 + $0x8] sm:$0xff]   ;;  %v501_v17 = vld [vmem:[%s649_s1] sm:$0xff]   ;;  %v505_v21 = vld [vmem:[%s650_s0 + $0x14] ss:$8 sps:$4 sm:$0xff]  }
   0x8   :  { %428 = vmatprep.subr.bf16.mxu0 %v490_v4  ;;  %472 = vmatprep.subr.bf16.mxu1 %v490_v4  ;;  %v25_v18 = vld [vmem:[%s650_s0 + $0x40] sm:$0xff]  ;;  %v507_v23 = vld [vmem:[%s650_s0 + $0x10] ss:$8 sps:$4 sm:$0xff]  }
   0x9   :  { %v407_v22 = vcombine.high %v25_v18, %v25_v18  ;;  %v406_v24 = vcombine.low %v25_v18, %v25_v18  ;;  %v511_v25 = vld [vmem:[%s650_s0 + $0x24] ss:$8 sps:$4 sm:$0xff]   ;;  %v513_v26 = vld [vmem:[%s650_s0 + $0x20] ss:$8 sps:$4 sm:$0xff]  }
   0xa   :  { %v397_v29 = vld [vmem:[%s651_s2] ss:$0 sm:$0xff] }
   0xb   :  { %429 = vmatpush3.bf16.msra.mxu0 %v491_v5  ;;  %480 = vmatpush3.bf16.msra.mxu1 %v491_v5 }
   0xc   :  { %430 = vmatprep.subr.bf16.mxu0 %v492_v6  ;;  %473 = vmatprep.subr.bf16.mxu1 %v492_v6 }
   0xf   :  { %431 = vmatpush3.bf16.msra.mxu0 %v493_v7  ;;  %481 = vmatpush3.bf16.msra.mxu1 %v493_v7 }
  0x10   :  { %432 = vmatprep.subr.bf16.mxu0 %v494_v8  ;;  %474 = vmatprep.subr.bf16.mxu1 %v494_v8 }
  0x13   :  { %433 = vmatpush3.bf16.msra.mxu0 %v495_v9  ;;  %482 = vmatpush3.bf16.msra.mxu1 %v495_v9 }
  0x14   :  { %434 = vmatprep.subr.bf16.mxu0 %v496_v10  ;;  %475 = vmatprep.subr.bf16.mxu1 %v496_v10 }
  0x17   :  { %435 = vmatpush3.bf16.msra.mxu0 %v497_v12  ;;  %483 = vmatpush3.bf16.msra.mxu1 %v497_v12 }
  0x18   :  { %436 = vmatprep.subr.bf16.mxu0 %v498_v14  ;;  %476 = vmatprep.subr.bf16.mxu1 %v498_v14 }
  0x1b   :  { %437 = vmatpush3.bf16.msra.mxu0 %v499_v15  ;;  %484 = vmatpush3.bf16.msra.mxu1 %v499_v15 }
  0x1c   :  { %438 = vmatprep.subr.bf16.mxu0 %v500_v16  ;;  %477 = vmatprep.subr.bf16.mxu1 %v500_v16 }
  0x1f   :  { %439 = vmatpush3.bf16.msra.mxu0 %v501_v17  ;;  %485 = vmatpush3.bf16.msra.mxu1 %v501_v17 }
  0x22   :  { %241 = vmatmul.mubr.bf16.vlgmr.msra.gmra.mxu0 %v502_v19  ;;  %265 = vmatmul.mubr.bf16.vlgmr.msra.gmra.mxu1 %v508_v20 }
  0x23   :  { %248 = vmatprep.mubr.bf16.mxu0 %v505_v21  ;;  %272 = vmatprep.mubr.bf16.mxu1 %v407_v22 }
  0x2a   :  { %249 = vmatmul.mubr.bf16.gmra.mxu0 %v507_v23  ;;  %273 = vmatmul.mubr.bf16.gmra.mxu1 %v406_v24 }
  0x2b   :  { %256 = vmatprep.mubr.bf16.mxu0 %v511_v25 }
  0x32   :  { %257 = vmatmul.mubr.bf16.gmra.mxu0 %v513_v26 }
  0xe2   :  { %v440_v27 = vpop.f32.mrf.mxu0  ;;  %v458_v28 = vpop.f32.mrf.mxu1 }
  0xe4   :  { %v441_v30 = vpop.f32.mrf.mxu0  ;;  %v459_v31 = vpop.f32.mrf.mxu1 }
  0xe5   :  { %v442_v32 = vadd.f32 %v441_v30, %v440_v27  ;;  %v460_v33 = vadd.f32 %v459_v31, %v458_v28  ;;  %v289_v30 = vlaneseq }
  0xe6   :  { %v443_v34 = vpop.f32.mrf.mxu0  ;;  %v461_v35 = vpop.f32.mrf.mxu1 }
  0xe7   :  { %v243_v36 = vadd.f32 %v442_v32, %v397_v29  ;;  %v267_v37 = vadd.f32 %v460_v33, %v397_v29 }
  0xe8   :  { %v444_v38 = vpop.f32.mrf.mxu0  ;;  %v462_v39 = vpop.f32.mrf.mxu1 }
  0xe9   :  { %280 = vst [vmem:[%s652_s3] sm:$0xff] %v243_v36  ;;  %v445_v40 = vadd.f32 %v444_v38, %v443_v34  ;;  %286 = vst [vmem:[%s652_s3 + $0x30] sm:$0xff] %v267_v37  ;;  %v463_v41 = vadd.f32 %v462_v39, %v461_v35  ;;  %v360_v61 = vmul.f32 %v243_v36, %v243_v36  ;;  %v290_v35 = vshrl.u32 %v289_v30, 7 }
  0xea   :  { %v446_v42 = vpop.f32.mrf.mxu0  ;;  %v464_v43 = vpop.f32.mrf.mxu1  ;;  %v366_v17 = vmul.f32 %v267_v37, %v267_v37 }
  0xeb   :  { %v246_v44 = vadd.f32 %v445_v40, %v397_v29  ;;  %v270_v45 = vadd.f32 %v463_v41, %v397_v29  ;;  %vm383_vm0 = vcmp.eq.s32.totalorder %v290_v35, 0  ;;  %vm385_vm1 = vcmp.eq.s32.totalorder %v290_v35, 1 }
  0xec   :  { %v447_v46 = vpop.f32.mrf.mxu0  ;;  %v465_v47 = vpop.f32.mrf.mxu1 }
  0xed   :  { %281 = vst [vmem:[%s652_s3 + $0x8] sm:$0xff] %v246_v44  ;;  %v448_v48 = vadd.f32 %v447_v46, %v446_v42  ;;  %287 = vst [vmem:[%s652_s3 + $0x38] sm:$0xff] %v270_v45  ;;  %v466_v50 = vadd.f32 %v465_v47, %v464_v43  ;;  %v361_v58 = vmul.f32 %v246_v44, %v246_v44 }
  0xee   :  { %v449_v49 = vpop.f32.mrf.mxu0  ;;  %v467_v51 = vpop.f32.mrf.mxu1  ;;  %v346_v62 = vadd.f32 %v246_v44, %v243_v36  ;;  %v367_v20 = vmul.f32 %v270_v45, %v270_v45 }
  0xef   :  { %v251_v52 = vadd.f32 %v448_v48, %v397_v29  ;;  %v275_v54 = vadd.f32 %v466_v50, %v397_v29  ;;  %v369_v2 = vadd.f32 %v361_v58, %v360_v61 }
  0xf0   :  { %v450_v53 = vpop.f32.mrf.mxu0  ;;  %v468_v55 = vpop.f32.mrf.mxu1 }
  0xf1   :  { %282 = vst [vmem:[%s652_s3 + $0x10] sm:$0xff] %v251_v52  ;;  %v451_v56 = vadd.f32 %v450_v53, %v449_v49  ;;  %288 = vst [vmem:[%s652_s3 + $0x40] sm:$0xff] %v275_v54  ;;  %v362_v63 = vmul.f32 %v251_v52, %v251_v52  ;;  %v347_v3 = vadd.f32 %v346_v62, %v251_v52 }
  0xf2   :  { %v452_v57 = vpop.f32.mrf.mxu0  ;;  %v368_v24 = vmul.f32 %v275_v54, %v275_v54 }
  0xf3   :  { %v254_v59 = vadd.f32 %v451_v56, %v397_v29  ;;  %v370_v7 = vadd.f32 %v369_v2, %v362_v63 }
  0xf4   :  { %v453_v60 = vpop.f32.mrf.mxu0 }
  0xf5   :  { %283 = vst [vmem:[%s652_s3 + $0x18] sm:$0xff] %v254_v59  ;;  %v454_v0 = vadd.f32 %v453_v60, %v452_v57  ;;  %v363_v4 = vmul.f32 %v254_v59, %v254_v59  ;;  %v348_v8 = vadd.f32 %v347_v3, %v254_v59 }
  0xf6   :  { %v455_v1 = vpop.f32.mrf.mxu0 }
  0xf7   :  { %v259_v5 = vadd.f32 %v454_v0, %v397_v29  ;;  %v371_v11 = vadd.f32 %v370_v7, %v363_v4 }
  0xf8   :  { %v456_v6 = vpop.f32.mrf.mxu0 }
  0xf9   :  { %284 = vst [vmem:[%s652_s3 + $0x20] sm:$0xff] %v259_v5  ;;  %v364_v9 = vmul.f32 %v259_v5, %v259_v5  ;;  %v457_v10 = vadd.f32 %v456_v6, %v455_v1  ;;  %v349_v12 = vadd.f32 %v348_v8, %v259_v5 }
  0xfb   :  { %v262_v13 = vadd.f32 %v457_v10, %v397_v29  ;;  %v372_v14 = vadd.f32 %v371_v11, %v364_v9 }
  0xfd   :  { %285 = vst [vmem:[%s652_s3 + $0x28] sm:$0xff] %v262_v13  ;;  %v350_v15 = vadd.f32 %v349_v12, %v262_v13  ;;  %v365_v16 = vmul.f32 %v262_v13, %v262_v13 }
  0xff   :  { %v351_v18 = vadd.f32 %v350_v15, %v267_v37  ;;  %v373_v19 = vadd.f32 %v372_v14, %v365_v16 }
 0x101   :  { %v374_v21 = vadd.f32 %v373_v19, %v366_v17  ;;  %v352_v22 = vadd.f32 %v351_v18, %v270_v45 }
 0x103   :  { %v353_v23 = vadd.f32 %v352_v22, %v275_v54  ;;  %v375_v25 = vadd.f32 %v374_v21, %v367_v20 }
 0x105   :  { %v354_v26 = vrot.slane %v353_v23, 4  ;;  %v376_v27 = vadd.f32 %v375_v25, %v368_v24 }
 0x107   :  { %v355_v28 = vadd.f32 %v354_v26, %v353_v23  ;;  %v377_v29 = vrot.slane %v376_v27, 4 }
 0x109   :  { %v356_v31 = vrot.slane %v355_v28, 2  ;;  %v378_v32 = vadd.f32 %v377_v29, %v376_v27 }
 0x10b   :  { %v357_v33 = vadd.f32 %v356_v31, %v355_v28  ;;  %v379_v34 = vrot.slane %v378_v32, 2 }
 0x10d   :  { %v358_v36 = vrot.slane %v357_v33, 1  ;;  %v380_v38 = vadd.f32 %v379_v34, %v378_v32 }
 0x10f   :  { %v359_v37 = vadd.f32 %v358_v36, %v357_v33  ;;  %v381_v39 = vrot.slane %v380_v38, 1 }
 0x111   :  { %v382_v40 = vadd.f32 %v381_v39, %v380_v38  ;;  %v384_v41 = vsel %vm383_vm0, %v359_v37, 0.0 }
 0x113   :  { %v386_v42 = vsel %vm385_vm1, %v382_v40, 0.0 }
 0x114   :  { %v387_v43 = vadd.f32 %v386_v42, %v384_v41 }
 0x116   :  { %388 = vst [vmem:[%s653_s4] sm:$0xff] %v387_v43 }

// kernel: dip_forward.34
= control target key start
LH: loop header
LB: loop body
LE: loop exit
PB: predicated region body
PF: predicated region fallthrough
CT: control target
= control target key end

     0   :  { %s177_s0 = inlined_call_operand.vmem [shape: f32[72,128], index: 0, kind: input, shape index: {}]   ;;  %s178_s1 = inlined_call_operand.vmem [shape: f32[1,128], index: 1, kind: input, shape index: {}]   ;;  %s179_s2 = inlined_call_operand.vmem [shape: f32[1,128], index: 2, kind: input, shape index: {}]   ;;  %s180_s3 = inlined_call_operand.vmem [shape: f32[72,128], index: 3, kind: output, shape index: {}]  }
   0x1   :  { %v14_v0 = vld [vmem:[%s177_s0] sm:$0xff]  ;;  %v15_v4 = vld [vmem:[%s177_s0 + $0x8] sm:$0xff]  ;;  %v16_v5 = vld [vmem:[%s177_s0 + $0x10] sm:$0xff] }
   0x2   :  { %v95_v1 = vld [vmem:[%s178_s1] ss:$0 sm:$0xff]  ;;  %v17_v6 = vld [vmem:[%s177_s0 + $0x18] sm:$0xff]  ;;  %v19_v11 = vld [vmem:[%s177_s0 + $0x28] sm:$0xff] }
   0x3   :  { %v96_v2 = vld [vmem:[%s179_s2] ss:$0 sm:$0xff]  ;;  %v30_v3 = vmul.f32 %v95_v1, %v14_v0  ;;  %v31_v7 = vmul.f32 %v95_v1, %v15_v4  ;;  %v32_v8 = vmul.f32 %v95_v1, %v16_v5  ;;  %v33_v9 = vmul.f32 %v95_v1, %v17_v6  ;;  %v20_v12 = vld [vmem:[%s177_s0 + $0x30] sm:$0xff]  ;;  %v21_v17 = vld [vmem:[%s177_s0 + $0x38] sm:$0xff] }
   0x4   :  { %v18_v10 = vld [vmem:[%s177_s0 + $0x20] sm:$0xff]  ;;  %v35_v15 = vmul.f32 %v95_v1, %v19_v11  ;;  %v36_v16 = vmul.f32 %v95_v1, %v20_v12  ;;  %v37_v21 = vmul.f32 %v95_v1, %v21_v17 }
   0x5   :  { %v46_v13 = vadd.f32 %v96_v2, %v30_v3  ;;  %v34_v14 = vmul.f32 %v95_v1, %v18_v10  ;;  %v47_v18 = vadd.f32 %v96_v2, %v31_v7  ;;  %v48_v19 = vadd.f32 %v96_v2, %v32_v8  ;;  %v22_v29 = vld [vmem:[%s177_s0 + $0x40] sm:$0xff] }
   0x6   :  { %v49_v20 = vadd.f32 %v96_v2, %v33_v9  ;;  %v51_v24 = vadd.f32 %v96_v2, %v35_v15  ;;  %v52_v35 = vadd.f32 %v96_v2, %v36_v16  ;;  %v53_v36 = vadd.f32 %v96_v2, %v37_v21 }
   0x7   :  { %vm55_vm0 = vcmp.ge.f32.partialorder %v46_v13, 0.0  ;;  %v64_v22 = vmul.f32 0.01, %v46_v13  ;;  %v50_v23 = vadd.f32 %v96_v2, %v34_v14  ;;  %vm56_vm1 = vcmp.ge.f32.partialorder %v47_v18, 0.0 }
   0x8   :  { %v65_v25 = vmul.f32 0.01, %v47_v18  ;;  %vm57_vm2 = vcmp.ge.f32.partialorder %v48_v19, 0.0  ;;  %v66_v26 = vmul.f32 0.01, %v48_v19  ;;  %vm58_vm3 = vcmp.ge.f32.partialorder %v49_v20, 0.0 }
   0x9   :  { %v73_v27 = vsel %vm55_vm0, %v46_v13, %v64_v22  ;;  %v67_v28 = vmul.f32 0.01, %v49_v20  ;;  %vm59_vm4 = vcmp.ge.f32.partialorder %v50_v23, 0.0  ;;  %v68_v32 = vmul.f32 0.01, %v50_v23 }
   0xa   :  { %82 = vst [vmem:[%s180_s3] sm:$0xff] %v73_v27  ;;  %v74_v30 = vsel %vm56_vm1, %v47_v18, %v65_v25  ;;  %v75_v31 = vsel %vm57_vm2, %v48_v19, %v66_v26  ;;  %vm60_vm5 = vcmp.ge.f32.partialorder %v51_v24, 0.0  ;;  %v69_v34 = vmul.f32 0.01, %v51_v24 }
   0xb   :  { %83 = vst [vmem:[%s180_s3 + $0x8] sm:$0xff] %v74_v30  ;;  %84 = vst [vmem:[%s180_s3 + $0x10] sm:$0xff] %v75_v31  ;;  %v76_v33 = vsel %vm58_vm3, %v49_v20, %v67_v28  ;;  %v77_v37 = vsel %vm59_vm4, %v50_v23, %v68_v32  ;;  %v38_v38 = vmul.f32 %v95_v1, %v22_v29  ;;  %vm61_vm6 = vcmp.ge.f32.partialorder %v52_v35, 0.0 }
   0xc   :  { %85 = vst [vmem:[%s180_s3 + $0x18] sm:$0xff] %v76_v33  ;;  %86 = vst [vmem:[%s180_s3 + $0x20] sm:$0xff] %v77_v37  ;;  %v78_v39 = vsel %vm60_vm5, %v51_v24, %v69_v34  ;;  %v70_v40 = vmul.f32 0.01, %v52_v35  ;;  %vm62_vm7 = vcmp.ge.f32.partialorder %v53_v36, 0.0 }
   0xd   :  { %87 = vst [vmem:[%s180_s3 + $0x28] sm:$0xff] %v78_v39  ;;  %v71_v41 = vmul.f32 0.01, %v53_v36  ;;  %v54_v42 = vadd.f32 %v96_v2, %v38_v38 }
   0xe   :  { %v79_v43 = vsel %vm61_vm6, %v52_v35, %v70_v40 }
   0xf   :  { %88 = vst [vmem:[%s180_s3 + $0x30] sm:$0xff] %v79_v43  ;;  %v80_v44 = vsel %vm62_vm7, %v53_v36, %v71_v41  ;;  %vm63_vm8 = vcmp.ge.f32.partialorder %v54_v42, 0.0  ;;  %v72_v45 = vmul.f32 0.01, %v54_v42 }
  0x10   :  { %89 = vst [vmem:[%s180_s3 + $0x38] sm:$0xff] %v80_v44 }
  0x11   :  { %v81_v46 = vsel %vm63_vm8, %v54_v42, %v72_v45 }
  0x12   :  { %90 = vst [vmem:[%s180_s3 + $0x40] sm:$0xff] %v81_v46 }

// kernel: dip_forward.36
= control target key start
LH: loop header
LB: loop body
LE: loop exit
PB: predicated region body
PF: predicated region fallthrough
CT: control target
= control target key end

     0   :  { %s112_s0 = inlined_call_operand.vmem [shape: f32[32,128], index: 0, kind: input, shape index: {}]   ;;  %s113_s1 = inlined_call_operand.vmem [shape: f32[1,128], index: 1, kind: input, shape index: {}]   ;;  %s114_s2 = inlined_call_operand.vmem [shape: f32[1,128], index: 2, kind: input, shape index: {}]   ;;  %s115_s3 = inlined_call_operand.vmem [shape: f32[32,128], index: 3, kind: output, shape index: {}]  }
   0x1   :  { %v14_v0 = vld [vmem:[%s112_s0] sm:$0xff]  ;;  %v15_v4 = vld [vmem:[%s112_s0 + $0x8] sm:$0xff]  ;;  %v16_v5 = vld [vmem:[%s112_s0 + $0x10] sm:$0xff] }
   0x2   :  { %v60_v1 = vld [vmem:[%s113_s1] ss:$0 sm:$0xff]  ;;  %v17_v6 = vld [vmem:[%s112_s0 + $0x18] sm:$0xff] }
   0x3   :  { %v61_v2 = vld [vmem:[%s114_s2] ss:$0 sm:$0xff]  ;;  %v25_v3 = vmul.f32 %v60_v1, %v14_v0  ;;  %v26_v7 = vmul.f32 %v60_v1, %v15_v4  ;;  %v27_v8 = vmul.f32 %v60_v1, %v16_v5  ;;  %v28_v9 = vmul.f32 %v60_v1, %v17_v6 }
   0x5   :  { %v36_v10 = vadd.f32 %v61_v2, %v25_v3  ;;  %v37_v11 = vadd.f32 %v61_v2, %v26_v7  ;;  %v38_v12 = vadd.f32 %v61_v2, %v27_v8  ;;  %v39_v13 = vadd.f32 %v61_v2, %v28_v9 }
   0x7   :  { %vm40_vm0 = vcmp.ge.f32.partialorder %v36_v10, 0.0  ;;  %v44_v14 = vmul.f32 0.01, %v36_v10  ;;  %vm41_vm1 = vcmp.ge.f32.partialorder %v37_v11, 0.0  ;;  %v45_v15 = vmul.f32 0.01, %v37_v11 }
   0x8   :  { %vm42_vm2 = vcmp.ge.f32.partialorder %v38_v12, 0.0  ;;  %v46_v16 = vmul.f32 0.01, %v38_v12  ;;  %vm43_vm3 = vcmp.ge.f32.partialorder %v39_v13, 0.0  ;;  %v47_v18 = vmul.f32 0.01, %v39_v13 }
   0x9   :  { %v48_v17 = vsel %vm40_vm0, %v36_v10, %v44_v14  ;;  %v49_v19 = vsel %vm41_vm1, %v37_v11, %v45_v15 }
   0xa   :  { %52 = vst [vmem:[%s115_s3] sm:$0xff] %v48_v17  ;;  %v50_v20 = vsel %vm42_vm2, %v38_v12, %v46_v16  ;;  %53 = vst [vmem:[%s115_s3 + $0x8] sm:$0xff] %v49_v19  ;;  %v51_v21 = vsel %vm43_vm3, %v39_v13, %v47_v18 }
   0xb   :  { %54 = vst [vmem:[%s115_s3 + $0x10] sm:$0xff] %v50_v20  ;;  %55 = vst [vmem:[%s115_s3 + $0x18] sm:$0xff] %v51_v21 }

// kernel: dip_forward.35
= control target key start
LH: loop header
LB: loop body
LE: loop exit
PB: predicated region body
PF: predicated region fallthrough
CT: control target
= control target key end

     0   :  { %v157_v32 = vlaneseq  ;;  %s344_s1 = inlined_call_operand.vmem [shape: bf16[128,128], index: 1, kind: input, shape index: {}]   ;;  %s345_s0 = inlined_call_operand.vmem [shape: bf16[32,128], index: 0, kind: input, shape index: {}]   ;;  %s346_s2 = inlined_call_operand.vmem [shape: f32[1,128], index: 2, kind: input, shape index: {}]   ;;  %s347_s3 = inlined_call_operand.vmem [shape: f32[32,128], index: 3, kind: output, shape index: {0}]   ;;  %s348_s4 = inlined_call_operand.vmem [shape: f32[1,8,128], index: 4, kind: output, shape index: {1}]  }
   0x1   :  { %v261_v0 = vld [vmem:[%s344_s1 + $0x38] sm:$0xff]   ;;  %v262_v1 = vld [vmem:[%s344_s1 + $0x30] sm:$0xff]   ;;  %v263_v2 = vld [vmem:[%s344_s1 + $0x28] sm:$0xff]  }
   0x2   :  { %241 = vmatprep.subr.bf16.mxu0 %v261_v0  ;;  %v264_v3 = vld [vmem:[%s344_s1 + $0x20] sm:$0xff]   ;;  %v265_v5 = vld [vmem:[%s344_s1 + $0x18] sm:$0xff]   ;;  %v266_v6 = vld [vmem:[%s344_s1 + $0x10] sm:$0xff]   ;;  %v158_v37 = vshrl.u32 %v157_v32, 7 }
   0x3   :  { %242 = vmatpush3.bf16.msra.mxu0 %v261_v0  ;;  %v269_v4 = vld [vmem:[%s345_s0] sm:$0xff]   ;;  %v267_v7 = vld [vmem:[%s344_s1 + $0x8] sm:$0xff]  }
   0x4   :  { %243 = vmatprep.subr.bf16.mxu0 %v262_v1  ;;  %257 = vmatprep.mubr.bf16.mxu0 %v269_v4  ;;  %v268_v8 = vld [vmem:[%s344_s1] sm:$0xff]   ;;  %v270_v9 = vld [vmem:[%s345_s0 + $0x8] sm:$0xff]   ;;  %vm206_vm0 = vcmp.eq.s32.totalorder %v158_v37, 0  ;;  %vm208_vm1 = vcmp.eq.s32.totalorder %v158_v37, 1 }
   0x5   :  { %v220_v10 = vld [vmem:[%s346_s2] ss:$0 sm:$0xff] }
   0x7   :  { %244 = vmatpush3.bf16.msra.mxu0 %v262_v1 }
   0x8   :  { %245 = vmatprep.subr.bf16.mxu0 %v263_v2 }
   0xb   :  { %246 = vmatpush3.bf16.msra.mxu0 %v263_v2 }
   0xc   :  { %247 = vmatprep.subr.bf16.mxu0 %v264_v3 }
   0xf   :  { %248 = vmatpush3.bf16.msra.mxu0 %v264_v3 }
  0x10   :  { %249 = vmatprep.subr.bf16.mxu0 %v265_v5 }
  0x13   :  { %250 = vmatpush3.bf16.msra.mxu0 %v265_v5 }
  0x14   :  { %251 = vmatprep.subr.bf16.mxu0 %v266_v6 }
  0x17   :  { %252 = vmatpush3.bf16.msra.mxu0 %v266_v6 }
  0x18   :  { %253 = vmatprep.subr.bf16.mxu0 %v267_v7 }
  0x1b   :  { %254 = vmatpush3.bf16.msra.mxu0 %v267_v7 }
  0x1c   :  { %255 = vmatprep.subr.bf16.mxu0 %v268_v8 }
  0x1f   :  { %256 = vmatpush3.bf16.msra.mxu0 %v268_v8 }
  0x22   :  { %258 = vmatmul.mubr.bf16.vlgmr.msra.gmra.mxu0 %v270_v9 }
  0xe2   :  { %v259_v11 = vpop.f32.mrf.mxu0 }
  0xe3   :  { %v147_v12 = vadd.f32 %v259_v11, %v220_v10 }
  0xe4   :  { %v138_v13 = vpop.f32.mrf.mxu0 }
  0xe5   :  { %155 = vst [vmem:[%s347_s3 + $0x10] sm:$0xff] %v147_v12  ;;  %v139_v14 = vadd.f32 %v220_v10, %v138_v13  ;;  %v195_v22 = vmul.f32 %v147_v12, %v147_v12 }
  0xe6   :  { %v260_v15 = vpop.f32.mrf.mxu0 }
  0xe7   :  { %153 = vst [vmem:[%s347_s3] sm:$0xff] %v139_v14  ;;  %v150_v16 = vadd.f32 %v260_v15, %v220_v10  ;;  %v193_v19 = vmul.f32 %v139_v14, %v139_v14 }
  0xe8   :  { %v141_v17 = vpop.f32.mrf.mxu0 }
  0xe9   :  { %156 = vst [vmem:[%s347_s3 + $0x18] sm:$0xff] %v150_v16  ;;  %v142_v18 = vadd.f32 %v220_v10, %v141_v17  ;;  %v196_v25 = vmul.f32 %v150_v16, %v150_v16 }
  0xeb   :  { %154 = vst [vmem:[%s347_s3 + $0x8] sm:$0xff] %v142_v18  ;;  %v184_v20 = vadd.f32 %v142_v18, %v139_v14  ;;  %v194_v21 = vmul.f32 %v142_v18, %v142_v18 }
  0xed   :  { %v185_v23 = vadd.f32 %v184_v20, %v147_v12  ;;  %v197_v24 = vadd.f32 %v194_v21, %v193_v19 }
  0xef   :  { %v186_v26 = vadd.f32 %v185_v23, %v150_v16  ;;  %v198_v27 = vadd.f32 %v197_v24, %v195_v22 }
  0xf1   :  { %v187_v28 = vrot.slane %v186_v26, 4  ;;  %v199_v29 = vadd.f32 %v198_v27, %v196_v25 }
  0xf3   :  { %v188_v30 = vadd.f32 %v187_v28, %v186_v26  ;;  %v200_v31 = vrot.slane %v199_v29, 4 }
  0xf5   :  { %v189_v33 = vrot.slane %v188_v30, 2  ;;  %v201_v34 = vadd.f32 %v200_v31, %v199_v29 }
  0xf7   :  { %v190_v35 = vadd.f32 %v189_v33, %v188_v30  ;;  %v202_v36 = vrot.slane %v201_v34, 2 }
  0xf9   :  { %v191_v38 = vrot.slane %v190_v35, 1  ;;  %v203_v39 = vadd.f32 %v202_v36, %v201_v34 }
  0xfb   :  { %v192_v40 = vadd.f32 %v191_v38, %v190_v35  ;;  %v204_v41 = vrot.slane %v203_v39, 1 }
  0xfd   :  { %v205_v42 = vadd.f32 %v204_v41, %v203_v39  ;;  %v207_v43 = vsel %vm206_vm0, %v192_v40, 0.0 }
  0xff   :  { %v209_v44 = vsel %vm208_vm1, %v205_v42, 0.0 }
 0x100   :  { %v210_v45 = vadd.f32 %v209_v44, %v207_v43 }
 0x102   :  { %211 = vst [vmem:[%s348_s4] sm:$0xff] %v210_v45 }

// kernel: dip_forward.37
= control target key start
LH: loop header
LB: loop body
LE: loop exit
PB: predicated region body
PF: predicated region fallthrough
CT: control target
= control target key end

     0   :  { %s847_s1 = inlined_call_operand.vmem [shape: bf16[128,128], index: 1, kind: input, shape index: {}]   ;;  %s848_s0 = inlined_call_operand.vmem [shape: bf16[128,128], index: 0, kind: input, shape index: {}]   ;;  %s849_s2 = inlined_call_operand.vmem [shape: f32[1,128], index: 2, kind: input, shape index: {}]   ;;  %s850_s3 = inlined_call_operand.vmem [shape: f32[128,128], index: 3, kind: output, shape index: {}]  }
   0x1   :  { %v524_v0 = vld [vmem:[%s847_s1 + $0x38] sm:$0xff]   ;;  %v525_v1 = vld [vmem:[%s847_s1 + $0x30] sm:$0xff]   ;;  %v526_v2 = vld [vmem:[%s847_s1 + $0x28] sm:$0xff]  }
   0x2   :  { %476 = vmatprep.subr.bf16.mxu0 %v524_v0  ;;  %508 = vmatprep.subr.bf16.mxu1 %v524_v0  ;;  %v527_v3 = vld [vmem:[%s847_s1 + $0x20] sm:$0xff]   ;;  %v528_v6 = vld [vmem:[%s847_s1 + $0x18] sm:$0xff]   ;;  %v529_v7 = vld [vmem:[%s847_s1 + $0x10] sm:$0xff]  }
   0x3   :  { %477 = vmatpush3.bf16.msra.mxu0 %v524_v0  ;;  %516 = vmatpush3.bf16.msra.mxu1 %v524_v0  ;;  %v532_v4 = vld [vmem:[%s848_s0] sm:$0xff]   ;;  %v530_v8 = vld [vmem:[%s847_s1 + $0x8] sm:$0xff]   ;;  %v536_v12 = vld [vmem:[%s848_s0 + $0x10] sm:$0xff]  }
   0x4   :  { %478 = vmatprep.subr.bf16.mxu0 %v525_v1  ;;  %509 = vmatprep.subr.bf16.mxu1 %v525_v1  ;;  %v533_v5 = vld [vmem:[%s848_s0 + $0x20] sm:$0xff]   ;;  %v534_v10 = vld [vmem:[%s848_s0 + $0x8] sm:$0xff]   ;;  %v537_v13 = vld [vmem:[%s848_s0 + $0x30] sm:$0xff]  }
   0x5   :  { %492 = vmatprep.mubr.bf16.mxu0 %v532_v4  ;;  %500 = vmatprep.mubr.bf16.mxu1 %v533_v5  ;;  %v531_v9 = vld [vmem:[%s847_s1] sm:$0xff]   ;;  %v535_v11 = vld [vmem:[%s848_s0 + $0x28] sm:$0xff]   ;;  %v538_v14 = vld [vmem:[%s848_s0 + $0x18] sm:$0xff]  }
   0x6   :  { %v539_v15 = vld [vmem:[%s848_s0 + $0x38] sm:$0xff]   ;;  %v675_v16 = vld [vmem:[%s849_s2] ss:$0 sm:$0xff] }
   0x7   :  { %479 = vmatpush3.bf16.msra.mxu0 %v525_v1  ;;  %517 = vmatpush3.bf16.msra.mxu1 %v525_v1 }
   0x8   :  { %480 = vmatprep.subr.bf16.mxu0 %v526_v2  ;;  %510 = vmatprep.subr.bf16.mxu1 %v526_v2 }
   0xb   :  { %481 = vmatpush3.bf16.msra.mxu0 %v526_v2  ;;  %518 = vmatpush3.bf16.msra.mxu1 %v526_v2 }
   0xc   :  { %482 = vmatprep.subr.bf16.mxu0 %v527_v3  ;;  %511 = vmatprep.subr.bf16.mxu1 %v527_v3 }
   0xf   :  { %483 = vmatpush3.bf16.msra.mxu0 %v527_v3  ;;  %519 = vmatpush3.bf16.msra.mxu1 %v527_v3 }
  0x10   :  { %484 = vmatprep.subr.bf16.mxu0 %v528_v6  ;;  %512 = vmatprep.subr.bf16.mxu1 %v528_v6 }
  0x13   :  { %485 = vmatpush3.bf16.msra.mxu0 %v528_v6  ;;  %520 = vmatpush3.bf16.msra.mxu1 %v528_v6 }
  0x14   :  { %486 = vmatprep.subr.bf16.mxu0 %v529_v7  ;;  %513 = vmatprep.subr.bf16.mxu1 %v529_v7 }
  0x17   :  { %487 = vmatpush3.bf16.msra.mxu0 %v529_v7  ;;  %521 = vmatpush3.bf16.msra.mxu1 %v529_v7 }
  0x18   :  { %488 = vmatprep.subr.bf16.mxu0 %v530_v8  ;;  %514 = vmatprep.subr.bf16.mxu1 %v530_v8 }
  0x1b   :  { %489 = vmatpush3.bf16.msra.mxu0 %v530_v8  ;;  %522 = vmatpush3.bf16.msra.mxu1 %v530_v8 }
  0x1c   :  { %490 = vmatprep.subr.bf16.mxu0 %v531_v9  ;;  %515 = vmatprep.subr.bf16.mxu1 %v531_v9 }
  0x1f   :  { %491 = vmatpush3.bf16.msra.mxu0 %v531_v9  ;;  %523 = vmatpush3.bf16.msra.mxu1 %v531_v9 }
  0x22   :  { %493 = vmatmul.mubr.bf16.vlgmr.msra.gmra.mxu0 %v534_v10  ;;  %501 = vmatmul.mubr.bf16.vlgmr.msra.gmra.mxu1 %v535_v11 }
  0x23   :  { %496 = vmatprep.mubr.bf16.mxu0 %v536_v12  ;;  %504 = vmatprep.mubr.bf16.mxu1 %v537_v13 }
  0x2a   :  { %497 = vmatmul.mubr.bf16.gmra.mxu0 %v538_v14  ;;  %505 = vmatmul.mubr.bf16.gmra.mxu1 %v539_v15 }
  0xe2   :  { %v494_v17 = vpop.f32.mrf.mxu0  ;;  %v502_v18 = vpop.f32.mrf.mxu1 }
  0xe3   :  { %v678_v19 = vadd.f32 %v494_v17, %v675_v16  ;;  %v681_v20 = vadd.f32 %v502_v18, %v675_v16 }
  0xe4   :  { %v184_v21 = vpop.f32.mrf.mxu0  ;;  %v216_v22 = vpop.f32.mrf.mxu1 }
  0xe5   :  { %v249_v23 = vand.u32 2147483647, %v678_v19  ;;  %v257_v24 = vand.u32 2147483647, %v681_v20  ;;  %v686_v25 = vadd.f32 %v675_v16, %v184_v21  ;;  %v689_v26 = vadd.f32 %v675_v16, %v216_v22 }
  0xe6   :  { %v495_v27 = vpop.f32.mrf.mxu0  ;;  %v503_v28 = vpop.f32.mrf.mxu1  ;;  %vm345_vm0 = vcmp.ge.f32.partialorder %v678_v19, 0.0  ;;  %vm353_vm1 = vcmp.ge.f32.partialorder %v681_v20, 0.0 }
  0xe7   :  { %v265_v29 = vsub.f32 0.0, %v249_v23  ;;  %v273_v30 = vsub.f32 0.0, %v257_v24  ;;  %v692_v31 = vadd.f32 %v495_v27, %v675_v16  ;;  %v695_v32 = vadd.f32 %v503_v28, %v675_v16 }
  0xe8   :  { %v247_v33 = vand.u32 2147483647, %v686_v25  ;;  %v255_v34 = vand.u32 2147483647, %v689_v26  ;;  %v187_v35 = vpop.f32.mrf.mxu0  ;;  %v219_v36 = vpop.f32.mrf.mxu1  ;;  %vm343_vm2 = vcmp.ge.f32.partialorder %v686_v25, 0.0  ;;  %vm351_vm3 = vcmp.ge.f32.partialorder %v689_v26, 0.0 }
  0xe9   :  { %v283_v37 = vmul.f32 1.442695, %v265_v29  ;;  %v299_v38 = vmul.f32 1.442695, %v273_v30  ;;  %v250_v39 = vand.u32 2147483647, %v692_v31  ;;  %v701_v40 = vadd.f32 %v675_v16, %v187_v35 }
  0xea   :  { %v263_v41 = vsub.f32 0.0, %v247_v33  ;;  %v271_v42 = vsub.f32 0.0, %v255_v34  ;;  %v258_v43 = vand.u32 2147483647, %v695_v32  ;;  %v498_v44 = vpop.f32.mrf.mxu0  ;;  %v506_v45 = vpop.f32.mrf.mxu1  ;;  %v706_v54 = vadd.f32 %v675_v16, %v219_v36 }
  0xeb   :  { %540 = vpow2.f32 %v283_v37  ;;  %v266_v46 = vsub.f32 0.0, %v250_v39  ;;  %v248_v47 = vand.u32 2147483647, %v701_v40  ;;  %v709_v57 = vadd.f32 %v498_v44, %v675_v16 }
  0xec   :  { %542 = vpow2.f32 %v299_v38  ;;  %v279_v48 = vmul.f32 1.442695, %v263_v41  ;;  %v295_v49 = vmul.f32 1.442695, %v271_v42  ;;  %v274_v50 = vsub.f32 0.0, %v258_v43  ;;  %v200_v51 = vpop.f32.mrf.mxu0  ;;  %v232_v55 = vpop.f32.mrf.mxu1 }
  0xed   :  { %v285_v52 = vmul.f32 1.442695, %v266_v46  ;;  %v264_v53 = vsub.f32 0.0, %v248_v47  ;;  %v712_v58 = vadd.f32 %v506_v45, %v675_v16  ;;  %v256_v60 = vand.u32 2147483647, %v706_v54 }
  0xee   :  { %544 = vpow2.f32 %v279_v48  ;;  %v301_v56 = vmul.f32 1.442695, %v274_v50  ;;  %v253_v61 = vand.u32 2147483647, %v709_v57  ;;  %v499_v63 = vpop.f32.mrf.mxu0  ;;  %v718_v1 = vadd.f32 %v675_v16, %v200_v51  ;;  %v507_v2 = vpop.f32.mrf.mxu1 }
  0xef   :  { %546 = vpow2.f32 %v295_v49  ;;  %v281_v59 = vmul.f32 1.442695, %v264_v53  ;;  %v261_v62 = vand.u32 2147483647, %v712_v58  ;;  %v272_v0 = vsub.f32 0.0, %v256_v60 }
  0xf0   :  { %548 = vpow2.f32 %v285_v52  ;;  %v269_v3 = vsub.f32 0.0, %v253_v61  ;;  %v721_v5 = vadd.f32 %v675_v16, %v232_v55  ;;  %v251_v7 = vand.u32 2147483647, %v718_v1  ;;  %v203_v15 = vpop.f32.mrf.mxu0  ;;  %v235_v17 = vpop.f32.mrf.mxu1 }
  0xf1   :  { %550 = vpow2.f32 %v301_v56  ;;  %v277_v4 = vsub.f32 0.0, %v261_v62  ;;  %v297_v6 = vmul.f32 1.442695, %v272_v0  ;;  %v725_v8 = vadd.f32 %v499_v63, %v675_v16 }
  0xf2   :  { %552 = vpow2.f32 %v281_v59  ;;  %v291_v9 = vmul.f32 1.442695, %v269_v3  ;;  %v259_v11 = vand.u32 2147483647, %v721_v5  ;;  %v729_v12 = vadd.f32 %v507_v2, %v675_v16 }
  0xf3   :  { %v307_v10 = vmul.f32 1.442695, %v277_v4  ;;  %554 = vpow2.f32 %v297_v6  ;;  %v267_v13 = vsub.f32 0.0, %v251_v7  ;;  %v254_v14 = vand.u32 2147483647, %v725_v8 }
  0xf4   :  { %556 = vpow2.f32 %v291_v9  ;;  %v275_v18 = vsub.f32 0.0, %v259_v11  ;;  %v262_v23 = vand.u32 2147483647, %v729_v12  ;;  %v734_v28 = vadd.f32 %v675_v16, %v203_v15 }
  0xf5   :  { %558 = vpow2.f32 %v307_v10  ;;  %v287_v21 = vmul.f32 1.442695, %v267_v13  ;;  %v270_v22 = vsub.f32 0.0, %v254_v14  ;;  %v737_v29 = vadd.f32 %v675_v16, %v235_v17 }
  0xf6   :  { %v303_v27 = vmul.f32 1.442695, %v275_v18  ;;  %v252_v36 = vand.u32 2147483647, %v734_v28  ;;  %v278_v38 = vsub.f32 0.0, %v262_v23  ;;  %vm346_vm4 = vcmp.ge.f32.partialorder %v692_v31, 0.0 }
  0xf7   :  { %560 = vpow2.f32 %v287_v21  ;;  %v293_v34 = vmul.f32 1.442695, %v270_v22  ;;  %v260_v43 = vand.u32 2147483647, %v737_v29  ;;  %vm354_vm5 = vcmp.ge.f32.partialorder %v695_v32, 0.0 }
  0xf8   :  { %v541_v24 = vpop.eup %540  ;;  %562 = vpow2.f32 %v303_v27  ;;  %v268_v42 = vsub.f32 0.0, %v252_v36  ;;  %v309_v49 = vmul.f32 1.442695, %v278_v38  ;;  %vm344_vm6 = vcmp.ge.f32.partialorder %v701_v40, 0.0 }
  0xf9   :  { %v543_v30 = vpop.eup %542  ;;  %v313_v33 = vadd.f32 1.0, %v541_v24  ;;  %v276_v52 = vsub.f32 0.0, %v260_v43  ;;  %vm352_vm7 = vcmp.ge.f32.partialorder %v706_v54, 0.0  ;;  %vm349_vm8 = vcmp.ge.f32.partialorder %v709_v57, 0.0 }
  0xfa   :  { %v321_v35 = vadd.f32 1.0, %v543_v30  ;;  %v289_v51 = vmul.f32 1.442695, %v268_v42  ;;  %vm357_vm9 = vcmp.ge.f32.partialorder %v712_v58, 0.0  ;;  %vm347_vm10 = vcmp.ge.f32.partialorder %v718_v1, 0.0 }
  0xfb   :  { %v545_v37 = vpop.eup %544  ;;  %564 = vrcp.f32 %v313_v33  ;;  %v305_v61 = vmul.f32 1.442695, %v276_v52  ;;  %vm355_vm11 = vcmp.ge.f32.partialorder %v721_v5, 0.0  ;;  %vm350_vm12 = vcmp.ge.f32.partialorder %v725_v8, 0.0 }
  0xfc   :  { %v547_v39 = vpop.eup %546  ;;  %566 = vrcp.f32 %v321_v35  ;;  %v311_v41 = vadd.f32 1.0, %v545_v37  ;;  %vm358_vm13 = vcmp.ge.f32.partialorder %v729_v12, 0.0  ;;  %vm348_vm14 = vcmp.ge.f32.partialorder %v734_v28, 0.0 }
  0xfd   :  { %v549_v44 = vpop.eup %548  ;;  %v319_v16 = vadd.f32 1.0, %v547_v39  ;;  %568 = vpow2.f32 %v293_v34  ;;  %vm356_vm15 = vcmp.ge.f32.partialorder %v737_v29, 0.0 }
  0xfe   :  { %v741_v45 = vpop.eup %550  ;;  %570 = vrcp.f32 %v311_v41  ;;  %v314_v46 = vadd.f32 1.0, %v549_v44 }
  0xff   :  { %v743_v47 = vpop.eup %552  ;;  %572 = vrcp.f32 %v319_v16  ;;  %v322_v48 = vadd.f32 1.0, %v741_v45 }
 0x100   :  { %574 = vrcp.f32 %v314_v46  ;;  %v312_v50 = vadd.f32 1.0, %v743_v47  ;;  %v747_v53 = vpop.eup %554 }
 0x101   :  { %576 = vrcp.f32 %v322_v48  ;;  %v749_v55 = vpop.eup %556  ;;  %v320_v56 = vadd.f32 1.0, %v747_v53 }
 0x102   :  { %578 = vrcp.f32 %v312_v50  ;;  %v752_v59 = vpop.eup %558  ;;  %v317_v60 = vadd.f32 1.0, %v749_v55 }
 0x103   :  { %580 = vpow2.f32 %v309_v49  ;;  %v325_v62 = vadd.f32 1.0, %v752_v59 }
 0x104   :  { %582 = vpow2.f32 %v289_v51  ;;  %v756_v63 = vpop.eup %560 }
 0x105   :  { %584 = vrcp.f32 %v320_v56  ;;  %v758_v0 = vpop.eup %562  ;;  %v315_v2 = vadd.f32 1.0, %v756_v63 }
 0x106   :  { %586 = vrcp.f32 %v317_v60  ;;  %v323_v4 = vadd.f32 1.0, %v758_v0 }
 0x107   :  { %588 = vrcp.f32 %v325_v62 }
 0x108   :  { %v565_v3 = vpop.eup %564  ;;  %590 = vpow2.f32 %v305_v61 }
 0x109   :  { %v567_v6 = vpop.eup %566  ;;  %v361_v7 = vmul.f32 %v565_v3, %v541_v24  ;;  %592 = vrcp.f32 %v315_v2 }
 0x10a   :  { %v762_v9 = vpop.eup %568  ;;  %v369_v10 = vmul.f32 %v567_v6, %v543_v30  ;;  %594 = vrcp.f32 %v323_v4 }
 0x10b   :  { %v571_v11 = vpop.eup %570  ;;  %v377_v13 = vsel %vm345_vm0, %v565_v3, %v361_v7  ;;  %v318_v14 = vadd.f32 1.0, %v762_v9 }
 0x10c   :  { %v573_v15 = vpop.eup %572  ;;  %v393_v17 = vmax.f32 %v377_v13, 0.0  ;;  %v385_v18 = vsel %vm353_vm1, %v567_v6, %v369_v10  ;;  %v359_v21 = vmul.f32 %v571_v11, %v545_v37 }
 0x10d   :  { %v575_v22 = vpop.eup %574  ;;  %v401_v23 = vmax.f32 %v385_v18, 0.0  ;;  %v367_v24 = vmul.f32 %v573_v15, %v547_v39  ;;  %596 = vrcp.f32 %v318_v14 }
 0x10e   :  { %v577_v19 = vpop.eup %576  ;;  %v409_v27 = vmin.f32 %v393_v17, 1.0  ;;  %v375_v30 = vsel %vm343_vm2, %v571_v11, %v359_v21  ;;  %v362_v20 = vmul.f32 %v575_v22, %v549_v44 }
 0x10f   :  { %v579_v25 = vpop.eup %578  ;;  %v417_v33 = vmin.f32 %v401_v23, 1.0  ;;  %v391_v34 = vmax.f32 %v375_v30, 0.0  ;;  %v383_v35 = vsel %vm351_vm3, %v573_v15, %v367_v24  ;;  %v370_v36 = vmul.f32 %v577_v19, %v741_v45 }
 0x110   :  { %v772_v37 = vpop.eup %580  ;;  %425 = vst [vmem:[%s850_s3 + $0x10] sm:$0xff] %v409_v27  ;;  %v399_v26 = vmax.f32 %v383_v35, 0.0  ;;  %v378_v31 = vsel %vm346_vm4, %v575_v22, %v362_v20  ;;  %v360_v38 = vmul.f32 %v579_v25, %v743_v47 }
 0x111   :  { %v779_v39 = vpop.eup %582  ;;  %433 = vst [vmem:[%s850_s3 + $0x50] sm:$0xff] %v417_v33  ;;  %v407_v41 = vmin.f32 %v391_v34, 1.0  ;;  %v394_v42 = vmax.f32 %v378_v31, 0.0  ;;  %v386_v43 = vsel %vm354_vm5, %v577_v19, %v370_v36  ;;  %v326_v44 = vadd.f32 1.0, %v772_v37 }
 0x112   :  { %v585_v16 = vpop.eup %584  ;;  %v415_v45 = vmin.f32 %v399_v26, 1.0  ;;  %v402_v46 = vmax.f32 %v386_v43, 0.0  ;;  %v376_v48 = vsel %vm344_vm6, %v579_v25, %v360_v38  ;;  %v316_v40 = vadd.f32 1.0, %v779_v39 }
 0x113   :  { %v587_v47 = vpop.eup %586  ;;  %423 = vst [vmem:[%s850_s3] sm:$0xff] %v407_v41  ;;  %v410_v49 = vmin.f32 %v394_v42, 1.0  ;;  %v392_v50 = vmax.f32 %v376_v48, 0.0  ;;  %v368_v51 = vmul.f32 %v585_v16, %v747_v53  ;;  %598 = vrcp.f32 %v326_v44 }
 0x114   :  { %v589_v32 = vpop.eup %588  ;;  %431 = vst [vmem:[%s850_s3 + $0x40] sm:$0xff] %v415_v45  ;;  %v418_v52 = vmin.f32 %v402_v46, 1.0  ;;  %v365_v56 = vmul.f32 %v587_v47, %v749_v55  ;;  %600 = vrcp.f32 %v316_v40 }
 0x115   :  { %v591_v60 = vpop.eup %590  ;;  %426 = vst [vmem:[%s850_s3 + $0x18] sm:$0xff] %v410_v49  ;;  %v408_v61 = vmin.f32 %v392_v50, 1.0  ;;  %v384_v62 = vsel %vm352_vm7, %v585_v16, %v368_v51  ;;  %v373_v53 = vmul.f32 %v589_v32, %v752_v59 }
 0x116   :  { %v593_v2 = vpop.eup %592  ;;  %434 = vst [vmem:[%s850_s3 + $0x58] sm:$0xff] %v418_v52  ;;  %v400_v54 = vmax.f32 %v384_v62, 0.0  ;;  %v381_v3 = vsel %vm349_vm8, %v587_v47, %v365_v56  ;;  %v324_v55 = vadd.f32 1.0, %v591_v60 }
 0x117   :  { %v595_v4 = vpop.eup %594  ;;  %424 = vst [vmem:[%s850_s3 + $0x8] sm:$0xff] %v408_v61  ;;  %v397_v6 = vmax.f32 %v381_v3, 0.0  ;;  %v389_v7 = vsel %vm357_vm9, %v589_v32, %v373_v53  ;;  %v363_v57 = vmul.f32 %v593_v2, %v756_v63 }
 0x118   :  { %v416_v59 = vmin.f32 %v400_v54, 1.0  ;;  %v405_v10 = vmax.f32 %v389_v7, 0.0  ;;  %v371_v11 = vmul.f32 %v595_v4, %v758_v0  ;;  %602 = vrcp.f32 %v324_v55 }
 0x119   :  { %v413_v13 = vmin.f32 %v397_v6, 1.0  ;;  %v379_v14 = vsel %vm347_vm10, %v593_v2, %v363_v57 }
 0x11a   :  { %v597_v58 = vpop.eup %596  ;;  %432 = vst [vmem:[%s850_s3 + $0x48] sm:$0xff] %v416_v59  ;;  %v421_v15 = vmin.f32 %v405_v10, 1.0  ;;  %v395_v17 = vmax.f32 %v379_v14, 0.0  ;;  %v387_v18 = vsel %vm355_vm11, %v595_v4, %v371_v11 }
 0x11b   :  { %429 = vst [vmem:[%s850_s3 + $0x30] sm:$0xff] %v413_v13  ;;  %v403_v1 = vmax.f32 %v387_v18, 0.0  ;;  %v366_v63 = vmul.f32 %v597_v58, %v762_v9 }
 0x11c   :  { %437 = vst [vmem:[%s850_s3 + $0x70] sm:$0xff] %v421_v15  ;;  %v411_v5 = vmin.f32 %v395_v17, 1.0 }
 0x11d   :  { %v419_v0 = vmin.f32 %v403_v1, 1.0  ;;  %v382_v21 = vsel %vm350_vm12, %v597_v58, %v366_v63 }
 0x11e   :  { %427 = vst [vmem:[%s850_s3 + $0x20] sm:$0xff] %v411_v5  ;;  %v398_v22 = vmax.f32 %v382_v21, 0.0 }
 0x11f   :  { %435 = vst [vmem:[%s850_s3 + $0x60] sm:$0xff] %v419_v0 }
 0x120   :  { %v599_v23 = vpop.eup %598  ;;  %v414_v9 = vmin.f32 %v398_v22, 1.0 }
 0x121   :  { %v601_v24 = vpop.eup %600  ;;  %v374_v19 = vmul.f32 %v599_v23, %v772_v37 }
 0x122   :  { %430 = vst [vmem:[%s850_s3 + $0x38] sm:$0xff] %v414_v9  ;;  %v364_v8 = vmul.f32 %v601_v24, %v779_v39 }
 0x123   :  { %v390_v27 = vsel %vm358_vm13, %v599_v23, %v374_v19 }
 0x124   :  { %v406_v30 = vmax.f32 %v390_v27, 0.0  ;;  %v380_v20 = vsel %vm348_vm14, %v601_v24, %v364_v8 }
 0x125   :  { %v603_v25 = vpop.eup %602  ;;  %v396_v33 = vmax.f32 %v380_v20, 0.0 }
 0x126   :  { %v422_v34 = vmin.f32 %v406_v30, 1.0  ;;  %v372_v35 = vmul.f32 %v603_v25, %v591_v60 }
 0x127   :  { %v412_v36 = vmin.f32 %v396_v33, 1.0 }
 0x128   :  { %438 = vst [vmem:[%s850_s3 + $0x78] sm:$0xff] %v422_v34  ;;  %v388_v37 = vsel %vm356_vm15, %v603_v25, %v372_v35 }
 0x129   :  { %428 = vst [vmem:[%s850_s3 + $0x28] sm:$0xff] %v412_v36  ;;  %v404_v12 = vmax.f32 %v388_v37, 0.0 }
 0x12b   :  { %v420_v28 = vmin.f32 %v404_v12, 1.0 }
 0x12d   :  { %436 = vst [vmem:[%s850_s3 + $0x68] sm:$0xff] %v420_v28 }

</bundles_post_ra>
